<compile_context>
chip_gen: v6e
topology: v6e:2x2x1
jax: 0.10.0
libtpu: 0.0.40
codegen_flags: <defaults>
</compile_context>

<pallas_src>
import jax
import jax.numpy as jnp
from jax.experimental import pallas as pl
from jax.experimental.pallas import tpu as pltpu

# ---------------------------------------------------------------------------
# Fixed Net geometry (the 16*5*5 flatten forces 3x32x32 inputs).
# ---------------------------------------------------------------------------
H = W = 32
CIN, C1, C2 = 3, 6, 16
OW1, PW1 = 28, 14            # conv1 / pool1 spatial extent
OW2, PW2 = 10, 5             # conv2 / pool2 spatial extent

XL = 128                     # input lane width   (96 real cols + 32 zero pad)
AL = 256                     # activation lane width (conv outputs, zero padded)
TB = 8                       # images per grid step -> matmul M = TB*32 = 256
M = TB * H                   # 256

N1 = OW1 * C1                # 168 real conv1 output lanes (rest of AL is zero)
N2 = OW2 * C2                # 160 real conv2 output lanes
KF = 5 * AL                  # 1280 fc1 contraction (5 pool2 rows x 256 lanes)


# ---------------------------------------------------------------------------
# Per-image layouts inside one grid step (2-D slabs of M = 256 rows; image b
# owns rows 32*b .. 32*b+31):
#   x      row h,     lane w*3+ci     real: h<32, lane<96
#   conv1  row h,     lane ow*6+co    real: h<28, lane<168
#   pool1  row 2*ph,  lane 12*pw+ci   real: ph<14, pw<14, ci<6
#   conv2  row 2*h2,  lane w2*16+co   real: h2<10, lane<160
#   pool2  row 4*q,   lane 32*p+co    real: q<5, p<5, co<16
# INVARIANT: everything outside the "real" sets is finite junk that is either
# never read again or multiplied against all-zero weight rows; real rows/lanes
# never read junk rows (all row shifts stay inside the same image for them).
# ---------------------------------------------------------------------------
def _net_kernel(x_ref, t1_ref, b1_ref, t2_ref, b2_ref, g1_ref, fb1_ref,
                w2_ref, fb2_ref, w3_ref, fb3_ref, o_ref):
    f32, bf16 = jnp.float32, jnp.bfloat16

    def row_ext(v):          # append 8 aligned junk rows so shifted row views stay in-bounds
        return jnp.concatenate([v, v[:8]], axis=0)

    def lane_ext(v):         # append 128 aligned junk lanes for shifted lane views
        return jnp.concatenate([v, v[:, :128]], axis=1)

    def conv_block(act, w_ref, b_ref, row_step):
        """5x5 'valid' conv + bias + ReLU as ONE matmul (kh taps folded into K)."""
        ext = row_ext(act)
        slab = jnp.concatenate(
            [ext[i * row_step:i * row_step + M] for i in range(5)], axis=1)
        out = jnp.dot(slab.astype(bf16), w_ref[...],
                      preferred_element_type=f32) + b_ref[...]
        return jnp.maximum(out, 0.0)

    def pool_block(act, row_step, lane_step):
        """2x2 max-pool in the expanded layout (result at even rows / lane groups)."""
        r = jnp.maximum(act, row_ext(act)[row_step:row_step + M])
        return jnp.maximum(r, lane_ext(r)[:, lane_step:lane_step + AL])

    x = x_ref[...].reshape(M, XL)                           # [256, 128] f32

    c1 = conv_block(x, t1_ref, b1_ref, row_step=1)          # conv1 + ReLU  [256, 256]
    p1 = pool_block(c1, row_step=1, lane_step=C1)           # pool1         [256, 256]
    c2 = conv_block(p1, t2_ref, b2_ref, row_step=2)         # conv2 + ReLU  [256, 256]
    p2 = pool_block(c2, row_step=2, lane_step=C2)           # pool2         [256, 256]

    # PyTorch (C,H,W) flatten, batch-major: one real row per image -> [TB, 1280].
    p2i = p2.reshape(TB, H, AL)
    f = jnp.concatenate([p2i[:, 4 * q:4 * q + 1, :] for q in range(PW2)], axis=2)
    f = f.reshape(TB, KF).astype(bf16)

    y = jnp.dot(f, g1_ref[...], preferred_element_type=f32) + fb1_ref[...]
    y = jnp.maximum(y, 0.0)                                  # fc1 + ReLU [TB, 120]
    y = jnp.dot(y.astype(bf16), w2_ref[...],
                preferred_element_type=f32) + fb2_ref[...]
    y = jnp.maximum(y, 0.0)                                  # fc2 + ReLU [TB, 84]
    o_ref[...] = jnp.dot(y.astype(bf16), w3_ref[...],
                         preferred_element_type=f32) + fb3_ref[...]   # fc3 [TB, 10]


# ---------------------------------------------------------------------------
# Parameters (PyTorch-equivalent shapes) and one-time packing into the kernel
# layout (Toeplitz conv weights with kh folded into K, expanded pool layouts
# and the (C,H,W) flatten folded into fc1, zero rows for all padding lanes).
# ---------------------------------------------------------------------------
def init_params(key):
    ks = jax.random.split(key, 10)

    def nrm(k, shape, s=0.1):
        return jax.random.normal(k, shape, jnp.float32) * s

    return {
        "w1": nrm(ks[0], (5, 5, CIN, C1)),            # conv1 [kh, kw, ci, co]
        "b1": nrm(ks[1], (C1,), 0.01),
        "w2": nrm(ks[2], (5, 5, C1, C2)),             # conv2
        "b2": nrm(ks[3], (C2,), 0.01),
        "fc1_w": nrm(ks[4], (C2 * PW2 * PW2, 120)),   # rows in PyTorch (C,H,W) order
        "fc1_b": nrm(ks[5], (120,), 0.01),
        "fc2_w": nrm(ks[6], (120, 84)),
        "fc2_b": nrm(ks[7], (84,), 0.01),
        "fc3_w": nrm(ks[8], (84, 10)),
        "fc3_b": nrm(ks[9], (10,), 0.01),
    }


def pack_params(p):
    f32, bf16 = jnp.float32, jnp.bfloat16

    def pad_to(a, rows, cols):
        out = jnp.zeros(a.shape[:-2] + (rows, cols), f32)
        return out.at[..., :a.shape[-2], :a.shape[-1]].set(a)

    # conv1 width-Toeplitz, kh taps stacked along K in 128-lane slots:
    #   T1[i*128 + w*3+ci, ow*6+co] = w1[i, w-ow, ci, co]
    sel1 = (jnp.arange(W)[None, :, None] ==
            jnp.arange(OW1)[None, None, :] + jnp.arange(5)[:, None, None])
    t1 = jnp.einsum("jwo,ijcd->iwcod", sel1.astype(f32), p["w1"])
    t1 = pad_to(t1.reshape(5, W * CIN, N1), XL, AL).reshape(5 * XL, AL)

    # conv2 width-Toeplitz over the expanded pool1 layout (lane = 12*pw + ci),
    # kh taps stacked along K in 256-lane slots:
    #   T2[i*256 + 12*pw+ci, w2*16+co] = w2[i, pw-w2, ci, co]
    sel2 = (jnp.arange(PW1)[None, :, None] ==
            jnp.arange(OW2)[None, None, :] + jnp.arange(5)[:, None, None])
    t2 = jnp.einsum("jpo,ijcd->ipcod", sel2.astype(f32), p["w2"])
    t2 = jnp.zeros((5, PW1, 12, OW2, C2), f32).at[:, :, :C1].set(t2)
    t2 = pad_to(t2.reshape(5, PW1 * 12, N2), AL, AL).reshape(5 * AL, AL)

    # fc1 with the PyTorch (C,H,W) flatten + expanded pool2 layout folded in:
    #   G1[q*256 + 32*p + co, n] = fc1_w[co*25 + q*5 + p, n]
    g = p["fc1_w"].reshape(C2, PW2, PW2, 120)            # [co, q, p, n]
    g = jnp.transpose(g, (1, 2, 0, 3))                   # [q, p, co, n]
    g = jnp.zeros((PW2, PW2, 32, 120), f32).at[:, :, :C2].set(g)
    g = pad_to(g.reshape(PW2, PW2 * 32, 120), AL, 120).reshape(5 * AL, 120)

    def bias_row(b, reps):                               # tiled bias, zero-padded to AL lanes
        return pad_to(jnp.tile(b, reps).reshape(1, -1), 1, AL)

    return dict(
        t1=t1.astype(bf16), b1=bias_row(p["b1"], OW1),
        t2=t2.astype(bf16), b2=bias_row(p["b2"], OW2),
        g1=g.astype(bf16), fb1=p["fc1_b"].reshape(1, 120),
        w2=p["fc2_w"].astype(bf16), fb2=p["fc2_b"].reshape(1, 84),
        w3=p["fc3_w"].astype(bf16), fb3=p["fc3_b"].reshape(1, 10),
    )


# ---------------------------------------------------------------------------
# Forward pass wrapper (matches Net.forward)
# ---------------------------------------------------------------------------
def net_forward(x_nchw, packed):
    B = x_nchw.shape[0]
    assert x_nchw.shape[1:] == (CIN, H, W), x_nchw.shape

    # Only external glue: NCHW -> [B, 32, 96], zero-pad lanes to 128, batch to TB.
    x2 = jnp.transpose(x_nchw, (0, 2, 3, 1)).reshape(B, H, W * CIN)
    x2 = jnp.pad(x2, ((0, 0), (0, 0), (0, XL - W * CIN)))
    Bp = ((B + TB - 1) // TB) * TB
    if Bp != B:
        x2 = jnp.pad(x2, ((0, Bp - B), (0, 0), (0, 0)))

    def fixed(a):   # whole-array block, constant across the grid (fetched once)
        zeros = (0,) * a.ndim
        return pl.BlockSpec(a.shape, lambda b: zeros)

    out = pl.pallas_call(
        _net_kernel,
        out_shape=jax.ShapeDtypeStruct((Bp, 10), jnp.float32),
        grid=(Bp // TB,),
        in_specs=[
            pl.BlockSpec((TB, H, XL), lambda b: (b, 0, 0)),    # TB images per step
            fixed(packed["t1"]), fixed(packed["b1"]),          # conv1
            fixed(packed["t2"]), fixed(packed["b2"]),          # conv2
            fixed(packed["g1"]), fixed(packed["fb1"]),         # fc1
            fixed(packed["w2"]), fixed(packed["fb2"]),         # fc2
            fixed(packed["w3"]), fixed(packed["fb3"]),         # fc3
        ],
        out_specs=pl.BlockSpec((TB, 10), lambda b: (b, 0)),
        compiler_params=pltpu.CompilerParams(
            dimension_semantics=("parallel",)),                # batch across TCs
    )(x2, packed["t1"], packed["b1"], packed["t2"], packed["b2"],
      packed["g1"], packed["fb1"], packed["w2"], packed["fb2"],
      packed["w3"], packed["fb3"])

    return out[:B]


# ---------------------------------------------------------------------------
# Plain-JAX reference (for an in-script numerical cross-check)
# ---------------------------------------------------------------------------
def net_forward_reference(x_nchw, params):
    x = jnp.transpose(x_nchw, (0, 2, 3, 1))

    def conv_relu(v, w, b):
        out = jax.lax.conv_general_dilated(
            v, w, window_strides=(1, 1), padding="VALID",
            dimension_numbers=("NHWC", "HWIO", "NHWC"))
        return jnp.maximum(out + b, 0.0)

    def pool(v):
        return jax.lax.reduce_window(v, -jnp.inf, jax.lax.max,
                                     (1, 2, 2, 1), (1, 2, 2, 1), "VALID")

    x = pool(conv_relu(x, params["w1"], params["b1"]))
    x = pool(conv_relu(x, params["w2"], params["b2"]))
    B = x.shape[0]
    x = jnp.transpose(x, (0, 3, 1, 2)).reshape(B, C2 * PW2 * PW2)
    x = jnp.maximum(x @ params["fc1_w"] + params["fc1_b"], 0.0)
    x = jnp.maximum(x @ params["fc2_w"] + params["fc2_b"], 0.0)
    return x @ params["fc3_w"] + params["fc3_b"]


if __name__ == "__main__":
    key = jax.random.PRNGKey(0)
    k_params, k_input = jax.random.split(key)

    params = init_params(k_params)
    packed = pack_params(params)                  # one-time weight packing
    B = 16                                        # 2 grid steps of TB = 8 images
    x = jax.random.normal(k_input, (B, CIN, H, W), jnp.float32)

    out = jax.block_until_ready(jax.jit(net_forward)(x, packed))
    assert out.shape == (B, 10) and out.dtype == jnp.float32, (out.shape, out.dtype)

    # Cross-check vs the f32 reference (activations/weights hit the MXU in bf16,
    # which is an intentional inference-precision choice).
    ref = net_forward_reference(x, params)
    err = float(jnp.max(jnp.abs(out - ref)))
    assert err < 5e-2, f"kernel/reference mismatch: max abs err = {err}"

    print("KERNEL_OK")
</pallas_src>

<mosaic_0001>
module attributes {stable_mosaic.version = 11 : i64} {
  func.func @_net_kernel(%arg0: i32, %arg1: memref<8x32x128xf32, #tpu.memory_space<vmem>>, %arg2: memref<640x256xbf16, #tpu.memory_space<vmem>>, %arg3: memref<1x256xf32, #tpu.memory_space<vmem>>, %arg4: memref<1280x256xbf16, #tpu.memory_space<vmem>>, %arg5: memref<1x256xf32, #tpu.memory_space<vmem>>, %arg6: memref<1280x120xbf16, #tpu.memory_space<vmem>>, %arg7: memref<1x120xf32, #tpu.memory_space<vmem>>, %arg8: memref<120x84xbf16, #tpu.memory_space<vmem>>, %arg9: memref<1x84xf32, #tpu.memory_space<vmem>>, %arg10: memref<84x10xbf16, #tpu.memory_space<vmem>>, %arg11: memref<1x10xf32, #tpu.memory_space<vmem>>, %arg12: memref<8x10xf32, #tpu.memory_space<vmem>>) attributes {dimension_semantics = [#tpu.dimension_semantics<parallel>], iteration_bounds = array<i64: 2>, scalar_prefetch = 0 : i64, scratch_operands = 0 : i64, tpu.core_type = #tpu.core_type<tc>, window_params = [{transform_indices = @transform_0, window_bounds = array<i64: 8, 32, 128>}, {pipeline_mode = #tpu.pipeline_mode<synchronous>, transform_indices = @transform_1, window_bounds = array<i64: 640, 256>}, {pipeline_mode = #tpu.pipeline_mode<synchronous>, transform_indices = @transform_2, window_bounds = array<i64: 1, 256>}, {pipeline_mode = #tpu.pipeline_mode<synchronous>, transform_indices = @transform_3, window_bounds = array<i64: 1280, 256>}, {pipeline_mode = #tpu.pipeline_mode<synchronous>, transform_indices = @transform_4, window_bounds = array<i64: 1, 256>}, {pipeline_mode = #tpu.pipeline_mode<synchronous>, transform_indices = @transform_5, window_bounds = array<i64: 1280, 120>}, {pipeline_mode = #tpu.pipeline_mode<synchronous>, transform_indices = @transform_6, window_bounds = array<i64: 1, 120>}, {pipeline_mode = #tpu.pipeline_mode<synchronous>, transform_indices = @transform_7, window_bounds = array<i64: 120, 84>}, {pipeline_mode = #tpu.pipeline_mode<synchronous>, transform_indices = @transform_8, window_bounds = array<i64: 1, 84>}, {pipeline_mode = #tpu.pipeline_mode<synchronous>, transform_indices = @transform_9, window_bounds = array<i64: 84, 10>}, {pipeline_mode = #tpu.pipeline_mode<synchronous>, transform_indices = @transform_10, window_bounds = array<i64: 1, 10>}, {transform_indices = @transform_11, window_bounds = array<i64: 8, 10>}]} {
    %c0 = arith.constant 0 : index
    %c0_0 = arith.constant 0 : index
    %c0_1 = arith.constant 0 : index
    %0 = vector.load %arg1[%c0, %c0_0, %c0_1] : memref<8x32x128xf32, #tpu.memory_space<vmem>>, vector<8x32x128xf32>
    %1 = vector.shape_cast %0 : vector<8x32x128xf32> to vector<256x128xf32>
    %2 = vector.extract_strided_slice %1 {offsets = [0, 0], sizes = [8, 128], strides = [1, 1]} : vector<256x128xf32> to vector<8x128xf32>
    %3 = tpu.concatenate %1, %2 in 0 : vector<256x128xf32>, vector<8x128xf32> -> vector<264x128xf32>
    %4 = vector.extract_strided_slice %3 {offsets = [0, 0], sizes = [256, 128], strides = [1, 1]} : vector<264x128xf32> to vector<256x128xf32>
    %5 = vector.extract_strided_slice %3 {offsets = [1, 0], sizes = [256, 128], strides = [1, 1]} : vector<264x128xf32> to vector<256x128xf32>
    %6 = vector.extract_strided_slice %3 {offsets = [2, 0], sizes = [256, 128], strides = [1, 1]} : vector<264x128xf32> to vector<256x128xf32>
    %7 = vector.extract_strided_slice %3 {offsets = [3, 0], sizes = [256, 128], strides = [1, 1]} : vector<264x128xf32> to vector<256x128xf32>
    %8 = vector.extract_strided_slice %3 {offsets = [4, 0], sizes = [256, 128], strides = [1, 1]} : vector<264x128xf32> to vector<256x128xf32>
    %9 = tpu.concatenate %4, %5, %6, %7, %8 in 1 : vector<256x128xf32>, vector<256x128xf32>, vector<256x128xf32>, vector<256x128xf32>, vector<256x128xf32> -> vector<256x640xf32>
    %10 = arith.truncf %9 : vector<256x640xf32> to vector<256x640xbf16>
    %c0_2 = arith.constant 0 : index
    %c0_3 = arith.constant 0 : index
    %11 = vector.load %arg2[%c0_2, %c0_3] : memref<640x256xbf16, #tpu.memory_space<vmem>>, vector<640x256xbf16>
    %cst = arith.constant dense<0.000000e+00> : vector<256x256xf32>
    %12 = tpu.matmul %10, %11, %cst {dimension_numbers = #tpu.dot_dimension_numbers<[1], [0], [0], [1], [0, 0, 1, 1], [], []>} : vector<256x640xbf16>, vector<640x256xbf16>, vector<256x256xf32> -> vector<256x256xf32>
    %c0_4 = arith.constant 0 : index
    %c0_5 = arith.constant 0 : index
    %13 = vector.load %arg3[%c0_4, %c0_5] : memref<1x256xf32, #tpu.memory_space<vmem>>, vector<1x256xf32>
    %14 = vector.broadcast %13 : vector<1x256xf32> to vector<256x256xf32>
    %15 = arith.addf %12, %14 : vector<256x256xf32>
    %cst_6 = arith.constant 0.000000e+00 : f32
    %16 = vector.broadcast %cst_6 : f32 to vector<256x256xf32>
    %17 = arith.maximumf %15, %16 : vector<256x256xf32>
    %18 = vector.extract_strided_slice %17 {offsets = [0, 0], sizes = [8, 256], strides = [1, 1]} : vector<256x256xf32> to vector<8x256xf32>
    %19 = tpu.concatenate %17, %18 in 0 : vector<256x256xf32>, vector<8x256xf32> -> vector<264x256xf32>
    %20 = vector.extract_strided_slice %19 {offsets = [1, 0], sizes = [256, 256], strides = [1, 1]} : vector<264x256xf32> to vector<256x256xf32>
    %21 = arith.maximumf %17, %20 : vector<256x256xf32>
    %22 = vector.extract_strided_slice %21 {offsets = [0, 0], sizes = [256, 128], strides = [1, 1]} : vector<256x256xf32> to vector<256x128xf32>
    %23 = tpu.concatenate %21, %22 in 1 : vector<256x256xf32>, vector<256x128xf32> -> vector<256x384xf32>
    %24 = vector.extract_strided_slice %23 {offsets = [0, 6], sizes = [256, 256], strides = [1, 1]} : vector<256x384xf32> to vector<256x256xf32>
    %25 = arith.maximumf %21, %24 : vector<256x256xf32>
    %26 = vector.extract_strided_slice %25 {offsets = [0, 0], sizes = [8, 256], strides = [1, 1]} : vector<256x256xf32> to vector<8x256xf32>
    %27 = tpu.concatenate %25, %26 in 0 : vector<256x256xf32>, vector<8x256xf32> -> vector<264x256xf32>
    %28 = vector.extract_strided_slice %27 {offsets = [0, 0], sizes = [256, 256], strides = [1, 1]} : vector<264x256xf32> to vector<256x256xf32>
    %29 = vector.extract_strided_slice %27 {offsets = [2, 0], sizes = [256, 256], strides = [1, 1]} : vector<264x256xf32> to vector<256x256xf32>
    %30 = vector.extract_strided_slice %27 {offsets = [4, 0], sizes = [256, 256], strides = [1, 1]} : vector<264x256xf32> to vector<256x256xf32>
    %31 = vector.extract_strided_slice %27 {offsets = [6, 0], sizes = [256, 256], strides = [1, 1]} : vector<264x256xf32> to vector<256x256xf32>
    %32 = vector.extract_strided_slice %27 {offsets = [8, 0], sizes = [256, 256], strides = [1, 1]} : vector<264x256xf32> to vector<256x256xf32>
    %33 = tpu.concatenate %28, %29, %30, %31, %32 in 1 : vector<256x256xf32>, vector<256x256xf32>, vector<256x256xf32>, vector<256x256xf32>, vector<256x256xf32> -> vector<256x1280xf32>
    %34 = arith.truncf %33 : vector<256x1280xf32> to vector<256x1280xbf16>
    %c0_7 = arith.constant 0 : index
    %c0_8 = arith.constant 0 : index
    %35 = vector.load %arg4[%c0_7, %c0_8] : memref<1280x256xbf16, #tpu.memory_space<vmem>>, vector<1280x256xbf16>
    %cst_9 = arith.constant dense<0.000000e+00> : vector<256x256xf32>
    %36 = tpu.matmul %34, %35, %cst_9 {dimension_numbers = #tpu.dot_dimension_numbers<[1], [0], [0], [1], [0, 0, 1, 1], [], []>} : vector<256x1280xbf16>, vector<1280x256xbf16>, vector<256x256xf32> -> vector<256x256xf32>
    %c0_10 = arith.constant 0 : index
    %c0_11 = arith.constant 0 : index
    %37 = vector.load %arg5[%c0_10, %c0_11] : memref<1x256xf32, #tpu.memory_space<vmem>>, vector<1x256xf32>
    %38 = vector.broadcast %37 : vector<1x256xf32> to vector<256x256xf32>
    %39 = arith.addf %36, %38 : vector<256x256xf32>
    %cst_12 = arith.constant 0.000000e+00 : f32
    %40 = vector.broadcast %cst_12 : f32 to vector<256x256xf32>
    %41 = arith.maximumf %39, %40 : vector<256x256xf32>
    %42 = vector.extract_strided_slice %41 {offsets = [0, 0], sizes = [8, 256], strides = [1, 1]} : vector<256x256xf32> to vector<8x256xf32>
    %43 = tpu.concatenate %41, %42 in 0 : vector<256x256xf32>, vector<8x256xf32> -> vector<264x256xf32>
    %44 = vector.extract_strided_slice %43 {offsets = [2, 0], sizes = [256, 256], strides = [1, 1]} : vector<264x256xf32> to vector<256x256xf32>
    %45 = arith.maximumf %41, %44 : vector<256x256xf32>
    %46 = vector.extract_strided_slice %45 {offsets = [0, 0], sizes = [256, 128], strides = [1, 1]} : vector<256x256xf32> to vector<256x128xf32>
    %47 = tpu.concatenate %45, %46 in 1 : vector<256x256xf32>, vector<256x128xf32> -> vector<256x384xf32>
    %48 = vector.extract_strided_slice %47 {offsets = [0, 16], sizes = [256, 256], strides = [1, 1]} : vector<256x384xf32> to vector<256x256xf32>
    %49 = arith.maximumf %45, %48 : vector<256x256xf32>
    %50 = vector.shape_cast %49 : vector<256x256xf32> to vector<8x32x256xf32>
    %51 = vector.extract_strided_slice %50 {offsets = [0, 0, 0], sizes = [8, 1, 256], strides = [1, 1, 1]} : vector<8x32x256xf32> to vector<8x1x256xf32>
    %52 = vector.extract_strided_slice %50 {offsets = [0, 4, 0], sizes = [8, 1, 256], strides = [1, 1, 1]} : vector<8x32x256xf32> to vector<8x1x256xf32>
    %53 = vector.extract_strided_slice %50 {offsets = [0, 8, 0], sizes = [8, 1, 256], strides = [1, 1, 1]} : vector<8x32x256xf32> to vector<8x1x256xf32>
    %54 = vector.extract_strided_slice %50 {offsets = [0, 12, 0], sizes = [8, 1, 256], strides = [1, 1, 1]} : vector<8x32x256xf32> to vector<8x1x256xf32>
    %55 = vector.extract_strided_slice %50 {offsets = [0, 16, 0], sizes = [8, 1, 256], strides = [1, 1, 1]} : vector<8x32x256xf32> to vector<8x1x256xf32>
    %56 = tpu.concatenate %51, %52, %53, %54, %55 in 2 : vector<8x1x256xf32>, vector<8x1x256xf32>, vector<8x1x256xf32>, vector<8x1x256xf32>, vector<8x1x256xf32> -> vector<8x1x1280xf32>
    %57 = vector.shape_cast %56 : vector<8x1x1280xf32> to vector<8x1280xf32>
    %58 = arith.truncf %57 : vector<8x1280xf32> to vector<8x1280xbf16>
    %c0_13 = arith.constant 0 : index
    %c0_14 = arith.constant 0 : index
    %59 = vector.load %arg6[%c0_13, %c0_14] : memref<1280x120xbf16, #tpu.memory_space<vmem>>, vector<1280x120xbf16>
    %cst_15 = arith.constant dense<0.000000e+00> : vector<8x120xf32>
    %60 = tpu.matmul %58, %59, %cst_15 {dimension_numbers = #tpu.dot_dimension_numbers<[1], [0], [0], [1], [0, 0, 1, 1], [], []>} : vector<8x1280xbf16>, vector<1280x120xbf16>, vector<8x120xf32> -> vector<8x120xf32>
    %c0_16 = arith.constant 0 : index
    %c0_17 = arith.constant 0 : index
    %61 = vector.load %arg7[%c0_16, %c0_17] : memref<1x120xf32, #tpu.memory_space<vmem>>, vector<1x120xf32>
    %62 = vector.broadcast %61 : vector<1x120xf32> to vector<8x120xf32>
    %63 = arith.addf %60, %62 : vector<8x120xf32>
    %cst_18 = arith.constant 0.000000e+00 : f32
    %64 = vector.broadcast %cst_18 : f32 to vector<8x120xf32>
    %65 = arith.maximumf %63, %64 : vector<8x120xf32>
    %66 = arith.truncf %65 : vector<8x120xf32> to vector<8x120xbf16>
    %c0_19 = arith.constant 0 : index
    %c0_20 = arith.constant 0 : index
    %67 = vector.load %arg8[%c0_19, %c0_20] : memref<120x84xbf16, #tpu.memory_space<vmem>>, vector<120x84xbf16>
    %cst_21 = arith.constant dense<0.000000e+00> : vector<8x84xf32>
    %68 = tpu.matmul %66, %67, %cst_21 {dimension_numbers = #tpu.dot_dimension_numbers<[1], [0], [0], [1], [0, 0, 1, 1], [], []>} : vector<8x120xbf16>, vector<120x84xbf16>, vector<8x84xf32> -> vector<8x84xf32>
    %c0_22 = arith.constant 0 : index
    %c0_23 = arith.constant 0 : index
    %69 = vector.load %arg9[%c0_22, %c0_23] : memref<1x84xf32, #tpu.memory_space<vmem>>, vector<1x84xf32>
    %70 = vector.broadcast %69 : vector<1x84xf32> to vector<8x84xf32>
    %71 = arith.addf %68, %70 : vector<8x84xf32>
    %cst_24 = arith.constant 0.000000e+00 : f32
    %72 = vector.broadcast %cst_24 : f32 to vector<8x84xf32>
    %73 = arith.maximumf %71, %72 : vector<8x84xf32>
    %74 = arith.truncf %73 : vector<8x84xf32> to vector<8x84xbf16>
    %c0_25 = arith.constant 0 : index
    %c0_26 = arith.constant 0 : index
    %75 = vector.load %arg10[%c0_25, %c0_26] : memref<84x10xbf16, #tpu.memory_space<vmem>>, vector<84x10xbf16>
    %cst_27 = arith.constant dense<0.000000e+00> : vector<8x10xf32>
    %76 = tpu.matmul %74, %75, %cst_27 {dimension_numbers = #tpu.dot_dimension_numbers<[1], [0], [0], [1], [0, 0, 1, 1], [], []>} : vector<8x84xbf16>, vector<84x10xbf16>, vector<8x10xf32> -> vector<8x10xf32>
    %c0_28 = arith.constant 0 : index
    %c0_29 = arith.constant 0 : index
    %77 = vector.load %arg11[%c0_28, %c0_29] : memref<1x10xf32, #tpu.memory_space<vmem>>, vector<1x10xf32>
    %78 = vector.broadcast %77 : vector<1x10xf32> to vector<8x10xf32>
    %79 = arith.addf %76, %78 : vector<8x10xf32>
    %c0_30 = arith.constant 0 : index
    %c0_31 = arith.constant 0 : index
    %80 = vector.load %arg12[%c0_30, %c0_31] : memref<8x10xf32, #tpu.memory_space<vmem>>, vector<8x10xf32>
    tpu.vector_store %arg12[%c0_30, %c0_31], %79 {strides = array<i32>} : memref<8x10xf32, #tpu.memory_space<vmem>>, vector<8x10xf32>,
    return
  }
  func.func @transform_0(%arg0: i32) -> (i32, i32, i32) {
    %c0_i32 = arith.constant 0 : i32
    %c0_i32_0 = arith.constant 0 : i32
    %c0_i32_1 = arith.constant 0 : i32
    return %arg0, %c0_i32, %c0_i32_0 : i32, i32, i32
  }
  func.func @transform_1(%arg0: i32) -> (i32, i32) {
    %c0_i32 = arith.constant 0 : i32
    %c0_i32_0 = arith.constant 0 : i32
    %c0_i32_1 = arith.constant 0 : i32
    return %c0_i32, %c0_i32_0 : i32, i32
  }
  func.func @transform_2(%arg0: i32) -> (i32, i32) {
    %c0_i32 = arith.constant 0 : i32
    %c0_i32_0 = arith.constant 0 : i32
    %c0_i32_1 = arith.constant 0 : i32
    return %c0_i32, %c0_i32_0 : i32, i32
  }
  func.func @transform_3(%arg0: i32) -> (i32, i32) {
    %c0_i32 = arith.constant 0 : i32
    %c0_i32_0 = arith.constant 0 : i32
    %c0_i32_1 = arith.constant 0 : i32
    return %c0_i32, %c0_i32_0 : i32, i32
  }
  func.func @transform_4(%arg0: i32) -> (i32, i32) {
    %c0_i32 = arith.constant 0 : i32
    %c0_i32_0 = arith.constant 0 : i32
    %c0_i32_1 = arith.constant 0 : i32
    return %c0_i32, %c0_i32_0 : i32, i32
  }
  func.func @transform_5(%arg0: i32) -> (i32, i32) {
    %c0_i32 = arith.constant 0 : i32
    %c0_i32_0 = arith.constant 0 : i32
    %c0_i32_1 = arith.constant 0 : i32
    return %c0_i32, %c0_i32_0 : i32, i32
  }
  func.func @transform_6(%arg0: i32) -> (i32, i32) {
    %c0_i32 = arith.constant 0 : i32
    %c0_i32_0 = arith.constant 0 : i32
    %c0_i32_1 = arith.constant 0 : i32
    return %c0_i32, %c0_i32_0 : i32, i32
  }
  func.func @transform_7(%arg0: i32) -> (i32, i32) {
    %c0_i32 = arith.constant 0 : i32
    %c0_i32_0 = arith.constant 0 : i32
    %c0_i32_1 = arith.constant 0 : i32
    return %c0_i32, %c0_i32_0 : i32, i32
  }
  func.func @transform_8(%arg0: i32) -> (i32, i32) {
    %c0_i32 = arith.constant 0 : i32
    %c0_i32_0 = arith.constant 0 : i32
    %c0_i32_1 = arith.constant 0 : i32
    return %c0_i32, %c0_i32_0 : i32, i32
  }
  func.func @transform_9(%arg0: i32) -> (i32, i32) {
    %c0_i32 = arith.constant 0 : i32
    %c0_i32_0 = arith.constant 0 : i32
    %c0_i32_1 = arith.constant 0 : i32
    return %c0_i32, %c0_i32_0 : i32, i32
  }
  func.func @transform_10(%arg0: i32) -> (i32, i32) {
    %c0_i32 = arith.constant 0 : i32
    %c0_i32_0 = arith.constant 0 : i32
    %c0_i32_1 = arith.constant 0 : i32
    return %c0_i32, %c0_i32_0 : i32, i32
  }
  func.func @transform_11(%arg0: i32) -> (i32, i32) {
    %c0_i32 = arith.constant 0 : i32
    %c0_i32_0 = arith.constant 0 : i32
    return %arg0, %c0_i32 : i32, i32
  }
}

</mosaic_0001>

<bundles_post_ra>
// kernel: net_forward.1
= control target key start
LH: loop header
LB: loop body
LE: loop exit
PB: predicated region body
PF: predicated region fallthrough
CT: control target
= control target key end

     0   :  { %16 = vsyncpa [#allocation3], 0  ;;  %s14010_s0 = inlined_call_operand.vmem [shape: f32[16,32,128], index: 0, kind: input, shape index: {}]   ;;  %s14011_s1 = inlined_call_operand.vmem [shape: bf16[640,256], index: 1, kind: input, shape index: {}]   ;;  %s14012_s2 = inlined_call_operand.vmem [shape: f32[1,256], index: 2, kind: input, shape index: {}]   ;;  %s14013_s3 = inlined_call_operand.vmem [shape: bf16[1280,256], index: 3, kind: input, shape index: {}]   ;;  %s14014_s4 = inlined_call_operand.vmem [shape: f32[1,256], index: 4, kind: input, shape index: {}]   ;;  %s14015_s5 = inlined_call_operand.vmem [shape: bf16[1280,120], index: 5, kind: input, shape index: {}]   ;;  %s14016_s6 = inlined_call_operand.vmem [shape: f32[1,120], index: 6, kind: input, shape index: {}]   ;;  %s14017_s7 = inlined_call_operand.vmem [shape: bf16[120,84], index: 7, kind: input, shape index: {}]   ;;  %s14018_s8 = inlined_call_operand.vmem [shape: f32[1,84], index: 8, kind: input, shape index: {}]   ;;  %s14019_s9 = inlined_call_operand.vmem [shape: bf16[84,10], index: 9, kind: input, shape index: {}]   ;;  %s14020_s10 = inlined_call_operand.vmem [shape: f32[1,10], index: 10, kind: input, shape index: {}]   ;;  %s14021_s11 = inlined_call_operand.hbm [shape: f32[16,10], index: 11, kind: output, shape index: {}]  }
   0x1   :  { %18 = vsyncpa [#allocation3 + $0x1], 0  ;;  %s9191_s17 = smov 0   ;;  %s9193_s18 = smov 0  }
   0x2   :  { %s9195_s19 = smov 0   ;;  %s9197_s20 = smov 0  }
   0x3 LB: > { %14195 = sst [smem:[#allocation5_spill]] %s9119_s19  ;;  %s9212_s21 = sadd.s32 4294967295, %s9123_s20   ;;  %s9123_s20 = sphi %s9197_s20, %s14747_s20   ;;  %s9119_s19 = sphi %s9195_s19, %s14744_s19   ;;  %s9115_s18 = sphi %s9193_s18, %s14746_s18   ;;  %s9111_s17 = sphi %s9191_s17, %s14745_s17  }
   0x4   : > { %s7767_s22 = sadd.s32 4294967294, %s9123_s20   ;;  %s9216_s23 = sadd.s32 1, %s9123_s20  }
   0x5   : > { %s267_s24 = sadd.s32 1, %s9119_s19  ;;  %s264_s25 = ssub.s32 %s9123_s20, %s9216_s23 }
   0x6   : > { %p277_p0 = scmp.ne.s32.totalorder %s9119_s19, %s9115_s18  ;;  %p265_p1 = scmp.eq.s32.totalorder %s264_s25, 0 }
   0x7   : > { %p278_p2 = scmp.eq.s32.totalorder %s9212_s21, 1  ;;  %p283_p3 = scmp.ne.s32.totalorder %s9115_s18, %s9111_s17 }
   0x8   : > { %p284_p4 = scmp.eq.s32.totalorder %s7767_s22, 1  ;;  %p7770_p7 = scmp.ge.s32.totalorder %s9123_s20, 1 }
   0x9   : > { %s9227_s26 = scalar_select %p265_p1, %s9119_s19, %s267_s24  }
   0xa   : > { %p9229_p5 = por %p278_p2, %p277_p0  ;;  %p9233_p6 = por %p284_p4, %p283_p3 }
   0xb   : > { %14196 = sst [smem:[#allocation6_spill]] %s9227_s26  ;;  %p342_p8 = scmp.lt.s32.totalorder %s9123_s20, 3 }
   0xd   : > { %p343_p9 = pnand %p7770_p7, %p342_p8 }
   0xf   : > { %346 = sbr.rel (%p343_p9) target bundleno = 1954 (0x7a2), region = 64 }
  0x14   : > { %v8605_v0 = vld [vmem:[%s14011_s1 + $0x74] ss:$8 sps:$4 sm:$0xff]   ;;  %v8607_v1 = vld [vmem:[%s14011_s1 + $0x70] ss:$8 sps:$4 sm:$0xff]   ;;  %v8611_v4 = vld [vmem:[%s14011_s1 + $0x64] ss:$8 sps:$4 sm:$0xff]  }
  0x15   : > { %1415 = vmatprep.subr.bf16.mxu0 %v8605_v0  ;;  %v8608_v2 = vld [vmem:[%s14011_s1 + $0x174] ss:$8 sps:$4 sm:$0xff]   ;;  %v8610_v3 = vld [vmem:[%s14011_s1 + $0x170] ss:$8 sps:$4 sm:$0xff]   ;;  %v8613_v5 = vld [vmem:[%s14011_s1 + $0x60] ss:$8 sps:$4 sm:$0xff]  }
  0x16   : > { %1416 = vmatpush1.bf16.msra.mxu0 %v8607_v1  ;;  %1608 = vmatprep.subr.bf16.mxu1 %v8608_v2  ;;  %v8614_v6 = vld [vmem:[%s14011_s1 + $0x164] ss:$8 sps:$4 sm:$0xff]   ;;  %v8616_v7 = vld [vmem:[%s14011_s1 + $0x160] ss:$8 sps:$4 sm:$0xff]   ;;  %v8617_v8 = vld [vmem:[%s14011_s1 + $0x54] ss:$8 sps:$4 sm:$0xff]  }
  0x17   : > { %1609 = vmatpush1.bf16.msra.mxu1 %v8610_v3  ;;  %1417 = vmatprep.subr.bf16.mxu0 %v8611_v4  ;;  %v8619_v9 = vld [vmem:[%s14011_s1 + $0x50] ss:$8 sps:$4 sm:$0xff]   ;;  %v8620_v10 = vld [vmem:[%s14011_s1 + $0x154] ss:$8 sps:$4 sm:$0xff]   ;;  %v8623_v11 = vld [vmem:[%s14011_s1 + $0x44] ss:$8 sps:$4 sm:$0xff]  }
  0x18   : > { %1610 = vmatprep.subr.bf16.mxu1 %v8614_v6  ;;  %v8622_v12 = vld [vmem:[%s14011_s1 + $0x150] ss:$8 sps:$4 sm:$0xff]   ;;  %v8626_v13 = vld [vmem:[%s14011_s1 + $0x144] ss:$8 sps:$4 sm:$0xff]   ;;  %v8625_v14 = vld [vmem:[%s14011_s1 + $0x40] ss:$8 sps:$4 sm:$0xff]  }
  0x19   : > { %v8629_v15 = vld [vmem:[%s14011_s1 + $0x34] ss:$8 sps:$4 sm:$0xff]   ;;  %v8628_v16 = vld [vmem:[%s14011_s1 + $0x140] ss:$8 sps:$4 sm:$0xff]   ;;  %v8631_v18 = vld [vmem:[%s14011_s1 + $0x30] ss:$8 sps:$4 sm:$0xff]  }
  0x1a   : > { %1418 = vmatpush1.bf16.msra.mxu0 %v8613_v5  ;;  %v8632_v17 = vld [vmem:[%s14011_s1 + $0x134] ss:$8 sps:$4 sm:$0xff]   ;;  %v8635_v19 = vld [vmem:[%s14011_s1 + $0x24] ss:$8 sps:$4 sm:$0xff]   ;;  %v8634_v20 = vld [vmem:[%s14011_s1 + $0x130] ss:$8 sps:$4 sm:$0xff]  }
  0x1b   : > { %1419 = vmatprep.subr.bf16.mxu0 %v8617_v8  ;;  %1611 = vmatpush1.bf16.msra.mxu1 %v8616_v7  ;;  %v8638_v21 = vld [vmem:[%s14011_s1 + $0x124] ss:$8 sps:$4 sm:$0xff]   ;;  %v8637_v22 = vld [vmem:[%s14011_s1 + $0x20] ss:$8 sps:$4 sm:$0xff]   ;;  %v8641_v23 = vld [vmem:[%s14011_s1 + $0x14] ss:$8 sps:$4 sm:$0xff]  }
  0x1c   : > { %1612 = vmatprep.subr.bf16.mxu1 %v8620_v10  ;;  %v8640_v24 = vld [vmem:[%s14011_s1 + $0x120] ss:$8 sps:$4 sm:$0xff]   ;;  %v8644_v25 = vld [vmem:[%s14011_s1 + $0x114] ss:$8 sps:$4 sm:$0xff]   ;;  %v8643_v26 = vld [vmem:[%s14011_s1 + $0x10] ss:$8 sps:$4 sm:$0xff]  }
  0x1d   : > { %v8647_v27 = vld [vmem:[%s14011_s1 + $0x4] ss:$8 sps:$4 sm:$0xff]   ;;  %v8646_v28 = vld [vmem:[%s14011_s1 + $0x110] ss:$8 sps:$4 sm:$0xff]   ;;  %s7772_s24 = sshll.u32 %s9212_s21, 3  ;;  %vm455_vm0 = vcmask 1046528  }
  0x1e   : > { %1420 = vmatpush1.bf16.msra.mxu0 %v8619_v9  ;;  %v8650_v29 = vld [vmem:[%s14011_s1 + $0x104] ss:$8 sps:$4 sm:$0xff]   ;;  %v8649_v30 = vld [vmem:[%s14011_s1] ss:$8 sps:$4 sm:$0xff]   ;;  %v8653_v31 = vld [vmem:[%s14011_s1 + $0xf4] ss:$8 sps:$4 sm:$0xff]  }
  0x1f   : > { %1421 = vmatprep.subr.bf16.mxu0 %v8623_v11  ;;  %1613 = vmatpush1.bf16.msra.mxu1 %v8622_v12  ;;  %p384_p10 = scmp.lt.s32.totalorder %s7772_s24, 15  ;;  %v8652_v32 = vld [vmem:[%s14011_s1 + $0x100] ss:$8 sps:$4 sm:$0xff]   ;;  %v8656_v33 = vld [vmem:[%s14011_s1 + $0x1f4] ss:$8 sps:$4 sm:$0xff]   ;;  %vm649_vm1 = vcmask 1044480  }
  0x20   : > { %1614 = vmatprep.subr.bf16.mxu1 %v8626_v13  ;;  %v8655_v34 = vld [vmem:[%s14011_s1 + $0xf0] ss:$8 sps:$4 sm:$0xff]   ;;  %v8659_v35 = vld [vmem:[%s14011_s1 + $0xe4] ss:$8 sps:$4 sm:$0xff]   ;;  %v8661_v38 = vld [vmem:[%s14011_s1 + $0xe0] ss:$8 sps:$4 sm:$0xff]  }
  0x21   : > { %s14749_s24 = smov (!%p384_p10, %s7772_s24), 15  ;;  %v8658_v36 = vld [vmem:[%s14011_s1 + $0x1f0] ss:$8 sps:$4 sm:$0xff]   ;;  %v8662_v37 = vld [vmem:[%s14011_s1 + $0x1e4] ss:$8 sps:$4 sm:$0xff]   ;;  %vm552_vm2 = vcmask 1045504  }
  0x22   : > { %1422 = vmatpush1.bf16.msra.mxu0 %v8625_v14  ;;  %v8665_v39 = vld [vmem:[%s14011_s1 + $0xd4] ss:$8 sps:$4 sm:$0xff]   ;;  %s8118_s13 = sshll.u32 %s14749_s24, 5  ;;  %v8664_v40 = vld [vmem:[%s14011_s1 + $0x1e0] ss:$8 sps:$4 sm:$0xff]   ;;  %vm746_vm3 = vcmask 1043456  }
  0x23   : > { %1423 = vmatprep.subr.bf16.mxu0 %v8629_v15  ;;  %1615 = vmatpush1.bf16.msra.mxu1 %v8628_v16  ;;  %v8668_v41 = vld [vmem:[%s14011_s1 + $0x1d4] ss:$8 sps:$4 sm:$0xff]   ;;  %v8667_v42 = vld [vmem:[%s14011_s1 + $0xd0] ss:$8 sps:$4 sm:$0xff]   ;;  %s9372_s30 = scalar_lea.vmem %s14010_s0, %s8118_s13  ;;  %v8671_v43 = vld [vmem:[%s14011_s1 + $0xc4] ss:$8 sps:$4 sm:$0xff]  }
  0x24   : > { %1616 = vmatprep.subr.bf16.mxu1 %v8632_v17  ;;  %v8670_v44 = vld [vmem:[%s14011_s1 + $0x1d0] ss:$8 sps:$4 sm:$0xff]   ;;  %v8674_v45 = vld [vmem:[%s14011_s1 + $0x1c4] ss:$8 sps:$4 sm:$0xff]   ;;  %v8673_v48 = vld [vmem:[%s14011_s1 + $0xc0] ss:$8 sps:$4 sm:$0xff]  }
  0x25   : > { %v9384_v46 = vld [vmem:[%s9372_s30] sm:$0xff]  ;;  %v9387_v47 = vld [vmem:[%s9372_s30 + $0x8] sm:$0xff]  ;;  %v9393_v49 = vld [vmem:[%s9372_s30 + $0x10] sm:$0xff]  ;;  %s9126_s14 = smov 122   ;;  %vm2570_vm4 = vcmask 998400   ;;  %vm3211_vm5 = vcmask 1041408  }
  0x26   : > { %1424 = vmatpush1.bf16.msra.mxu0 %v8631_v18  ;;  %v14024_v50 = vrot.slane %v9384_v46, 1  ;;  %v457_v51 = vrot.slane %v9387_v47, 1  ;;  %v8677_v52 = vld [vmem:[%s14011_s1 + $0xb4] ss:$8 sps:$4 sm:$0xff]   ;;  %v459_v53 = vrot.slane %v9393_v49, 1  ;;  %v14025_v56 = vrot.slane %v9384_v46, 3 }
  0x27   : > { %1425 = vmatprep.subr.bf16.mxu0 %v8635_v19  ;;  %1617 = vmatpush1.bf16.msra.mxu1 %v8634_v20  ;;  %v8676_v54 = vld [vmem:[%s14011_s1 + $0x1c0] ss:$8 sps:$4 sm:$0xff]   ;;  %v651_v57 = vrot.slane %v9387_v47, 3  ;;  %v653_v58 = vrot.slane %v9393_v49, 3  ;;  %v8680_v59 = vld [vmem:[%s14011_s1 + $0x1b4] ss:$8 sps:$4 sm:$0xff]  }
  0x28   : > { %1618 = vmatprep.subr.bf16.mxu1 %v8638_v21  ;;  %v458_v55 = vsel %vm455_vm0, %v14024_v50, %v457_v51  ;;  %v460_v60 = vsel %vm455_vm0, %v457_v51, %v459_v53  ;;  %v8679_v61 = vld [vmem:[%s14011_s1 + $0xb0] ss:$8 sps:$4 sm:$0xff]   ;;  %v8683_v1 = vld [vmem:[%s14011_s1 + $0xa4] ss:$8 sps:$4 sm:$0xff]   ;;  %v8685_v5 = vld [vmem:[%s14011_s1 + $0xa0] ss:$8 sps:$4 sm:$0xff]  }
  0x29   : > { %v844_v62 = vpack.c.bf16 %v460_v60, %v458_v55  ;;  %v652_v63 = vsel %vm649_vm1, %v14025_v56, %v651_v57  ;;  %v654_v0 = vsel %vm649_vm1, %v651_v57, %v653_v58  ;;  %v8682_v3 = vld [vmem:[%s14011_s1 + $0x1b0] ss:$8 sps:$4 sm:$0xff]   ;;  %v8686_v4 = vld [vmem:[%s14011_s1 + $0x1a4] ss:$8 sps:$4 sm:$0xff]   ;;  %v8689_v6 = vld [vmem:[%s14011_s1 + $0x94] ss:$8 sps:$4 sm:$0xff]  }
  0x2a   : > { %1426 = vmatpush1.bf16.msra.mxu0 %v8637_v22  ;;  %v846_v2 = vpack.c.bf16 %v654_v0, %v652_v63  ;;  %v8688_v7 = vld [vmem:[%s14011_s1 + $0x1a0] ss:$8 sps:$4 sm:$0xff]   ;;  %v9440_v8 = vld [vmem:[%s9372_s30 + $0x18] sm:$0xff]  ;;  %v8695_v12 = vld [vmem:[%s14011_s1 + $0x84] ss:$8 sps:$4 sm:$0xff]   ;;  %v14023_v16 = vrot.slane %v9384_v46, 2 }
  0x2b   : > { %1427 = vmatprep.subr.bf16.mxu0 %v8641_v23  ;;  %1619 = vmatpush1.bf16.msra.mxu1 %v8640_v24  ;;  %v9443_v9 = vld [vmem:[%s9372_s30 + $0x20] sm:$0xff]  ;;  %v8692_v10 = vld [vmem:[%s14011_s1 + $0x194] ss:$8 sps:$4 sm:$0xff]   ;;  %v8691_v11 = vld [vmem:[%s14011_s1 + $0x90] ss:$8 sps:$4 sm:$0xff]   ;;  %v461_v13 = vrot.slane %v9440_v8, 1 }
  0x2c   : > { %1620 = vmatprep.subr.bf16.mxu1 %v8644_v25  ;;  %1447 = vmatprep.mubr.bf16.mxu0 %v844_v62  ;;  %v463_v14 = vrot.slane %v9443_v9, 1  ;;  %v8694_v15 = vld [vmem:[%s14011_s1 + $0x190] ss:$8 sps:$4 sm:$0xff]   ;;  %v554_v17 = vrot.slane %v9387_v47, 2  ;;  %v556_v18 = vrot.slane %v9393_v49, 2  ;;  %v655_v20 = vrot.slane %v9440_v8, 3 }
  0x2d   : > { %1640 = vmatprep.mubr.bf16.mxu1 %v846_v2  ;;  %v8698_v19 = vld [vmem:[%s14011_s1 + $0x184] ss:$8 sps:$4 sm:$0xff]   ;;  %v657_v21 = vrot.slane %v9443_v9, 3  ;;  %v8697_v22 = vld [vmem:[%s14011_s1 + $0x80] ss:$8 sps:$4 sm:$0xff]   ;;  %v462_v25 = vsel %vm455_vm0, %v459_v53, %v461_v13  ;;  %v9529_v63 = vld [vmem:[%s9372_s30 + $0x70] sm:$0xff] }
  0x2e   : > { %1428 = vmatpush1.bf16.msra.mxu0 %v8643_v26  ;;  %v8700_v23 = vld [vmem:[%s14011_s1 + $0x180] ss:$8 sps:$4 sm:$0xff]   ;;  %v8703_v24 = vld [vmem:[%s14011_s1 + $0x274] ss:$8 sps:$4 sm:$0xff]   ;;  %v464_v26 = vsel %vm455_vm0, %v461_v13, %v463_v14  ;;  %v8712_v0 = vld [vmem:[%s14011_s1 + $0x244] ss:$8 sps:$4 sm:$0xff]  }
  0x2f   : > { %1429 = vmatprep.subr.bf16.mxu0 %v8647_v27  ;;  %1621 = vmatpush1.bf16.msra.mxu1 %v8646_v28  ;;  %v555_v27 = vsel %vm552_vm2, %v14023_v16, %v554_v17  ;;  %v557_v28 = vsel %vm552_vm2, %v554_v17, %v556_v18  ;;  %v9511_v51 = vld [vmem:[%s9372_s30 + $0x40] sm:$0xff]  ;;  %v9698_v16 = vld [vmem:[%s9372_s30 + $0xc8] sm:$0xff]  ;;  %s9127_s12 = smov 112   ;;  %vm5981_vm6 = vcmask 916480   ;;  %vm6630_vm7 = vcmask 1041409   ;;  %s380_s15 = sand.u32 1, %s9115_s18  }
  0x30   : > { %1622 = vmatprep.subr.bf16.mxu1 %v8650_v29  ;;  %v9483_v29 = vld [vmem:[%s9372_s30 + $0x28] sm:$0xff]  ;;  %v9538_v2 = vld [vmem:[%s9372_s30 + $0x80] sm:$0xff]  ;;  %vm6633_vm8 = vcmask 1042434   ;;  %vm6636_vm9 = vcmask 1043459   ;;  %vm6639_vm10 = vcmask 1044484   ;;  %vm6642_vm11 = vcmask 1045509  }
  0x31   : > { %vm6645_vm12 = vcmask 1046534   ;;  %vm6648_vm13 = vcmask 1047559   ;;  %vm9129_vm14 = vmmov 0   ;;  %vm7545_vm15 = vcmask 982016   ;;  %s7771_s16 = sshll.u32 %s380_s15, 3  ;;  %s8115_s22 = sshll.u32 %s9212_s21, 7 }
  0x32   : > { %1430 = vmatpush1.bf16.msra.mxu0 %v8649_v30  ;;  %v9486_v30 = vld [vmem:[%s9372_s30 + $0x30] sm:$0xff]  ;;  %s382_s25 = scalar_lea.vmem [#allocation2], %s7771_s16  ;;  %s13969_s24 = scalar_lea.hbm %s14021_s11, %s8115_s22 }
  0x33   : > { %1431 = vmatprep.subr.bf16.mxu0 %v8653_v31  ;;  %1623 = vmatpush1.bf16.msra.mxu1 %v8652_v32  ;;  %v843_v31 = vpack.c.bf16 %v9387_v47, %v9384_v46  ;;  %v656_v32 = vsel %vm649_vm1, %v653_v58, %v655_v20  ;;  %v8707_v58 = vld [vmem:[%s14011_s1 + $0x250] ss:$8 sps:$4 sm:$0xff]   ;;  %s7708_s29 = sshll.u32 %s382_s25, 4  ;;  %s13971_s29 = int_to_ptr.vmem [resolvable:$true] %s7708_s29 }
  0x34   : > { %1624 = vmatprep.subr.bf16.mxu1 %v8656_v33  ;;  %v658_v33 = vsel %vm649_vm1, %v655_v20, %v657_v21  ;;  %v9556_v20 = vld [vmem:[%s9372_s30 + $0x88] sm:$0xff]  ;;  %s9063_s21 = scalar_lea.vmem %s13971_s29, 128 }
  0x35   : > { %p9064_p11 = scmp.ne.s32.totalorder %s13971_s29, %s9063_s21 }
  0x36   : > { %1432 = vmatpush2.bf16.msra.mxu0 %v8655_v34  ;;  %v8701_v34 = vld [vmem:[%s14011_s1 + $0x270] ss:$8 sps:$4 sm:$0xff]  }
  0x37   : > { %1433 = vmatprep.subr.bf16.mxu0 %v8659_v35  ;;  %1625 = vmatpush2.bf16.msra.mxu1 %v8658_v36  ;;  %v849_v35 = vpack.c.bf16 %v464_v26, %v462_v25  ;;  %v845_v36 = vpack.c.bf16 %v557_v28, %v555_v27  ;;  %v9576_v26 = vld [vmem:[%s9372_s30 + $0x90] sm:$0xff]  ;;  %v853_v28 = vpack.c.bf16 %v9483_v29, %v9443_v9  ;;  %p9065_p12 = pnand %p9064_p11, %p9229_p5 }
  0x38   : > { %1626 = vmatprep.subr.bf16.mxu1 %v8662_v37  ;;  %v465_v37 = vrot.slane %v9483_v29, 1 }
  0x39   : > { %p9066_p13 = pneg %p9065_p12 }
  0x3a   : > { %1434 = vmatpush2.bf16.msra.mxu0 %v8661_v38  ;;  %v467_v38 = vrot.slane %v9486_v30, 1  ;;  %v466_v53 = vsel %vm455_vm0, %v463_v14, %v465_v37  ;;  %v681_v14 = vrot.slane %v9538_v2, 3 }
  0x3b   : > { %1435 = vmatprep.subr.bf16.mxu0 %v8665_v39  ;;  %1627 = vmatpush2.bf16.msra.mxu1 %v8664_v40  ;;  %v8706_v39 = vld [vmem:[%s14011_s1 + $0x264] ss:$8 sps:$4 sm:$0xff]   ;;  %v851_v40 = vpack.c.bf16 %v658_v33, %v656_v32  ;;  %v8713_v33 = vld [vmem:[%s14011_s1 + $0x230] ss:$8 sps:$4 sm:$0xff]  }
  0x3c   : > { %1628 = vmatprep.subr.bf16.mxu1 %v8668_v41  ;;  %v558_v41 = vrot.slane %v9440_v8, 2 }
  0x3e   : > { %1436 = vmatpush2.bf16.msra.mxu0 %v8667_v42  ;;  %v560_v42 = vrot.slane %v9443_v9, 2  ;;  %v559_v55 = vsel %vm552_vm2, %v556_v18, %v558_v41  ;;  %v665_v18 = vrot.slane %v9511_v51, 3 }
  0x3f   : > { %1437 = vmatprep.subr.bf16.mxu0 %v8671_v43  ;;  %1629 = vmatpush2.bf16.msra.mxu1 %v8670_v44  ;;  %v8704_v43 = vld [vmem:[%s14011_s1 + $0x260] ss:$8 sps:$4 sm:$0xff]   ;;  %v9506_v44 = vld [vmem:[%s9372_s30 + $0x38] sm:$0xff] }
  0x40   : > { %1630 = vmatprep.subr.bf16.mxu1 %v8674_v45  ;;  %v659_v45 = vrot.slane %v9483_v29, 3  ;;  %v561_v57 = vsel %vm552_vm2, %v558_v41, %v560_v42  ;;  %v469_v62 = vrot.slane %v9506_v44, 1  ;;  %v663_v17 = vrot.slane %v9506_v44, 3 }
  0x41   : > { %v568_v41 = vrot.slane %v9511_v51, 2 }
  0x42   : > { %1438 = vmatpush2.bf16.msra.mxu0 %v8673_v48  ;;  %v661_v48 = vrot.slane %v9486_v30, 3  ;;  %v660_v60 = vsel %vm649_vm1, %v657_v21, %v659_v45  ;;  %v8715_v21 = vld [vmem:[%s14011_s1 + $0x234] ss:$8 sps:$4 sm:$0xff]  }
  0x43   : > { %1439 = vmatprep.subr.bf16.mxu0 %v8677_v52  ;;  %1631 = vmatpush2.bf16.msra.mxu1 %v8676_v54  ;;  %v8709_v52 = vld [vmem:[%s14011_s1 + $0x254] ss:$8 sps:$4 sm:$0xff]   ;;  %v468_v54 = vsel %vm455_vm0, %v465_v37, %v467_v38  ;;  %v666_v37 = vsel %vm649_vm1, %v663_v17, %v665_v18 }
  0x44   : > { %1632 = vmatprep.subr.bf16.mxu1 %v8680_v59  ;;  %v848_v59 = vpack.c.bf16 %v9440_v8, %v9393_v49 }
  0x46   : > { %1440 = vmatpush2.bf16.msra.mxu0 %v8679_v61  ;;  %v662_v61 = vsel %vm649_vm1, %v659_v45, %v661_v48  ;;  %v9603_v45 = vld [vmem:[%s9372_s30 + $0x98] sm:$0xff] }
  0x47   : > { %1441 = vmatprep.subr.bf16.mxu0 %v8683_v1  ;;  %1633 = vmatpush2.bf16.msra.mxu1 %v8682_v3  ;;  %v9535_v1 = vld [vmem:[%s9372_s30 + $0x78] sm:$0xff]  ;;  %v854_v3 = vpack.c.bf16 %v468_v54, %v466_v53 }
  0x48   : > { %1634 = vmatprep.subr.bf16.mxu1 %v8686_v4  ;;  %v471_v4 = vrot.slane %v9511_v51, 1  ;;  %v679_v13 = vrot.slane %v9535_v1, 3 }
  0x4a   : > { %1442 = vmatpush2.bf16.msra.mxu0 %v8685_v5  ;;  %v850_v5 = vpack.c.bf16 %v561_v57, %v559_v55  ;;  %v9573_v25 = vsel %vm649_vm1, %v679_v13, %v681_v14 }
  0x4b   : > { %1443 = vmatprep.subr.bf16.mxu0 %v8689_v6  ;;  %1635 = vmatpush2.bf16.msra.mxu1 %v8688_v7  ;;  %v562_v6 = vrot.slane %v9483_v29, 2  ;;  %v564_v7 = vrot.slane %v9486_v30, 2 }
  0x4c   : > { %1636 = vmatprep.subr.bf16.mxu1 %v8692_v10  ;;  %v856_v10 = vpack.c.bf16 %v662_v61, %v660_v60  ;;  %v9617_v60 = vld [vmem:[%s9372_s30 + $0xa8] sm:$0xff] }
  0x4d   : > { %v565_v32 = vsel %vm552_vm2, %v562_v6, %v564_v7  ;;  %v8716_v61 = vld [vmem:[%s14011_s1 + $0x220] ss:$8 sps:$4 sm:$0xff]  }
  0x4e   : > { %1444 = vmatpush2.bf16.msra.mxu0 %v8691_v11  ;;  %v8710_v11 = vld [vmem:[%s14011_s1 + $0x240] ss:$8 sps:$4 sm:$0xff]  }
  0x4f   : > { %1445 = vmatprep.subr.bf16.mxu0 %v8695_v12  ;;  %1637 = vmatpush2.bf16.msra.mxu1 %v8694_v15  ;;  %v14026_v12 = vrot.slane %v9529_v63, 3  ;;  %v470_v15 = vsel %vm455_vm0, %v467_v38, %v469_v62  ;;  %v685_v38 = vrot.slane %v9576_v26, 3 }
  0x50   : > { %1638 = vmatprep.subr.bf16.mxu1 %v8698_v19  ;;  %v9553_v19 = vld [vmem:[%s9372_s30 + $0x48] sm:$0xff] }
  0x51   : > { %v667_v57 = vrot.slane %v9553_v19, 3 }
  0x52   : > { %1446 = vmatpush2.bf16.msra.mxu0 %v8697_v22  ;;  %v472_v22 = vsel %vm455_vm0, %v469_v62, %v471_v4  ;;  %v9623_v62 = vld [vmem:[%s9372_s30 + $0x58] sm:$0xff] }
  0x53   : > { %1801 = vmatprep.subr.bf16.mxu0 %v8703_v24  ;;  %1639 = vmatpush2.bf16.msra.mxu1 %v8700_v23  ;;  %v9565_v23 = vld [vmem:[%s9372_s30 + $0x50] sm:$0xff]  ;;  %v9570_v24 = vsel %vm649_vm1, %v14026_v12, %v679_v13 }
  0x54   : > { %v475_v53 = vrot.slane %v9565_v23, 1 }
  0x55   : > { %1448 = vmatmul.mubr.bf16.vlgmr.msra.gmra.mxu0 %v843_v31  ;;  %v563_v31 = vsel %vm552_vm2, %v560_v42, %v562_v6  ;;  %v473_v42 = vrot.slane %v9553_v19, 1  ;;  %v8721_v6 = vld [vmem:[%s14011_s1 + $0x214] ss:$8 sps:$4 sm:$0xff]  }
  0x56   : > { %1802 = vmatpush1.bf16.msra.mxu0 %v8701_v34  ;;  %1457 = vmatprep.mubr.bf16.mxu0 %v849_v35  ;;  %v683_v34 = vrot.slane %v9556_v20, 3  ;;  %v859_v35 = vpack.c.bf16 %v472_v22, %v470_v15  ;;  %v668_v22 = vsel %vm649_vm1, %v665_v18, %v667_v57 }
  0x57   : > { %1641 = vmatmul.mubr.bf16.vlgmr.msra.gmra.mxu1 %v845_v36  ;;  %1803 = vmatprep.subr.bf16.mxu0 %v8706_v39  ;;  %v664_v36 = vsel %vm649_vm1, %v661_v48, %v663_v17  ;;  %v8718_v39 = vld [vmem:[%s14011_s1 + $0x224] ss:$8 sps:$4 sm:$0xff]   ;;  %v474_v13 = vsel %vm455_vm0, %v471_v4, %v473_v42  ;;  %v476_v15 = vsel %vm455_vm0, %v473_v42, %v475_v53 }
  0x58   : > { %1650 = vmatprep.mubr.bf16.mxu1 %v851_v40  ;;  %v566_v40 = vrot.slane %v9506_v44, 2  ;;  %v9606_v48 = vld [vmem:[%s9372_s30 + $0xa0] sm:$0xff]  ;;  %v9610_v54 = vsel %vm649_vm1, %v683_v34, %v685_v38  ;;  %v861_v55 = vpack.c.bf16 %v666_v37, %v664_v36  ;;  %v858_v4 = vpack.c.bf16 %v9506_v44, %v9486_v30 }
  0x59   : > { %v572_v36 = vrot.slane %v9565_v23, 2 }
  0x5a   : > { %1804 = vmatpush1.bf16.msra.mxu0 %v8704_v43  ;;  %v9600_v43 = vsel %vm649_vm1, %v681_v14, %v683_v34  ;;  %v9641_v14 = vld [vmem:[%s9372_s30 + $0xb0] sm:$0xff] }
  0x5b   : > { %1805 = vmatprep.subr.bf16.mxu0 %v8709_v52  ;;  %v855_v52 = vpack.c.bf16 %v565_v32, %v563_v31  ;;  %v9664_v32 = vld [vmem:[%s9372_s30 + $0xb8] sm:$0xff]  ;;  %v693_v37 = vrot.slane %v9641_v14, 3 }
  0x5c   : > { %v8719_v34 = vld [vmem:[%s14011_s1 + $0x210] ss:$8 sps:$4 sm:$0xff]  }
  0x5d   : > { %1458 = vmatmul.mubr.bf16.gmra.mxu0 %v848_v59  ;;  %v574_v59 = vrot.slane %v9623_v62, 2 }
  0x5e   : > { %1467 = vmatprep.mubr.bf16.mxu0 %v854_v3  ;;  %1806 = vmatpush1.bf16.msra.mxu0 %v8707_v58  ;;  %v669_v58 = vrot.slane %v9565_v23, 3  ;;  %v687_v3 = vrot.slane %v9603_v45, 3 }
  0x5f   : > { %1651 = vmatmul.mubr.bf16.gmra.mxu1 %v850_v5  ;;  %1807 = vmatprep.subr.bf16.mxu0 %v8712_v0  ;;  %v9626_v0 = vld [vmem:[%s9372_s30 + $0x60] sm:$0xff]  ;;  %v689_v5 = vrot.slane %v9606_v48, 3 }
  0x60   : > { %1660 = vmatprep.mubr.bf16.mxu1 %v856_v10  ;;  %v567_v10 = vsel %vm552_vm2, %v564_v7, %v566_v40  ;;  %v9647_v7 = vsel %vm649_vm1, %v685_v38, %v687_v3  ;;  %v479_v42 = vrot.slane %v9626_v0, 1 }
  0x61   : > { %v9650_v17 = vsel %vm649_vm1, %v687_v3, %v689_v5 }
  0x62   : > { %1808 = vmatpush1.bf16.msra.mxu0 %v8710_v11  ;;  %v569_v11 = vsel %vm552_vm2, %v566_v40, %v568_v41  ;;  %v477_v40 = vrot.slane %v9623_v62, 1 }
  0x63   : > { %1809 = vmatprep.subr.bf16.mxu0 %v8715_v21  ;;  %v691_v21 = vrot.slane %v9617_v60, 3  ;;  %v860_v38 = vpack.c.bf16 %v569_v11, %v567_v10  ;;  %v863_v11 = vpack.c.bf16 %v9553_v19, %v9511_v51 }
  0x64   : > { %v478_v31 = vsel %vm455_vm0, %v475_v53, %v477_v40 }
  0x65   : > { %1468 = vmatmul.mubr.bf16.gmra.mxu0 %v853_v28  ;;  %v670_v28 = vsel %vm649_vm1, %v667_v57, %v669_v58  ;;  %v9675_v18 = vsel %vm649_vm1, %v689_v5, %v691_v21  ;;  %v671_v57 = vrot.slane %v9623_v62, 3  ;;  %v9688_v3 = vsel %vm649_vm1, %v691_v21, %v693_v37  ;;  %v8722_v21 = vld [vmem:[%s14011_s1 + $0x200] ss:$8 sps:$4 sm:$0xff]  }
  0x66   : > { %1477 = vmatprep.mubr.bf16.mxu0 %v859_v35  ;;  %1810 = vmatpush1.bf16.msra.mxu0 %v8713_v33  ;;  %v9667_v33 = vld [vmem:[%s9372_s30 + $0xc0] sm:$0xff]  ;;  %v570_v35 = vrot.slane %v9553_v19, 2  ;;  %14199 = vst [vmem:[#allocation7_spill] sm:$0xff] %v9675_v18  ;;  %v695_v5 = vrot.slane %v9664_v32, 3  ;;  %v14202_v18 = vrot.slane %v9529_v63, 3 }
  0x67   : > { %1661 = vmatmul.mubr.bf16.gmra.mxu1 %v855_v52  ;;  %1811 = vmatprep.subr.bf16.mxu0 %v8718_v39  ;;  %v864_v39 = vpack.c.bf16 %v476_v15, %v474_v13  ;;  %v9681_v52 = vld [vmem:[%s9372_s30 + $0x68] sm:$0xff]  ;;  %v697_v10 = vrot.slane %v9667_v33, 3  ;;  %v866_v13 = vpack.c.bf16 %v670_v28, %v668_v22  ;;  %v9714_v15 = vld [vmem:[%s9372_s30 + $0xd0] sm:$0xff] }
  0x68   : > { %1670 = vmatprep.mubr.bf16.mxu1 %v861_v55  ;;  %v8724_v55 = vld [vmem:[%s14011_s1 + $0x204] ss:$8 sps:$4 sm:$0xff]   ;;  %v573_v50 = vsel %vm552_vm2, %v570_v35, %v572_v36  ;;  %v9708_v22 = vsel %vm649_vm1, %v693_v37, %v695_v5  ;;  %v576_v37 = vrot.slane %v9626_v0, 2  ;;  %v578_v27 = vrot.slane %v9681_v52, 2 }
  0x69   : > { %14200 = vst [vmem:[#allocation8_spill] sm:$0xff] %v9708_v22  ;;  %v9711_v28 = vsel %vm649_vm1, %v695_v5, %v697_v10  ;;  %v699_v5 = vrot.slane %v9698_v16, 3 }
  0x6a   : > { %1812 = vmatpush1.bf16.msra.mxu0 %v8716_v61  ;;  %v673_v61 = vrot.slane %v9626_v0, 3  ;;  %14201 = vst [vmem:[#allocation9_spill] sm:$0xff] %v9711_v28 }
  0x6b   : > { %1813 = vmatprep.subr.bf16.mxu0 %v8721_v6  ;;  %v571_v6 = vsel %vm552_vm2, %v568_v41, %v570_v35  ;;  %v672_v35 = vsel %vm649_vm1, %v669_v58, %v671_v57  ;;  %v675_v41 = vrot.slane %v9681_v52, 3  ;;  %v580_v58 = vrot.slane %v9529_v63, 2 }
  0x6c   : > { %v674_v53 = vsel %vm649_vm1, %v671_v57, %v673_v61  ;;  %v9736_v56 = vsel %vm649_vm1, %v697_v10, %v699_v5  ;;  %v756_v10 = vrot.slane %v9483_v29, 4 }
  0x6d   : > { %1478 = vmatmul.mubr.bf16.gmra.mxu0 %v858_v4  ;;  %v480_v4 = vsel %vm455_vm0, %v477_v40, %v479_v42  ;;  %v483_v40 = vrot.slane %v9529_v63, 1  ;;  %v871_v22 = vpack.c.bf16 %v674_v53, %v672_v35  ;;  %v676_v28 = vsel %vm649_vm1, %v673_v61, %v675_v41 }
  0x6e   : > { %1487 = vmatprep.mubr.bf16.mxu0 %v864_v39  ;;  %1814 = vmatpush1.bf16.msra.mxu0 %v8719_v34  ;;  %v481_v39 = vrot.slane %v9681_v52, 1  ;;  %v14030_v34 = vrot.slane %v9714_v15, 3  ;;  %v869_v12 = vpack.c.bf16 %v480_v4, %v478_v31  ;;  %v489_v53 = vrot.slane %v9556_v20, 1 }
  0x6f   : > { %1671 = vmatmul.mubr.bf16.gmra.mxu1 %v860_v38  ;;  %1815 = vmatprep.subr.bf16.mxu0 %v8724_v55  ;;  %v865_v38 = vpack.c.bf16 %v573_v50, %v571_v6  ;;  %v485_v55 = vrot.slane %v9535_v1, 1  ;;  %v575_v50 = vsel %vm552_vm2, %v572_v36, %v574_v59  ;;  %v577_v6 = vsel %vm552_vm2, %v574_v59, %v576_v37 }
  0x70   : > { %1680 = vmatprep.mubr.bf16.mxu1 %v866_v13  ;;  %v487_v13 = vrot.slane %v9538_v2, 1  ;;  %v9743_v57 = vsel %vm649_vm1, %v699_v5, %v14030_v34  ;;  %v482_v31 = vsel %vm455_vm0, %v479_v42, %v481_v39  ;;  %v484_v4 = vsel %vm455_vm0, %v481_v39, %v483_v40 }
  0x71   : > { %v678_v5 = vsel %vm649_vm1, %v675_v41, %v14202_v18  ;;  %v9758_v36 = vsel %vm552_vm2, %v576_v37, %v578_v27  ;;  %v9761_v59 = vsel %vm552_vm2, %v578_v27, %v580_v58  ;;  %v873_v42 = vpack.c.bf16 %v9681_v52, %v9626_v0 }
  0x72   : > { %1816 = vmatpush1.bf16.msra.mxu0 %v8722_v21  ;;  %v868_v21 = vpack.c.bf16 %v9623_v62, %v9565_v23  ;;  %v9766_v61 = vsel %vm455_vm0, %v483_v40, %v485_v55  ;;  %v9769_v35 = vsel %vm455_vm0, %v485_v55, %v487_v13  ;;  %v582_v18 = vrot.slane %v9535_v1, 2 }
  0x73   : > { %v874_v41 = vpack.c.bf16 %v484_v4, %v482_v31  ;;  %v876_v37 = vpack.c.bf16 %v678_v5, %v676_v28  ;;  %v14032_v27 = vrot.slane %v9538_v2, 2  ;;  %v878_v39 = vpack.c.bf16 %v9535_v1, %v9529_v63 }
  0x74   : > { %v491_v40 = vrot.slane %v9576_v26, 1  ;;  %v879_v55 = vpack.c.bf16 %v9769_v35, %v9766_v61  ;;  %v9791_v31 = vsel %vm552_vm2, %v580_v58, %v582_v18  ;;  %v495_v4 = vrot.slane %v9606_v48, 1 }
  0x75   : > { %1488 = vmatmul.mubr.bf16.gmra.mxu0 %v863_v11  ;;  %v870_v11 = vpack.c.bf16 %v577_v6, %v575_v50  ;;  %v493_v50 = vrot.slane %v9603_v45, 1  ;;  %v9788_v6 = vld [vmem:[%s9372_s30 + $0xf8] sm:$0xff]  ;;  %v9799_v61 = vsel %vm552_vm2, %v582_v18, %v14032_v27  ;;  %v9805_v58 = vsel %vm455_vm0, %v487_v13, %v489_v53 }
  0x76   : > { %1497 = vmatprep.mubr.bf16.mxu0 %v869_v12  ;;  %v875_v12 = vpack.c.bf16 %v9761_v59, %v9758_v36  ;;  %v711_v34 = vrot.slane %v9788_v6, 3  ;;  %v9813_v18 = vsel %vm455_vm0, %v489_v53, %v491_v40  ;;  %v14033_v28 = vrot.slane %v9384_v46, 4  ;;  %v9963_v36 = vld [vmem:[%s9372_s30 + $0xe8] sm:$0xff] }
  0x77   : > { %1681 = vmatmul.mubr.bf16.gmra.mxu1 %v865_v38  ;;  %v14203_v38 = vrot.slane %v9384_v46, 3  ;;  %v748_v53 = vrot.slane %v9387_v47, 4  ;;  %v505_v27 = vrot.slane %v9698_v16, 1  ;;  %v752_v47 = vrot.slane %v9440_v8, 4 }
  0x78   : > { %1690 = vmatprep.mubr.bf16.mxu1 %v871_v22  ;;  %v9785_v22 = vld [vmem:[%s9372_s30 + $0xf0] sm:$0xff]  ;;  %v762_v8 = vrot.slane %v9511_v51, 4  ;;  %v764_v51 = vrot.slane %v9553_v19, 4 }
  0x79   : > { %v14031_v5 = vrot.slane %v9785_v22, 3 }
  0x7b   : > { %v9820_v13 = vsel %vm649_vm1, %v14031_v5, %v711_v34  ;;  %v750_v5 = vrot.slane %v9393_v49, 4  ;;  %v760_v49 = vrot.slane %v9506_v44, 4 }
  0x7d   : > { %1498 = vmatmul.mubr.bf16.gmra.mxu0 %v868_v21  ;;  %v9825_v21 = vsel %vm649_vm1, %v711_v34, %v14203_v38  ;;  %v9838_v34 = vsel %vm746_vm3, %v14033_v28, %v748_v53  ;;  %v9843_v38 = vsel %vm746_vm3, %v748_v53, %v750_v5  ;;  %v9851_v35 = vsel %vm746_vm3, %v750_v5, %v752_v47 }
  0x7e   : > { %1507 = vmatprep.mubr.bf16.mxu0 %v874_v41  ;;  %v758_v41 = vrot.slane %v9486_v30, 4  ;;  %v9871_v53 = vsel %vm746_vm3, %v760_v49, %v762_v8  ;;  %v772_v5 = vrot.slane %v9681_v52, 4 }
  0x7f   : > { %1691 = vmatmul.mubr.bf16.gmra.mxu1 %v870_v11  ;;  %v754_v11 = vrot.slane %v9443_v9, 4 }
  0x80   : > { %1700 = vmatprep.mubr.bf16.mxu1 %v876_v37  ;;  %v9863_v30 = vsel %vm746_vm3, %v756_v10, %v758_v41  ;;  %v9866_v44 = vsel %vm746_vm3, %v758_v41, %v760_v49  ;;  %v768_v41 = vrot.slane %v9623_v62, 4  ;;  %v9884_v49 = vsel %vm746_vm3, %v762_v8, %v764_v51  ;;  %v9921_v62 = vld [vmem:[%s9372_s30 + $0xd8] sm:$0xff] }
  0x81   : > { %v9854_v28 = vsel %vm746_vm3, %v752_v47, %v754_v11  ;;  %v9860_v29 = vsel %vm746_vm3, %v754_v11, %v756_v10  ;;  %v766_v47 = vrot.slane %v9565_v23, 4  ;;  %v770_v11 = vrot.slane %v9626_v0, 4 }
  0x82   : > { %v774_v23 = vrot.slane %v9529_v63, 4  ;;  %v14204_v8 = vpack.c.bf16 %v9573_v25, %v9570_v24  ;;  %v9924_v24 = vld [vmem:[%s9372_s30 + $0xe0] sm:$0xff]  ;;  %v14205_v63 = vrot.slane %v9556_v20, 2  ;;  %v780_v10 = vrot.slane %v9556_v20, 4 }
  0x83   : > { %v9887_v19 = vsel %vm746_vm3, %v764_v51, %v766_v47  ;;  %v9897_v0 = vsel %vm746_vm3, %v766_v47, %v768_v41  ;;  %v9900_v52 = vsel %vm746_vm3, %v768_v41, %v770_v11  ;;  %v778_v51 = vrot.slane %v9538_v2, 4 }
  0x84   : > { %v9911_v59 = vsel %vm746_vm3, %v772_v5, %v774_v23  ;;  %v507_v47 = vrot.slane %v9714_v15, 1  ;;  %v602_v41 = vrot.slane %v9698_v16, 2  ;;  %v513_v25 = vrot.slane %v9963_v36, 1 }
  0x85   : > { %1508 = vmatmul.mubr.bf16.gmra.mxu0 %v873_v42  ;;  %v776_v42 = vrot.slane %v9535_v1, 4  ;;  %v14206_v1 = vrot.slane %v9538_v2, 2  ;;  %v9977_v37 = vsel %vm746_vm3, %v778_v51, %v780_v10 }
  0x86   : > { %1517 = vmatprep.mubr.bf16.mxu0 %v879_v55  ;;  %v9903_v55 = vsel %vm746_vm3, %v770_v11, %v772_v5  ;;  %v604_v11 = vrot.slane %v9714_v15, 2  ;;  %v884_v5 = vpack.c.bf16 %v9813_v18, %v9805_v58  ;;  %v494_v58 = vsel %vm455_vm0, %v491_v40, %v493_v50 }
  0x87   : > { %1701 = vmatmul.mubr.bf16.gmra.mxu1 %v875_v12  ;;  %v9914_v12 = vsel %vm746_vm3, %v774_v23, %v776_v42  ;;  %v9931_v23 = vsel %vm746_vm3, %v776_v42, %v778_v51  ;;  %v511_v18 = vrot.slane %v9924_v24, 1  ;;  %v14207_v42 = vrot.slane %v9576_v26, 2 }
  0x88   : > { %1710 = vmatprep.mubr.bf16.mxu1 %v14204_v8  ;;  %v880_v8 = vpack.c.bf16 %v9799_v61, %v9791_v31  ;;  %v496_v31 = vsel %vm455_vm0, %v493_v50, %v495_v4  ;;  %v509_v61 = vrot.slane %v9921_v62, 1  ;;  %v14208_v40 = vmov %v14205_v63 }
  0x89   : > { %v14209_v50 = vpack.c.bf16 %v9610_v54, %v9600_v43  ;;  %v889_v9 = vpack.c.bf16 %v496_v31, %v494_v58  ;;  %v14213_v31 = vpack.c.bf16 %v9650_v17, %v9647_v7  ;;  %v888_v7 = vpack.c.bf16 %v9603_v45, %v9576_v26 }
  0x8d   : > { %1518 = vmatmul.mubr.bf16.gmra.mxu0 %v878_v39  ;;  %v587_v39 = vsel %vm552_vm2, %v14206_v1, %v14205_v63  ;;  %v782_v63 = vrot.slane %v9576_v26, 4  ;;  %v883_v1 = vpack.c.bf16 %v9556_v20, %v9538_v2  ;;  %v14210_v2 = vrot.slane %v9617_v60, 1 }
  0x8e   : > { %1527 = vmatprep.mubr.bf16.mxu0 %v884_v5  ;;  %v589_v5 = vsel %vm552_vm2, %v14208_v40, %v14207_v42  ;;  %v606_v42 = vrot.slane %v9921_v62, 2  ;;  %v608_v40 = vrot.slane %v9924_v24, 2 }
  0x8f   : > { %1711 = vmatmul.mubr.bf16.gmra.mxu1 %v880_v8  ;;  %v9980_v43 = vsel %vm746_vm3, %v780_v10, %v782_v63  ;;  %v885_v54 = vpack.c.bf16 %v589_v5, %v587_v39  ;;  %v515_v8 = vrot.slane %v9785_v22, 1  ;;  %v498_v20 = vsel %vm455_vm0, %v495_v4, %v14210_v2 }
  0x90   : > { %1720 = vmatprep.mubr.bf16.mxu1 %v14209_v50  ;;  %v887_v50 = vpack.c.bf16 %v9980_v43, %v9977_v37  ;;  %v14211_v10 = vrot.slane %v9641_v14, 1  ;;  %v14212_v51 = vmov %v14210_v2  ;;  %v14214_v39 = vrot.slane %v9603_v45, 2 }
  0x91   : > { %v784_v2 = vrot.slane %v9603_v45, 4  ;;  %v14220_v45 = vrot.slane %v9667_v33, 1 }
  0x92   : > { %v500_v58 = vsel %vm455_vm0, %v14212_v51, %v14211_v10  ;;  %v14217_v4 = vmov %v14214_v39  ;;  %v786_v10 = vrot.slane %v9606_v48, 4 }
  0x93   : > { %v894_v17 = vpack.c.bf16 %v500_v58, %v498_v20  ;;  %v10014_v51 = vsel %vm746_vm3, %v782_v63, %v784_v2  ;;  %v14222_v58 = vld [vmem:[#allocation7_spill] sm:$0xff] }
  0x95   : > { %1528 = vmatmul.mubr.bf16.gmra.mxu0 %v883_v1  ;;  %v14216_v1 = vrot.slane %v9606_v48, 2 }
  0x96   : > { %1537 = vmatprep.mubr.bf16.mxu0 %v889_v9  ;;  %v14215_v9 = vrot.slane %v9576_v26, 2 }
  0x97   : > { %1721 = vmatmul.mubr.bf16.gmra.mxu1 %v885_v54  ;;  %v593_v54 = vsel %vm552_vm2, %v14217_v4, %v14216_v1  ;;  %v14218_v1 = vrot.slane %v9664_v32, 1  ;;  %v14219_v4 = vrot.slane %v9641_v14, 1 }
  0x98   : > { %1730 = vmatprep.mubr.bf16.mxu1 %v14213_v31  ;;  %v591_v5 = vsel %vm552_vm2, %v14215_v9, %v14214_v39  ;;  %v10017_v31 = vsel %vm746_vm3, %v784_v2, %v786_v10  ;;  %v14225_v2 = vrot.slane %v9606_v48, 2 }
  0x99   : > { %v890_v39 = vpack.c.bf16 %v593_v54, %v591_v5  ;;  %v892_v9 = vpack.c.bf16 %v10017_v31, %v10014_v51  ;;  %v502_v26 = vsel %vm455_vm0, %v14219_v4, %v14218_v1  ;;  %v14221_v63 = vmov %v14218_v1 }
  0x9a   : > { %v504_v20 = vsel %vm455_vm0, %v14221_v63, %v14220_v45  ;;  %v14223_v5 = vpack.c.bf16 %v9688_v3, %v14222_v58  ;;  %v14224_v54 = vrot.slane %v9617_v60, 2  ;;  %v788_v4 = vrot.slane %v9617_v60, 4 }
  0x9b   : > { %v790_v45 = vrot.slane %v9641_v14, 4  ;;  %v893_v3 = vpack.c.bf16 %v9617_v60, %v9606_v48  ;;  %v899_v63 = vpack.c.bf16 %v504_v20, %v502_v26  ;;  %v508_v60 = vsel %vm455_vm0, %v505_v27, %v507_v47  ;;  %v14230_v26 = vld [vmem:[#allocation8_spill] sm:$0xff] }
  0x9c   : > { %v10049_v58 = vsel %vm746_vm3, %v786_v10, %v788_v4  ;;  %v14229_v10 = vld [vmem:[#allocation9_spill] sm:$0xff] }
  0x9d   : > { %1538 = vmatmul.mubr.bf16.gmra.mxu0 %v888_v7  ;;  %v595_v7 = vsel %vm552_vm2, %v14225_v2, %v14224_v54  ;;  %v14231_v20 = vpack.c.bf16 %v14229_v10, %v14230_v26 }
  0x9e   : > { %1547 = vmatprep.mubr.bf16.mxu0 %v894_v17  ;;  %v14226_v17 = vrot.slane %v9641_v14, 2 }
  0x9f   : > { %1731 = vmatmul.mubr.bf16.gmra.mxu1 %v890_v39  ;;  %v14227_v39 = vmov %v14224_v54 }
  0xa0   : > { %1740 = vmatprep.mubr.bf16.mxu1 %v14223_v5  ;;  %v597_v1 = vsel %vm552_vm2, %v14227_v39, %v14226_v17  ;;  %v10052_v5 = vsel %vm746_vm3, %v788_v4, %v790_v45  ;;  %v14228_v17 = vrot.slane %v9667_v33, 1  ;;  %v14233_v39 = vrot.slane %v9641_v14, 2 }
  0xa1   : > { %v895_v54 = vpack.c.bf16 %v597_v1, %v595_v7  ;;  %v897_v2 = vpack.c.bf16 %v10052_v5, %v10049_v58  ;;  %v14232_v7 = vrot.slane %v9664_v32, 2  ;;  %v14234_v4 = vrot.slane %v9667_v33, 2  ;;  %v8727_v58 = vld [vmem:[%s14013_s3 + $0x74] ss:$8 sps:$4 sm:$0xff]  }
  0xa2   : > { %v506_v48 = vsel %vm455_vm0, %v14228_v17, %v505_v27  ;;  %v794_v27 = vrot.slane %v9667_v33, 4  ;;  %v898_v17 = vpack.c.bf16 %v9664_v32, %v9641_v14  ;;  %v510_v14 = vsel %vm455_vm0, %v507_v47, %v509_v61  ;;  %4536 = vmatprep.subr.bf16.mxu1 %v8727_v58 }
  0xa3   : > { %v599_v1 = vsel %vm552_vm2, %v14233_v39, %v14232_v7  ;;  %v904_v10 = vpack.c.bf16 %v508_v60, %v506_v48  ;;  %v14237_v48 = vmov %v14234_v4  ;;  %v605_v47 = vsel %vm552_vm2, %v602_v41, %v604_v11 }
  0xa4   : > { %v603_v60 = vsel %vm552_vm2, %v14237_v48, %v602_v41  ;;  %v517_v48 = vrot.slane %v9788_v6, 1 }
  0xa5   : > { %1548 = vmatmul.mubr.bf16.gmra.mxu0 %v893_v3  ;;  %v14235_v3 = vmov %v14232_v7 }
  0xa6   : > { %1557 = vmatprep.mubr.bf16.mxu0 %v899_v63  ;;  %v601_v63 = vsel %vm552_vm2, %v14235_v3, %v14234_v4  ;;  %v14239_v4 = vrot.slane %v9714_v15, 3 }
  0xa7   : > { %1741 = vmatmul.mubr.bf16.gmra.mxu1 %v895_v54  ;;  %v792_v54 = vrot.slane %v9664_v32, 4  ;;  %v900_v7 = vpack.c.bf16 %v601_v63, %v599_v1  ;;  %v512_v32 = vsel %vm455_vm0, %v509_v61, %v511_v18  ;;  %v707_v1 = vrot.slane %v9963_v36, 3 }
  0xa8   : > { %1750 = vmatprep.mubr.bf16.mxu1 %v14231_v20  ;;  %v610_v61 = vrot.slane %v9963_v36, 2  ;;  %v14240_v63 = vrot.slane %v9924_v24, 3  ;;  %v909_v41 = vpack.c.bf16 %v512_v32, %v510_v14  ;;  %v607_v14 = vsel %vm552_vm2, %v604_v11, %v606_v42 }
  0xa9   : > { %v10084_v26 = vsel %vm746_vm3, %v790_v45, %v792_v54  ;;  %v10089_v20 = vsel %vm746_vm3, %v792_v54, %v794_v27  ;;  %v14236_v45 = vpack.c.bf16 %v9743_v57, %v9736_v56  ;;  %v903_v56 = vpack.c.bf16 %v9698_v16, %v9667_v33  ;;  %v8730_v33 = vld [vmem:[%s14013_s3 + $0x64] ss:$8 sps:$4 sm:$0xff]  }
  0xaa   : > { %v902_v39 = vpack.c.bf16 %v10089_v20, %v10084_v26  ;;  %v14238_v57 = vrot.slane %v9921_v62, 3  ;;  %v514_v16 = vsel %vm455_vm0, %v511_v18, %v513_v25  ;;  %v609_v32 = vsel %vm552_vm2, %v606_v42, %v608_v40 }
  0xab   : > { %v612_v18 = vrot.slane %v9785_v22, 2  ;;  %v518_v42 = vsel %vm455_vm0, %v515_v8, %v517_v48  ;;  %v800_v26 = vrot.slane %v9921_v62, 4  ;;  %v802_v20 = vrot.slane %v9924_v24, 4 }
  0xac   : > { %v704_v3 = vsel %vm649_vm1, %v14239_v4, %v14238_v57  ;;  %v14241_v54 = vmov %v14238_v57  ;;  %v910_v4 = vpack.c.bf16 %v609_v32, %v607_v14  ;;  %v9125_v32 = vmov 0  }
  0xad   : > { %1558 = vmatmul.mubr.bf16.gmra.mxu0 %v898_v17  ;;  %v706_v17 = vsel %vm649_vm1, %v14241_v54, %v14240_v63  ;;  %v611_v54 = vsel %vm552_vm2, %v608_v40, %v610_v61  ;;  %v14246_v40 = vrot.slane %v9384_v46, 2 }
  0xae   : > { %1567 = vmatprep.mubr.bf16.mxu0 %v904_v10  ;;  %v905_v10 = vpack.c.bf16 %v605_v47, %v603_v60  ;;  %v14242_v60 = vmov %v14240_v63 }
  0xaf   : > { %1751 = vmatmul.mubr.bf16.gmra.mxu1 %v900_v7  ;;  %v911_v7 = vpack.c.bf16 %v706_v17, %v704_v3  ;;  %v708_v47 = vsel %vm649_vm1, %v14242_v60, %v707_v1  ;;  %v614_v17 = vrot.slane %v9788_v6, 2 }
  0xb0   : > { %1760 = vmatprep.mubr.bf16.mxu1 %v14236_v45  ;;  %v516_v45 = vsel %vm455_vm0, %v513_v25, %v515_v8  ;;  %v908_v25 = vpack.c.bf16 %v9921_v62, %v9714_v15  ;;  %v14244_v15 = vrot.slane %v9384_v46, 1  ;;  %v14245_v8 = vpack.c.bf16 %v9825_v21, %v9820_v13 }
  0xb1   : > { %v914_v57 = vpack.c.bf16 %v516_v45, %v514_v16  ;;  %v615_v16 = vsel %vm552_vm2, %v612_v18, %v614_v17  ;;  %v918_v45 = vpack.c.bf16 %v9788_v6, %v9785_v22  ;;  %v14248_v13 = vpack.c.bf16 %v9854_v28, %v9851_v35 }
  0xb2   : > { %v519_v63 = vsel %vm455_vm0, %v517_v48, %v14244_v15  ;;  %v14247_v48 = vpack.c.bf16 %v9843_v38, %v9838_v34  ;;  %v14250_v6 = vpack.c.bf16 %v9871_v53, %v9866_v44  ;;  %v14251_v21 = vpack.c.bf16 %v9887_v19, %v9884_v49 }
  0xb3   : > { %v14252_v28 = vpack.c.bf16 %v9900_v52, %v9897_v0  ;;  %v14253_v35 = vpack.c.bf16 %v9911_v59, %v9903_v55  ;;  %v14254_v34 = vpack.c.bf16 %v9931_v23, %v9914_v12 }
  0xb5   : > { %1568 = vmatmul.mubr.bf16.gmra.mxu0 %v903_v56  ;;  %v14243_v56 = vrot.slane %v9785_v22, 3  ;;  %v14249_v22 = vpack.c.bf16 %v9863_v30, %v9860_v29 }
  0xb6   : > { %1577 = vmatprep.mubr.bf16.mxu0 %v909_v41  ;;  %v913_v41 = vpack.c.bf16 %v9963_v36, %v9924_v24  ;;  %v803_v24 = vsel %vm746_vm3, %v800_v26, %v802_v20 }
  0xb7   : > { %1761 = vmatmul.mubr.bf16.gmra.mxu1 %v905_v10  ;;  %v710_v11 = vsel %vm649_vm1, %v707_v1, %v14243_v56  ;;  %v613_v1 = vsel %vm552_vm2, %v610_v61, %v612_v18  ;;  %v919_v10 = vpack.c.bf16 %v519_v63, %v518_v42  ;;  %v616_v61 = vsel %vm552_vm2, %v614_v17, %v14246_v40  ;;  %v8731_v40 = vld [vmem:[%s14013_s3 + $0x50] ss:$8 sps:$4 sm:$0xff]  }
  0xb8   : > { %1770 = vmatprep.mubr.bf16.mxu1 %v911_v7  ;;  %v916_v3 = vpack.c.bf16 %v710_v11, %v708_v47  ;;  %v915_v7 = vpack.c.bf16 %v613_v1, %v611_v54  ;;  %v920_v14 = vpack.c.bf16 %v616_v61, %v615_v16  ;;  %v8725_v47 = vld [vmem:[%s14013_s3 + $0x70] ss:$8 sps:$4 sm:$0xff]   ;;  %v8733_v61 = vld [vmem:[%s14013_s3 + $0x54] ss:$8 sps:$4 sm:$0xff]   ;;  %vm7692_vm1 = vcmask 80896  }
  0xb9   : > { %4537 = vmatpush1.bf16.msra.mxu1 %v8725_v47 }
  0xba   : > { %4538 = vmatprep.subr.bf16.mxu1 %v8730_v33  ;;  %v8737_v33 = vld [vmem:[%s14013_s3 + $0x30] ss:$8 sps:$4 sm:$0xff]  }
  0xbd   : > { %1578 = vmatmul.mubr.bf16.gmra.mxu0 %v908_v25  ;;  %v9060_v25 = vld [vmem:[%s9372_s30 + $0xd0] sm:$0xff] }
  0xbe   : > { %1587 = vmatprep.mubr.bf16.mxu0 %v914_v57  ;;  %v798_v60 = vrot.slane %v9060_v25, 4 }
  0xbf   : > { %1771 = vmatmul.mubr.bf16.gmra.mxu1 %v910_v4 }
  0xc0   : > { %1780 = vmatprep.mubr.bf16.mxu1 %v916_v3  ;;  %v801_v62 = vsel %vm746_vm3, %v798_v60, %v800_v26 }
  0xc5   : > { %1588 = vmatmul.mubr.bf16.gmra.mxu0 %v913_v41  ;;  %v912_v41 = vpack.c.bf16 %v803_v24, %v801_v62 }
  0xc6   : > { %1597 = vmatprep.mubr.bf16.mxu0 %v919_v10 }
  0xc7   : > { %1781 = vmatmul.mubr.bf16.gmra.mxu1 %v915_v7  ;;  %v804_v7 = vrot.slane %v9963_v36, 4 }
  0xc8   : > { %1790 = vmatprep.mubr.bf16.mxu1 %v14245_v8  ;;  %v9061_v8 = vld [vmem:[%s9372_s30 + $0xf0] sm:$0xff] }
  0xc9   : > { %v806_v16 = vrot.slane %v9061_v8, 4  ;;  %v805_v36 = vsel %vm746_vm3, %v802_v20, %v804_v7 }
  0xcd   : > { %1598 = vmatmul.mubr.bf16.gmra.mxu0 %v918_v45 }
  0xce   : > { %1833 = vmatprep.mubr.bf16.mxu0 %v9125_v32 }
  0xcf   : > { %1791 = vmatmul.mubr.bf16.gmra.mxu1 %v920_v14 }
  0xd5   : > { %1834 = vmatmul.mubr.bf16.vlgmr.msra.gmra.mxu0 %v14247_v48 }
  0xd6   : > { %1843 = vmatprep.mubr.bf16.mxu0 %v9125_v32 }
  0xdd   : > { %1844 = vmatmul.mubr.bf16.gmra.mxu0 %v14248_v13  ;;  %v807_v13 = vsel %vm746_vm3, %v804_v7, %v806_v16 }
  0xde   : > { %1853 = vmatprep.mubr.bf16.mxu0 %v9125_v32 }
  0xe5   : > { %1854 = vmatmul.mubr.bf16.gmra.mxu0 %v14249_v22 }
  0xe6   : > { %1863 = vmatprep.mubr.bf16.mxu0 %v9125_v32 }
  0xed   : > { %1864 = vmatmul.mubr.bf16.gmra.mxu0 %v14250_v6 }
  0xee   : > { %1873 = vmatprep.mubr.bf16.mxu0 %v9125_v32 }
  0xf5   : > { %1874 = vmatmul.mubr.bf16.gmra.mxu0 %v14251_v21  ;;  %v917_v21 = vpack.c.bf16 %v807_v13, %v805_v36 }
  0xf6   : > { %1883 = vmatprep.mubr.bf16.mxu0 %v9125_v32 }
  0xfd   : > { %1884 = vmatmul.mubr.bf16.gmra.mxu0 %v14252_v28 }
  0xfe   : > { %1893 = vmatprep.mubr.bf16.mxu0 %v9125_v32 }
 0x105   : > { %1894 = vmatmul.mubr.bf16.gmra.mxu0 %v14253_v35  ;;  %v9062_v35 = vld [vmem:[%s9372_s30 + $0xf8] sm:$0xff] }
 0x106   : > { %1903 = vmatprep.mubr.bf16.mxu0 %v9125_v32 }
 0x10d   : > { %1904 = vmatmul.mubr.bf16.gmra.mxu0 %v14254_v34  ;;  %v808_v34 = vrot.slane %v9062_v35, 4 }
 0x10e   : > { %1913 = vmatprep.mubr.bf16.mxu0 %v9125_v32 }
 0x10f   : > { %v809_v58 = vsel %vm746_vm3, %v806_v16, %v808_v34  ;;  %v8740_v16 = vld [vmem:[%s14013_s3 + $0x20] ss:$8 sps:$4 sm:$0xff]  }
 0x115   : > { %v10215_v38 = vpop.f32.mrf.mxu0  ;;  %1914 = vmatmul.mubr.bf16.gmra.mxu0 %v887_v50 }
 0x116   : > { %1923 = vmatprep.mubr.bf16.mxu0 %v9125_v32 }
 0x117   : > { %v10221_v29 = vpop.f32.mrf.mxu0  ;;  %v10223_v30 = vpop.f32.mrf.mxu1 }
 0x119   : > { %v10225_v44 = vpop.f32.mrf.mxu0  ;;  %v10227_v53 = vpop.f32.mrf.mxu1 }
 0x11b   : > { %v10229_v49 = vpop.f32.mrf.mxu0  ;;  %v10231_v19 = vpop.f32.mrf.mxu1 }
 0x11d   : > { %v10233_v0 = vpop.f32.mrf.mxu0  ;;  %1924 = vmatmul.mubr.bf16.gmra.mxu0 %v892_v9  ;;  %v10238_v37 = vpop.f32.mrf.mxu1  ;;  %v9059_v9 = vld [vmem:[%s9372_s30 + $0xc8] sm:$0xff]  ;;  %s7695_s30 = scalar_lea.sflag [#allocation3], %s380_s15 }
 0x11e   : > { %1933 = vmatprep.mubr.bf16.mxu0 %v9125_v32  ;;  %v796_v18 = vrot.slane %v9059_v9, 4  ;;  %v8734_v9 = vld [vmem:[%s14013_s3 + $0x40] ss:$8 sps:$4 sm:$0xff]  }
 0x11f   : > { %v10241_v52 = vpop.f32.mrf.mxu0  ;;  %v10245_v59 = vpop.f32.mrf.mxu1 }
 0x120   : > { %v797_v11 = vsel %vm746_vm3, %v794_v27, %v796_v18  ;;  %v799_v57 = vsel %vm746_vm3, %v796_v18, %v798_v60  ;;  %v8736_v18 = vld [vmem:[%s14013_s3 + $0x44] ss:$8 sps:$4 sm:$0xff]  }
 0x121   : > { %v10243_v55 = vpop.f32.mrf.mxu0  ;;  %v10254_v43 = vpop.f32.mrf.mxu1  ;;  %v907_v42 = vpack.c.bf16 %v799_v57, %v797_v11  ;;  %v14255_v11 = vrot.slane %v9384_v46, 4 }
 0x123   : > { %v10247_v12 = vpop.f32.mrf.mxu0  ;;  %v10261_v31 = vpop.f32.mrf.mxu1  ;;  %v810_v57 = vsel %vm746_vm3, %v808_v34, %v14255_v11 }
 0x124   : > { %v922_v20 = vpack.c.bf16 %v810_v57, %v809_v58 }
 0x125   : > { %v10249_v23 = vpop.f32.mrf.mxu0  ;;  %1934 = vmatmul.mubr.bf16.gmra.mxu0 %v897_v2  ;;  %v10278_v56 = vpop.f32.mrf.mxu1 }
 0x126   : > { %1943 = vmatprep.mubr.bf16.mxu0 %v9125_v32 }
 0x127   : > { %v10257_v50 = vpop.f32.mrf.mxu0  ;;  %v10289_v15 = vpop.f32.mrf.mxu1 }
 0x129   : > { %v10259_v51 = vpop.f32.mrf.mxu0  ;;  %v10303_v54 = vpop.f32.mrf.mxu1 }
 0x12b   : > { %v10271_v5 = vpop.f32.mrf.mxu0  ;;  %v10312_v10 = vpop.f32.mrf.mxu1 }
 0x12d   : > { %v10273_v2 = vpop.f32.mrf.mxu0  ;;  %1944 = vmatmul.mubr.bf16.gmra.mxu0 %v902_v39  ;;  %v8728_v39 = vld [vmem:[%s14013_s3 + $0x60] ss:$8 sps:$4 sm:$0xff]   ;;  %v10326_v48 = vpop.f32.mrf.mxu1 }
 0x12e   : > { %1953 = vmatprep.mubr.bf16.mxu0 %v9125_v32  ;;  %4539 = vmatpush1.bf16.msra.mxu1 %v8728_v39 }
 0x12f   : > { %v10285_v4 = vpop.f32.mrf.mxu0  ;;  %4540 = vmatprep.subr.bf16.mxu1 %v8733_v61  ;;  %v10335_v28 = vpop.f32.mrf.mxu1 }
 0x131   : > { %v10287_v3 = vpop.f32.mrf.mxu0  ;;  %v10348_v47 = vpop.f32.mrf.mxu1 }
 0x132   : > { %4541 = vmatpush1.bf16.msra.mxu1 %v8731_v40  ;;  %v8742_v40 = vld [vmem:[%s14013_s3 + $0x24] ss:$8 sps:$4 sm:$0xff]  }
 0x133   : > { %v10299_v27 = vpop.f32.mrf.mxu0  ;;  %4542 = vmatprep.subr.bf16.mxu1 %v8736_v18  ;;  %v10359_v39 = vpop.f32.mrf.mxu1  ;;  %v8745_v18 = vld [vmem:[%s14013_s3 + $0x14] ss:$8 sps:$4 sm:$0xff]  }
 0x135   : > { %v10301_v63 = vpop.f32.mrf.mxu0  ;;  %1954 = vmatmul.mubr.bf16.gmra.mxu0 %v907_v42  ;;  %v10371_v24 = vpop.f32.mrf.mxu1 }
 0x136   : > { %1963 = vmatprep.mubr.bf16.mxu0 %v9125_v32  ;;  %4543 = vmatpush1.bf16.msra.mxu1 %v8734_v9  ;;  %v8743_v9 = vld [vmem:[%s14013_s3 + $0x10] ss:$8 sps:$4 sm:$0xff]  }
 0x137   : > { %v10308_v1 = vpop.f32.mrf.mxu0  ;;  %v10377_v8 = vpop.f32.mrf.mxu1 }
 0x139   : > { %v10310_v17 = vpop.f32.mrf.mxu0  ;;  %v10389_v13 = vpop.f32.mrf.mxu1 }
 0x13b   : > { %v10322_v45 = vpop.f32.mrf.mxu0  ;;  %v10395_v34 = vpop.f32.mrf.mxu1 }
 0x13d   : > { %v10324_v14 = vpop.f32.mrf.mxu0  ;;  %1964 = vmatmul.mubr.bf16.gmra.mxu0 %v912_v41  ;;  %v10407_v57 = vpop.f32.mrf.mxu1 }
 0x13e   : > { %1973 = vmatprep.mubr.bf16.mxu0 %v9125_v32 }
 0x13f   : > { %v10331_v22 = vpop.f32.mrf.mxu0 }
 0x141   : > { %v10333_v6 = vpop.f32.mrf.mxu0 }
 0x143   : > { %v10344_v25 = vpop.f32.mrf.mxu0 }
 0x145   : > { %v10346_v60 = vpop.f32.mrf.mxu0  ;;  %1974 = vmatmul.mubr.bf16.gmra.mxu0 %v917_v21 }
 0x146   : > { %1983 = vmatprep.mubr.bf16.mxu0 %v9125_v32  ;;  %v8739_v32 = vld [vmem:[%s14013_s3 + $0x34] ss:$8 sps:$4 sm:$0xff]  }
 0x147   : > { %v10355_v42 = vpop.f32.mrf.mxu0  ;;  %4544 = vmatprep.subr.bf16.mxu1 %v8739_v32  ;;  %v10413_v32 = vpop.f32.mrf.mxu1 }
 0x148   : > { %4545 = vmatpush1.bf16.msra.mxu1 %v8737_v33 }
 0x149   : > { %v10357_v26 = vpop.f32.mrf.mxu0  ;;  %4546 = vmatprep.subr.bf16.mxu1 %v8742_v40  ;;  %v8748_v40 = vld [vmem:[%s14013_s3 + $0x4] ss:$8 sps:$4 sm:$0xff]  }
 0x14a   : > { %14256 = vst [vmem:[#allocation7_spill] sm:$0xff] %v10357_v26 }
 0x14b   : > { %v10367_v62 = vpop.f32.mrf.mxu0 }
 0x14c   : > { %14257 = vst [vmem:[#allocation9_spill] sm:$0xff] %v10367_v62  ;;  %4547 = vmatpush1.bf16.msra.mxu1 %v8740_v16  ;;  %v8746_v16 = vld [vmem:[%s14013_s3] ss:$8 sps:$4 sm:$0xff]  }
 0x14d   : > { %v10369_v46 = vpop.f32.mrf.mxu0  ;;  %1984 = vmatmul.mubr.bf16.gmra.mxu0 %v922_v20  ;;  %4548 = vmatprep.subr.bf16.mxu1 %v8745_v18 }
 0x14e   : > { %14258 = vst [vmem:[#allocation8_spill] sm:$0xff] %v10369_v46 }
 0x14f   : > { %v10373_v41 = vpop.f32.mrf.mxu0 }
 0x150   : > { %14259 = vst [vmem:[#allocation10_spill] sm:$0xff] %v10373_v41  ;;  %4549 = vmatpush1.bf16.msra.mxu1 %v8743_v9 }
 0x151   : > { %v10375_v7 = vpop.f32.mrf.mxu0  ;;  %4550 = vmatprep.subr.bf16.mxu1 %v8748_v40 }
 0x152   : > { %14260 = vst [vmem:[#allocation11_spill] sm:$0xff] %v10375_v7 }
 0x153   : > { %v10385_v61 = vpop.f32.mrf.mxu0 }
 0x154   : > { %14261 = vst [vmem:[#allocation12_spill] sm:$0xff] %v10385_v61  ;;  %4551 = vmatpush1.bf16.msra.mxu1 %v8746_v16  ;;  %v8754_v16 = vld [vmem:[%s14013_s3 + $0x174] ss:$8 sps:$4 sm:$0xff]  }
 0x155   : > { %v10387_v36 = vpop.f32.mrf.mxu0  ;;  %4729 = vmatprep.subr.bf16.mxu0 %v8754_v16 }
 0x156   : > { %14262 = vst [vmem:[#allocation13_spill] sm:$0xff] %v10387_v36 }
 0x157   : > { %v10391_v21 = vpop.f32.mrf.mxu0 }
 0x158   : > { %14263 = vst [vmem:[#allocation14_spill] sm:$0xff] %v10391_v21 }
 0x159   : > { %v10393_v35 = vpop.f32.mrf.mxu0 }
 0x15a   : > { %14264 = vst [vmem:[#allocation15_spill] sm:$0xff] %v10393_v35  ;;  %v8749_v35 = vld [vmem:[%s14013_s3 + $0xf0] ss:$8 sps:$4 sm:$0xff]  }
 0x15b   : > { %v10403_v58 = vpop.f32.mrf.mxu0 }
 0x15c   : > { %14265 = vst [vmem:[#allocation16_spill] sm:$0xff] %v10403_v58 }
 0x15d   : > { %v10405_v11 = vpop.f32.mrf.mxu0 }
 0x15e   : > { %14266 = vst [vmem:[#allocation17_spill] sm:$0xff] %v10405_v11  ;;  %v10425_v11 = vpop.f32.mrf.mxu1 }
 0x15f   : > { %v10409_v20 = vpop.f32.mrf.mxu0 }
 0x160   : > { %14267 = vst [vmem:[#allocation18_spill] sm:$0xff] %v10409_v20  ;;  %v10431_v58 = vpop.f32.mrf.mxu1 }
 0x161   : > { %v10411_v33 = vpop.f32.mrf.mxu0 }
 0x162   : > { %14268 = vst [vmem:[#allocation19_spill] sm:$0xff] %v10411_v33 }
 0x163   : > { %v10421_v18 = vpop.f32.mrf.mxu0 }
 0x164   : > { %14269 = vst [vmem:[#allocation20_spill] sm:$0xff] %v10421_v18  ;;  %v8751_v18 = vld [vmem:[%s14013_s3 + $0xf4] ss:$8 sps:$4 sm:$0xff]  }
 0x165   : > { %v10423_v9 = vpop.f32.mrf.mxu0  ;;  %4552 = vmatprep.subr.bf16.mxu1 %v8751_v18  ;;  %v8758_v18 = vld [vmem:[%s14013_s3 + $0x160] ss:$8 sps:$4 sm:$0xff]  }
 0x166   : > { %14270 = vst [vmem:[#allocation21_spill] sm:$0xff] %v10423_v9  ;;  %4553 = vmatpush2.bf16.msra.mxu1 %v8749_v35  ;;  %v10449_v9 = vpop.f32.mrf.mxu1  ;;  %v8755_v35 = vld [vmem:[%s14013_s3 + $0xe0] ss:$8 sps:$4 sm:$0xff]  }
 0x167   : > { %v10427_v20 = vpop.f32.mrf.mxu0 }
 0x168   : > { %14271 = vst [vmem:[#allocation22_spill] sm:$0xff] %v10427_v20  ;;  %v10461_v61 = vpop.f32.mrf.mxu1 }
 0x169   : > { %v10429_v33 = vpop.f32.mrf.mxu0 }
 0x16a   : > { %14272 = vst [vmem:[#allocation23_spill] sm:$0xff] %v10429_v33  ;;  %v8752_v33 = vld [vmem:[%s14013_s3 + $0x170] ss:$8 sps:$4 sm:$0xff]  }
 0x16b   : > { %v10439_v40 = vpop.f32.mrf.mxu0  ;;  %4730 = vmatpush1.bf16.msra.mxu0 %v8752_v33  ;;  %v8757_v33 = vld [vmem:[%s14013_s3 + $0xe4] ss:$8 sps:$4 sm:$0xff]  }
 0x16c   : > { %14273 = vst [vmem:[#allocation24_spill] sm:$0xff] %v10439_v40  ;;  %v8760_v40 = vld [vmem:[%s14013_s3 + $0x164] ss:$8 sps:$4 sm:$0xff]   ;;  %4554 = vmatprep.subr.bf16.mxu1 %v8757_v33  ;;  %v8767_v33 = vld [vmem:[%s14013_s3 + $0x140] ss:$8 sps:$4 sm:$0xff]  }
 0x16d   : > { %v10447_v20 = vpop.f32.mrf.mxu0  ;;  %4731 = vmatprep.subr.bf16.mxu0 %v8760_v40  ;;  %v8761_v40 = vld [vmem:[%s14013_s3 + $0x150] ss:$8 sps:$4 sm:$0xff]   ;;  %4555 = vmatpush2.bf16.msra.mxu1 %v8755_v35  ;;  %v8766_v35 = vld [vmem:[%s14013_s3 + $0xd4] ss:$8 sps:$4 sm:$0xff]  }
 0x16e   : > { %14274 = vst [vmem:[#allocation25_spill] sm:$0xff] %v10447_v20  ;;  %v10479_v20 = vpop.f32.mrf.mxu1  ;;  %4556 = vmatprep.subr.bf16.mxu1 %v8766_v35  ;;  %v8776_v35 = vld [vmem:[%s14013_s3 + $0x120] ss:$8 sps:$4 sm:$0xff]  }
 0x16f   : > { %v10451_v21 = vpop.f32.mrf.mxu0  ;;  %4732 = vmatpush1.bf16.msra.mxu0 %v8758_v18  ;;  %14279 = vst [vmem:[#allocation30_spill] sm:$0xff] %v10479_v20  ;;  %v8769_v18 = vld [vmem:[%s14013_s3 + $0x144] ss:$8 sps:$4 sm:$0xff]  }
 0x170   : > { %14275 = vst [vmem:[#allocation26_spill] sm:$0xff] %v10451_v21  ;;  %v8763_v21 = vld [vmem:[%s14013_s3 + $0x154] ss:$8 sps:$4 sm:$0xff]   ;;  %v10491_v41 = vpop.f32.mrf.mxu1 }
 0x171   : > { %v10459_v36 = vpop.f32.mrf.mxu0  ;;  %4733 = vmatprep.subr.bf16.mxu0 %v8763_v21  ;;  %14282 = vst [vmem:[#allocation33_spill] sm:$0xff] %v10491_v41  ;;  %v8764_v21 = vld [vmem:[%s14013_s3 + $0xd0] ss:$8 sps:$4 sm:$0xff]  }
 0x172   : > { %14276 = vst [vmem:[#allocation27_spill] sm:$0xff] %v10459_v36  ;;  %4557 = vmatpush2.bf16.msra.mxu1 %v8764_v21  ;;  %v8775_v21 = vld [vmem:[%s14013_s3 + $0xc4] ss:$8 sps:$4 sm:$0xff]  }
 0x173   : > { %v10469_v16 = vpop.f32.mrf.mxu0  ;;  %4734 = vmatpush1.bf16.msra.mxu0 %v8761_v40  ;;  %4558 = vmatprep.subr.bf16.mxu1 %v8775_v21  ;;  %v8785_v21 = vld [vmem:[%s14013_s3 + $0x100] ss:$8 sps:$4 sm:$0xff]  }
 0x174   : > { %14277 = vst [vmem:[#allocation28_spill] sm:$0xff] %v10469_v16  ;;  %4735 = vmatprep.subr.bf16.mxu0 %v8769_v18  ;;  %v8770_v18 = vld [vmem:[%s14013_s3 + $0x130] ss:$8 sps:$4 sm:$0xff]  }
 0x175   : > { %v10477_v36 = vpop.f32.mrf.mxu0 }
 0x176   : > { %14278 = vst [vmem:[#allocation29_spill] sm:$0xff] %v10477_v36  ;;  %v10509_v36 = vpop.f32.mrf.mxu1 }
 0x177   : > { %v10481_v7 = vpop.f32.mrf.mxu0  ;;  %4736 = vmatpush1.bf16.msra.mxu0 %v8767_v33  ;;  %14285 = vst [vmem:[#allocation36_spill] sm:$0xff] %v10509_v36  ;;  %v8778_v33 = vld [vmem:[%s14013_s3 + $0x124] ss:$8 sps:$4 sm:$0xff]  }
 0x178   : > { %14280 = vst [vmem:[#allocation31_spill] sm:$0xff] %v10481_v7  ;;  %v8772_v7 = vld [vmem:[%s14013_s3 + $0x134] ss:$8 sps:$4 sm:$0xff]  }
 0x179   : > { %v10489_v16 = vpop.f32.mrf.mxu0  ;;  %4737 = vmatprep.subr.bf16.mxu0 %v8772_v7  ;;  %v8773_v7 = vld [vmem:[%s14013_s3 + $0xc0] ss:$8 sps:$4 sm:$0xff]  }
 0x17a   : > { %14281 = vst [vmem:[#allocation32_spill] sm:$0xff] %v10489_v16  ;;  %4559 = vmatpush2.bf16.msra.mxu1 %v8773_v7  ;;  %v1003_v7 = vld [vmem:[%s14012_s2] sm:$0x3] }
 0x17b   : > { %v10499_v40 = vpop.f32.mrf.mxu0  ;;  %4738 = vmatpush1.bf16.msra.mxu0 %v8770_v18 }
 0x17c   : > { %14283 = vst [vmem:[#allocation34_spill] sm:$0xff] %v10499_v40  ;;  %v1005_v40 = vlaneseq  ;;  %4739 = vmatprep.subr.bf16.mxu0 %v8778_v33  ;;  %v8779_v33 = vld [vmem:[%s14013_s3 + $0x110] ss:$8 sps:$4 sm:$0xff]  }
 0x17d   : > { %v10507_v16 = vpop.f32.mrf.mxu0 }
 0x17e   : > { %14284 = vst [vmem:[#allocation35_spill] sm:$0xff] %v10507_v16  ;;  %v10521_v16 = vpop.f32.mrf.mxu1  ;;  %v10534_v36 = vshrl.u32 %v1005_v40, 7  ;;  %v8784_v40 = vld [vmem:[%s14013_s3 + $0xb4] ss:$8 sps:$4 sm:$0xff]  }
 0x17f   : > { %v10511_v46 = vpop.f32.mrf.mxu0  ;;  %14288 = vst [vmem:[#allocation39_spill] sm:$0xff] %v10521_v16  ;;  %4740 = vmatpush1.bf16.msra.mxu0 %v8776_v35  ;;  %4560 = vmatprep.subr.bf16.mxu1 %v8784_v40  ;;  %v8796_v40 = vld [vmem:[%s14013_s3 + $0x1e4] ss:$8 sps:$4 sm:$0xff]  }
 0x180   : > { %14286 = vst [vmem:[#allocation37_spill] sm:$0xff] %v10511_v46  ;;  %v8781_v46 = vld [vmem:[%s14013_s3 + $0x114] ss:$8 sps:$4 sm:$0xff]   ;;  %14290 = vst [vmem:[#allocation41_spill] sm:$0xff] %v10534_v36  ;;  %v10541_v16 = vpop.f32.mrf.mxu1 }
 0x181   : > { %v10519_v41 = vpop.f32.mrf.mxu0  ;;  %4741 = vmatprep.subr.bf16.mxu0 %v8781_v46  ;;  %14292 = vst [vmem:[#allocation43_spill] sm:$0xff] %v10541_v16 }
 0x182   : > { %14287 = vst [vmem:[#allocation38_spill] sm:$0xff] %v10519_v41 }
 0x183   : > { %v10529_v18 = vpop.f32.mrf.mxu0  ;;  %4742 = vmatpush1.bf16.msra.mxu0 %v8779_v33 }
 0x184   : > { %14289 = vst [vmem:[#allocation40_spill] sm:$0xff] %v10529_v18  ;;  %v8787_v18 = vld [vmem:[%s14013_s3 + $0x104] ss:$8 sps:$4 sm:$0xff]  }
 0x185   : > { %v10539_v41 = vpop.f32.mrf.mxu0  ;;  %4743 = vmatprep.subr.bf16.mxu0 %v8787_v18  ;;  %v14297_v18 = vsub.s32 0, %v10534_v36 }
 0x186   : > { %14291 = vst [vmem:[#allocation42_spill] sm:$0xff] %v10539_v41  ;;  %v8782_v41 = vld [vmem:[%s14013_s3 + $0xb0] ss:$8 sps:$4 sm:$0xff]  }
 0x187   : > { %v10543_v35 = vpop.f32.mrf.mxu0  ;;  %4744 = vmatpush1.bf16.msra.mxu0 %v8785_v21  ;;  %v10573_v33 = vrot.slane %v1003_v7, %v14297_v18  ;;  %4561 = vmatpush2.bf16.msra.mxu1 %v8782_v41  ;;  %v14299_v21 = vsub.s32 1, %v10534_v36  ;;  %v8794_v41 = vld [vmem:[%s14013_s3 + $0x1e0] ss:$8 sps:$4 sm:$0xff]  }
 0x188   : > { %14293 = vst [vmem:[#allocation44_spill] sm:$0xff] %v10543_v35  ;;  %v10558_v35 = vpop.f32.mrf.mxu1 }
 0x189   : > { %v10555_v46 = vpop.f32.mrf.mxu0  ;;  %14295 = vst [vmem:[#allocation46_spill] sm:$0xff] %v10558_v35  ;;  %v8788_v35 = vld [vmem:[%s14013_s3 + $0x1f0] ss:$8 sps:$4 sm:$0xff]   ;;  %v1450_v18 = vadd.f32 %v10215_v38, %v10573_v33  ;;  %v8793_v38 = vld [vmem:[%s14013_s3 + $0xa4] ss:$8 sps:$4 sm:$0xff]  }
 0x18a   : > { %14294 = vst [vmem:[#allocation45_spill] sm:$0xff] %v10555_v46  ;;  %v8790_v46 = vld [vmem:[%s14013_s3 + $0x1f4] ss:$8 sps:$4 sm:$0xff]   ;;  %v10584_v20 = vpop.f32.mrf.mxu1  ;;  %4562 = vmatprep.subr.bf16.mxu1 %v8793_v38 }
 0x18b   : > { %v10566_v16 = vpop.f32.mrf.mxu0  ;;  %4745 = vmatprep.subr.bf16.mxu0 %v8790_v46  ;;  %14300 = vst [vmem:[#allocation49_spill] sm:$0xff] %v10584_v20 }
 0x18c   : > { %14296 = vst [vmem:[#allocation47_spill] sm:$0xff] %v10566_v16  ;;  %v10582_v16 = vrot.slane %v1003_v7, %v14299_v21  ;;  %4746 = vmatpush2.bf16.msra.mxu0 %v8788_v35  ;;  %v10600_v35 = vpop.f32.mrf.mxu1  ;;  %v8791_v21 = vld [vmem:[%s14013_s3 + $0xa0] ss:$8 sps:$4 sm:$0xff]  }
 0x18d   : > { %v10578_v62 = vpop.f32.mrf.mxu0  ;;  %4747 = vmatprep.subr.bf16.mxu0 %v8796_v40  ;;  %14303 = vst [vmem:[#allocation52_spill] sm:$0xff] %v10600_v35  ;;  %v8799_v40 = vld [vmem:[%s14013_s3 + $0x1d4] ss:$8 sps:$4 sm:$0xff]   ;;  %4563 = vmatpush2.bf16.msra.mxu1 %v8791_v21  ;;  %v1460_v21 = vadd.f32 %v10233_v0, %v10573_v33 }
 0x18e   : > { %14298 = vst [vmem:[#allocation48_spill] sm:$0xff] %v10578_v62  ;;  %v1452_v7 = vadd.f32 %v10221_v29, %v10582_v16  ;;  %v1454_v29 = vadd.f32 %v10225_v44, %v10573_v33  ;;  %v10622_v35 = vpop.f32.mrf.mxu1  ;;  %v8805_v44 = vld [vmem:[%s14013_s3 + $0x1c4] ss:$8 sps:$4 sm:$0xff]  }
 0x18f   : > { %v10586_v26 = vpop.f32.mrf.mxu0 }
 0x190   : > { %14301 = vst [vmem:[#allocation50_spill] sm:$0xff] %v10586_v26  ;;  %4748 = vmatpush2.bf16.msra.mxu0 %v8794_v41  ;;  %v8797_v26 = vld [vmem:[%s14013_s3 + $0x1d0] ss:$8 sps:$4 sm:$0xff]   ;;  %v1645_v41 = vadd.f32 %v10227_v53, %v1452_v7  ;;  %v8803_v53 = vld [vmem:[%s14013_s3 + $0x1c0] ss:$8 sps:$4 sm:$0xff]  }
 0x191   : > { %v10596_v46 = vpop.f32.mrf.mxu0  ;;  %4749 = vmatprep.subr.bf16.mxu0 %v8799_v40 }
 0x192   : > { %14302 = vst [vmem:[#allocation51_spill] sm:$0xff] %v10596_v46  ;;  %v1643_v46 = vadd.f32 %v10223_v30, %v1450_v18  ;;  %v1647_v18 = vadd.f32 %v10231_v19, %v1454_v29  ;;  %v1464_v19 = vadd.f32 %v10243_v55, %v10573_v33  ;;  %v8806_v55 = vld [vmem:[%s14013_s3 + $0x1b0] ss:$8 sps:$4 sm:$0xff]  }
 0x193   : > { %v10608_v36 = vpop.f32.mrf.mxu0 }
 0x194   : > { %14304 = vst [vmem:[#allocation53_spill] sm:$0xff] %v10608_v36  ;;  %v1456_v36 = vadd.f32 %v10229_v49, %v10582_v16  ;;  %4750 = vmatpush2.bf16.msra.mxu0 %v8797_v26  ;;  %v1462_v49 = vadd.f32 %v10241_v52, %v10582_v16  ;;  %v8802_v52 = vld [vmem:[%s14013_s3 + $0x94] ss:$8 sps:$4 sm:$0xff]  }
 0x195   : > { %v1835_v62 = vpop.f32.mrf.mxu0  ;;  %4751 = vmatprep.subr.bf16.mxu0 %v8805_v44  ;;  %4564 = vmatprep.subr.bf16.mxu1 %v8802_v52 }
 0x196   : > { %v1836_v20 = vadd.f32 %v1835_v62, %v1643_v46  ;;  %v1649_v26 = vadd.f32 %v10238_v37, %v1456_v36  ;;  %v10636_v46 = vpop.f32.mrf.mxu1  ;;  %v1653_v37 = vadd.f32 %v10245_v59, %v1460_v21  ;;  %v1655_v44 = vadd.f32 %v10254_v43, %v1462_v49 }
 0x197   : > { %v1837_v30 = vpop.f32.mrf.mxu0  ;;  %v1470_v43 = vadd.f32 %v10249_v23, %v10573_v33  ;;  %v8811_v23 = vld [vmem:[%s14013_s3 + $0x84] ss:$8 sps:$4 sm:$0xff]  }
 0x198   : > { %v1838_v38 = vadd.f32 %v1837_v30, %v1645_v41  ;;  %v1994_v7 = vmax.f32 %v1836_v20, 0.0  ;;  %4752 = vmatpush2.bf16.msra.mxu0 %v8803_v53  ;;  %v8800_v41 = vld [vmem:[%s14013_s3 + $0x90] ss:$8 sps:$4 sm:$0xff]   ;;  %v8808_v30 = vld [vmem:[%s14013_s3 + $0x1b4] ss:$8 sps:$4 sm:$0xff]   ;;  %v10661_v59 = vpop.f32.mrf.mxu1 }
 0x199   : > { %v1839_v62 = vpop.f32.mrf.mxu0  ;;  %14305 = vst [vmem:[#allocation54_spill] sm:$0xff] %v10661_v59  ;;  %4565 = vmatpush2.bf16.msra.mxu1 %v8800_v41  ;;  %4753 = vmatprep.subr.bf16.mxu0 %v8808_v30 }
 0x19a   : > { %v10638_v40 = vadd.f32 %v1839_v62, %v1647_v18  ;;  %v1995_v0 = vmax.f32 %v1838_v38, 0.0  ;;  %v1466_v18 = vadd.f32 %v10247_v12, %v10582_v16  ;;  %v10663_v21 = vrot.slane %v1994_v7, 1  ;;  %4566 = vmatprep.subr.bf16.mxu1 %v8811_v23 }
 0x19b   : > { %v1841_v29 = vpop.f32.mrf.mxu0 }
 0x19c   : > { %v1996_v36 = vmax.f32 %v10638_v40, 0.0  ;;  %v10650_v20 = vadd.f32 %v1841_v29, %v1649_v26  ;;  %14306 = vst [vmem:[#allocation55_spill] sm:$0xff] %v10663_v21  ;;  %v1657_v40 = vadd.f32 %v10261_v31, %v1464_v19  ;;  %v10671_v49 = vrot.slane %v1995_v0, 1  ;;  %4754 = vmatpush2.bf16.msra.mxu0 %v8806_v55  ;;  %v8814_v29 = vld [vmem:[%s14013_s3 + $0x1a4] ss:$8 sps:$4 sm:$0xff]  }
 0x19d   : > { %v1845_v38 = vpop.f32.mrf.mxu0  ;;  %v8812_v31 = vld [vmem:[%s14013_s3 + $0x1a0] ss:$8 sps:$4 sm:$0xff]   ;;  %v1659_v19 = vadd.f32 %v10278_v56, %v1466_v18  ;;  %v1472_v55 = vadd.f32 %v10257_v50, %v10582_v16  ;;  %4755 = vmatprep.subr.bf16.mxu0 %v8814_v29  ;;  %v1663_v50 = vadd.f32 %v10289_v15, %v1470_v43  ;;  %v8817_v29 = vld [vmem:[%s14013_s3 + $0x194] ss:$8 sps:$4 sm:$0xff]  }
 0x19e   : > { %v2123_v53 = vrot.slane %v1996_v36, 1  ;;  %v1997_v62 = vmax.f32 %v10650_v20, 0.0  ;;  %v10666_v26 = vadd.f32 %v1845_v38, %v1653_v37 }
 0x19f   : > { %v1847_v12 = vpop.f32.mrf.mxu0  ;;  %v1665_v15 = vadd.f32 %v10303_v54, %v1472_v55 }
 0x1a0   : > { %v2126_v52 = vrot.slane %v1997_v62, 1  ;;  %v1998_v20 = vmax.f32 %v10666_v26, 0.0  ;;  %v10677_v37 = vadd.f32 %v1847_v12, %v1655_v44  ;;  %v2124_v41 = vsel %vm455_vm0, %v10663_v21, %v2123_v53  ;;  %v8809_v44 = vld [vmem:[%s14013_s3 + $0x80] ss:$8 sps:$4 sm:$0xff]   ;;  %v10695_v26 = vpop.f32.mrf.mxu1  ;;  %4756 = vmatpush2.bf16.msra.mxu0 %v8812_v31 }
 0x1a1   : > { %v1849_v30 = vpop.f32.mrf.mxu0  ;;  %v10690_v38 = vmax.f32 %v1994_v7, %v2124_v41  ;;  %v1474_v7 = vadd.f32 %v10259_v51, %v10573_v33  ;;  %4567 = vmatpush2.bf16.msra.mxu1 %v8809_v44  ;;  %v8815_v51 = vld [vmem:[%s14013_s3 + $0x190] ss:$8 sps:$4 sm:$0xff]   ;;  %4757 = vmatprep.subr.bf16.mxu0 %v8817_v29 }
 0x1a2   : > { %v2128_v12 = vrot.slane %v1998_v20, 1  ;;  %v1999_v21 = vmax.f32 %v10677_v37, 0.0  ;;  %v10698_v59 = vadd.f32 %v1849_v30, %v1657_v40  ;;  %v2127_v56 = vsel %vm455_vm0, %v10671_v49, %v2126_v52 }
 0x1a3   : > { %14307 = vst [vmem:[#allocation56_spill] sm:$0xff] %v10690_v38  ;;  %v1851_v18 = vpop.f32.mrf.mxu0  ;;  %v10705_v41 = vmax.f32 %v1995_v0, %v2127_v56  ;;  %v1476_v0 = vadd.f32 %v10271_v5, %v10582_v16  ;;  %v1667_v54 = vadd.f32 %v10312_v10, %v1474_v7  ;;  %v1480_v5 = vadd.f32 %v10273_v2, %v10573_v33 }
 0x1a4   : > { %v2130_v40 = vrot.slane %v1999_v21, 1  ;;  %v2000_v37 = vmax.f32 %v10698_v59, 0.0  ;;  %v10711_v30 = vadd.f32 %v1851_v18, %v1659_v19  ;;  %v2129_v23 = vsel %vm455_vm0, %v2123_v53, %v2128_v12  ;;  %v10724_v59 = vpop.f32.mrf.mxu1  ;;  %4758 = vmatpush2.bf16.msra.mxu0 %v8815_v51  ;;  %v8820_v51 = vld [vmem:[%s14013_s3 + $0x274] ss:$8 sps:$4 sm:$0xff]  }
 0x1a5   : > { %v1855_v43 = vpop.f32.mrf.mxu0  ;;  %v8325_v31 = vpack.i.bf16 %v10705_v41, %v10690_v38  ;;  %v10722_v44 = vmax.f32 %v1996_v36, %v2129_v23  ;;  %v1669_v10 = vadd.f32 %v10326_v48, %v1476_v0  ;;  %v1482_v2 = vadd.f32 %v10285_v4, %v10582_v16  ;;  %4922 = vmatprep.subr.bf16.mxu1 %v8820_v51 }
 0x1a6   : > { %v2132_v19 = vrot.slane %v2000_v37, 1  ;;  %v2001_v53 = vmax.f32 %v10711_v30, 0.0  ;;  %v1856_v56 = vadd.f32 %v1855_v43, %v1663_v50  ;;  %v2131_v18 = vsel %vm455_vm0, %v2126_v52, %v2130_v40  ;;  %v8823_v52 = vld [vmem:[%s14013_s3 + $0x184] ss:$8 sps:$4 sm:$0xff]  }
 0x1a7   : > { %v1857_v55 = vpop.f32.mrf.mxu0  ;;  %8326 = vrot.lane.b32.xlu0 %v8325_v31, %s9126_s14  ;;  %v10732_v36 = vmax.f32 %v1997_v62, %v2131_v18  ;;  %4759 = vmatprep.subr.bf16.mxu0 %v8823_v52  ;;  %v1673_v31 = vadd.f32 %v10335_v28, %v1480_v5  ;;  %v1486_v28 = vadd.f32 %v10299_v27, %v10582_v16 }
 0x1a8   : > { %v2134_v29 = vrot.slane %v2001_v53, 1  ;;  %v2002_v23 = vmax.f32 %v1856_v56, 0.0  ;;  %v1858_v38 = vadd.f32 %v1857_v55, %v1665_v15  ;;  %v2133_v30 = vsel %vm455_vm0, %v2128_v12, %v2132_v19  ;;  %v8821_v12 = vld [vmem:[%s14013_s3 + $0x180] ss:$8 sps:$4 sm:$0xff]   ;;  %v10751_v15 = vpop.f32.mrf.mxu1 }
 0x1a9   : > { %14308 = vst [vmem:[#allocation57_spill] sm:$0xff] %v10732_v36  ;;  %v1859_v50 = vpop.f32.mrf.mxu0  ;;  %v8330_v62 = vpack.i.bf16 %v10732_v36, %v10722_v44  ;;  %v10743_v7 = vmax.f32 %v1998_v20, %v2133_v30  ;;  %v1484_v20 = vadd.f32 %v10287_v3, %v10573_v33  ;;  %4760 = vmatpush2.bf16.msra.mxu0 %v8821_v12 }
 0x1aa   : > { %v2136_v48 = vrot.slane %v2002_v23, 1  ;;  %v2003_v0 = vmax.f32 %v1858_v38, 0.0  ;;  %v1860_v43 = vadd.f32 %v1859_v50, %v1667_v54  ;;  %v2135_v4 = vsel %vm455_vm0, %v2130_v40, %v2134_v29 }
 0x1ab   : > { %v1861_v56 = vpop.f32.mrf.mxu0  ;;  %8331 = vrot.lane.b32.xlu0 %v8330_v62, %s9126_s14  ;;  %v10758_v18 = vmax.f32 %v1999_v21, %v2135_v4  ;;  %v1675_v40 = vadd.f32 %v10348_v47, %v1482_v2  ;;  %v10768_v21 = vpop.f32.mrf.mxu1  ;;  %v1490_v47 = vadd.f32 %v10301_v63, %v10573_v33 }
 0x1ac   : > { %v2138_v55 = vrot.slane %v2003_v0, 1  ;;  %v2004_v30 = vmax.f32 %v1860_v43, 0.0  ;;  %v1862_v36 = vadd.f32 %v1861_v56, %v1669_v10  ;;  %v2137_v38 = vsel %vm455_vm0, %v2132_v19, %v2136_v48 }
 0x1ad   : > { %v1865_v54 = vpop.f32.mrf.mxu0  ;;  %v8335_v3 = vpack.i.bf16 %v10758_v18, %v10743_v7  ;;  %v10766_v5 = vmax.f32 %v2000_v37, %v2137_v38  ;;  %v1677_v19 = vadd.f32 %v10359_v39, %v1484_v20 }
 0x1ae   : > { %v2140_v52 = vrot.slane %v2004_v30, 1  ;;  %v2005_v50 = vmax.f32 %v1862_v36, 0.0  ;;  %v1866_v62 = vadd.f32 %v1865_v54, %v1673_v31  ;;  %v2139_v10 = vsel %vm455_vm0, %v2134_v29, %v2138_v55  ;;  %v10785_v31 = vpop.f32.mrf.mxu1 }
 0x1af   : > { %v1867_v2 = vpop.f32.mrf.mxu0  ;;  %8336 = vrot.lane.b32.xlu1 %v8335_v3, %s9126_s14  ;;  %v10775_v27 = vmax.f32 %v2001_v53, %v2139_v10  ;;  %v1679_v36 = vadd.f32 %v10371_v24, %v1486_v28  ;;  %v1492_v29 = vadd.f32 %v10308_v1, %v10582_v16  ;;  %v1494_v24 = vadd.f32 %v10310_v17, %v10573_v33 }
 0x1b0   : > { %v2142_v51 = vrot.slane %v2005_v50, 1  ;;  %v2006_v37 = vmax.f32 %v1866_v62, 0.0  ;;  %v1868_v12 = vadd.f32 %v1867_v2, %v1675_v40  ;;  %v2141_v43 = vsel %vm455_vm0, %v2136_v48, %v2140_v52 }
 0x1b1   : > { %v1869_v4 = vpop.f32.mrf.mxu0  ;;  %v8340_v39 = vpack.i.bf16 %v10775_v27, %v10766_v5  ;;  %v10783_v63 = vmax.f32 %v2002_v23, %v2141_v43  ;;  %v1683_v48 = vadd.f32 %v10377_v8, %v1490_v47  ;;  %v1685_v62 = vadd.f32 %v10389_v13, %v1492_v29 }
 0x1b2   : > { %v2144_v53 = vrot.slane %v2006_v37, 1  ;;  %v2007_v20 = vmax.f32 %v1868_v12, 0.0  ;;  %v1870_v56 = vadd.f32 %v1869_v4, %v1677_v19  ;;  %v2143_v38 = vsel %vm455_vm0, %v2138_v55, %v2142_v51  ;;  %v10802_v19 = vpop.f32.mrf.mxu1 }
 0x1b3   : > { %v1871_v40 = vpop.f32.mrf.mxu0  ;;  %8341 = vrot.lane.b32.xlu1 %v8340_v39, %s9126_s14  ;;  %v10792_v1 = vmax.f32 %v2003_v0, %v2143_v38  ;;  %v1496_v55 = vadd.f32 %v10322_v45, %v10582_v16  ;;  %v1500_v13 = vadd.f32 %v10324_v14, %v10573_v33 }
 0x1b4   : > { %v2146_v28 = vrot.slane %v2007_v20, 1  ;;  %v2008_v23 = vmax.f32 %v1870_v56, 0.0  ;;  %v1872_v54 = vadd.f32 %v1871_v40, %v1679_v36  ;;  %v2145_v3 = vsel %vm455_vm0, %v2140_v52, %v2144_v53  ;;  %v10819_v38 = vpop.f32.mrf.mxu1 }
 0x1b5   : > { %v1875_v10 = vpop.f32.mrf.mxu0  ;;  %v8345_v8 = vpack.i.bf16 %v10792_v1, %v10783_v63  ;;  %v10800_v17 = vmax.f32 %v2004_v30, %v2145_v3  ;;  %v1687_v52 = vadd.f32 %v10395_v34, %v1494_v24  ;;  %v1689_v39 = vadd.f32 %v10407_v57, %v1496_v55 }
 0x1b6   : > { %v2148_v0 = vrot.slane %v2008_v23, 1  ;;  %v2009_v47 = vmax.f32 %v1872_v54, 0.0  ;;  %v1876_v2 = vadd.f32 %v1875_v10, %v1683_v48  ;;  %v2147_v12 = vsel %vm455_vm0, %v2142_v51, %v2146_v28 }
 0x1b7   : > { %v1877_v43 = vpop.f32.mrf.mxu0  ;;  %8346 = vrot.lane.b32.xlu0 %v8345_v8, %s9126_s14  ;;  %v10809_v45 = vmax.f32 %v2005_v50, %v2147_v12  ;;  %v1502_v51 = vadd.f32 %v10331_v22, %v10582_v16  ;;  %v1504_v57 = vadd.f32 %v10333_v6, %v10573_v33 }
 0x1b8   : > { %v2150_v36 = vrot.slane %v2009_v47, 1  ;;  %v2010_v30 = vmax.f32 %v1876_v2, 0.0  ;;  %v1878_v29 = vadd.f32 %v1877_v43, %v1685_v62  ;;  %v2149_v4 = vsel %vm455_vm0, %v2144_v53, %v2148_v0  ;;  %v10836_v2 = vpop.f32.mrf.mxu1 }
 0x1b9   : > { %v1879_v56 = vpop.f32.mrf.mxu0  ;;  %v8350_v34 = vpack.i.bf16 %v10809_v45, %v10800_v17  ;;  %v10817_v14 = vmax.f32 %v2006_v37, %v2149_v4  ;;  %v1693_v53 = vadd.f32 %v10413_v32, %v1500_v13  ;;  %v1695_v10 = vadd.f32 %v10425_v11, %v1502_v51 }
 0x1ba   : > { %v2152_v50 = vrot.slane %v2010_v30, 1  ;;  %v2011_v48 = vmax.f32 %v1878_v29, 0.0  ;;  %v1880_v24 = vadd.f32 %v1879_v56, %v1687_v52  ;;  %v2151_v40 = vsel %vm455_vm0, %v2146_v28, %v2150_v36 }
 0x1bb   : > { %v1881_v54 = vpop.f32.mrf.mxu0  ;;  %8351 = vrot.lane.b32.xlu1 %v8350_v34, %s9126_s14  ;;  %v10826_v22 = vmax.f32 %v2007_v20, %v2151_v40  ;;  %v1506_v28 = vadd.f32 %v10344_v25, %v10582_v16  ;;  %v1510_v11 = vadd.f32 %v10346_v60, %v10573_v33  ;;  %v10853_v34 = vpop.f32.mrf.mxu1 }
 0x1bc   : > { %v2154_v3 = vrot.slane %v2011_v48, 1  ;;  %v2012_v37 = vmax.f32 %v1880_v24, 0.0  ;;  %v1882_v62 = vadd.f32 %v1881_v54, %v1689_v39  ;;  %v2153_v55 = vsel %vm455_vm0, %v2148_v0, %v2152_v50 }
 0x1bd   : > { %v1885_v8 = vpop.f32.mrf.mxu0  ;;  %v8355_v32 = vpack.i.bf16 %v10826_v22, %v10817_v14  ;;  %v10834_v6 = vmax.f32 %v2008_v23, %v2153_v55  ;;  %v1697_v0 = vadd.f32 %v10431_v58, %v1504_v57  ;;  %v1699_v51 = vadd.f32 %v10449_v9, %v1506_v28  ;;  %v14309_v9 = vld [vmem:[#allocation7_spill] sm:$0xff]  ;;  %v14310_v28 = vld [vmem:[#allocation30_spill] sm:$0xff] }
 0x1be   : > { %v2156_v20 = vrot.slane %v2012_v37, 1  ;;  %v2013_v12 = vmax.f32 %v1882_v62, 0.0  ;;  %v1886_v52 = vadd.f32 %v1885_v8, %v1693_v53  ;;  %v2155_v13 = vsel %vm455_vm0, %v2150_v36, %v2154_v3 }
 0x1bf   : > { %v1887_v43 = vpop.f32.mrf.mxu0  ;;  %8356 = vrot.lane.b32.xlu0 %v8355_v32, %s9126_s14  ;;  %v10843_v25 = vmax.f32 %v2009_v47, %v2155_v13  ;;  %v1512_v36 = vadd.f32 %v10355_v42, %v10582_v16  ;;  %v1514_v57 = vadd.f32 %v14309_v9, %v10573_v33  ;;  %v14311_v32 = vld [vmem:[#allocation9_spill] sm:$0xff] }
 0x1c0   : > { %v2158_v29 = vrot.slane %v2013_v12, 1  ;;  %v2014_v23 = vmax.f32 %v1886_v52, 0.0  ;;  %v1888_v4 = vadd.f32 %v1887_v43, %v1695_v10  ;;  %v2157_v39 = vsel %vm455_vm0, %v2152_v50, %v2156_v20 }
 0x1c1   : > { %v1889_v56 = vpop.f32.mrf.mxu0  ;;  %v8360_v58 = vpack.i.bf16 %v10843_v25, %v10834_v6  ;;  %v10851_v60 = vmax.f32 %v2010_v30, %v2157_v39  ;;  %v1703_v50 = vadd.f32 %v10461_v61, %v1510_v11  ;;  %v1705_v8 = vadd.f32 %v14310_v28, %v1512_v36  ;;  %v14312_v39 = vld [vmem:[#allocation33_spill] sm:$0xff] }
 0x1c2   : > { %v2160_v47 = vrot.slane %v2014_v23, 1  ;;  %v2015_v24 = vmax.f32 %v1888_v4, 0.0  ;;  %v1890_v40 = vadd.f32 %v1889_v56, %v1697_v0  ;;  %v2159_v53 = vsel %vm455_vm0, %v2154_v3, %v2158_v29  ;;  %v10870_v0 = vpop.f32.mrf.mxu1 }
 0x1c3   : > { %v1891_v54 = vpop.f32.mrf.mxu0  ;;  %8361 = vrot.lane.b32.xlu1 %v8360_v58, %s9126_s14  ;;  %v10860_v42 = vmax.f32 %v2011_v48, %v2159_v53  ;;  %v1516_v3 = vadd.f32 %v14311_v32, %v10582_v16 }
 0x1c4   : > { %v2162_v62 = vrot.slane %v2015_v24, 1  ;;  %v2016_v30 = vmax.f32 %v1890_v40, 0.0  ;;  %v1892_v55 = vadd.f32 %v1891_v54, %v1699_v51  ;;  %v2161_v10 = vsel %vm455_vm0, %v2156_v20, %v2160_v47  ;;  %v14313_v51 = vld [vmem:[#allocation8_spill] sm:$0xff]  ;;  %v10887_v32 = vpop.f32.mrf.mxu1 }
 0x1c5   : > { %v1895_v52 = vpop.f32.mrf.mxu0  ;;  %v8365_v61 = vpack.i.bf16 %v10860_v42, %v10851_v60  ;;  %v10868_v13 = vmax.f32 %v2012_v37, %v2161_v10  ;;  %v1707_v20 = vadd.f32 %v14312_v39, %v1514_v57  ;;  %v1520_v36 = vadd.f32 %v14313_v51, %v10573_v33  ;;  %v14315_v54 = vld [vmem:[#allocation36_spill] sm:$0xff] }
 0x1c6   : > { %v2164_v48 = vrot.slane %v2016_v30, 1  ;;  %v2017_v11 = vmax.f32 %v1892_v55, 0.0  ;;  %v1896_v43 = vadd.f32 %v1895_v52, %v1703_v50  ;;  %v2163_v4 = vsel %vm455_vm0, %v2158_v29, %v2162_v62  ;;  %v14316_v50 = vld [vmem:[#allocation10_spill] sm:$0xff] }
 0x1c7   : > { %v1897_v56 = vpop.f32.mrf.mxu0  ;;  %8366 = vrot.lane.b32.xlu0 %v8365_v61, %s9126_s14  ;;  %v10877_v58 = vmax.f32 %v2013_v12, %v2163_v4  ;;  %v1709_v55 = vadd.f32 %v14315_v54, %v1516_v3  ;;  %v1522_v29 = vadd.f32 %v14316_v50, %v10582_v16  ;;  %v14319_v3 = vld [vmem:[#allocation11_spill] sm:$0xff] }
 0x1c8   : > { %v2166_v40 = vrot.slane %v2017_v11, 1  ;;  %v2018_v37 = vmax.f32 %v1896_v43, 0.0  ;;  %v1898_v53 = vadd.f32 %v1897_v56, %v1705_v8  ;;  %v2165_v9 = vsel %vm455_vm0, %v2160_v47, %v2164_v48  ;;  %v14318_v43 = vld [vmem:[#allocation39_spill] sm:$0xff] }
 0x1c9   : > { %14314 = vst [vmem:[#allocation7_spill] sm:$0xff] %v10877_v58  ;;  %v1899_v10 = vpop.f32.mrf.mxu0  ;;  %v8370_v57 = vpack.i.bf16 %v10877_v58, %v10868_v13  ;;  %v10885_v28 = vmax.f32 %v2014_v23, %v2165_v9  ;;  %v1713_v47 = vadd.f32 %v14318_v43, %v1520_v36  ;;  %v1524_v4 = vadd.f32 %v14319_v3, %v10573_v33  ;;  %v14321_v50 = vld [vmem:[#allocation43_spill] sm:$0xff]  ;;  %v10904_v3 = vpop.f32.mrf.mxu1  ;;  %v14327_v58 = vld [vmem:[#allocation49_spill] sm:$0xff] }
 0x1ca   : > { %v2168_v12 = vrot.slane %v2018_v37, 1  ;;  %v2019_v52 = vmax.f32 %v1898_v53, 0.0  ;;  %v1900_v61 = vadd.f32 %v1899_v10, %v1707_v20  ;;  %v2167_v8 = vsel %vm455_vm0, %v2162_v62, %v2166_v40  ;;  %v14322_v20 = vld [vmem:[#allocation12_spill] sm:$0xff] }
 0x1cb   : > { %14317 = vst [vmem:[#allocation30_spill] sm:$0xff] %v10885_v28  ;;  %v1901_v39 = vpop.f32.mrf.mxu0  ;;  %8371 = vrot.lane.b32.xlu1 %v8370_v57, %s9126_s14  ;;  %v10894_v51 = vmax.f32 %v2015_v24, %v2167_v8  ;;  %v1715_v53 = vadd.f32 %v14321_v50, %v1522_v29  ;;  %v1526_v62 = vadd.f32 %v14322_v20, %v10582_v16  ;;  %v14325_v29 = vld [vmem:[#allocation13_spill] sm:$0xff] }
 0x1cc   : > { %v2170_v56 = vrot.slane %v2019_v52, 1  ;;  %v2020_v23 = vmax.f32 %v1900_v61, 0.0  ;;  %v1902_v9 = vadd.f32 %v1901_v39, %v1709_v55  ;;  %v2169_v54 = vsel %vm455_vm0, %v2164_v48, %v2168_v12  ;;  %v14324_v61 = vld [vmem:[#allocation46_spill] sm:$0xff] }
 0x1cd   : > { %14320 = vst [vmem:[#allocation9_spill] sm:$0xff] %v10894_v51  ;;  %v1905_v10 = vpop.f32.mrf.mxu0  ;;  %v8375_v36 = vpack.i.bf16 %v10894_v51, %v10885_v28  ;;  %v10902_v43 = vmax.f32 %v2016_v30, %v2169_v54  ;;  %v1717_v48 = vadd.f32 %v14324_v61, %v1524_v4  ;;  %v1530_v39 = vadd.f32 %v14325_v29, %v10573_v33  ;;  %v10921_v29 = vpop.f32.mrf.mxu1 }
 0x1ce   : > { %v2172_v24 = vrot.slane %v2020_v23, 1  ;;  %v2021_v57 = vmax.f32 %v1902_v9, 0.0  ;;  %v1906_v8 = vadd.f32 %v1905_v10, %v1713_v47  ;;  %v2171_v55 = vsel %vm455_vm0, %v2166_v40, %v2170_v56  ;;  %v14328_v47 = vld [vmem:[#allocation14_spill] sm:$0xff] }
 0x1cf   : > { %14323 = vst [vmem:[#allocation33_spill] sm:$0xff] %v10902_v43  ;;  %v1907_v50 = vpop.f32.mrf.mxu0  ;;  %8376 = vrot.lane.b32.xlu0 %v8375_v36, %s9126_s14  ;;  %v10911_v20 = vmax.f32 %v2017_v11, %v2171_v55  ;;  %v1719_v9 = vadd.f32 %v14327_v58, %v1526_v62  ;;  %v1532_v40 = vadd.f32 %v14328_v47, %v10582_v16  ;;  %v14331_v58 = vld [vmem:[#allocation15_spill] sm:$0xff] }
 0x1d0   : > { %v2174_v51 = vrot.slane %v2021_v57, 1  ;;  %v2022_v30 = vmax.f32 %v1906_v8, 0.0  ;;  %v1908_v54 = vadd.f32 %v1907_v50, %v1715_v53  ;;  %v2173_v28 = vsel %vm455_vm0, %v2168_v12, %v2172_v24  ;;  %v14330_v8 = vld [vmem:[#allocation52_spill] sm:$0xff] }
 0x1d1   : > { %14326 = vst [vmem:[#allocation8_spill] sm:$0xff] %v10911_v20  ;;  %v1909_v10 = vpop.f32.mrf.mxu0  ;;  %v8380_v4 = vpack.i.bf16 %v10911_v20, %v10902_v43  ;;  %v10919_v61 = vmax.f32 %v2018_v37, %v2173_v28  ;;  %v1723_v12 = vadd.f32 %v14330_v8, %v1530_v39  ;;  %v1534_v62 = vadd.f32 %v14331_v58, %v10573_v33  ;;  %v10938_v58 = vpop.f32.mrf.mxu1 }
 0x1d2   : > { %v2176_v11 = vrot.slane %v2022_v30, 1  ;;  %v2023_v36 = vmax.f32 %v1908_v54, 0.0  ;;  %v1910_v55 = vadd.f32 %v1909_v10, %v1717_v48  ;;  %v2175_v53 = vsel %vm455_vm0, %v2170_v56, %v2174_v51  ;;  %v14333_v48 = vld [vmem:[#allocation16_spill] sm:$0xff] }
 0x1d3   : > { %14329 = vst [vmem:[#allocation36_spill] sm:$0xff] %v10919_v61  ;;  %v1911_v50 = vpop.f32.mrf.mxu0  ;;  %8381 = vrot.lane.b32.xlu1 %v8380_v4, %s9126_s14  ;;  %v10928_v47 = vmax.f32 %v2019_v52, %v2175_v53  ;;  %v1725_v54 = vadd.f32 %v10622_v35, %v1532_v40  ;;  %v1536_v56 = vadd.f32 %v14333_v48, %v10582_v16  ;;  %v14334_v35 = vld [vmem:[#allocation17_spill] sm:$0xff] }
 0x1d4   : > { %v2178_v20 = vrot.slane %v2023_v36, 1  ;;  %v2024_v37 = vmax.f32 %v1910_v55, 0.0  ;;  %v1912_v28 = vadd.f32 %v1911_v50, %v1719_v9  ;;  %v2177_v43 = vsel %vm455_vm0, %v2172_v24, %v2176_v11 }
 0x1d5   : > { %14332 = vst [vmem:[#allocation10_spill] sm:$0xff] %v10928_v47  ;;  %v1915_v10 = vpop.f32.mrf.mxu0  ;;  %v8385_v39 = vpack.i.bf16 %v10928_v47, %v10919_v61  ;;  %v10936_v8 = vmax.f32 %v2020_v23, %v2177_v43  ;;  %v1727_v24 = vadd.f32 %v10636_v46, %v1534_v62  ;;  %v1540_v40 = vadd.f32 %v14334_v35, %v10573_v33  ;;  %v14336_v61 = vld [vmem:[#allocation54_spill] sm:$0xff]  ;;  %v10955_v35 = vpop.f32.mrf.mxu1 }
 0x1d6   : > { %v2180_v52 = vrot.slane %v2024_v37, 1  ;;  %v2025_v4 = vmax.f32 %v1912_v28, 0.0  ;;  %v1916_v53 = vadd.f32 %v1915_v10, %v1723_v12  ;;  %v2179_v9 = vsel %vm455_vm0, %v2174_v51, %v2178_v20  ;;  %v14337_v12 = vld [vmem:[#allocation18_spill] sm:$0xff] }
 0x1d7   : > { %v1917_v55 = vpop.f32.mrf.mxu0  ;;  %8386 = vrot.lane.b32.xlu0 %v8385_v39, %s9126_s14  ;;  %v10945_v50 = vmax.f32 %v2021_v57, %v2179_v9  ;;  %v1729_v28 = vadd.f32 %v14336_v61, %v1536_v56  ;;  %v1542_v51 = vadd.f32 %v14337_v12, %v10582_v16  ;;  %v14338_v61 = vld [vmem:[#allocation19_spill] sm:$0xff] }
 0x1d8   : > { %v2182_v48 = vrot.slane %v2025_v4, 1  ;;  %v2026_v23 = vmax.f32 %v1916_v53, 0.0  ;;  %v1918_v43 = vadd.f32 %v1917_v55, %v1725_v54  ;;  %v2181_v47 = vsel %vm455_vm0, %v2176_v11, %v2180_v52 }
 0x1d9   : > { %14335 = vst [vmem:[#allocation39_spill] sm:$0xff] %v10945_v50  ;;  %v1919_v10 = vpop.f32.mrf.mxu0  ;;  %v8390_v46 = vpack.i.bf16 %v10945_v50, %v10936_v8  ;;  %v10953_v62 = vmax.f32 %v2022_v30, %v2181_v47  ;;  %v1733_v11 = vadd.f32 %v10695_v26, %v1540_v40  ;;  %v1544_v56 = vadd.f32 %v14338_v61, %v10573_v33  ;;  %v10972_v61 = vpop.f32.mrf.mxu1 }
 0x1da   : > { %v2184_v57 = vrot.slane %v2026_v23, 1  ;;  %v2027_v39 = vmax.f32 %v1918_v43, 0.0  ;;  %v1920_v9 = vadd.f32 %v1919_v10, %v1727_v24  ;;  %v2183_v54 = vsel %vm455_vm0, %v2178_v20, %v2182_v48  ;;  %v14340_v24 = vld [vmem:[#allocation20_spill] sm:$0xff] }
 0x1db   : > { %v1921_v53 = vpop.f32.mrf.mxu0  ;;  %8391 = vrot.lane.b32.xlu1 %v8390_v46, %s9126_s14  ;;  %v10962_v55 = vmax.f32 %v2023_v36, %v2183_v54  ;;  %v1735_v43 = vadd.f32 %v10724_v59, %v1542_v51  ;;  %v1546_v20 = vadd.f32 %v14340_v24, %v10582_v16  ;;  %v14341_v59 = vld [vmem:[#allocation21_spill] sm:$0xff] }
 0x1dc   : > { %v2186_v12 = vrot.slane %v2027_v39, 1  ;;  %v2028_v30 = vmax.f32 %v1920_v9, 0.0  ;;  %v1922_v47 = vadd.f32 %v1921_v53, %v1729_v28  ;;  %v2185_v50 = vsel %vm455_vm0, %v2180_v52, %v2184_v57 }
 0x1dd   : > { %14339 = vst [vmem:[#allocation11_spill] sm:$0xff] %v10962_v55  ;;  %v1925_v10 = vpop.f32.mrf.mxu0  ;;  %v8395_v26 = vpack.i.bf16 %v10962_v55, %v10953_v62  ;;  %v10970_v40 = vmax.f32 %v2024_v37, %v2185_v50  ;;  %v1737_v52 = vadd.f32 %v10751_v15, %v1544_v56  ;;  %v1550_v51 = vadd.f32 %v14341_v59, %v10573_v33  ;;  %v10989_v59 = vpop.f32.mrf.mxu1 }
 0x1de   : > { %v2188_v36 = vrot.slane %v2028_v30, 1  ;;  %v2029_v46 = vmax.f32 %v1922_v47, 0.0  ;;  %v1926_v54 = vadd.f32 %v1925_v10, %v1733_v11  ;;  %v2187_v28 = vsel %vm455_vm0, %v2182_v48, %v2186_v12  ;;  %v14343_v11 = vld [vmem:[#allocation22_spill] sm:$0xff] }
 0x1df   : > { %v1927_v9 = vpop.f32.mrf.mxu0  ;;  %8396 = vrot.lane.b32.xlu0 %v8395_v26, %s9126_s14  ;;  %v10979_v53 = vmax.f32 %v2025_v4, %v2187_v28  ;;  %v1739_v47 = vadd.f32 %v10768_v21, %v1546_v20  ;;  %v1552_v48 = vadd.f32 %v14343_v11, %v10582_v16  ;;  %v14344_v21 = vld [vmem:[#allocation23_spill] sm:$0xff] }
 0x1e0   : > { %v2190_v24 = vrot.slane %v2029_v46, 1  ;;  %v2030_v37 = vmax.f32 %v1926_v54, 0.0  ;;  %v1928_v50 = vadd.f32 %v1927_v9, %v1735_v43  ;;  %v2189_v55 = vsel %vm455_vm0, %v2184_v57, %v2188_v36 }
 0x1e1   : > { %14342 = vst [vmem:[#allocation43_spill] sm:$0xff] %v10979_v53  ;;  %v1929_v10 = vpop.f32.mrf.mxu0  ;;  %v8400_v15 = vpack.i.bf16 %v10979_v53, %v10970_v40  ;;  %v10987_v56 = vmax.f32 %v2026_v23, %v2189_v55  ;;  %v1743_v57 = vadd.f32 %v10785_v31, %v1550_v51  ;;  %v1554_v20 = vadd.f32 %v14344_v21, %v10573_v33  ;;  %v11006_v21 = vpop.f32.mrf.mxu1 }
 0x1e2   : > { %v2192_v4 = vrot.slane %v2030_v37, 1  ;;  %v2031_v26 = vmax.f32 %v1928_v50, 0.0  ;;  %v1930_v28 = vadd.f32 %v1929_v10, %v1737_v52  ;;  %v2191_v43 = vsel %vm455_vm0, %v2186_v12, %v2190_v24  ;;  %v14346_v52 = vld [vmem:[#allocation24_spill] sm:$0xff] }
 0x1e3   : > { %v1931_v54 = vpop.f32.mrf.mxu0  ;;  %8401 = vrot.lane.b32.xlu1 %v8400_v15, %s9126_s14  ;;  %v10996_v9 = vmax.f32 %v2027_v39, %v2191_v43  ;;  %v1745_v50 = vadd.f32 %v10802_v19, %v1552_v48  ;;  %v1556_v12 = vadd.f32 %v14346_v52, %v10582_v16  ;;  %v14347_v19 = vld [vmem:[#allocation25_spill] sm:$0xff] }
 0x1e4   : > { %v2194_v11 = vrot.slane %v2031_v26, 1  ;;  %v2032_v23 = vmax.f32 %v1930_v28, 0.0  ;;  %v1932_v55 = vadd.f32 %v1931_v54, %v1739_v47  ;;  %v2193_v53 = vsel %vm455_vm0, %v2188_v36, %v2192_v4 }
 0x1e5   : > { %14345 = vst [vmem:[#allocation12_spill] sm:$0xff] %v10996_v9  ;;  %v1935_v10 = vpop.f32.mrf.mxu0  ;;  %v8405_v31 = vpack.i.bf16 %v10996_v9, %v10987_v56  ;;  %v11004_v51 = vmax.f32 %v2028_v30, %v2193_v53  ;;  %v1747_v36 = vadd.f32 %v10819_v38, %v1554_v20  ;;  %v1560_v48 = vadd.f32 %v14347_v19, %v10573_v33  ;;  %v11023_v19 = vpop.f32.mrf.mxu1 }
 0x1e6   : > { %v2196_v39 = vrot.slane %v2032_v23, 1  ;;  %v2033_v15 = vmax.f32 %v1932_v55, 0.0  ;;  %v1936_v43 = vadd.f32 %v1935_v10, %v1743_v57  ;;  %v2195_v47 = vsel %vm455_vm0, %v2190_v24, %v2194_v11  ;;  %v14349_v57 = vld [vmem:[#allocation26_spill] sm:$0xff] }
 0x1e7   : > { %v1937_v28 = vpop.f32.mrf.mxu0  ;;  %8406 = vrot.lane.b32.xlu0 %v8405_v31, %s9126_s14  ;;  %v11013_v54 = vmax.f32 %v2029_v46, %v2195_v47  ;;  %v1749_v55 = vadd.f32 %v10836_v2, %v1556_v12  ;;  %v1562_v24 = vadd.f32 %v14349_v57, %v10582_v16  ;;  %v14351_v2 = vld [vmem:[#allocation27_spill] sm:$0xff] }
 0x1e8   : > { %v2198_v52 = vrot.slane %v2033_v15, 1  ;;  %v2034_v30 = vmax.f32 %v1936_v43, 0.0  ;;  %v1938_v53 = vadd.f32 %v1937_v28, %v1745_v50  ;;  %v2197_v9 = vsel %vm455_vm0, %v2192_v4, %v2196_v39 }
 0x1e9   : > { %14348 = vst [vmem:[#allocation46_spill] sm:$0xff] %v11013_v54  ;;  %v1939_v10 = vpop.f32.mrf.mxu0  ;;  %v8410_v38 = vpack.i.bf16 %v11013_v54, %v11004_v51  ;;  %v11021_v20 = vmax.f32 %v2030_v37, %v2197_v9  ;;  %v1753_v4 = vadd.f32 %v10853_v34, %v1560_v48  ;;  %v1564_v12 = vadd.f32 %v14351_v2, %v10573_v33  ;;  %v14353_v34 = vld [vmem:[#allocation28_spill] sm:$0xff] }
 0x1ea   : > { %v2200_v46 = vrot.slane %v2034_v30, 1  ;;  %v2035_v31 = vmax.f32 %v1938_v53, 0.0  ;;  %v1940_v47 = vadd.f32 %v1939_v10, %v1747_v36  ;;  %v2199_v50 = vsel %vm455_vm0, %v2194_v11, %v2198_v52  ;;  %v8850_v36 = vld [vmem:[%s14013_s3 + $0x374] ss:$8 sps:$4 sm:$0xff]  }
 0x1eb   : > { %14350 = vst [vmem:[#allocation13_spill] sm:$0xff] %v11021_v20  ;;  %v1941_v43 = vpop.f32.mrf.mxu0  ;;  %8411 = vrot.lane.b32.xlu1 %v8410_v38, %s9126_s14  ;;  %v11030_v28 = vmax.f32 %v2031_v26, %v2199_v50  ;;  %v1755_v11 = vadd.f32 %v10870_v0, %v1562_v24  ;;  %v1566_v48 = vadd.f32 %v14353_v34, %v10582_v16  ;;  %v11043_v38 = vpop.f32.mrf.mxu1  ;;  %v14354_v0 = vld [vmem:[#allocation29_spill] sm:$0xff] }
 0x1ec   : > { %v2202_v57 = vrot.slane %v2035_v31, 1  ;;  %v2036_v37 = vmax.f32 %v1940_v47, 0.0  ;;  %v1942_v9 = vadd.f32 %v1941_v43, %v1749_v55  ;;  %v2201_v54 = vsel %vm455_vm0, %v2196_v39, %v2200_v46  ;;  %5115 = vmatprep.subr.bf16.mxu0 %v8850_v36 }
 0x1ed   : > { %14352 = vst [vmem:[#allocation49_spill] sm:$0xff] %v11030_v28  ;;  %v1945_v53 = vpop.f32.mrf.mxu0  ;;  %v8415_v10 = vpack.i.bf16 %v11030_v28, %v11021_v20  ;;  %v11041_v26 = vmax.f32 %v2032_v23, %v2201_v54  ;;  %v1757_v2 = vadd.f32 %v10887_v32, %v1564_v12  ;;  %v1570_v24 = vadd.f32 %v14354_v0, %v10573_v33 }
 0x1ee   : > { %v2204_v55 = vrot.slane %v2036_v37, 1  ;;  %v2037_v47 = vmax.f32 %v1942_v9, 0.0  ;;  %v1946_v39 = vadd.f32 %v1945_v53, %v1753_v4  ;;  %v2203_v50 = vsel %vm455_vm0, %v2198_v52, %v2202_v57  ;;  %v14355_v52 = vld [vmem:[#allocation31_spill] sm:$0xff]  ;;  %v11060_v53 = vpop.f32.mrf.mxu1 }
 0x1ef   : > { %v1947_v43 = vpop.f32.mrf.mxu0  ;;  %8416 = vrot.lane.b32.xlu0 %v8415_v10, %s9126_s14  ;;  %v11050_v34 = vmax.f32 %v2033_v15, %v2203_v50  ;;  %v1759_v4 = vadd.f32 %v10904_v3, %v1566_v48  ;;  %v1572_v9 = vadd.f32 %v14355_v52, %v10582_v16  ;;  %v14356_v3 = vld [vmem:[#allocation32_spill] sm:$0xff] }
 0x1f0   : > { %v2206_v23 = vrot.slane %v2037_v47, 1  ;;  %v2038_v54 = vmax.f32 %v1946_v39, 0.0  ;;  %v1948_v28 = vadd.f32 %v1947_v43, %v1755_v11  ;;  %v2205_v20 = vsel %vm455_vm0, %v2200_v46, %v2204_v55 }
 0x1f1   : > { %v1949_v36 = vpop.f32.mrf.mxu0  ;;  %v8420_v32 = vpack.i.bf16 %v11050_v34, %v11041_v26  ;;  %v11058_v12 = vmax.f32 %v2034_v30, %v2205_v20  ;;  %v1763_v46 = vadd.f32 %v10921_v29, %v1570_v24  ;;  %v1574_v48 = vadd.f32 %v14356_v3, %v10573_v33  ;;  %v11077_v3 = vpop.f32.mrf.mxu1 }
 0x1f2   : > { %v2208_v15 = vrot.slane %v2038_v54, 1  ;;  %v2039_v10 = vmax.f32 %v1948_v28, 0.0  ;;  %v1950_v50 = vadd.f32 %v1949_v36, %v1757_v2  ;;  %v2207_v11 = vsel %vm455_vm0, %v2202_v57, %v2206_v23  ;;  %v14358_v2 = vld [vmem:[#allocation34_spill] sm:$0xff] }
 0x1f3   : > { %v1951_v39 = vpop.f32.mrf.mxu0  ;;  %8421 = vrot.lane.b32.xlu1 %v8420_v32, %s9126_s14  ;;  %v11067_v0 = vmax.f32 %v2035_v31, %v2207_v11  ;;  %v1765_v28 = vadd.f32 %v10938_v58, %v1572_v9  ;;  %v1576_v57 = vadd.f32 %v14358_v2, %v10582_v16  ;;  %v14359_v58 = vld [vmem:[#allocation35_spill] sm:$0xff] }
 0x1f4   : > { %v2210_v43 = vrot.slane %v2039_v10, 1  ;;  %v2040_v30 = vmax.f32 %v1950_v50, 0.0  ;;  %v1952_v20 = vadd.f32 %v1951_v39, %v1759_v4  ;;  %v2209_v52 = vsel %vm455_vm0, %v2204_v55, %v2208_v15 }
 0x1f5   : > { %14357 = vst [vmem:[#allocation14_spill] sm:$0xff] %v11067_v0  ;;  %v1955_v36 = vpop.f32.mrf.mxu0  ;;  %v8425_v29 = vpack.i.bf16 %v11067_v0, %v11058_v12  ;;  %v11075_v24 = vmax.f32 %v2036_v37, %v2209_v52  ;;  %v1767_v55 = vadd.f32 %v10955_v35, %v1574_v48  ;;  %v1580_v9 = vadd.f32 %v14359_v58, %v10573_v33  ;;  %v11094_v58 = vpop.f32.mrf.mxu1 }
 0x1f6   : > { %v2212_v31 = vrot.slane %v2040_v30, 1  ;;  %v2041_v32 = vmax.f32 %v1952_v20, 0.0  ;;  %v1956_v11 = vadd.f32 %v1955_v36, %v1763_v46  ;;  %v2211_v4 = vsel %vm455_vm0, %v2206_v23, %v2210_v43  ;;  %v14361_v46 = vld [vmem:[#allocation37_spill] sm:$0xff] }
 0x1f7   : > { %v1957_v50 = vpop.f32.mrf.mxu0  ;;  %8426 = vrot.lane.b32.xlu0 %v8425_v29, %s9126_s14  ;;  %v11084_v39 = vmax.f32 %v2037_v47, %v2211_v4  ;;  %v1769_v20 = vadd.f32 %v10972_v61, %v1576_v57  ;;  %v1582_v23 = vadd.f32 %v14361_v46, %v10582_v16  ;;  %v14362_v61 = vld [vmem:[#allocation38_spill] sm:$0xff] }
 0x1f8   : > { %v2214_v2 = vrot.slane %v2041_v32, 1  ;;  %v2042_v37 = vmax.f32 %v1956_v11, 0.0  ;;  %v1958_v52 = vadd.f32 %v1957_v50, %v1765_v28  ;;  %v2213_v0 = vsel %vm455_vm0, %v2208_v15, %v2212_v31 }
 0x1f9   : > { %14360 = vst [vmem:[#allocation52_spill] sm:$0xff] %v11084_v39  ;;  %v1959_v36 = vpop.f32.mrf.mxu0  ;;  %v8430_v35 = vpack.i.bf16 %v11084_v39, %v11075_v24  ;;  %v11092_v48 = vmax.f32 %v2038_v54, %v2213_v0  ;;  %v1773_v15 = vadd.f32 %v10989_v59, %v1580_v9  ;;  %v1584_v57 = vadd.f32 %v14362_v61, %v10573_v33  ;;  %v1788_v61 = vpop.f32.mrf.mxu1 }
 0x1fa   : > { %v2216_v47 = vrot.slane %v2042_v37, 1  ;;  %v2043_v29 = vmax.f32 %v1958_v52, 0.0  ;;  %v1960_v4 = vadd.f32 %v1959_v36, %v1767_v55  ;;  %v2215_v28 = vsel %vm455_vm0, %v2210_v43, %v2214_v2  ;;  %v14364_v55 = vld [vmem:[#allocation40_spill] sm:$0xff] }
 0x1fb   : > { %v1961_v11 = vpop.f32.mrf.mxu0  ;;  %8431 = vrot.lane.b32.xlu1 %v8430_v35, %s9126_s14  ;;  %v11101_v50 = vmax.f32 %v2039_v10, %v2215_v28  ;;  %v1775_v52 = vadd.f32 %v11006_v21, %v1582_v23  ;;  %v1586_v43 = vadd.f32 %v14364_v55, %v10582_v16 }
 0x1fc   : > { %v2218_v46 = vrot.slane %v2043_v29, 1  ;;  %v2044_v54 = vmax.f32 %v1960_v4, 0.0  ;;  %v1962_v0 = vadd.f32 %v1961_v11, %v1769_v20  ;;  %v2217_v39 = vsel %vm455_vm0, %v2212_v31, %v2216_v47  ;;  %v14365_v31 = vld [vmem:[#allocation42_spill] sm:$0xff] }
 0x1fd   : > { %14363 = vst [vmem:[#allocation15_spill] sm:$0xff] %v11101_v50  ;;  %v1965_v36 = vpop.f32.mrf.mxu0  ;;  %v8435_v59 = vpack.i.bf16 %v11101_v50, %v11092_v48  ;;  %v11109_v9 = vmax.f32 %v2040_v30, %v2217_v39  ;;  %v1777_v20 = vadd.f32 %v11023_v19, %v1584_v57  ;;  %v1590_v21 = vadd.f32 %v14365_v31, %v10573_v33  ;;  %v1792_v31 = vpop.f32.mrf.mxu1 }
 0x1fe   : > { %v2220_v35 = vrot.slane %v2044_v54, 1  ;;  %v2045_v10 = vmax.f32 %v1962_v0, 0.0  ;;  %v1966_v28 = vadd.f32 %v1965_v36, %v1773_v15  ;;  %v2219_v4 = vsel %vm455_vm0, %v2214_v2, %v2218_v46  ;;  %v14367_v15 = vld [vmem:[#allocation44_spill] sm:$0xff] }
 0x1ff   : > { %v1967_v23 = vpop.f32.mrf.mxu0  ;;  %8436 = vrot.lane.b32.xlu0 %v8435_v59, %s9126_s14  ;;  %v11116_v11 = vmax.f32 %v2041_v32, %v2219_v4  ;;  %v1779_v0 = vadd.f32 %v11043_v38, %v1586_v43  ;;  %v1592_v2 = vadd.f32 %v14367_v15, %v10582_v16 }
 0x200   : > { %v2222_v55 = vrot.slane %v2045_v10, 1  ;;  %v2046_v50 = vmax.f32 %v1966_v28, 0.0  ;;  %v1968_v30 = vadd.f32 %v1967_v23, %v1775_v52  ;;  %v2221_v39 = vsel %vm455_vm0, %v2216_v47, %v2220_v35  ;;  %v14369_v47 = vld [vmem:[#allocation45_spill] sm:$0xff] }
 0x201   : > { %14366 = vst [vmem:[#allocation16_spill] sm:$0xff] %v11116_v11  ;;  %v1969_v36 = vpop.f32.mrf.mxu0  ;;  %v8440_v19 = vpack.i.bf16 %v11116_v11, %v11109_v9  ;;  %v11124_v57 = vmax.f32 %v2042_v37, %v2221_v39  ;;  %v1783_v52 = vadd.f32 %v11060_v53, %v1590_v21  ;;  %v1594_v38 = vadd.f32 %v14369_v47, %v10573_v33  ;;  %v1794_v47 = vpop.f32.mrf.mxu1 }
 0x202   : > { %v2224_v59 = vrot.slane %v2046_v50, 1  ;;  %v2047_v32 = vmax.f32 %v1968_v30, 0.0  ;;  %v1970_v4 = vadd.f32 %v1969_v36, %v1777_v20  ;;  %v2223_v28 = vsel %vm455_vm0, %v2218_v46, %v2222_v55  ;;  %v14371_v20 = vld [vmem:[#allocation47_spill] sm:$0xff] }
 0x203   : > { %14368 = vst [vmem:[#allocation17_spill] sm:$0xff] %v11124_v57  ;;  %v1971_v43 = vpop.f32.mrf.mxu0  ;;  %8441 = vrot.lane.b32.xlu1 %v8440_v19, %s9126_s14  ;;  %v11131_v23 = vmax.f32 %v2043_v29, %v2223_v28  ;;  %v1785_v30 = vadd.f32 %v11077_v3, %v1592_v2  ;;  %v1596_v46 = vadd.f32 %v14371_v20, %v10582_v16 }
 0x204   : > { %v2226_v15 = vrot.slane %v2047_v32, 1  ;;  %v2048_v11 = vmax.f32 %v1970_v4, 0.0  ;;  %v1972_v37 = vadd.f32 %v1971_v43, %v1779_v0  ;;  %v2225_v39 = vsel %vm455_vm0, %v2220_v35, %v2224_v59  ;;  %v14372_v35 = vld [vmem:[#allocation48_spill] sm:$0xff] }
 0x205   : > { %14370 = vst [vmem:[#allocation54_spill] sm:$0xff] %v11131_v23  ;;  %v1975_v36 = vpop.f32.mrf.mxu0  ;;  %v8445_v53 = vpack.i.bf16 %v11131_v23, %v11124_v57  ;;  %v11139_v21 = vmax.f32 %v2044_v54, %v2225_v39  ;;  %v1787_v0 = vadd.f32 %v11094_v58, %v1594_v38  ;;  %v1600_v3 = vadd.f32 %v14372_v35, %v10573_v33 }
 0x206   : > { %v2228_v19 = vrot.slane %v2048_v11, 1  ;;  %v2049_v29 = vmax.f32 %v1972_v37, 0.0  ;;  %v1976_v28 = vadd.f32 %v1975_v36, %v1783_v52  ;;  %v2227_v4 = vsel %vm455_vm0, %v2222_v55, %v2226_v15  ;;  %v14374_v52 = vld [vmem:[#allocation50_spill] sm:$0xff]  ;;  %v1796_v36 = vpop.f32.mrf.mxu1 }
 0x207   : > { %v1977_v2 = vpop.f32.mrf.mxu0  ;;  %8446 = vrot.lane.b32.xlu0 %v8445_v53, %s9126_s14  ;;  %v11146_v43 = vmax.f32 %v2045_v10, %v2227_v4  ;;  %v1789_v57 = vadd.f32 %v1788_v61, %v1596_v46  ;;  %v1602_v37 = vadd.f32 %v14374_v52, %v10582_v16 }
 0x208   : > { %v2230_v20 = vrot.slane %v2049_v29, 1  ;;  %v2050_v23 = vmax.f32 %v1976_v28, 0.0  ;;  %v1978_v54 = vadd.f32 %v1977_v2, %v1785_v30  ;;  %v2229_v39 = vsel %vm455_vm0, %v2224_v59, %v2228_v19  ;;  %v14375_v30 = vld [vmem:[#allocation51_spill] sm:$0xff] }
 0x209   : > { %14373 = vst [vmem:[#allocation18_spill] sm:$0xff] %v11146_v43  ;;  %v1979_v55 = vpop.f32.mrf.mxu0  ;;  %v8450_v58 = vpack.i.bf16 %v11146_v43, %v11139_v21  ;;  %v11153_v38 = vmax.f32 %v2046_v50, %v2229_v39  ;;  %v1793_v28 = vadd.f32 %v1792_v31, %v1600_v3  ;;  %v1604_v59 = vadd.f32 %v14375_v30, %v10573_v33  ;;  %v1798_v33 = vpop.f32.mrf.mxu1 }
 0x20a   : > { %v2232_v35 = vrot.slane %v2050_v23, 1  ;;  %v2051_v53 = vmax.f32 %v1978_v54, 0.0  ;;  %v1980_v10 = vadd.f32 %v1979_v55, %v1787_v0  ;;  %v2231_v4 = vsel %vm455_vm0, %v2226_v15, %v2230_v20  ;;  %v14376_v54 = vld [vmem:[#allocation53_spill] sm:$0xff] }
 0x20b   : > { %v1981_v61 = vpop.f32.mrf.mxu0  ;;  %8451 = vrot.lane.b32.xlu1 %v8450_v58, %s9126_s14  ;;  %v11159_v46 = vmax.f32 %v2047_v32, %v2231_v4  ;;  %v1795_v39 = vadd.f32 %v1794_v47, %v1602_v37  ;;  %v1606_v0 = vadd.f32 %v14376_v54, %v10582_v16 }
 0x20c   : > { %v2234_v2 = vrot.slane %v2051_v53, 1  ;;  %v2052_v52 = vmax.f32 %v1980_v10, 0.0  ;;  %v1982_v43 = vadd.f32 %v1981_v61, %v1789_v57  ;;  %v2233_v50 = vsel %vm455_vm0, %v2228_v19, %v2232_v35 }
 0x20d   : > { %v1985_v55 = vpop.f32.mrf.mxu0  ;;  %v8455_v31 = vpack.i.bf16 %v11159_v46, %v11153_v38  ;;  %v11166_v15 = vmax.f32 %v2048_v11, %v2233_v50  ;;  %v1797_v10 = vadd.f32 %v1796_v36, %v1604_v59  ;;  %v1799_v61 = vadd.f32 %v1798_v33, %v1606_v0 }
 0x20e   : > { %v2236_v3 = vrot.slane %v2052_v52, 1  ;;  %v2053_v58 = vmax.f32 %v1982_v43, 0.0  ;;  %v1986_v32 = vadd.f32 %v1985_v55, %v1793_v28  ;;  %v2235_v4 = vsel %vm455_vm0, %v2230_v20, %v2234_v2 }
 0x20f   : > { %v1987_v57 = vpop.f32.mrf.mxu0  ;;  %8456 = vrot.lane.b32.xlu0 %v8455_v31, %s9126_s14  ;;  %v11170_v47 = vmax.f32 %v2049_v29, %v2235_v4 }
 0x210   : > { %v2238_v19 = vrot.slane %v2053_v58, 1  ;;  %v2054_v16 = vmax.f32 %v1986_v32, 0.0  ;;  %v1988_v37 = vadd.f32 %v1987_v57, %v1795_v39  ;;  %v2237_v30 = vsel %vm455_vm0, %v2232_v35, %v2236_v3 }
 0x211   : > { %v1989_v11 = vpop.f32.mrf.mxu0  ;;  %v8460_v50 = vpack.i.bf16 %v11170_v47, %v11166_v15  ;;  %v11175_v43 = vmax.f32 %v2050_v23, %v2237_v30 }
 0x212   : > { %v2240_v28 = vrot.slane %v2054_v16, 1  ;;  %v2055_v20 = vmax.f32 %v1988_v37, 0.0  ;;  %v1990_v36 = vadd.f32 %v1989_v11, %v1797_v10  ;;  %v2239_v59 = vsel %vm455_vm0, %v2234_v2, %v2238_v19 }
 0x213   : > { %v1991_v54 = vpop.f32.mrf.mxu0  ;;  %8461 = vrot.lane.b32.xlu1 %v8460_v50, %s9126_s14  ;;  %v11179_v29 = vmax.f32 %v2051_v53, %v2239_v59  ;;  %v14377_v53 = vld [vmem:[#allocation55_spill] sm:$0xff] }
 0x214   : > { %v2242_v39 = vrot.slane %v2055_v20, 1  ;;  %v2056_v55 = vmax.f32 %v1990_v36, 0.0  ;;  %v1992_v35 = vadd.f32 %v1991_v54, %v1799_v61  ;;  %v2241_v0 = vsel %vm455_vm0, %v2236_v3, %v2240_v28 }
 0x215   : > { %v8465_v31 = vpack.i.bf16 %v11179_v29, %v11175_v43  ;;  %v11184_v23 = vmax.f32 %v2052_v52, %v2241_v0 }
 0x216   : > { %v2244_v33 = vrot.slane %v2056_v55, 1  ;;  %v2057_v32 = vmax.f32 %v1992_v35, 0.0  ;;  %v2243_v4 = vsel %vm455_vm0, %v2238_v19, %v2242_v39 }
 0x217   : > { %8466 = vrot.lane.b32.xlu0 %v8465_v31, %s9126_s14  ;;  %v11188_v2 = vmax.f32 %v2053_v58, %v2243_v4 }
 0x218   : > { %v2248_v10 = vsel %vm455_vm0, %v2244_v33, %v14377_v53  ;;  %v2246_v57 = vrot.slane %v2057_v32, 1  ;;  %v2245_v37 = vsel %vm455_vm0, %v2240_v28, %v2244_v33 }
 0x219   : > { %v8327_v3 = vpop.permute.xlu0 %8326  ;;  %v8470_v30 = vpack.i.bf16 %v11188_v2, %v11184_v23  ;;  %v11195_v52 = vmax.f32 %v2054_v16, %v2245_v37  ;;  %v11200_v50 = vmax.f32 %v2056_v55, %v2248_v10  ;;  %v14382_v10 = vld [vmem:[#allocation56_spill] sm:$0xff] }
 0x21a   : > { %v2249_v61 = vsel %vm455_vm0, %v2246_v57, %v10671_v49  ;;  %v8329_v19 = vunpack.i.h.bf16 %v8327_v3  ;;  %v8328_v11 = vunpack.i.l.bf16 %v8327_v3  ;;  %v2247_v58 = vsel %vm455_vm0, %v2242_v39, %v2246_v57 }
 0x21b   : > { %v11202_v36 = vmax.f32 %v2057_v32, %v2249_v61  ;;  %8471 = vrot.lane.b32.xlu1 %v8470_v30, %s9126_s14  ;;  %v11205_v28 = vmax.f32 %v2055_v20, %v2247_v58  ;;  %v14380_v32 = vld [vmem:[#allocation57_spill] sm:$0xff]  ;;  %vm7645_vm0 = vcmask 687104  }
 0x21c   : > { %v2572_v54 = vsel %vm2570_vm4, %v8329_v19, %v8328_v11  ;;  %v2571_v55 = vsel %vm2570_vm4, %v8328_v11, %v8329_v19 }
 0x21d   : > { %v8332_v59 = vpop.permute.xlu0 %8331  ;;  %v8480_v16 = vpack.i.bf16 %v11202_v36, %v11200_v50  ;;  %v8475_v49 = vpack.i.bf16 %v11205_v28, %v11195_v52  ;;  %v11218_v31 = vmax.f32 %v10705_v41, %v2572_v54  ;;  %v11227_v57 = vmax.f32 %v14382_v10, %v2571_v55  ;;  %v8818_v41 = vld [vmem:[%s14013_s3 + $0x270] ss:$8 sps:$4 sm:$0xff]  }
 0x21e   : > { %v8334_v35 = vunpack.i.h.bf16 %v8332_v59  ;;  %v8333_v39 = vunpack.i.l.bf16 %v8332_v59  ;;  %v8826_v59 = vld [vmem:[%s14013_s3 + $0x264] ss:$8 sps:$4 sm:$0xff]  }
 0x21f   : > { %8481 = vrot.lane.b32.xlu1 %v8480_v16, %s9126_s14  ;;  %8476 = vrot.lane.b32.xlu0 %v8475_v49, %s9126_s14  ;;  %14378 = vst [vmem:[#allocation19_spill] sm:$0xff] %v11218_v31  ;;  %14383 = vst [vmem:[#allocation22_spill] sm:$0xff] %v11227_v57  ;;  %s9130_s14 = smov [#allocation2]  }
 0x220   : > { %v2573_v20 = vsel %vm2570_vm4, %v8333_v39, %v8334_v35  ;;  %v2574_v0 = vsel %vm2570_vm4, %v8334_v35, %v8333_v39  ;;  %v14060_v35 = vrot.slane %v11227_v57, 2  ;;  %s9067_s16 = sshll.u32 %s9130_s14, 4  ;;  %s9068_s16 = int_to_ptr.vmem [resolvable:$false] %s9067_s16 }
 0x221   : > { %v11221_v33 = vmax.f32 %v10722_v44, %v2573_v20  ;;  %v11224_v4 = vmax.f32 %v14380_v32, %v2574_v0  ;;  %v8337_v53 = vpop.permute.xlu1 %8336  ;;  %v14061_v20 = vrot.slane %v11218_v31, 2  ;;  %s9069_s19 = scalar_lea.vmem %s9068_s16, 256  ;;  %p9070_p0 = scmp.lt.s32.totalorder %s13971_s29, %s9068_s16 }
 0x222   : > { %v8339_v37 = vunpack.i.h.bf16 %v8337_v53  ;;  %v8338_v3 = vunpack.i.l.bf16 %v8337_v53  ;;  %p9071_p1 = scmp.lt.s32.totalorder %s9069_s19, %s9063_s21 }
 0x223   : > { %14379 = vst [vmem:[#allocation20_spill] sm:$0xff] %v11221_v33  ;;  %14381 = vst [vmem:[#allocation21_spill] sm:$0xff] %v11224_v4  ;;  %v2828_v30 = vrot.slane %v11221_v33, 2  ;;  %v3405_v61 = vpack.c.bf16 %v11224_v4, %v11218_v31  ;;  %v3404_v11 = vpack.c.bf16 %v11221_v33, %v11227_v57  ;;  %v2831_v58 = vrot.slane %v11224_v4, 2 }
 0x224   : > { %v2575_v44 = vsel %vm2570_vm4, %v8338_v3, %v8339_v37  ;;  %v2576_v19 = vsel %vm2570_vm4, %v8339_v37, %v8338_v3  ;;  %v8829_v3 = vld [vmem:[%s14013_s3 + $0x254] ss:$8 sps:$4 sm:$0xff]   ;;  %p9072_p2 = por %p9071_p1, %p9070_p0 }
 0x225   : > { %v11244_v16 = vmax.f32 %v10743_v7, %v2575_v44  ;;  %v11247_v49 = vmax.f32 %v10758_v18, %v2576_v19  ;;  %v8342_v54 = vpop.permute.xlu1 %8341  ;;  %4568 = vmatprep.mubr.bf16.mxu1 %v3405_v61  ;;  %v8824_v7 = vld [vmem:[%s14013_s3 + $0x260] ss:$8 sps:$4 sm:$0xff]   ;;  %v2832_v10 = vsel %vm552_vm2, %v14061_v20, %v2831_v58  ;;  %v2829_v37 = vsel %vm552_vm2, %v14060_v35, %v2828_v30 }
 0x226   : > { %v8344_v39 = vunpack.i.h.bf16 %v8342_v54  ;;  %v8343_v55 = vunpack.i.l.bf16 %v8342_v54  ;;  %4569 = vmatmul.mubr.bf16.vlgmr.msra.gmra.mxu1 %v3404_v11  ;;  %p9073_p3 = pnand %p9072_p2, %p9066_p13 }
 0x227   : > { %14384 = vst [vmem:[#allocation23_spill] sm:$0xff] %v11244_v16  ;;  %14385 = vst [vmem:[#allocation24_spill] sm:$0xff] %v11247_v49  ;;  %v2833_v0 = vrot.slane %v11244_v16, 2  ;;  %4923 = vmatpush1.bf16.msra.mxu1 %v8818_v41  ;;  %v2835_v32 = vrot.slane %v11247_v49, 2 }
 0x228   : > { %v2577_v18 = vsel %vm2570_vm4, %v8343_v55, %v8344_v39  ;;  %v2578_v53 = vsel %vm2570_vm4, %v8344_v39, %v8343_v55  ;;  %4924 = vmatprep.subr.bf16.mxu1 %v8826_v59  ;;  %v8848_v59 = vld [vmem:[%s14013_s3 + $0x370] ss:$8 sps:$4 sm:$0xff]  }
 0x229   : > { %v11268_v61 = vmax.f32 %v10766_v5, %v2577_v18  ;;  %v11271_v41 = vmax.f32 %v10775_v27, %v2578_v53  ;;  %v8347_v44 = vpop.permute.xlu0 %8346  ;;  %v2836_v19 = vsel %vm552_vm2, %v2831_v58, %v2835_v32  ;;  %v2834_v11 = vsel %vm552_vm2, %v2828_v30, %v2833_v0  ;;  %v8827_v58 = vld [vmem:[%s14013_s3 + $0x250] ss:$8 sps:$4 sm:$0xff]   ;;  %v8856_v30 = vld [vmem:[%s14013_s3 + $0x364] ss:$8 sps:$4 sm:$0xff]  }
 0x22a   : > { %v8349_v54 = vunpack.i.h.bf16 %v8347_v44  ;;  %v8348_v39 = vunpack.i.l.bf16 %v8347_v44  ;;  %v3407_v55 = vpack.c.bf16 %v2836_v19, %v2832_v10  ;;  %v3406_v35 = vpack.c.bf16 %v2834_v11, %v2829_v37 }
 0x22b   : > { %14386 = vst [vmem:[#allocation25_spill] sm:$0xff] %v11268_v61  ;;  %14387 = vst [vmem:[#allocation26_spill] sm:$0xff] %v11271_v41  ;;  %v3415_v5 = vpack.c.bf16 %v11271_v41, %v11247_v49  ;;  %v3414_v27 = vpack.c.bf16 %v11268_v61, %v11244_v16  ;;  %4925 = vmatpush1.bf16.msra.mxu1 %v8824_v7  ;;  %v2839_v10 = vrot.slane %v11271_v41, 2  ;;  %v2837_v37 = vrot.slane %v11268_v61, 2  ;;  %v8832_v7 = vld [vmem:[%s14013_s3 + $0x244] ss:$8 sps:$4 sm:$0xff]  }
 0x22c   : > { %v2579_v18 = vsel %vm2570_vm4, %v8348_v39, %v8349_v54  ;;  %v2580_v53 = vsel %vm2570_vm4, %v8349_v54, %v8348_v39  ;;  %4761 = vmatprep.mubr.bf16.mxu0 %v3407_v55  ;;  %4926 = vmatprep.subr.bf16.mxu1 %v8829_v3  ;;  %v8854_v3 = vld [vmem:[%s14013_s3 + $0x360] ss:$8 sps:$4 sm:$0xff]  }
 0x22d   : > { %v11296_v44 = vmax.f32 %v10783_v63, %v2579_v18  ;;  %v11299_v19 = vmax.f32 %v10792_v1, %v2580_v53  ;;  %v8352_v11 = vpop.permute.xlu1 %8351  ;;  %4578 = vmatprep.mubr.bf16.mxu1 %v3415_v5  ;;  %4762 = vmatmul.mubr.bf16.vlgmr.msra.gmra.mxu0 %v3406_v35  ;;  %v8830_v63 = vld [vmem:[%s14013_s3 + $0x240] ss:$8 sps:$4 sm:$0xff]   ;;  %v8859_v1 = vld [vmem:[%s14013_s3 + $0x354] ss:$8 sps:$4 sm:$0xff]   ;;  %v2840_v5 = vsel %vm552_vm2, %v2835_v32, %v2839_v10 }
 0x22e   : > { %v8354_v54 = vunpack.i.h.bf16 %v8352_v11  ;;  %v8353_v39 = vunpack.i.l.bf16 %v8352_v11  ;;  %4579 = vmatmul.mubr.bf16.gmra.mxu1 %v3414_v27  ;;  %5116 = vmatpush1.bf16.msra.mxu0 %v8848_v59  ;;  %v2838_v27 = vsel %vm552_vm2, %v2833_v0, %v2837_v37 }
 0x22f   : > { %14388 = vst [vmem:[#allocation27_spill] sm:$0xff] %v11299_v19  ;;  %v2843_v55 = vrot.slane %v11299_v19, 2  ;;  %v2841_v20 = vrot.slane %v11296_v44, 2  ;;  %4927 = vmatpush1.bf16.msra.mxu1 %v8827_v58  ;;  %5117 = vmatprep.subr.bf16.mxu0 %v8856_v30  ;;  %v8835_v58 = vld [vmem:[%s14013_s3 + $0x234] ss:$8 sps:$4 sm:$0xff]  }
 0x230   : > { %v2581_v35 = vsel %vm2570_vm4, %v8353_v39, %v8354_v54  ;;  %v2582_v59 = vsel %vm2570_vm4, %v8354_v54, %v8353_v39  ;;  %4928 = vmatprep.subr.bf16.mxu1 %v8832_v7  ;;  %v8857_v7 = vld [vmem:[%s14013_s3 + $0x350] ss:$8 sps:$4 sm:$0xff]  }
 0x231   : > { %v11320_v18 = vmax.f32 %v10800_v17, %v2581_v35  ;;  %v11323_v30 = vmax.f32 %v10809_v45, %v2582_v59  ;;  %v8357_v53 = vpop.permute.xlu0 %8356  ;;  %v2844_v11 = vsel %vm552_vm2, %v2839_v10, %v2843_v55  ;;  %v2842_v54 = vsel %vm552_vm2, %v2837_v37, %v2841_v20  ;;  %v8833_v10 = vld [vmem:[%s14013_s3 + $0x230] ss:$8 sps:$4 sm:$0xff]   ;;  %v8865_v37 = vld [vmem:[%s14013_s3 + $0x344] ss:$8 sps:$4 sm:$0xff]  }
 0x232   : > { %v8359_v39 = vunpack.i.h.bf16 %v8357_v53  ;;  %v8358_v32 = vunpack.i.l.bf16 %v8357_v53  ;;  %v3417_v61 = vpack.c.bf16 %v2844_v11, %v2840_v5  ;;  %v3416_v0 = vpack.c.bf16 %v2842_v54, %v2838_v27  ;;  %5118 = vmatpush1.bf16.msra.mxu0 %v8854_v3 }
 0x233   : > { %v3425_v17 = vpack.c.bf16 %v11323_v30, %v11299_v19  ;;  %v3424_v45 = vpack.c.bf16 %v11320_v18, %v11296_v44  ;;  %4929 = vmatpush1.bf16.msra.mxu1 %v8830_v63  ;;  %5119 = vmatprep.subr.bf16.mxu0 %v8859_v1  ;;  %v2847_v59 = vrot.slane %v11323_v30, 2  ;;  %v2845_v5 = vrot.slane %v11320_v18, 2  ;;  %v8838_v63 = vld [vmem:[%s14013_s3 + $0x224] ss:$8 sps:$4 sm:$0xff]  }
 0x234   : > { %v2583_v3 = vsel %vm2570_vm4, %v8358_v32, %v8359_v39  ;;  %v2584_v35 = vsel %vm2570_vm4, %v8359_v39, %v8358_v32  ;;  %4771 = vmatprep.mubr.bf16.mxu0 %v3417_v61  ;;  %4930 = vmatprep.subr.bf16.mxu1 %v8835_v58  ;;  %v8863_v58 = vld [vmem:[%s14013_s3 + $0x340] ss:$8 sps:$4 sm:$0xff]  }
 0x235   : > { %v11348_v1 = vmax.f32 %v10817_v14, %v2583_v3  ;;  %v11351_v27 = vmax.f32 %v10826_v22, %v2584_v35  ;;  %v8362_v53 = vpop.permute.xlu1 %8361  ;;  %4588 = vmatprep.mubr.bf16.mxu1 %v3425_v17  ;;  %4772 = vmatmul.mubr.bf16.gmra.mxu0 %v3416_v0  ;;  %v8836_v14 = vld [vmem:[%s14013_s3 + $0x220] ss:$8 sps:$4 sm:$0xff]   ;;  %v8868_v22 = vld [vmem:[%s14013_s3 + $0x334] ss:$8 sps:$4 sm:$0xff]   ;;  %v2846_v17 = vsel %vm552_vm2, %v2841_v20, %v2845_v5 }
 0x236   : > { %v8364_v11 = vunpack.i.h.bf16 %v8362_v53  ;;  %v8363_v61 = vunpack.i.l.bf16 %v8362_v53  ;;  %4589 = vmatmul.mubr.bf16.gmra.mxu1 %v3424_v45  ;;  %5120 = vmatpush1.bf16.msra.mxu0 %v8857_v7  ;;  %v2848_v7 = vsel %vm552_vm2, %v2843_v55, %v2847_v59  ;;  %v8841_v45 = vld [vmem:[%s14013_s3 + $0x214] ss:$8 sps:$4 sm:$0xff]  }
 0x237   : > { %14389 = vst [vmem:[#allocation28_spill] sm:$0xff] %v11348_v1  ;;  %14390 = vst [vmem:[#allocation29_spill] sm:$0xff] %v11351_v27  ;;  %v2851_v54 = vrot.slane %v11351_v27, 2  ;;  %v2849_v39 = vrot.slane %v11348_v1, 2  ;;  %4931 = vmatpush1.bf16.msra.mxu1 %v8833_v10  ;;  %5121 = vmatprep.subr.bf16.mxu0 %v8865_v37 }
 0x238   : > { %v2585_v32 = vsel %vm2570_vm4, %v8363_v61, %v8364_v11  ;;  %v2586_v0 = vsel %vm2570_vm4, %v8364_v11, %v8363_v61  ;;  %4932 = vmatprep.subr.bf16.mxu1 %v8838_v63  ;;  %v8866_v63 = vld [vmem:[%s14013_s3 + $0x330] ss:$8 sps:$4 sm:$0xff]  }
 0x239   : > { %v11372_v10 = vmax.f32 %v10834_v6, %v2585_v32  ;;  %v11375_v37 = vmax.f32 %v10843_v25, %v2586_v0  ;;  %v8367_v3 = vpop.permute.xlu0 %8366  ;;  %v2852_v35 = vsel %vm552_vm2, %v2847_v59, %v2851_v54  ;;  %v2850_v53 = vsel %vm552_vm2, %v2845_v5, %v2849_v39  ;;  %v8839_v59 = vld [vmem:[%s14013_s3 + $0x210] ss:$8 sps:$4 sm:$0xff]   ;;  %v8874_v5 = vld [vmem:[%s14013_s3 + $0x324] ss:$8 sps:$4 sm:$0xff]  }
 0x23a   : > { %v8369_v11 = vunpack.i.h.bf16 %v8367_v3  ;;  %v8368_v55 = vunpack.i.l.bf16 %v8367_v3  ;;  %v3427_v61 = vpack.c.bf16 %v2852_v35, %v2848_v7  ;;  %v3426_v20 = vpack.c.bf16 %v2850_v53, %v2846_v17  ;;  %5122 = vmatpush1.bf16.msra.mxu0 %v8863_v58 }
 0x23b   : > { %14391 = vst [vmem:[#allocation31_spill] sm:$0xff] %v11372_v10  ;;  %14392 = vst [vmem:[#allocation32_spill] sm:$0xff] %v11375_v37  ;;  %v3435_v6 = vpack.c.bf16 %v11375_v37, %v11351_v27  ;;  %v3434_v25 = vpack.c.bf16 %v11372_v10, %v11348_v1  ;;  %4933 = vmatpush1.bf16.msra.mxu1 %v8836_v14  ;;  %5123 = vmatprep.subr.bf16.mxu0 %v8868_v22  ;;  %v2855_v0 = vrot.slane %v11375_v37, 2  ;;  %v8844_v14 = vld [vmem:[%s14013_s3 + $0x204] ss:$8 sps:$4 sm:$0xff]  }
 0x23c   : > { %v2587_v58 = vsel %vm2570_vm4, %v8368_v55, %v8369_v11  ;;  %v2588_v32 = vsel %vm2570_vm4, %v8369_v11, %v8368_v55  ;;  %4781 = vmatprep.mubr.bf16.mxu0 %v3427_v61  ;;  %v2853_v7 = vrot.slane %v11372_v10, 2  ;;  %4934 = vmatprep.subr.bf16.mxu1 %v8841_v45  ;;  %v8872_v45 = vld [vmem:[%s14013_s3 + $0x320] ss:$8 sps:$4 sm:$0xff]  }
 0x23d   : > { %v11400_v22 = vmax.f32 %v10851_v60, %v2587_v58  ;;  %v11403_v17 = vmax.f32 %v10860_v42, %v2588_v32  ;;  %v8372_v3 = vpop.permute.xlu1 %8371  ;;  %4598 = vmatprep.mubr.bf16.mxu1 %v3435_v6  ;;  %4782 = vmatmul.mubr.bf16.gmra.mxu0 %v3426_v20  ;;  %v8842_v60 = vld [vmem:[%s14013_s3 + $0x200] ss:$8 sps:$4 sm:$0xff]   ;;  %v8877_v42 = vld [vmem:[%s14013_s3 + $0x314] ss:$8 sps:$4 sm:$0xff]  }
 0x23e   : > { %v8374_v35 = vunpack.i.h.bf16 %v8372_v3  ;;  %v8373_v53 = vunpack.i.l.bf16 %v8372_v3  ;;  %4599 = vmatmul.mubr.bf16.gmra.mxu1 %v3434_v25  ;;  %5124 = vmatpush1.bf16.msra.mxu0 %v8866_v63  ;;  %v2856_v63 = vsel %vm552_vm2, %v2851_v54, %v2855_v0  ;;  %v2854_v6 = vsel %vm552_vm2, %v2849_v39, %v2853_v7  ;;  %v8847_v25 = vld [vmem:[%s14013_s3 + $0x2f4] ss:$8 sps:$4 sm:$0xff]  }
 0x23f   : > { %14393 = vst [vmem:[#allocation34_spill] sm:$0xff] %v11400_v22  ;;  %14394 = vst [vmem:[#allocation35_spill] sm:$0xff] %v11403_v17  ;;  %v2859_v11 = vrot.slane %v11403_v17, 2  ;;  %v2857_v55 = vrot.slane %v11400_v22, 2  ;;  %4935 = vmatpush1.bf16.msra.mxu1 %v8839_v59  ;;  %5125 = vmatprep.subr.bf16.mxu0 %v8874_v5  ;;  %v14396_v5 = vld [vmem:[#allocation7_spill] sm:$0xff] }
 0x240   : > { %v2589_v61 = vsel %vm2570_vm4, %v8373_v53, %v8374_v35  ;;  %v2590_v20 = vsel %vm2570_vm4, %v8374_v35, %v8373_v53  ;;  %4936 = vmatprep.subr.bf16.mxu1 %v8844_v14  ;;  %v8875_v14 = vld [vmem:[%s14013_s3 + $0x310] ss:$8 sps:$4 sm:$0xff]  }
 0x241   : > { %v11424_v59 = vmax.f32 %v10868_v13, %v2589_v61  ;;  %v11427_v58 = vmax.f32 %v14396_v5, %v2590_v20  ;;  %v8377_v32 = vpop.permute.xlu0 %8376  ;;  %v2860_v3 = vsel %vm552_vm2, %v2855_v0, %v2859_v11  ;;  %v2858_v35 = vsel %vm552_vm2, %v2853_v7, %v2857_v55  ;;  %v8845_v0 = vld [vmem:[%s14013_s3 + $0x2f0] ss:$8 sps:$4 sm:$0xff]   ;;  %v8883_v7 = vld [vmem:[%s14013_s3 + $0x304] ss:$8 sps:$4 sm:$0xff]  }
 0x242   : > { %v8379_v53 = vunpack.i.h.bf16 %v8377_v32  ;;  %v8378_v54 = vunpack.i.l.bf16 %v8377_v32  ;;  %v3437_v10 = vpack.c.bf16 %v2860_v3, %v2856_v63  ;;  %v3436_v39 = vpack.c.bf16 %v2858_v35, %v2854_v6  ;;  %5126 = vmatpush1.bf16.msra.mxu0 %v8872_v45  ;;  %v14398_v5 = vld [vmem:[#allocation30_spill] sm:$0xff]  ;;  %v14400_v32 = vld [vmem:[#allocation9_spill] sm:$0xff] }
 0x243   : > { %14395 = vst [vmem:[#allocation37_spill] sm:$0xff] %v11424_v59  ;;  %14397 = vst [vmem:[#allocation38_spill] sm:$0xff] %v11427_v58  ;;  %v3445_v13 = vpack.c.bf16 %v11427_v58, %v11403_v17  ;;  %v3444_v61 = vpack.c.bf16 %v11424_v59, %v11400_v22  ;;  %4937 = vmatpush1.bf16.msra.mxu1 %v8842_v60  ;;  %5127 = vmatprep.subr.bf16.mxu0 %v8877_v42  ;;  %v2863_v63 = vrot.slane %v11427_v58, 2  ;;  %v8853_v60 = vld [vmem:[%s14013_s3 + $0x2e4] ss:$8 sps:$4 sm:$0xff]  }
 0x244   : > { %v2591_v45 = vsel %vm2570_vm4, %v8378_v54, %v8379_v53  ;;  %v2592_v20 = vsel %vm2570_vm4, %v8379_v53, %v8378_v54  ;;  %4791 = vmatprep.mubr.bf16.mxu0 %v3437_v10  ;;  %v2861_v6 = vrot.slane %v11424_v59, 2  ;;  %4938 = vmatprep.subr.bf16.mxu1 %v8847_v25  ;;  %v8881_v25 = vld [vmem:[%s14013_s3 + $0x300] ss:$8 sps:$4 sm:$0xff]  }
 0x245   : > { %v11452_v42 = vmax.f32 %v14398_v5, %v2591_v45  ;;  %v11455_v3 = vmax.f32 %v14400_v32, %v2592_v20  ;;  %v8382_v35 = vpop.permute.xlu1 %8381  ;;  %4608 = vmatprep.mubr.bf16.mxu1 %v3445_v13  ;;  %4792 = vmatmul.mubr.bf16.gmra.mxu0 %v3436_v39  ;;  %v8851_v45 = vld [vmem:[%s14013_s3 + $0x2e0] ss:$8 sps:$4 sm:$0xff]   ;;  %v8886_v39 = vld [vmem:[%s14013_s3 + $0x3f4] ss:$8 sps:$4 sm:$0xff]  }
 0x246   : > { %v8384_v53 = vunpack.i.h.bf16 %v8382_v35  ;;  %v8383_v10 = vunpack.i.l.bf16 %v8382_v35  ;;  %4609 = vmatmul.mubr.bf16.gmra.mxu1 %v3444_v61  ;;  %5128 = vmatpush1.bf16.msra.mxu0 %v8875_v14  ;;  %v2864_v61 = vsel %vm552_vm2, %v2859_v11, %v2863_v63  ;;  %v2862_v20 = vsel %vm552_vm2, %v2857_v55, %v2861_v6  ;;  %v14401_v5 = vld [vmem:[#allocation33_spill] sm:$0xff] }
 0x247   : > { %14399 = vst [vmem:[#allocation40_spill] sm:$0xff] %v11452_v42  ;;  %v2867_v54 = vrot.slane %v11455_v3, 2  ;;  %v2865_v59 = vrot.slane %v11452_v42, 2  ;;  %4939 = vmatpush2.bf16.msra.mxu1 %v8845_v0  ;;  %5129 = vmatprep.subr.bf16.mxu0 %v8883_v7  ;;  %v8862_v0 = vld [vmem:[%s14013_s3 + $0x2d4] ss:$8 sps:$4 sm:$0xff]  }
 0x248   : > { %v2593_v14 = vsel %vm2570_vm4, %v8383_v10, %v8384_v53  ;;  %v2594_v13 = vsel %vm2570_vm4, %v8384_v53, %v8383_v10  ;;  %4940 = vmatprep.subr.bf16.mxu1 %v8853_v60  ;;  %v14403_v7 = vld [vmem:[#allocation8_spill] sm:$0xff] }
 0x249   : > { %v11476_v32 = vmax.f32 %v14401_v5, %v2593_v14  ;;  %v11479_v35 = vmax.f32 %v14403_v7, %v2594_v13  ;;  %v8387_v58 = vpop.permute.xlu0 %8386  ;;  %v2868_v22 = vsel %vm552_vm2, %v2863_v63, %v2867_v54  ;;  %v2866_v53 = vsel %vm552_vm2, %v2861_v6, %v2865_v59  ;;  %v8884_v60 = vld [vmem:[%s14013_s3 + $0x3f0] ss:$8 sps:$4 sm:$0xff]   ;;  %v14407_v5 = vld [vmem:[#allocation10_spill] sm:$0xff] }
 0x24a   : > { %v8389_v10 = vunpack.i.h.bf16 %v8387_v58  ;;  %v8388_v11 = vunpack.i.l.bf16 %v8387_v58  ;;  %v3447_v37 = vpack.c.bf16 %v2868_v22, %v2864_v61  ;;  %v3446_v55 = vpack.c.bf16 %v2866_v53, %v2862_v20  ;;  %5130 = vmatpush1.bf16.msra.mxu0 %v8881_v25  ;;  %v8860_v63 = vld [vmem:[%s14013_s3 + $0x2d0] ss:$8 sps:$4 sm:$0xff]   ;;  %v8892_v22 = vld [vmem:[%s14013_s3 + $0x3e4] ss:$8 sps:$4 sm:$0xff]  }
 0x24b   : > { %14402 = vst [vmem:[#allocation42_spill] sm:$0xff] %v11476_v32  ;;  %14404 = vst [vmem:[#allocation44_spill] sm:$0xff] %v11479_v35  ;;  %v3455_v14 = vpack.c.bf16 %v11479_v35, %v11455_v3  ;;  %v3454_v13 = vpack.c.bf16 %v11476_v32, %v11452_v42  ;;  %4941 = vmatpush2.bf16.msra.mxu1 %v8851_v45  ;;  %5131 = vmatprep.subr.bf16.mxu0 %v8886_v39  ;;  %v2871_v25 = vrot.slane %v11479_v35, 2  ;;  %v8871_v45 = vld [vmem:[%s14013_s3 + $0x2c4] ss:$8 sps:$4 sm:$0xff]   ;;  %v14405_v20 = vld [vmem:[#allocation36_spill] sm:$0xff] }
 0x24c   : > { %v2595_v58 = vsel %vm2570_vm4, %v8388_v11, %v8389_v10  ;;  %v2596_v6 = vsel %vm2570_vm4, %v8389_v10, %v8388_v11  ;;  %4801 = vmatprep.mubr.bf16.mxu0 %v3447_v37  ;;  %v2869_v61 = vrot.slane %v11476_v32, 2  ;;  %4942 = vmatprep.subr.bf16.mxu1 %v8862_v0  ;;  %v8890_v0 = vld [vmem:[%s14013_s3 + $0x3e0] ss:$8 sps:$4 sm:$0xff]  }
 0x24d   : > { %v11504_v39 = vmax.f32 %v14405_v20, %v2595_v58  ;;  %v11507_v7 = vmax.f32 %v14407_v5, %v2596_v6  ;;  %v8392_v53 = vpop.permute.xlu1 %8391  ;;  %4618 = vmatprep.mubr.bf16.mxu1 %v3455_v14  ;;  %4802 = vmatmul.mubr.bf16.gmra.mxu0 %v3446_v55  ;;  %v8869_v58 = vld [vmem:[%s14013_s3 + $0x2c0] ss:$8 sps:$4 sm:$0xff]   ;;  %v8895_v55 = vld [vmem:[%s14013_s3 + $0x3d4] ss:$8 sps:$4 sm:$0xff]  }
 0x24e   : > { %v8394_v10 = vunpack.i.h.bf16 %v8392_v53  ;;  %v8393_v37 = vunpack.i.l.bf16 %v8392_v53  ;;  %4619 = vmatmul.mubr.bf16.gmra.mxu1 %v3454_v13  ;;  %5132 = vmatpush2.bf16.msra.mxu0 %v8884_v60  ;;  %v2872_v13 = vsel %vm552_vm2, %v2867_v54, %v2871_v25  ;;  %v2870_v6 = vsel %vm552_vm2, %v2865_v59, %v2869_v61 }
 0x24f   : > { %14406 = vst [vmem:[#allocation45_spill] sm:$0xff] %v11504_v39  ;;  %14408 = vst [vmem:[#allocation47_spill] sm:$0xff] %v11507_v7  ;;  %v2875_v11 = vrot.slane %v11507_v7, 2  ;;  %v2873_v32 = vrot.slane %v11504_v39, 2  ;;  %4943 = vmatpush2.bf16.msra.mxu1 %v8860_v63  ;;  %5133 = vmatprep.subr.bf16.mxu0 %v8892_v22  ;;  %v8880_v63 = vld [vmem:[%s14013_s3 + $0x2b4] ss:$8 sps:$4 sm:$0xff]  }
 0x250   : > { %v2597_v60 = vsel %vm2570_vm4, %v8393_v37, %v8394_v10  ;;  %v2598_v14 = vsel %vm2570_vm4, %v8394_v10, %v8393_v37  ;;  %4944 = vmatprep.subr.bf16.mxu1 %v8871_v45  ;;  %v14410_v22 = vld [vmem:[#allocation39_spill] sm:$0xff] }
 0x251   : > { %v11528_v20 = vmax.f32 %v10936_v8, %v2597_v60  ;;  %v11531_v5 = vmax.f32 %v14410_v22, %v2598_v14  ;;  %v8397_v53 = vpop.permute.xlu0 %8396  ;;  %v2876_v35 = vsel %vm552_vm2, %v2871_v25, %v2875_v11  ;;  %v2874_v10 = vsel %vm552_vm2, %v2869_v61, %v2873_v32  ;;  %v8893_v45 = vld [vmem:[%s14013_s3 + $0x3d0] ss:$8 sps:$4 sm:$0xff]  }
 0x252   : > { %v8399_v37 = vunpack.i.h.bf16 %v8397_v53  ;;  %v8398_v54 = vunpack.i.l.bf16 %v8397_v53  ;;  %v3457_v42 = vpack.c.bf16 %v2876_v35, %v2872_v13  ;;  %v3456_v59 = vpack.c.bf16 %v2874_v10, %v2870_v6  ;;  %5134 = vmatpush2.bf16.msra.mxu0 %v8890_v0  ;;  %v8878_v25 = vld [vmem:[%s14013_s3 + $0x2b0] ss:$8 sps:$4 sm:$0xff]   ;;  %v8901_v35 = vld [vmem:[%s14013_s3 + $0x3c4] ss:$8 sps:$4 sm:$0xff]  }
 0x253   : > { %14409 = vst [vmem:[#allocation48_spill] sm:$0xff] %v11528_v20  ;;  %14411 = vst [vmem:[#allocation50_spill] sm:$0xff] %v11531_v5  ;;  %v3465_v8 = vpack.c.bf16 %v11531_v5, %v11507_v7  ;;  %v3464_v60 = vpack.c.bf16 %v11528_v20, %v11504_v39  ;;  %4945 = vmatpush2.bf16.msra.mxu1 %v8869_v58  ;;  %5135 = vmatprep.subr.bf16.mxu0 %v8895_v55  ;;  %v2879_v14 = vrot.slane %v11531_v5, 2  ;;  %v8889_v58 = vld [vmem:[%s14013_s3 + $0x2a4] ss:$8 sps:$4 sm:$0xff]   ;;  %v14413_v6 = vld [vmem:[#allocation11_spill] sm:$0xff] }
 0x254   : > { %v2599_v61 = vsel %vm2570_vm4, %v8398_v54, %v8399_v37  ;;  %v2600_v0 = vsel %vm2570_vm4, %v8399_v37, %v8398_v54  ;;  %4811 = vmatprep.mubr.bf16.mxu0 %v3457_v42  ;;  %v2877_v13 = vrot.slane %v11528_v20, 2  ;;  %4946 = vmatprep.subr.bf16.mxu1 %v8880_v63  ;;  %v8899_v63 = vld [vmem:[%s14013_s3 + $0x3c0] ss:$8 sps:$4 sm:$0xff]  }
 0x255   : > { %v11556_v55 = vmax.f32 %v10953_v62, %v2599_v61  ;;  %v11559_v22 = vmax.f32 %v14413_v6, %v2600_v0  ;;  %v8402_v53 = vpop.permute.xlu1 %8401  ;;  %4628 = vmatprep.mubr.bf16.mxu1 %v3465_v8  ;;  %4812 = vmatmul.mubr.bf16.gmra.mxu0 %v3456_v59  ;;  %v8887_v62 = vld [vmem:[%s14013_s3 + $0x2a0] ss:$8 sps:$4 sm:$0xff]   ;;  %v8904_v59 = vld [vmem:[%s14013_s3 + $0x3b4] ss:$8 sps:$4 sm:$0xff]  }
 0x256   : > { %v8404_v10 = vunpack.i.h.bf16 %v8402_v53  ;;  %v8403_v42 = vunpack.i.l.bf16 %v8402_v53  ;;  %4629 = vmatmul.mubr.bf16.gmra.mxu1 %v3464_v60  ;;  %5136 = vmatpush2.bf16.msra.mxu0 %v8893_v45  ;;  %v2880_v60 = vsel %vm552_vm2, %v2875_v11, %v2879_v14  ;;  %v2878_v61 = vsel %vm552_vm2, %v2873_v32, %v2877_v13 }
 0x257   : > { %14412 = vst [vmem:[#allocation51_spill] sm:$0xff] %v11556_v55  ;;  %v2883_v37 = vrot.slane %v11559_v22, 2  ;;  %v2881_v54 = vrot.slane %v11556_v55, 2  ;;  %4947 = vmatpush2.bf16.msra.mxu1 %v8878_v25  ;;  %5137 = vmatprep.subr.bf16.mxu0 %v8901_v35  ;;  %v8898_v25 = vld [vmem:[%s14013_s3 + $0x294] ss:$8 sps:$4 sm:$0xff]  }
 0x258   : > { %v2601_v45 = vsel %vm2570_vm4, %v8403_v42, %v8404_v10  ;;  %v2602_v8 = vsel %vm2570_vm4, %v8404_v10, %v8403_v42  ;;  %4948 = vmatprep.subr.bf16.mxu1 %v8889_v58  ;;  %v14415_v35 = vld [vmem:[#allocation43_spill] sm:$0xff] }
 0x259   : > { %v11580_v0 = vmax.f32 %v10970_v40, %v2601_v45  ;;  %v11583_v6 = vmax.f32 %v14415_v35, %v2602_v8  ;;  %v8407_v53 = vpop.permute.xlu0 %8406  ;;  %v2884_v20 = vsel %vm552_vm2, %v2879_v14, %v2883_v37  ;;  %v2882_v10 = vsel %vm552_vm2, %v2877_v13, %v2881_v54  ;;  %v8902_v58 = vld [vmem:[%s14013_s3 + $0x3b0] ss:$8 sps:$4 sm:$0xff]  }
 0x25a   : > { %v8409_v42 = vunpack.i.h.bf16 %v8407_v53  ;;  %v8408_v11 = vunpack.i.l.bf16 %v8407_v53  ;;  %v3467_v5 = vpack.c.bf16 %v2884_v20, %v2880_v60  ;;  %v3466_v32 = vpack.c.bf16 %v2882_v10, %v2878_v61  ;;  %5138 = vmatpush2.bf16.msra.mxu0 %v8899_v63  ;;  %v8896_v14 = vld [vmem:[%s14013_s3 + $0x290] ss:$8 sps:$4 sm:$0xff]   ;;  %v8910_v20 = vld [vmem:[%s14013_s3 + $0x3a4] ss:$8 sps:$4 sm:$0xff]  }
 0x25b   : > { %14414 = vst [vmem:[#allocation53_spill] sm:$0xff] %v11580_v0  ;;  %14416 = vst [vmem:[#allocation55_spill] sm:$0xff] %v11583_v6  ;;  %v3475_v40 = vpack.c.bf16 %v11583_v6, %v11559_v22  ;;  %v3474_v45 = vpack.c.bf16 %v11580_v0, %v11556_v55  ;;  %4949 = vmatpush2.bf16.msra.mxu1 %v8887_v62  ;;  %5139 = vmatprep.subr.bf16.mxu0 %v8904_v59  ;;  %v2887_v8 = vrot.slane %v11583_v6, 2  ;;  %v8907_v62 = vld [vmem:[%s14013_s3 + $0x284] ss:$8 sps:$4 sm:$0xff]   ;;  %v14418_v61 = vld [vmem:[#allocation12_spill] sm:$0xff] }
 0x25c   : > { %v2603_v13 = vsel %vm2570_vm4, %v8408_v11, %v8409_v42  ;;  %v2604_v63 = vsel %vm2570_vm4, %v8409_v42, %v8408_v11  ;;  %4821 = vmatprep.mubr.bf16.mxu0 %v3467_v5  ;;  %v2885_v60 = vrot.slane %v11580_v0, 2  ;;  %4950 = vmatprep.subr.bf16.mxu1 %v8898_v25  ;;  %v8908_v25 = vld [vmem:[%s14013_s3 + $0x3a0] ss:$8 sps:$4 sm:$0xff]  }
 0x25d   : > { %v11608_v59 = vmax.f32 %v10987_v56, %v2603_v13  ;;  %v11611_v35 = vmax.f32 %v14418_v61, %v2604_v63  ;;  %v8412_v53 = vpop.permute.xlu1 %8411  ;;  %4638 = vmatprep.mubr.bf16.mxu1 %v3475_v40  ;;  %4822 = vmatmul.mubr.bf16.gmra.mxu0 %v3466_v32  ;;  %v8905_v56 = vld [vmem:[%s14013_s3 + $0x280] ss:$8 sps:$4 sm:$0xff]   ;;  %v8913_v32 = vld [vmem:[%s14013_s3 + $0x394] ss:$8 sps:$4 sm:$0xff]  }
 0x25e   : > { %v8414_v10 = vunpack.i.h.bf16 %v8412_v53  ;;  %v8413_v5 = vunpack.i.l.bf16 %v8412_v53  ;;  %4639 = vmatmul.mubr.bf16.gmra.mxu1 %v3474_v45  ;;  %5140 = vmatpush2.bf16.msra.mxu0 %v8902_v58  ;;  %v2888_v45 = vsel %vm552_vm2, %v2883_v37, %v2887_v8  ;;  %v2886_v13 = vsel %vm552_vm2, %v2881_v54, %v2885_v60 }
 0x25f   : > { %14417 = vst [vmem:[#allocation57_spill] sm:$0xff] %v11608_v59  ;;  %14419 = vst [vmem:[#allocation56_spill] sm:$0xff] %v11611_v35  ;;  %v2891_v42 = vrot.slane %v11611_v35, 2  ;;  %v2889_v11 = vrot.slane %v11608_v59, 2  ;;  %4951 = vmatpush2.bf16.msra.mxu1 %v8896_v14  ;;  %5141 = vmatprep.subr.bf16.mxu0 %v8910_v20  ;;  %v8916_v14 = vld [vmem:[%s14013_s3 + $0x474] ss:$8 sps:$4 sm:$0xff]  }
 0x260   : > { %v2605_v58 = vsel %vm2570_vm4, %v8413_v5, %v8414_v10  ;;  %v2606_v40 = vsel %vm2570_vm4, %v8414_v10, %v8413_v5  ;;  %4952 = vmatprep.subr.bf16.mxu1 %v8907_v62  ;;  %v14421_v20 = vld [vmem:[#allocation46_spill] sm:$0xff]  ;;  %v8911_v62 = vld [vmem:[%s14013_s3 + $0x390] ss:$8 sps:$4 sm:$0xff]  }
 0x261   : > { %v11632_v63 = vmax.f32 %v11004_v51, %v2605_v58  ;;  %v11635_v61 = vmax.f32 %v14421_v20, %v2606_v40  ;;  %v8417_v53 = vpop.permute.xlu0 %8416  ;;  %v2892_v0 = vsel %vm552_vm2, %v2887_v8, %v2891_v42  ;;  %v2890_v10 = vsel %vm552_vm2, %v2885_v60, %v2889_v11  ;;  %v8919_v8 = vld [vmem:[%s14013_s3 + $0x384] ss:$8 sps:$4 sm:$0xff]  }
 0x262   : > { %v8419_v5 = vunpack.i.h.bf16 %v8417_v53  ;;  %v8418_v37 = vunpack.i.l.bf16 %v8417_v53  ;;  %v3477_v6 = vpack.c.bf16 %v2892_v0, %v2888_v45  ;;  %v3476_v54 = vpack.c.bf16 %v2890_v10, %v2886_v13  ;;  %5142 = vmatpush2.bf16.msra.mxu0 %v8908_v25  ;;  %v14423_v45 = vld [vmem:[#allocation13_spill] sm:$0xff] }
 0x263   : > { %14420 = vst [vmem:[#allocation7_spill] sm:$0xff] %v11632_v63  ;;  %14422 = vst [vmem:[#allocation30_spill] sm:$0xff] %v11635_v61  ;;  %v3485_v51 = vpack.c.bf16 %v11635_v61, %v11611_v35  ;;  %v3484_v58 = vpack.c.bf16 %v11632_v63, %v11608_v59  ;;  %4953 = vmatpush2.bf16.msra.mxu1 %v8905_v56  ;;  %5143 = vmatprep.subr.bf16.mxu0 %v8913_v32  ;;  %v2895_v25 = vrot.slane %v11635_v61, 2  ;;  %v14425_v20 = vld [vmem:[#allocation49_spill] sm:$0xff] }
 0x264   : > { %v2607_v0 = vsel %vm2570_vm4, %v8418_v37, %v8419_v5  ;;  %v2608_v60 = vsel %vm2570_vm4, %v8419_v5, %v8418_v37  ;;  %4831 = vmatprep.mubr.bf16.mxu0 %v3477_v6  ;;  %v2893_v40 = vrot.slane %v11632_v63, 2  ;;  %5308 = vmatprep.subr.bf16.mxu1 %v8916_v14  ;;  %v8917_v6 = vld [vmem:[%s14013_s3 + $0x380] ss:$8 sps:$4 sm:$0xff]  }
 0x265   : > { %v11654_v13 = vmax.f32 %v14423_v45, %v2607_v0  ;;  %v11657_v56 = vmax.f32 %v14425_v20, %v2608_v60  ;;  %v8422_v32 = vpop.permute.xlu1 %8421  ;;  %4648 = vmatprep.mubr.bf16.mxu1 %v3485_v51  ;;  %4832 = vmatmul.mubr.bf16.gmra.mxu0 %v3476_v54  ;;  %v2896_v51 = vsel %vm552_vm2, %v2891_v42, %v2895_v25 }
 0x266   : > { %v8424_v53 = vunpack.i.h.bf16 %v8422_v32  ;;  %v8423_v10 = vunpack.i.l.bf16 %v8422_v32  ;;  %4649 = vmatmul.mubr.bf16.gmra.mxu1 %v3484_v58  ;;  %5144 = vmatpush2.bf16.msra.mxu0 %v8911_v62  ;;  %v2894_v54 = vsel %vm552_vm2, %v2889_v11, %v2893_v40 }
 0x267   : > { %14424 = vst [vmem:[#allocation9_spill] sm:$0xff] %v11654_v13  ;;  %14426 = vst [vmem:[#allocation33_spill] sm:$0xff] %v11657_v56  ;;  %v2899_v5 = vrot.slane %v11657_v56, 2  ;;  %v2897_v14 = vrot.slane %v11654_v13, 2  ;;  %5145 = vmatprep.subr.bf16.mxu0 %v8919_v8 }
 0x268   : > { %v2609_v37 = vsel %vm2570_vm4, %v8423_v10, %v8424_v53  ;;  %v2610_v0 = vsel %vm2570_vm4, %v8424_v53, %v8423_v10  ;;  %v14429_v10 = vld [vmem:[#allocation14_spill] sm:$0xff] }
 0x269   : > { %v11669_v58 = vmax.f32 %v11041_v26, %v2609_v37  ;;  %v11672_v62 = vmax.f32 %v11050_v34, %v2610_v0  ;;  %v8427_v60 = vpop.permute.xlu0 %8426  ;;  %v2900_v45 = vsel %vm552_vm2, %v2895_v25, %v2899_v5  ;;  %v2898_v20 = vsel %vm552_vm2, %v2893_v40, %v2897_v14 }
 0x26a   : > { %v8429_v8 = vunpack.i.h.bf16 %v8427_v60  ;;  %v8428_v32 = vunpack.i.l.bf16 %v8427_v60  ;;  %v3487_v63 = vpack.c.bf16 %v2900_v45, %v2896_v51  ;;  %v3486_v61 = vpack.c.bf16 %v2898_v20, %v2894_v54  ;;  %5146 = vmatpush2.bf16.msra.mxu0 %v8917_v6 }
 0x26b   : > { %14427 = vst [vmem:[#allocation8_spill] sm:$0xff] %v11669_v58  ;;  %14428 = vst [vmem:[#allocation36_spill] sm:$0xff] %v11672_v62  ;;  %v3495_v42 = vpack.c.bf16 %v11672_v62, %v11657_v56  ;;  %v3494_v26 = vpack.c.bf16 %v11669_v58, %v11654_v13  ;;  %v2903_v25 = vrot.slane %v11672_v62, 2  ;;  %v2901_v40 = vrot.slane %v11669_v58, 2 }
 0x26c   : > { %v2611_v11 = vsel %vm2570_vm4, %v8428_v32, %v8429_v8  ;;  %v2612_v34 = vsel %vm2570_vm4, %v8429_v8, %v8428_v32  ;;  %4841 = vmatprep.mubr.bf16.mxu0 %v3487_v63  ;;  %v14432_v32 = vld [vmem:[#allocation52_spill] sm:$0xff] }
 0x26d   : > { %v11685_v53 = vmax.f32 %v11058_v12, %v2611_v11  ;;  %v11688_v6 = vmax.f32 %v14429_v10, %v2612_v34  ;;  %v8432_v37 = vpop.permute.xlu1 %8431  ;;  %4658 = vmatprep.mubr.bf16.mxu1 %v3495_v42  ;;  %4842 = vmatmul.mubr.bf16.gmra.mxu0 %v3486_v61  ;;  %v2904_v12 = vsel %vm552_vm2, %v2899_v5, %v2903_v25 }
 0x26e   : > { %v8434_v0 = vunpack.i.h.bf16 %v8432_v37  ;;  %v8433_v51 = vunpack.i.l.bf16 %v8432_v37  ;;  %4659 = vmatmul.mubr.bf16.gmra.mxu1 %v3494_v26  ;;  %v2902_v20 = vsel %vm552_vm2, %v2897_v14, %v2901_v40 }
 0x26f   : > { %14430 = vst [vmem:[#allocation10_spill] sm:$0xff] %v11688_v6  ;;  %v2907_v54 = vrot.slane %v11688_v6, 2  ;;  %v2905_v63 = vrot.slane %v11685_v53, 2 }
 0x270   : > { %v2613_v60 = vsel %vm2570_vm4, %v8433_v51, %v8434_v0  ;;  %v2614_v45 = vsel %vm2570_vm4, %v8434_v0, %v8433_v51 }
 0x271   : > { %v11697_v8 = vmax.f32 %v11075_v24, %v2613_v60  ;;  %v11700_v61 = vmax.f32 %v14432_v32, %v2614_v45  ;;  %v8437_v42 = vpop.permute.xlu0 %8436  ;;  %v2908_v26 = vsel %vm552_vm2, %v2903_v25, %v2907_v54  ;;  %v2906_v11 = vsel %vm552_vm2, %v2901_v40, %v2905_v63  ;;  %v14435_v60 = vld [vmem:[#allocation15_spill] sm:$0xff] }
 0x272   : > { %v8439_v34 = vunpack.i.h.bf16 %v8437_v42  ;;  %v8438_v10 = vunpack.i.l.bf16 %v8437_v42  ;;  %v3497_v37 = vpack.c.bf16 %v2908_v26, %v2904_v12  ;;  %v3496_v58 = vpack.c.bf16 %v2906_v11, %v2902_v20 }
 0x273   : > { %14431 = vst [vmem:[#allocation39_spill] sm:$0xff] %v11697_v8  ;;  %14433 = vst [vmem:[#allocation11_spill] sm:$0xff] %v11700_v61  ;;  %v3505_v5 = vpack.c.bf16 %v11700_v61, %v11688_v6  ;;  %v3504_v14 = vpack.c.bf16 %v11697_v8, %v11685_v53  ;;  %v2911_v51 = vrot.slane %v11700_v61, 2  ;;  %v2909_v25 = vrot.slane %v11697_v8, 2 }
 0x274   : > { %v2615_v24 = vsel %vm2570_vm4, %v8438_v10, %v8439_v34  ;;  %v2616_v0 = vsel %vm2570_vm4, %v8439_v34, %v8438_v10  ;;  %4851 = vmatprep.mubr.bf16.mxu0 %v3497_v37 }
 0x275   : > { %v11713_v40 = vmax.f32 %v11092_v48, %v2615_v24  ;;  %v11716_v45 = vmax.f32 %v14435_v60, %v2616_v0  ;;  %v8442_v12 = vpop.permute.xlu1 %8441  ;;  %4668 = vmatprep.mubr.bf16.mxu1 %v3505_v5  ;;  %4852 = vmatmul.mubr.bf16.gmra.mxu0 %v3496_v58  ;;  %v2912_v48 = vsel %vm552_vm2, %v2907_v54, %v2911_v51  ;;  %v14437_v5 = vld [vmem:[#allocation16_spill] sm:$0xff] }
 0x276   : > { %v8444_v20 = vunpack.i.h.bf16 %v8442_v12  ;;  %v8443_v32 = vunpack.i.l.bf16 %v8442_v12  ;;  %4669 = vmatmul.mubr.bf16.gmra.mxu1 %v3504_v14  ;;  %v2910_v10 = vsel %vm552_vm2, %v2905_v63, %v2909_v25 }
 0x277   : > { %14434 = vst [vmem:[#allocation43_spill] sm:$0xff] %v11713_v40  ;;  %v2915_v42 = vrot.slane %v11716_v45, 2  ;;  %v2913_v26 = vrot.slane %v11713_v40, 2 }
 0x278   : > { %v2617_v11 = vsel %vm2570_vm4, %v8443_v32, %v8444_v20  ;;  %v2618_v34 = vsel %vm2570_vm4, %v8444_v20, %v8443_v32 }
 0x279   : > { %v11725_v37 = vmax.f32 %v11109_v9, %v2617_v11  ;;  %v11728_v58 = vmax.f32 %v14437_v5, %v2618_v34  ;;  %v8447_v24 = vpop.permute.xlu0 %8446  ;;  %v2916_v14 = vsel %vm552_vm2, %v2911_v51, %v2915_v42  ;;  %v2914_v0 = vsel %vm552_vm2, %v2909_v25, %v2913_v26  ;;  %v14439_v25 = vld [vmem:[#allocation17_spill] sm:$0xff]  ;;  %v14440_v34 = vld [vmem:[#allocation54_spill] sm:$0xff] }
 0x27a   : > { %v8449_v60 = vunpack.i.h.bf16 %v8447_v24  ;;  %v8448_v12 = vunpack.i.l.bf16 %v8447_v24  ;;  %v3507_v8 = vpack.c.bf16 %v2916_v14, %v2912_v48  ;;  %v3506_v61 = vpack.c.bf16 %v2914_v0, %v2910_v10 }
 0x27b   : > { %14436 = vst [vmem:[#allocation12_spill] sm:$0xff] %v11725_v37  ;;  %14438 = vst [vmem:[#allocation46_spill] sm:$0xff] %v11728_v58  ;;  %v3515_v54 = vpack.c.bf16 %v11728_v58, %v11716_v45  ;;  %v3514_v63 = vpack.c.bf16 %v11725_v37, %v11713_v40  ;;  %v2919_v32 = vrot.slane %v11728_v58, 2  ;;  %v2917_v51 = vrot.slane %v11725_v37, 2 }
 0x27c   : > { %v2619_v9 = vsel %vm2570_vm4, %v8448_v12, %v8449_v60  ;;  %v2620_v20 = vsel %vm2570_vm4, %v8449_v60, %v8448_v12  ;;  %4861 = vmatprep.mubr.bf16.mxu0 %v3507_v8 }
 0x27d   : > { %v11741_v11 = vmax.f32 %v14439_v25, %v2619_v9  ;;  %v11744_v48 = vmax.f32 %v14440_v34, %v2620_v20  ;;  %v8452_v10 = vpop.permute.xlu1 %8451  ;;  %4678 = vmatprep.mubr.bf16.mxu1 %v3515_v54  ;;  %4862 = vmatmul.mubr.bf16.gmra.mxu0 %v3506_v61  ;;  %v2920_v12 = vsel %vm552_vm2, %v2915_v42, %v2919_v32  ;;  %v14442_v54 = vld [vmem:[#allocation18_spill] sm:$0xff] }
 0x27e   : > { %v8454_v5 = vunpack.i.h.bf16 %v8452_v10  ;;  %v8453_v24 = vunpack.i.l.bf16 %v8452_v10  ;;  %4679 = vmatmul.mubr.bf16.gmra.mxu1 %v3514_v63  ;;  %v2918_v9 = vsel %vm552_vm2, %v2913_v26, %v2917_v51 }
 0x27f   : > { %v2923_v14 = vrot.slane %v11744_v48, 2  ;;  %v2921_v8 = vrot.slane %v11741_v11, 2 }
 0x280   : > { %v2621_v0 = vsel %vm2570_vm4, %v8453_v24, %v8454_v5  ;;  %v2622_v60 = vsel %vm2570_vm4, %v8454_v5, %v8453_v24 }
 0x281   : > { %v11753_v20 = vmax.f32 %v11139_v21, %v2621_v0  ;;  %v11756_v61 = vmax.f32 %v14442_v54, %v2622_v60  ;;  %v8457_v25 = vpop.permute.xlu0 %8456  ;;  %v2924_v63 = vsel %vm552_vm2, %v2919_v32, %v2923_v14  ;;  %v2922_v34 = vsel %vm552_vm2, %v2917_v51, %v2921_v8 }
 0x282   : > { %v8459_v10 = vunpack.i.h.bf16 %v8457_v25  ;;  %v8458_v37 = vunpack.i.l.bf16 %v8457_v25  ;;  %v3517_v58 = vpack.c.bf16 %v2924_v63, %v2920_v12  ;;  %v3516_v40 = vpack.c.bf16 %v2922_v34, %v2918_v9 }
 0x283   : > { %14441 = vst [vmem:[#allocation13_spill] sm:$0xff] %v11753_v20  ;;  %14443 = vst [vmem:[#allocation49_spill] sm:$0xff] %v11756_v61  ;;  %v3525_v42 = vpack.c.bf16 %v11756_v61, %v11744_v48  ;;  %v3524_v26 = vpack.c.bf16 %v11753_v20, %v11741_v11  ;;  %v2927_v24 = vrot.slane %v11756_v61, 2  ;;  %v2925_v32 = vrot.slane %v11753_v20, 2 }
 0x284   : > { %v2623_v21 = vsel %vm2570_vm4, %v8458_v37, %v8459_v10  ;;  %v2624_v5 = vsel %vm2570_vm4, %v8459_v10, %v8458_v37  ;;  %4871 = vmatprep.mubr.bf16.mxu0 %v3517_v58 }
 0x285   : > { %v11769_v51 = vmax.f32 %v11153_v38, %v2623_v21  ;;  %v11772_v0 = vmax.f32 %v11159_v46, %v2624_v5  ;;  %v8462_v60 = vpop.permute.xlu1 %8461  ;;  %4688 = vmatprep.mubr.bf16.mxu1 %v3525_v42  ;;  %4872 = vmatmul.mubr.bf16.gmra.mxu0 %v3516_v40  ;;  %v2928_v38 = vsel %vm552_vm2, %v2923_v14, %v2927_v24 }
 0x286   : > { %v8464_v12 = vunpack.i.h.bf16 %v8462_v60  ;;  %v8463_v9 = vunpack.i.l.bf16 %v8462_v60  ;;  %4689 = vmatmul.mubr.bf16.gmra.mxu1 %v3524_v26  ;;  %v2926_v63 = vsel %vm552_vm2, %v2921_v8, %v2925_v32 }
 0x287   : > { %14444 = vst [vmem:[#allocation14_spill] sm:$0xff] %v11769_v51  ;;  %v2931_v54 = vrot.slane %v11772_v0, 2  ;;  %v2929_v37 = vrot.slane %v11769_v51, 2 }
 0x288   : > { %v2625_v58 = vsel %vm2570_vm4, %v8463_v9, %v8464_v12  ;;  %v2626_v25 = vsel %vm2570_vm4, %v8464_v12, %v8463_v9 }
 0x289   : > { %v11781_v46 = vmax.f32 %v11166_v15, %v2625_v58  ;;  %v11784_v40 = vmax.f32 %v11170_v47, %v2626_v25  ;;  %v8467_v34 = vpop.permute.xlu0 %8466  ;;  %v2932_v10 = vsel %vm552_vm2, %v2927_v24, %v2931_v54  ;;  %v2930_v42 = vsel %vm552_vm2, %v2925_v32, %v2929_v37 }
 0x28a   : > { %v8469_v26 = vunpack.i.h.bf16 %v8467_v34  ;;  %v8468_v21 = vunpack.i.l.bf16 %v8467_v34  ;;  %v3527_v5 = vpack.c.bf16 %v2932_v10, %v2928_v38  ;;  %v3526_v60 = vpack.c.bf16 %v2930_v42, %v2926_v63 }
 0x28b   : > { %14445 = vst [vmem:[#allocation52_spill] sm:$0xff] %v11784_v40  ;;  %v3535_v14 = vpack.c.bf16 %v11784_v40, %v11772_v0  ;;  %v3534_v8 = vpack.c.bf16 %v11781_v46, %v11769_v51  ;;  %v2935_v12 = vrot.slane %v11784_v40, 2  ;;  %v2933_v24 = vrot.slane %v11781_v46, 2 }
 0x28c   : > { %v2627_v15 = vsel %vm2570_vm4, %v8468_v21, %v8469_v26  ;;  %v2628_v47 = vsel %vm2570_vm4, %v8469_v26, %v8468_v21  ;;  %4881 = vmatprep.mubr.bf16.mxu0 %v3527_v5 }
 0x28d   : > { %v11797_v32 = vmax.f32 %v11175_v43, %v2627_v15  ;;  %v11800_v9 = vmax.f32 %v11179_v29, %v2628_v47  ;;  %v8472_v58 = vpop.permute.xlu1 %8471  ;;  %4698 = vmatprep.mubr.bf16.mxu1 %v3535_v14  ;;  %4882 = vmatmul.mubr.bf16.gmra.mxu0 %v3526_v60  ;;  %v2936_v43 = vsel %vm552_vm2, %v2931_v54, %v2935_v12 }
 0x28e   : > { %v8474_v25 = vunpack.i.h.bf16 %v8472_v58  ;;  %v8473_v38 = vunpack.i.l.bf16 %v8472_v58  ;;  %4699 = vmatmul.mubr.bf16.gmra.mxu1 %v3534_v8  ;;  %v2934_v26 = vsel %vm552_vm2, %v2929_v37, %v2933_v24 }
 0x28f   : > { %14446 = vst [vmem:[#allocation15_spill] sm:$0xff] %v11797_v32  ;;  %v2939_v63 = vrot.slane %v11800_v9, 2  ;;  %v2937_v34 = vrot.slane %v11797_v32, 2 }
 0x290   : > { %v2629_v10 = vsel %vm2570_vm4, %v8473_v38, %v8474_v25  ;;  %v2630_v42 = vsel %vm2570_vm4, %v8474_v25, %v8473_v38 }
 0x291   : > { %v11809_v29 = vmax.f32 %v11184_v23, %v2629_v10  ;;  %v11812_v21 = vmax.f32 %v11188_v2, %v2630_v42  ;;  %v8482_v5 = vpop.permute.xlu1 %8481  ;;  %v8477_v60 = vpop.permute.xlu0 %8476  ;;  %v2940_v14 = vsel %vm552_vm2, %v2935_v12, %v2939_v63  ;;  %v2938_v8 = vsel %vm552_vm2, %v2933_v24, %v2937_v34 }
 0x292   : > { %v8484_v15 = vunpack.i.h.bf16 %v8482_v5  ;;  %v8483_v47 = vunpack.i.l.bf16 %v8482_v5  ;;  %v8479_v58 = vunpack.i.h.bf16 %v8477_v60  ;;  %v8478_v25 = vunpack.i.l.bf16 %v8477_v60 }
 0x293   : > { %14447 = vst [vmem:[#allocation16_spill] sm:$0xff] %v11809_v29  ;;  %14448 = vst [vmem:[#allocation17_spill] sm:$0xff] %v11812_v21  ;;  %v3537_v38 = vpack.c.bf16 %v2940_v14, %v2936_v43  ;;  %v3545_v54 = vpack.c.bf16 %v11812_v21, %v11800_v9  ;;  %v3536_v37 = vpack.c.bf16 %v2938_v8, %v2934_v26  ;;  %v2943_v26 = vrot.slane %v11812_v21, 2 }
 0x294   : > { %v3544_v23 = vpack.c.bf16 %v11809_v29, %v11797_v32  ;;  %v2634_v2 = vsel %vm2570_vm4, %v8484_v15, %v8483_v47  ;;  %v2631_v10 = vsel %vm2570_vm4, %v8478_v25, %v8479_v58  ;;  %v2632_v12 = vsel %vm2570_vm4, %v8479_v58, %v8478_v25 }
 0x295   : > { %v2633_v24 = vsel %vm2570_vm4, %v8483_v47, %v8484_v15  ;;  %v11825_v42 = vmax.f32 %v11202_v36, %v2634_v2  ;;  %v11828_v43 = vmax.f32 %v11195_v52, %v2631_v10  ;;  %v11831_v5 = vmax.f32 %v11205_v28, %v2632_v12  ;;  %4891 = vmatprep.mubr.bf16.mxu0 %v3537_v38 }
 0x296   : > { %4708 = vmatprep.mubr.bf16.mxu1 %v3545_v54  ;;  %4892 = vmatmul.mubr.bf16.gmra.mxu0 %v3536_v37  ;;  %v2941_v60 = vrot.slane %v11809_v29, 2  ;;  %v3027_v52 = vrot.slane %v11247_v49, 4  ;;  %v11841_v28 = vmax.f32 %v11200_v50, %v2633_v24  ;;  %v3023_v47 = vrot.slane %v11224_v4, 4 }
 0x297   : > { %14449 = vst [vmem:[#allocation54_spill] sm:$0xff] %v11825_v42  ;;  %14450 = vst [vmem:[#allocation18_spill] sm:$0xff] %v11831_v5  ;;  %4709 = vmatmul.mubr.bf16.gmra.mxu1 %v3544_v23  ;;  %v3555_v14 = vpack.c.bf16 %v11825_v42, %v11831_v5  ;;  %v2947_v36 = vrot.slane %v11831_v5, 2  ;;  %v2945_v8 = vrot.slane %v11828_v43, 2  ;;  %v2951_v15 = vrot.slane %v11825_v42, 2 }
 0x298   : > { %14451 = vst [vmem:[#allocation58_spill] sm:$0xff] %v11841_v28  ;;  %v2944_v58 = vsel %vm552_vm2, %v2939_v63, %v2943_v26  ;;  %v2942_v38 = vsel %vm552_vm2, %v2937_v34, %v2941_v60  ;;  %v14452_v50 = vrot.slane %v11218_v31, 2  ;;  %v14104_v12 = vrot.slane %v11218_v31, 4 }
 0x299   : > { %4718 = vmatprep.mubr.bf16.mxu1 %v3555_v14  ;;  %v2948_v25 = vsel %vm552_vm2, %v2943_v26, %v2947_v36  ;;  %v2946_v54 = vsel %vm552_vm2, %v2941_v60, %v2945_v8  ;;  %v2952_v2 = vsel %vm552_vm2, %v2947_v36, %v2951_v15  ;;  %v3028_v24 = vsel %vm746_vm3, %v3023_v47, %v3027_v52 }
 0x29a   : > { %v3547_v37 = vpack.c.bf16 %v2948_v25, %v2944_v58  ;;  %v3546_v23 = vpack.c.bf16 %v2946_v54, %v2942_v38  ;;  %v2954_v10 = vsel %vm552_vm2, %v2951_v15, %v14452_v50  ;;  %v3554_v63 = vpack.c.bf16 %v11841_v28, %v11828_v43 }
 0x29b   : > { %v3557_v26 = vpack.c.bf16 %v2954_v10, %v2952_v2  ;;  %v3024_v34 = vsel %vm746_vm3, %v14104_v12, %v3023_v47  ;;  %v2949_v60 = vrot.slane %v11841_v28, 2  ;;  %v3025_v14 = vrot.slane %v11244_v16, 4 }
 0x29c   : > { %4901 = vmatprep.mubr.bf16.mxu0 %v3547_v37  ;;  %v3409_v36 = vpack.c.bf16 %v3028_v24, %v3024_v34  ;;  %v3220_v15 = vrot.slane %v11247_v49, 6  ;;  %v3035_v58 = vrot.slane %v11299_v19, 4  ;;  %v3020_v25 = vrot.slane %v11221_v33, 4 }
 0x29d   : > { %v3216_v38 = vrot.slane %v11224_v4, 6  ;;  %v2950_v54 = vsel %vm552_vm2, %v2945_v8, %v2949_v60  ;;  %v14453_v47 = vrot.slane %v11227_v57, 2  ;;  %v14107_v2 = vrot.slane %v11227_v57, 4 }
 0x29e   : > { %4902 = vmatmul.mubr.bf16.gmra.mxu0 %v3546_v23  ;;  %v3031_v23 = vrot.slane %v11271_v41, 4  ;;  %v3026_v50 = vsel %vm746_vm3, %v3020_v25, %v3025_v14  ;;  %v14106_v10 = vrot.slane %v11218_v31, 6  ;;  %v3226_v29 = vrot.slane %v11296_v44, 6 }
 0x29f   : > { %4719 = vmatmul.mubr.bf16.gmra.mxu1 %v3554_v63  ;;  %4911 = vmatprep.mubr.bf16.mxu0 %v3557_v26  ;;  %v2953_v37 = vsel %vm552_vm2, %v2949_v60, %v14453_v47  ;;  %v3221_v24 = vsel %vm3211_vm5, %v3216_v38, %v3220_v15  ;;  %v3021_v8 = vsel %vm746_vm3, %v14107_v2, %v3020_v25  ;;  %v8914_v60 = vld [vmem:[%s14013_s3 + $0x470] ss:$8 sps:$4 sm:$0xff]   ;;  %v3043_v2 = vrot.slane %v11351_v27, 4 }
 0x2a0   : > { %4954 = vmatprep.mubr.bf16.mxu1 %v3409_v36  ;;  %v3036_v63 = vsel %vm746_vm3, %v3031_v23, %v3035_v58  ;;  %v3556_v26 = vpack.c.bf16 %v2953_v37, %v2950_v54  ;;  %v3217_v34 = vsel %vm3211_vm5, %v14106_v10, %v3216_v38  ;;  %v3218_v36 = vrot.slane %v11244_v16, 6  ;;  %v8922_v54 = vld [vmem:[%s14013_s3 + $0x464] ss:$8 sps:$4 sm:$0xff]  }
 0x2a1   : > { %v3408_v47 = vpack.c.bf16 %v3026_v50, %v3021_v8  ;;  %v3411_v12 = vpack.c.bf16 %v3221_v24, %v3217_v34  ;;  %v3032_v49 = vsel %vm746_vm3, %v3027_v52, %v3031_v23  ;;  %v3033_v37 = vrot.slane %v11296_v44, 4  ;;  %v14454_v50 = vld [vmem:[#allocation25_spill] sm:$0xff] }
 0x2a2   : > { %v3419_v25 = vpack.c.bf16 %v3036_v63, %v3032_v49  ;;  %v3228_v38 = vrot.slane %v11299_v19, 6  ;;  %v3213_v10 = vrot.slane %v11221_v33, 6  ;;  %v3029_v52 = vrot.slane %v14454_v50, 4  ;;  %v8920_v49 = vld [vmem:[%s14013_s3 + $0x460] ss:$8 sps:$4 sm:$0xff]  }
 0x2a3   : > { %v3224_v23 = vrot.slane %v11271_v41, 6  ;;  %v14115_v24 = vrot.slane %v11227_v57, 6  ;;  %v8923_v41 = vld [vmem:[%s14013_s3 + $0x450] ss:$8 sps:$4 sm:$0xff]  }
 0x2a4   : > { %v3219_v63 = vsel %vm3211_vm5, %v3213_v10, %v3218_v36  ;;  %v3034_v8 = vsel %vm746_vm3, %v3029_v52, %v3033_v37  ;;  %v3030_v19 = vsel %vm746_vm3, %v3025_v14, %v3029_v52  ;;  %v3236_v52 = vrot.slane %v11351_v27, 6 }
 0x2a5   : > { %v3229_v34 = vsel %vm3211_vm5, %v3224_v23, %v3228_v38  ;;  %v3418_v16 = vpack.c.bf16 %v3034_v8, %v3030_v19  ;;  %v3222_v19 = vrot.slane %v14454_v50, 6 }
 0x2a6   : > { %4912 = vmatmul.mubr.bf16.gmra.mxu0 %v3556_v26  ;;  %v3039_v26 = vrot.slane %v11323_v30, 4 }
 0x2a7   : > { %4955 = vmatmul.mubr.bf16.vlgmr.msra.gmra.mxu1 %v3408_v47  ;;  %5147 = vmatprep.mubr.bf16.mxu0 %v3411_v12  ;;  %v8925_v12 = vld [vmem:[%s14013_s3 + $0x454] ss:$8 sps:$4 sm:$0xff]  }
 0x2a8   : > { %4964 = vmatprep.mubr.bf16.mxu1 %v3419_v25  ;;  %5309 = vmatpush1.bf16.msra.mxu1 %v8914_v60  ;;  %v3214_v60 = vsel %vm3211_vm5, %v14115_v24, %v3213_v10  ;;  %v3044_v47 = vsel %vm746_vm3, %v3039_v26, %v3043_v2  ;;  %v3040_v4 = vsel %vm746_vm3, %v3035_v58, %v3039_v26  ;;  %v8928_v10 = vld [vmem:[%s14013_s3 + $0x444] ss:$8 sps:$4 sm:$0xff]   ;;  %v3037_v58 = vrot.slane %v11320_v18, 4  ;;  %v14455_v26 = vld [vmem:[#allocation32_spill] sm:$0xff] }
 0x2a9   : > { %5310 = vmatprep.subr.bf16.mxu1 %v8922_v54  ;;  %v3410_v25 = vpack.c.bf16 %v3219_v63, %v3214_v60  ;;  %v3225_v54 = vsel %vm3211_vm5, %v3220_v15, %v3224_v23  ;;  %v3429_v14 = vpack.c.bf16 %v3044_v47, %v3040_v4  ;;  %v3041_v15 = vrot.slane %v11348_v1, 4  ;;  %v8926_v4 = vld [vmem:[%s14013_s3 + $0x440] ss:$8 sps:$4 sm:$0xff]  }
 0x2aa   : > { %v3421_v33 = vpack.c.bf16 %v3229_v34, %v3225_v54  ;;  %v3051_v23 = vrot.slane %v11403_v17, 4  ;;  %v3227_v63 = vsel %vm3211_vm5, %v3222_v19, %v3226_v29  ;;  %v3223_v34 = vsel %vm3211_vm5, %v3218_v36, %v3222_v19  ;;  %v8934_v36 = vld [vmem:[%s14013_s3 + $0x424] ss:$8 sps:$4 sm:$0xff]  }
 0x2ab   : > { %v3420_v60 = vpack.c.bf16 %v3227_v63, %v3223_v34  ;;  %v3038_v47 = vsel %vm746_vm3, %v3033_v37, %v3037_v58  ;;  %v3234_v54 = vrot.slane %v11348_v1, 6  ;;  %v14456_v19 = vld [vmem:[#allocation34_spill] sm:$0xff]  ;;  %v14457_v63 = vld [vmem:[#allocation31_spill] sm:$0xff] }
 0x2ac   : > { %5311 = vmatpush1.bf16.msra.mxu1 %v8920_v49  ;;  %v3232_v49 = vrot.slane %v11323_v30, 6 }
 0x2ad   : > { %5312 = vmatprep.subr.bf16.mxu1 %v8925_v12  ;;  %v3047_v12 = vrot.slane %v14455_v26, 4 }
 0x2ae   : > { %5148 = vmatmul.mubr.bf16.vlgmr.msra.gmra.mxu0 %v3410_v25  ;;  %v3237_v8 = vsel %vm3211_vm5, %v3232_v49, %v3236_v52  ;;  %v3233_v25 = vsel %vm3211_vm5, %v3228_v38, %v3232_v49  ;;  %v3230_v38 = vrot.slane %v11320_v18, 6  ;;  %v3244_v49 = vrot.slane %v11403_v17, 6 }
 0x2af   : > { %4965 = vmatmul.mubr.bf16.gmra.mxu1 %v3418_v16  ;;  %5157 = vmatprep.mubr.bf16.mxu0 %v3421_v33  ;;  %v8931_v33 = vld [vmem:[%s14013_s3 + $0x434] ss:$8 sps:$4 sm:$0xff]   ;;  %v3042_v16 = vsel %vm746_vm3, %v3037_v58, %v3041_v15  ;;  %v3431_v24 = vpack.c.bf16 %v3237_v8, %v3233_v25  ;;  %v3048_v27 = vsel %vm746_vm3, %v3043_v2, %v3047_v12  ;;  %v3049_v58 = vrot.slane %v14456_v19, 4 }
 0x2b0   : > { %4974 = vmatprep.mubr.bf16.mxu1 %v3429_v14  ;;  %5313 = vmatpush1.bf16.msra.mxu1 %v8923_v41  ;;  %v3052_v41 = vsel %vm746_vm3, %v3047_v12, %v3051_v23  ;;  %v3428_v14 = vpack.c.bf16 %v3042_v16, %v3038_v47  ;;  %v3235_v2 = vsel %vm3211_vm5, %v3230_v38, %v3234_v54  ;;  %v3045_v12 = vrot.slane %v14457_v63, 4  ;;  %v14458_v16 = vld [vmem:[#allocation38_spill] sm:$0xff] }
 0x2b1   : > { %5314 = vmatprep.subr.bf16.mxu1 %v8928_v10  ;;  %v8929_v10 = vld [vmem:[%s14013_s3 + $0x430] ss:$8 sps:$4 sm:$0xff]   ;;  %v3439_v37 = vpack.c.bf16 %v3052_v41, %v3048_v27  ;;  %v8932_v27 = vld [vmem:[%s14013_s3 + $0x420] ss:$8 sps:$4 sm:$0xff]   ;;  %v3055_v8 = vrot.slane %v14458_v16, 4  ;;  %v3231_v34 = vsel %vm3211_vm5, %v3226_v29, %v3230_v38 }
 0x2b2   : > { %v3050_v41 = vsel %vm746_vm3, %v3045_v12, %v3049_v58  ;;  %v3430_v47 = vpack.c.bf16 %v3235_v2, %v3231_v34  ;;  %v8935_v29 = vld [vmem:[%s14013_s3 + $0x410] ss:$8 sps:$4 sm:$0xff]   ;;  %v14120_v2 = vrot.slane %v11455_v3, 6  ;;  %v3248_v34 = vrot.slane %v14458_v16, 6  ;;  %v14462_v16 = vld [vmem:[#allocation42_spill] sm:$0xff] }
 0x2b3   : > { %v3056_v1 = vsel %vm746_vm3, %v3051_v23, %v3055_v8 }
 0x2b4   : > { %5315 = vmatpush1.bf16.msra.mxu1 %v8926_v4  ;;  %v3059_v4 = vrot.slane %v11455_v3, 4 }
 0x2b5   : > { %5316 = vmatprep.subr.bf16.mxu1 %v8931_v33  ;;  %v3240_v33 = vrot.slane %v14455_v26, 6 }
 0x2b6   : > { %5158 = vmatmul.mubr.bf16.gmra.mxu0 %v3420_v60  ;;  %v3060_v25 = vsel %vm746_vm3, %v3055_v8, %v3059_v4 }
 0x2b7   : > { %4975 = vmatmul.mubr.bf16.gmra.mxu1 %v3428_v14  ;;  %5167 = vmatprep.mubr.bf16.mxu0 %v3431_v24  ;;  %v8937_v24 = vld [vmem:[%s14013_s3 + $0x414] ss:$8 sps:$4 sm:$0xff]   ;;  %v3245_v60 = vsel %vm3211_vm5, %v3240_v33, %v3244_v49  ;;  %v3241_v14 = vsel %vm3211_vm5, %v3236_v52, %v3240_v33  ;;  %v3449_v52 = vpack.c.bf16 %v3060_v25, %v3056_v1  ;;  %v14460_v33 = vld [vmem:[#allocation37_spill] sm:$0xff] }
 0x2b8   : > { %4984 = vmatprep.mubr.bf16.mxu1 %v3439_v37  ;;  %5317 = vmatpush1.bf16.msra.mxu1 %v8929_v10  ;;  %v3046_v10 = vsel %vm746_vm3, %v3041_v15, %v3045_v12  ;;  %v3242_v37 = vrot.slane %v14456_v19, 6  ;;  %v3441_v26 = vpack.c.bf16 %v3245_v60, %v3241_v14  ;;  %v8940_v15 = vld [vmem:[%s14013_s3 + $0x404] ss:$8 sps:$4 sm:$0xff]   ;;  %v3238_v12 = vrot.slane %v14457_v63, 6  ;;  %v8938_v1 = vld [vmem:[%s14013_s3 + $0x400] ss:$8 sps:$4 sm:$0xff]  }
 0x2b9   : > { %5318 = vmatprep.subr.bf16.mxu1 %v8934_v36  ;;  %v14459_v36 = vld [vmem:[#allocation40_spill] sm:$0xff]  ;;  %v3438_v38 = vpack.c.bf16 %v3050_v41, %v3046_v10  ;;  %v3067_v41 = vrot.slane %v11507_v7, 4  ;;  %v3061_v19 = vrot.slane %v14462_v16, 4 }
 0x2ba   : > { %v3057_v17 = vrot.slane %v14459_v36, 4  ;;  %v3243_v23 = vsel %vm3211_vm5, %v3238_v12, %v3242_v37  ;;  %v14461_v60 = vld [vmem:[#allocation44_spill] sm:$0xff]  ;;  %v3239_v14 = vsel %vm3211_vm5, %v3234_v54, %v3238_v12 }
 0x2bb   : > { %v8943_v10 = vld [vmem:[%s14013_s3 + $0x4f4] ss:$8 sps:$4 sm:$0xff]   ;;  %v8941_v54 = vld [vmem:[%s14013_s3 + $0x4f0] ss:$8 sps:$4 sm:$0xff]  }
 0x2bc   : > { %5319 = vmatpush1.bf16.msra.mxu1 %v8932_v27  ;;  %v3053_v27 = vrot.slane %v14460_v33, 4 }
 0x2bd   : > { %5320 = vmatprep.subr.bf16.mxu1 %v8937_v24  ;;  %v3253_v24 = vsel %vm3211_vm5, %v3248_v34, %v14120_v2  ;;  %v3246_v2 = vrot.slane %v14460_v33, 6 }
 0x2be   : > { %5168 = vmatmul.mubr.bf16.gmra.mxu0 %v3430_v47  ;;  %v3058_v8 = vsel %vm746_vm3, %v3053_v27, %v3057_v17  ;;  %v3440_v47 = vpack.c.bf16 %v3243_v23, %v3239_v14  ;;  %v8946_v23 = vld [vmem:[%s14013_s3 + $0x4e4] ss:$8 sps:$4 sm:$0xff]   ;;  %v3062_v14 = vsel %vm746_vm3, %v3057_v17, %v3061_v19  ;;  %v8949_v17 = vld [vmem:[%s14013_s3 + $0x4d4] ss:$8 sps:$4 sm:$0xff]  }
 0x2bf   : > { %4985 = vmatmul.mubr.bf16.gmra.mxu1 %v3438_v38  ;;  %5177 = vmatprep.mubr.bf16.mxu0 %v3441_v26  ;;  %v3063_v26 = vrot.slane %v14461_v60, 4  ;;  %v3249_v38 = vsel %vm3211_vm5, %v3244_v49, %v3248_v34  ;;  %v14463_v49 = vrot.slane %v14459_v36, 6 }
 0x2c0   : > { %4994 = vmatprep.mubr.bf16.mxu1 %v3449_v52  ;;  %5321 = vmatpush1.bf16.msra.mxu1 %v8935_v29  ;;  %v3054_v29 = vsel %vm746_vm3, %v3049_v58, %v3053_v27  ;;  %v3451_v25 = vpack.c.bf16 %v3253_v24, %v3249_v38  ;;  %v14464_v27 = vrot.slane %v11504_v39, 4  ;;  %v3256_v24 = vrot.slane %v14461_v60, 6 }
 0x2c1   : > { %5322 = vmatprep.subr.bf16.mxu1 %v8940_v15  ;;  %v3068_v52 = vsel %vm746_vm3, %v3063_v26, %v3067_v41  ;;  %v3448_v63 = vpack.c.bf16 %v3058_v8, %v3054_v29  ;;  %v14129_v15 = vrot.slane %v11507_v7, 6  ;;  %v3064_v58 = vsel %vm746_vm3, %v3059_v4, %v3063_v26 }
 0x2c2   : > { %v3251_v12 = vsel %vm3211_vm5, %v3246_v2, %v14463_v49  ;;  %v3066_v34 = vsel %vm746_vm3, %v3061_v19, %v14464_v27  ;;  %v14124_v8 = vrot.slane %v11831_v5, 4  ;;  %v14125_v4 = vrot.slane %v11559_v22, 4 }
 0x2c3   : > { %v3247_v26 = vsel %vm3211_vm5, %v3242_v37, %v3246_v2  ;;  %v3458_v38 = vpack.c.bf16 %v3066_v34, %v3062_v14  ;;  %v14126_v19 = vrot.slane %v11828_v43, 4  ;;  %v14128_v37 = vrot.slane %v11831_v5, 6  ;;  %v8947_v34 = vld [vmem:[%s14013_s3 + $0x4d0] ss:$8 sps:$4 sm:$0xff]  }
 0x2c4   : > { %5323 = vmatpush1.bf16.msra.mxu1 %v8938_v1  ;;  %v3459_v1 = vpack.c.bf16 %v3068_v52, %v3064_v58  ;;  %v3450_v29 = vpack.c.bf16 %v3251_v12, %v3247_v26  ;;  %v14465_v52 = vld [vmem:[#allocation50_spill] sm:$0xff]  ;;  %v14467_v49 = vrot.slane %v11455_v3, 6  ;;  %v3141_v26 = vrot.slane %v11841_v28, 4 }
 0x2c5   : > { %5324 = vmatprep.subr.bf16.mxu1 %v8943_v10  ;;  %v3143_v10 = vrot.slane %v11825_v42, 4  ;;  %v3071_v58 = vrot.slane %v14465_v52, 4  ;;  %v3336_v14 = vrot.slane %v11825_v42, 6  ;;  %v14475_v42 = vrot.slane %v11507_v7, 6  ;;  %v8959_v7 = vld [vmem:[%s14013_s3 + $0x490] ss:$8 sps:$4 sm:$0xff]  }
 0x2c6   : > { %5178 = vmatmul.mubr.bf16.gmra.mxu0 %v3440_v47  ;;  %v3261_v47 = vsel %vm3211_vm5, %v3256_v24, %v14129_v15  ;;  %v3257_v12 = vsel %vm3211_vm5, %v14467_v49, %v3256_v24  ;;  %v14131_v24 = vrot.slane %v11504_v39, 6  ;;  %v14137_v49 = vrot.slane %v11556_v55, 4 }
 0x2c7   : > { %4995 = vmatmul.mubr.bf16.gmra.mxu1 %v3448_v63  ;;  %5187 = vmatprep.mubr.bf16.mxu0 %v3451_v25  ;;  %v8944_v63 = vld [vmem:[%s14013_s3 + $0x4e0] ss:$8 sps:$4 sm:$0xff]   ;;  %v12038_v2 = vsel %vm746_vm3, %v14124_v8, %v3143_v10  ;;  %v14466_v25 = vrot.slane %v11218_v31, 4  ;;  %v3076_v27 = vsel %vm746_vm3, %v3071_v58, %v14125_v4  ;;  %v14136_v8 = vrot.slane %v11559_v22, 6 }
 0x2c8   : > { %5004 = vmatprep.mubr.bf16.mxu1 %v3459_v1  ;;  %5325 = vmatpush2.bf16.msra.mxu1 %v8941_v54  ;;  %v3461_v1 = vpack.c.bf16 %v3261_v47, %v3257_v12  ;;  %v8952_v12 = vld [vmem:[%s14013_s3 + $0x4c4] ss:$8 sps:$4 sm:$0xff]   ;;  %v3264_v15 = vrot.slane %v14465_v52, 6 }
 0x2c9   : > { %5326 = vmatprep.subr.bf16.mxu1 %v8946_v23  ;;  %v12043_v54 = vsel %vm746_vm3, %v3143_v10, %v14466_v25  ;;  %v14127_v23 = vrot.slane %v11828_v43, 6  ;;  %v3334_v10 = vrot.slane %v11841_v28, 6  ;;  %v3072_v25 = vsel %vm746_vm3, %v3067_v41, %v3071_v58 }
 0x2ca   : > { %v3469_v47 = vpack.c.bf16 %v3076_v27, %v3072_v25  ;;  %v12070_v41 = vsel %vm746_vm3, %v14126_v19, %v3141_v26  ;;  %v14468_v58 = vrot.slane %v11227_v57, 4  ;;  %v14469_v27 = vrot.slane %v11218_v31, 6 }
 0x2cb   : > { %v12092_v19 = vsel %vm3211_vm5, %v14127_v23, %v3334_v10  ;;  %v14471_v23 = vld [vmem:[#allocation48_spill] sm:$0xff]  ;;  %v3265_v52 = vsel %vm3211_vm5, %v14475_v42, %v3264_v15 }
 0x2cc   : > { %5327 = vmatpush2.bf16.msra.mxu1 %v8944_v63  ;;  %v12075_v4 = vsel %vm746_vm3, %v3141_v26, %v14468_v58  ;;  %v12080_v63 = vsel %vm3211_vm5, %v14128_v37, %v3336_v14  ;;  %v12087_v25 = vsel %vm3211_vm5, %v3336_v14, %v14469_v27  ;;  %v14470_v26 = vrot.slane %v11227_v57, 6 }
 0x2cd   : > { %5328 = vmatprep.subr.bf16.mxu1 %v8949_v17  ;;  %v3083_v17 = vrot.slane %v11611_v35, 4  ;;  %v3069_v37 = vrot.slane %v14471_v23, 4  ;;  %v14473_v14 = vrot.slane %v14459_v36, 6 }
 0x2ce   : > { %5188 = vmatmul.mubr.bf16.gmra.mxu0 %v3450_v29  ;;  %v12097_v58 = vsel %vm3211_vm5, %v3334_v10, %v14470_v26  ;;  %v3254_v29 = vrot.slane %v14462_v16, 6  ;;  %v14472_v10 = vld [vmem:[#allocation55_spill] sm:$0xff] }
 0x2cf   : > { %5005 = vmatmul.mubr.bf16.gmra.mxu1 %v3458_v38  ;;  %5197 = vmatprep.mubr.bf16.mxu0 %v3461_v1  ;;  %v8950_v38 = vld [vmem:[%s14013_s3 + $0x4c0] ss:$8 sps:$4 sm:$0xff]   ;;  %v3079_v26 = vrot.slane %v14472_v10, 4  ;;  %v3074_v27 = vsel %vm746_vm3, %v3069_v37, %v14137_v49 }
 0x2d0   : > { %5014 = vmatprep.mubr.bf16.mxu1 %v3469_v47  ;;  %5329 = vmatpush2.bf16.msra.mxu1 %v8947_v34  ;;  %v3259_v1 = vsel %vm3211_vm5, %v3254_v29, %v14131_v24  ;;  %v8955_v47 = vld [vmem:[%s14013_s3 + $0x4b4] ss:$8 sps:$4 sm:$0xff]   ;;  %v3269_v34 = vsel %vm3211_vm5, %v3264_v15, %v14136_v8  ;;  %v3255_v57 = vsel %vm3211_vm5, %v14473_v14, %v3254_v29  ;;  %v8953_v8 = vld [vmem:[%s14013_s3 + $0x4b0] ss:$8 sps:$4 sm:$0xff]   ;;  %v14476_v29 = vrot.slane %v11559_v22, 4 }
 0x2d1   : > { %5330 = vmatprep.subr.bf16.mxu1 %v8952_v12  ;;  %v3084_v24 = vsel %vm746_vm3, %v3079_v26, %v3083_v17  ;;  %v3460_v28 = vpack.c.bf16 %v3259_v1, %v3255_v57  ;;  %v14474_v12 = vrot.slane %v11504_v39, 4  ;;  %v3471_v16 = vpack.c.bf16 %v3269_v34, %v3265_v52 }
 0x2d2   : > { %v3080_v14 = vsel %vm746_vm3, %v14476_v29, %v3079_v26  ;;  %v3266_v57 = vrot.slane %v11556_v55, 6  ;;  %v3081_v15 = vrot.slane %v11608_v59, 4  ;;  %v3091_v52 = vrot.slane %v11657_v56, 4 }
 0x2d3   : > { %v3070_v31 = vsel %vm746_vm3, %v14474_v12, %v3069_v37  ;;  %v8958_v37 = vld [vmem:[%s14013_s3 + $0x4a4] ss:$8 sps:$4 sm:$0xff]   ;;  %v3479_v42 = vpack.c.bf16 %v3084_v24, %v3080_v14  ;;  %v3272_v26 = vrot.slane %v14472_v10, 6  ;;  %v14479_v29 = vrot.slane %v11504_v39, 6 }
 0x2d4   : > { %5331 = vmatpush2.bf16.msra.mxu1 %v8950_v38  ;;  %v3468_v49 = vpack.c.bf16 %v3074_v27, %v3070_v31  ;;  %v3276_v38 = vrot.slane %v11611_v35, 6  ;;  %v3262_v31 = vrot.slane %v14471_v23, 6  ;;  %v14477_v27 = vld [vmem:[#allocation53_spill] sm:$0xff]  ;;  %v14480_v35 = vrot.slane %v11556_v55, 4 }
 0x2d5   : > { %5332 = vmatprep.subr.bf16.mxu1 %v8955_v47  ;;  %v3077_v1 = vrot.slane %v14477_v27, 4  ;;  %v14478_v47 = vld [vmem:[#allocation30_spill] sm:$0xff]  ;;  %v14489_v55 = vrot.slane %v11685_v53, 6 }
 0x2d6   : > { %5198 = vmatmul.mubr.bf16.gmra.mxu0 %v3460_v28  ;;  %v8956_v28 = vld [vmem:[%s14013_s3 + $0x4a0] ss:$8 sps:$4 sm:$0xff]   ;;  %v3267_v24 = vsel %vm3211_vm5, %v3262_v31, %v3266_v57  ;;  %v3087_v34 = vrot.slane %v14478_v47, 4  ;;  %v3277_v12 = vsel %vm3211_vm5, %v3272_v26, %v3276_v38 }
 0x2d7   : > { %5015 = vmatmul.mubr.bf16.gmra.mxu1 %v3468_v49  ;;  %5207 = vmatprep.mubr.bf16.mxu0 %v3471_v16  ;;  %v8961_v16 = vld [vmem:[%s14013_s3 + $0x494] ss:$8 sps:$4 sm:$0xff]   ;;  %v3082_v49 = vsel %vm746_vm3, %v3077_v1, %v3081_v15  ;;  %v3078_v10 = vsel %vm746_vm3, %v14480_v35, %v3077_v1  ;;  %v8964_v35 = vld [vmem:[%s14013_s3 + $0x484] ss:$8 sps:$4 sm:$0xff]  }
 0x2d8   : > { %5024 = vmatprep.mubr.bf16.mxu1 %v3479_v42  ;;  %5333 = vmatpush2.bf16.msra.mxu1 %v8953_v8  ;;  %v3263_v8 = vsel %vm3211_vm5, %v14479_v29, %v3262_v31  ;;  %v3092_v14 = vsel %vm746_vm3, %v3087_v34, %v3091_v52  ;;  %v3478_v60 = vpack.c.bf16 %v3082_v49, %v3078_v10  ;;  %v3274_v29 = vrot.slane %v11608_v59, 6 }
 0x2d9   : > { %5334 = vmatprep.subr.bf16.mxu1 %v8958_v37  ;;  %v3470_v42 = vpack.c.bf16 %v3267_v24, %v3263_v8  ;;  %v14481_v37 = vrot.slane %v11559_v22, 6  ;;  %v3088_v31 = vsel %vm746_vm3, %v3083_v17, %v3087_v34  ;;  %v3270_v10 = vrot.slane %v14477_v27, 6  ;;  %v14482_v17 = vld [vmem:[#allocation7_spill] sm:$0xff] }
 0x2da   : > { %v3489_v1 = vpack.c.bf16 %v3092_v14, %v3088_v31  ;;  %v3085_v24 = vrot.slane %v14482_v17, 4  ;;  %v3280_v34 = vrot.slane %v14478_v47, 6  ;;  %v3282_v31 = vrot.slane %v11654_v13, 6 }
 0x2db   : > { %v3273_v23 = vsel %vm3211_vm5, %v14481_v37, %v3272_v26  ;;  %v3089_v26 = vrot.slane %v11654_v13, 4  ;;  %v3275_v49 = vsel %vm3211_vm5, %v3270_v10, %v3274_v29  ;;  %v3271_v8 = vsel %vm3211_vm5, %v3266_v57, %v3270_v10 }
 0x2dc   : > { %5335 = vmatpush2.bf16.msra.mxu1 %v8956_v28  ;;  %v3481_v39 = vpack.c.bf16 %v3277_v12, %v3273_v23  ;;  %v3284_v28 = vrot.slane %v11657_v56, 6  ;;  %v3099_v23 = vrot.slane %v11688_v6, 4  ;;  %v3095_v12 = vrot.slane %v11672_v62, 4 }
 0x2dd   : > { %5336 = vmatprep.subr.bf16.mxu1 %v8961_v16  ;;  %v8962_v16 = vld [vmem:[%s14013_s3 + $0x480] ss:$8 sps:$4 sm:$0xff]   ;;  %v3281_v37 = vsel %vm3211_vm5, %v3276_v38, %v3280_v34  ;;  %v14151_v57 = vrot.slane %v11685_v53, 4  ;;  %v3292_v38 = vrot.slane %v11688_v6, 6  ;;  %v14488_v6 = vrot.slane %v11716_v45, 4 }
 0x2de   : > { %5208 = vmatmul.mubr.bf16.gmra.mxu0 %v3470_v42  ;;  %v3100_v14 = vsel %vm746_vm3, %v3095_v12, %v3099_v23  ;;  %v3480_v42 = vpack.c.bf16 %v3275_v49, %v3271_v8  ;;  %v3096_v47 = vsel %vm746_vm3, %v3091_v52, %v3095_v12  ;;  %v14484_v8 = vld [vmem:[#allocation41_spill] sm:$0xff] }
 0x2df   : > { %5025 = vmatmul.mubr.bf16.gmra.mxu1 %v3478_v60  ;;  %5217 = vmatprep.mubr.bf16.mxu0 %v3481_v39  ;;  %v3090_v39 = vsel %vm746_vm3, %v3085_v24, %v3089_v26  ;;  %v3285_v60 = vsel %vm3211_vm5, %v3280_v34, %v3284_v28  ;;  %v3499_v49 = vpack.c.bf16 %v3100_v14, %v3096_v47  ;;  %v14483_v34 = vld [vmem:[#allocation8_spill] sm:$0xff]  ;;  %v3288_v47 = vrot.slane %v11672_v62, 6  ;;  %v14486_v14 = vld [vmem:[#allocation11_spill] sm:$0xff] }
 0x2e0   : > { %5034 = vmatprep.mubr.bf16.mxu1 %v3489_v1  ;;  %5337 = vmatpush2.bf16.msra.mxu1 %v8959_v7  ;;  %v3086_v7 = vsel %vm746_vm3, %v3081_v15, %v3085_v24  ;;  %v3491_v56 = vpack.c.bf16 %v3285_v60, %v3281_v37  ;;  %v3278_v15 = vrot.slane %v14482_v17, 6  ;;  %v14487_v37 = vsub.s32 1, %v14484_v8 }
 0x2e1   : > { %5338 = vmatprep.subr.bf16.mxu1 %v8964_v35  ;;  %v3724_v35 = vld [vmem:[%s14014_s4] sm:$0x3]  ;;  %v3488_v1 = vpack.c.bf16 %v3090_v39, %v3086_v7  ;;  %v14485_v39 = vsub.s32 0, %v14484_v8  ;;  %v3293_v24 = vsel %vm3211_vm5, %v3288_v47, %v3292_v38 }
 0x2e2   : > { %v3283_v12 = vsel %vm3211_vm5, %v3278_v15, %v3282_v31 }
 0x2e3   : > { %v12206_v60 = vrot.slane %v3724_v35, %v14485_v39 }
 0x2e4   : > { %5339 = vmatpush2.bf16.msra.mxu1 %v8962_v16  ;;  %v3093_v16 = vrot.slane %v14483_v34, 4 }
 0x2e6   : > { %5218 = vmatmul.mubr.bf16.gmra.mxu0 %v3480_v42  ;;  %v4570_v10 = vpop.f32.mrf.mxu1  ;;  %v3103_v42 = vrot.slane %v14486_v14, 4  ;;  %v3098_v7 = vsel %vm746_vm3, %v3093_v16, %v14151_v57  ;;  %v3094_v17 = vsel %vm746_vm3, %v3089_v26, %v3093_v16  ;;  %v3286_v57 = vrot.slane %v14483_v34, 6 }
 0x2e7   : > { %5035 = vmatmul.mubr.bf16.gmra.mxu1 %v3488_v1  ;;  %5227 = vmatprep.mubr.bf16.mxu0 %v3491_v56  ;;  %v12217_v1 = vrot.slane %v3724_v35, %v14487_v37  ;;  %v4571_v56 = vadd.f32 %v4570_v10, %v12206_v60  ;;  %v3498_v8 = vpack.c.bf16 %v3098_v7, %v3094_v17  ;;  %v14155_v17 = vrot.slane %v11716_v45, 6  ;;  %v14493_v7 = vld [vmem:[#allocation46_spill] sm:$0xff] }
 0x2e8   : > { %5044 = vmatprep.mubr.bf16.mxu1 %v3499_v49  ;;  %v4572_v52 = vpop.f32.mrf.mxu1  ;;  %v3279_v49 = vsel %vm3211_vm5, %v3274_v29, %v3278_v15  ;;  %v3108_v62 = vsel %vm746_vm3, %v3103_v42, %v14488_v6  ;;  %v3289_v35 = vsel %vm3211_vm5, %v3284_v28, %v3288_v47  ;;  %v3104_v37 = vsel %vm746_vm3, %v3099_v23, %v3103_v42 }
 0x2e9   : > { %v3490_v13 = vpack.c.bf16 %v3283_v12, %v3279_v49  ;;  %v3501_v15 = vpack.c.bf16 %v3293_v24, %v3289_v35  ;;  %v3509_v27 = vpack.c.bf16 %v3108_v62, %v3104_v37  ;;  %v3291_v6 = vsel %vm3211_vm5, %v3286_v57, %v14489_v55  ;;  %v14490_v12 = vld [vmem:[#allocation43_spill] sm:$0xff] }
 0x2ea   : > { %v4574_v39 = vpop.f32.mrf.mxu1  ;;  %v3105_v49 = vrot.slane %v14490_v12, 4  ;;  %v4573_v26 = vadd.f32 %v4572_v52, %v12217_v1  ;;  %v14491_v62 = vld [vmem:[#allocation39_spill] sm:$0xff]  ;;  %v3296_v47 = vrot.slane %v14486_v14, 6  ;;  %v14497_v14 = vrot.slane %v11716_v45, 4 }
 0x2eb   : > { %v3101_v24 = vrot.slane %v14491_v62, 4  ;;  %v4575_v55 = vadd.f32 %v4574_v39, %v12206_v60  ;;  %v14159_v34 = vrot.slane %v11741_v11, 4 }
 0x2ec   : > { %v4576_v59 = vpop.f32.mrf.mxu1  ;;  %v3301_v39 = vsel %vm3211_vm5, %v3296_v47, %v14155_v17 }
 0x2ed   : > { %v4763_v29 = vpop.f32.mrf.mxu0 }
 0x2ee   : > { %v12234_v16 = vadd.f32 %v4763_v29, %v4571_v56  ;;  %5228 = vmatmul.mubr.bf16.gmra.mxu0 %v3490_v13  ;;  %v4580_v10 = vpop.f32.mrf.mxu1  ;;  %v3287_v13 = vsel %vm3211_vm5, %v3282_v31, %v3286_v57  ;;  %v3111_v56 = vrot.slane %v14493_v7, 4  ;;  %v4577_v29 = vadd.f32 %v4576_v59, %v12217_v1 }
 0x2ef   : > { %5045 = vmatmul.mubr.bf16.gmra.mxu1 %v3498_v8  ;;  %5237 = vmatprep.mubr.bf16.mxu0 %v3501_v15  ;;  %v4765_v23 = vpop.f32.mrf.mxu0  ;;  %v3500_v37 = vpack.c.bf16 %v3291_v6, %v3287_v13  ;;  %v3106_v8 = vsel %vm746_vm3, %v3101_v24, %v3105_v49  ;;  %v14496_v57 = vrot.slane %v11685_v53, 4  ;;  %v3294_v59 = vrot.slane %v14491_v62, 6 }
 0x2f0   : > { %v12241_v42 = vadd.f32 %v4765_v23, %v4573_v26  ;;  %5054 = vmatprep.mubr.bf16.mxu1 %v3509_v27  ;;  %v4582_v52 = vpop.f32.mrf.mxu1  ;;  %v14495_v27 = vrot.slane %v11744_v48, 4  ;;  %v3297_v23 = vsel %vm3211_vm5, %v3292_v38, %v3296_v47  ;;  %v4581_v13 = vadd.f32 %v4580_v10, %v12206_v60  ;;  %v14498_v38 = vld [vmem:[#allocation12_spill] sm:$0xff] }
 0x2f1   : > { %v4767_v35 = vpop.f32.mrf.mxu0  ;;  %v3102_v6 = vsel %vm746_vm3, %v14496_v57, %v3101_v24  ;;  %v3511_v24 = vpack.c.bf16 %v3301_v39, %v3297_v23  ;;  %v3109_v47 = vrot.slane %v14498_v38, 4  ;;  %v4583_v62 = vadd.f32 %v4582_v52, %v12217_v1 }
 0x2f2   : > { %14492 = vst [vmem:[#allocation25_spill] sm:$0xff] %v12241_v42  ;;  %v12247_v15 = vadd.f32 %v4767_v35, %v4575_v55  ;;  %v4584_v28 = vpop.f32.mrf.mxu1  ;;  %v3116_v26 = vsel %vm746_vm3, %v3111_v56, %v14495_v27  ;;  %v3112_v27 = vsel %vm746_vm3, %v14497_v14, %v3111_v56  ;;  %v3508_v42 = vpack.c.bf16 %v3106_v8, %v3102_v6 }
 0x2f3   : > { %v4769_v31 = vpop.f32.mrf.mxu0  ;;  %v3519_v57 = vpack.c.bf16 %v3116_v26, %v3112_v27  ;;  %v14499_v56 = vrot.slane %v14490_v12, 6  ;;  %v3304_v39 = vrot.slane %v14493_v7, 6  ;;  %v4585_v26 = vadd.f32 %v4584_v28, %v12206_v60 }
 0x2f4   : > { %14494 = vst [vmem:[#allocation40_spill] sm:$0xff] %v12247_v15  ;;  %v12262_v35 = vadd.f32 %v4769_v31, %v4577_v29  ;;  %v4586_v17 = vpop.f32.mrf.mxu1  ;;  %v14161_v29 = vrot.slane %v11744_v48, 6  ;;  %v14162_v31 = vrot.slane %v11772_v0, 4  ;;  %v14501_v23 = vrot.slane %v11685_v53, 6 }
 0x2f5   : > { %v4773_v15 = vpop.f32.mrf.mxu0  ;;  %v3299_v8 = vsel %vm3211_vm5, %v3294_v59, %v14499_v56  ;;  %v3110_v27 = vsel %vm746_vm3, %v3105_v49, %v3109_v47 }
 0x2f6   : > { %v12270_v55 = vadd.f32 %v4773_v15, %v4581_v13  ;;  %5238 = vmatmul.mubr.bf16.gmra.mxu0 %v3500_v37  ;;  %v4590_v10 = vpop.f32.mrf.mxu1  ;;  %v3114_v15 = vsel %vm746_vm3, %v3109_v47, %v14159_v34  ;;  %v3295_v13 = vsel %vm3211_vm5, %v14501_v23, %v3294_v59  ;;  %v14503_v59 = vrot.slane %v11716_v45, 6 }
 0x2f7   : > { %5055 = vmatmul.mubr.bf16.gmra.mxu1 %v3508_v42  ;;  %5247 = vmatprep.mubr.bf16.mxu0 %v3511_v24  ;;  %v4775_v14 = vpop.f32.mrf.mxu0  ;;  %v3119_v42 = vrot.slane %v11756_v61, 4  ;;  %v4587_v24 = vadd.f32 %v4586_v17, %v12217_v1  ;;  %v3510_v34 = vpack.c.bf16 %v3299_v8, %v3295_v13  ;;  %v3518_v7 = vpack.c.bf16 %v3114_v15, %v3110_v27 }
 0x2f8   : > { %v12279_v52 = vadd.f32 %v4775_v14, %v4583_v62  ;;  %5064 = vmatprep.mubr.bf16.mxu1 %v3519_v57  ;;  %v4592_v37 = vpop.f32.mrf.mxu1  ;;  %v3309_v57 = vsel %vm3211_vm5, %v3304_v39, %v14161_v29  ;;  %v3305_v49 = vsel %vm3211_vm5, %v14503_v59, %v3304_v39  ;;  %v4591_v17 = vadd.f32 %v4590_v10, %v12206_v60 }
 0x2f9   : > { %v4777_v6 = vpop.f32.mrf.mxu0  ;;  %v3124_v14 = vsel %vm746_vm3, %v3119_v42, %v14162_v31  ;;  %v14163_v29 = vrot.slane %v11741_v11, 6  ;;  %v3521_v31 = vpack.c.bf16 %v3309_v57, %v3305_v49  ;;  %v3302_v8 = vrot.slane %v14498_v38, 6 }
 0x2fa   : > { %14500 = vst [vmem:[#allocation37_spill] sm:$0xff] %v12279_v52  ;;  %v12290_v28 = vadd.f32 %v4777_v6, %v4585_v26  ;;  %v4594_v62 = vpop.f32.mrf.mxu1  ;;  %v14504_v6 = vrot.slane %v11744_v48, 4  ;;  %v14164_v15 = vrot.slane %v11769_v51, 4  ;;  %v4593_v39 = vadd.f32 %v4592_v37, %v12217_v1 }
 0x2fb   : > { %v4779_v56 = vpop.f32.mrf.mxu0  ;;  %v14166_v27 = vrot.slane %v11772_v0, 6  ;;  %v3117_v57 = vrot.slane %v11753_v20, 4 }
 0x2fc   : > { %14502 = vst [vmem:[#allocation41_spill] sm:$0xff] %v12290_v28  ;;  %v12302_v47 = vadd.f32 %v4779_v56, %v4587_v24  ;;  %v4596_v26 = vpop.f32.mrf.mxu1  ;;  %v3120_v23 = vsel %vm746_vm3, %v14504_v6, %v3119_v42  ;;  %v14168_v24 = vrot.slane %v11800_v9, 4  ;;  %v4595_v56 = vadd.f32 %v4594_v62, %v12206_v60 }
 0x2fd   : > { %v4783_v28 = vpop.f32.mrf.mxu0  ;;  %v3529_v52 = vpack.c.bf16 %v3124_v14, %v3120_v23  ;;  %v3312_v14 = vrot.slane %v11756_v61, 6  ;;  %v4597_v62 = vadd.f32 %v4596_v26, %v12217_v1 }
 0x2fe   : > { %v12311_v13 = vadd.f32 %v4783_v28, %v4591_v17  ;;  %5248 = vmatmul.mubr.bf16.gmra.mxu0 %v3510_v34  ;;  %v4600_v10 = vpop.f32.mrf.mxu1  ;;  %v3307_v34 = vsel %vm3211_vm5, %v3302_v8, %v14163_v29  ;;  %v3127_v28 = vrot.slane %v11784_v40, 4  ;;  %v3122_v17 = vsel %vm746_vm3, %v3117_v57, %v14164_v15 }
 0x2ff   : > { %5065 = vmatmul.mubr.bf16.gmra.mxu1 %v3518_v7  ;;  %5257 = vmatprep.mubr.bf16.mxu0 %v3521_v31  ;;  %v4785_v42 = vpop.f32.mrf.mxu0  ;;  %v14506_v7 = vrot.slane %v14490_v12, 6  ;;  %v3317_v23 = vsel %vm3211_vm5, %v3312_v14, %v14166_v27  ;;  %v4601_v15 = vadd.f32 %v4600_v10, %v12206_v60  ;;  %v14510_v27 = vrot.slane %v11772_v0, 4 }
 0x300   : > { %v12318_v59 = vadd.f32 %v4785_v42, %v4593_v39  ;;  %5074 = vmatprep.mubr.bf16.mxu1 %v3529_v52  ;;  %v4602_v37 = vpop.f32.mrf.mxu1  ;;  %v3132_v39 = vsel %vm746_vm3, %v3127_v28, %v14168_v24 }
 0x301   : > { %v4787_v49 = vpop.f32.mrf.mxu0  ;;  %v3303_v31 = vsel %vm3211_vm5, %v14506_v7, %v3302_v8  ;;  %v14508_v8 = vrot.slane %v11741_v11, 4  ;;  %v3128_v38 = vsel %vm746_vm3, %v14510_v27, %v3127_v28  ;;  %v3310_v27 = vrot.slane %v11753_v20, 6 }
 0x302   : > { %14505 = vst [vmem:[#allocation43_spill] sm:$0xff] %v12318_v59  ;;  %v12331_v6 = vadd.f32 %v4787_v49, %v4595_v56  ;;  %v4604_v52 = vpop.f32.mrf.mxu1  ;;  %v3520_v29 = vpack.c.bf16 %v3307_v34, %v3303_v31  ;;  %v14509_v49 = vrot.slane %v11744_v48, 6  ;;  %v3539_v31 = vpack.c.bf16 %v3132_v39, %v3128_v38 }
 0x303   : > { %v4789_v42 = vpop.f32.mrf.mxu0  ;;  %v3118_v7 = vsel %vm746_vm3, %v14508_v8, %v3117_v57  ;;  %v3314_v59 = vrot.slane %v11769_v51, 6  ;;  %v4603_v57 = vadd.f32 %v4602_v37, %v12217_v1  ;;  %v4605_v38 = vadd.f32 %v4604_v52, %v12206_v60 }
 0x304   : > { %14507 = vst [vmem:[#allocation59_spill] sm:$0xff] %v12331_v6  ;;  %v12343_v26 = vadd.f32 %v4789_v42, %v4597_v62  ;;  %v4606_v56 = vpop.f32.mrf.mxu1  ;;  %v3313_v61 = vsel %vm3211_vm5, %v14509_v49, %v3312_v14  ;;  %v3528_v6 = vpack.c.bf16 %v3122_v17, %v3118_v7  ;;  %v3129_v42 = vrot.slane %v11797_v32, 4 }
 0x305   : > { %v4793_v24 = vpop.f32.mrf.mxu0  ;;  %v3531_v34 = vpack.c.bf16 %v3317_v23, %v3313_v61  ;;  %v3324_v14 = vrot.slane %v11800_v9, 6  ;;  %v3125_v61 = vrot.slane %v11781_v46, 4  ;;  %v3315_v37 = vsel %vm3211_vm5, %v3310_v27, %v3314_v59 }
 0x306   : > { %v12353_v10 = vadd.f32 %v4793_v24, %v4601_v15  ;;  %5258 = vmatmul.mubr.bf16.gmra.mxu0 %v3520_v29  ;;  %v4610_v62 = vpop.f32.mrf.mxu1  ;;  %v3320_v29 = vrot.slane %v11784_v40, 6  ;;  %v3135_v17 = vrot.slane %v11812_v21, 4  ;;  %v14516_v40 = vrot.slane %v11831_v5, 4 }
 0x307   : > { %5075 = vmatmul.mubr.bf16.gmra.mxu1 %v3528_v6  ;;  %5267 = vmatprep.mubr.bf16.mxu0 %v3531_v34  ;;  %v4795_v8 = vpop.f32.mrf.mxu0  ;;  %v4607_v6 = vadd.f32 %v4606_v56, %v12217_v1  ;;  %v3130_v7 = vsel %vm746_vm3, %v3125_v61, %v3129_v42  ;;  %v14514_v34 = vrot.slane %v11741_v11, 6 }
 0x308   : > { %14511 = vst [vmem:[#allocation60_spill] sm:$0xff] %v12353_v10  ;;  %v12360_v28 = vadd.f32 %v4795_v8, %v4603_v57  ;;  %5084 = vmatprep.mubr.bf16.mxu1 %v3539_v31  ;;  %v4612_v15 = vpop.f32.mrf.mxu1  ;;  %v3325_v52 = vsel %vm3211_vm5, %v3320_v29, %v3324_v14  ;;  %v14515_v57 = vrot.slane %v11769_v51, 4  ;;  %v3140_v56 = vsel %vm746_vm3, %v3135_v17, %v14516_v40 }
 0x309   : > { %v4797_v24 = vpop.f32.mrf.mxu0  ;;  %v3311_v31 = vsel %vm3211_vm5, %v14514_v34, %v3310_v27  ;;  %v3322_v40 = vrot.slane %v11797_v32, 6 }
 0x30a   : > { %14512 = vst [vmem:[#allocation61_spill] sm:$0xff] %v12360_v28  ;;  %v12366_v23 = vadd.f32 %v4797_v24, %v4605_v38  ;;  %v4614_v39 = vpop.f32.mrf.mxu1  ;;  %v3126_v8 = vsel %vm746_vm3, %v14515_v57, %v3125_v61  ;;  %v4611_v38 = vadd.f32 %v4610_v62, %v12206_v60  ;;  %v14518_v28 = vrot.slane %v11772_v0, 6 }
 0x30b   : > { %v4799_v49 = vpop.f32.mrf.mxu0  ;;  %v3538_v34 = vpack.c.bf16 %v3130_v7, %v3126_v8  ;;  %v14519_v61 = vrot.slane %v11800_v9, 4  ;;  %v4613_v62 = vadd.f32 %v4612_v15, %v12217_v1  ;;  %v14520_v7 = vld [vmem:[#allocation16_spill] sm:$0xff]  ;;  %v3328_v15 = vrot.slane %v11812_v21, 6 }
 0x30c   : > { %14513 = vst [vmem:[#allocation62_spill] sm:$0xff] %v12366_v23  ;;  %v12380_v24 = vadd.f32 %v4799_v49, %v4607_v6  ;;  %v12382_v20 = vpop.f32.mrf.mxu1  ;;  %v3530_v23 = vpack.c.bf16 %v3315_v37, %v3311_v31  ;;  %v3321_v10 = vsel %vm3211_vm5, %v14518_v28, %v3320_v29  ;;  %v3318_v28 = vrot.slane %v11781_v46, 6 }
 0x30d   : > { %14517 = vst [vmem:[#allocation63_spill] sm:$0xff] %v12382_v20  ;;  %v4803_v27 = vpop.f32.mrf.mxu0  ;;  %v3541_v51 = vpack.c.bf16 %v3325_v52, %v3321_v10  ;;  %v3136_v57 = vsel %vm746_vm3, %v14519_v61, %v3135_v17  ;;  %v4615_v10 = vadd.f32 %v4614_v39, %v12206_v60  ;;  %v3133_v52 = vrot.slane %v14520_v7, 4 }
 0x30e   : > { %v12392_v6 = vadd.f32 %v4803_v27, %v4611_v38  ;;  %5268 = vmatmul.mubr.bf16.gmra.mxu0 %v3530_v23  ;;  %v4620_v49 = vpop.f32.mrf.mxu1  ;;  %v3549_v37 = vpack.c.bf16 %v3140_v56, %v3136_v57  ;;  %v3323_v23 = vsel %vm3211_vm5, %v3318_v28, %v3322_v40  ;;  %v14522_v39 = vrot.slane %v11831_v5, 6 }
 0x30f   : > { %5085 = vmatmul.mubr.bf16.gmra.mxu1 %v3538_v34  ;;  %5277 = vmatprep.mubr.bf16.mxu0 %v3541_v51  ;;  %v4805_v31 = vpop.f32.mrf.mxu0  ;;  %v14521_v51 = vrot.slane %v11828_v43, 4  ;;  %v3319_v57 = vsel %vm3211_vm5, %v3314_v59, %v3318_v28 }
 0x310   : > { %v12396_v29 = vadd.f32 %v4805_v31, %v4613_v62  ;;  %5094 = vmatprep.mubr.bf16.mxu1 %v3549_v37  ;;  %v4622_v17 = vpop.f32.mrf.mxu1  ;;  %v3333_v34 = vsel %vm3211_vm5, %v3328_v15, %v14522_v39  ;;  %v4621_v62 = vadd.f32 %v4620_v49, %v12206_v60  ;;  %v3540_v31 = vpack.c.bf16 %v3323_v23, %v3319_v57 }
 0x311   : > { %v4807_v8 = vpop.f32.mrf.mxu0  ;;  %v3138_v27 = vsel %vm746_vm3, %v3133_v52, %v14521_v51  ;;  %v4623_v5 = vadd.f32 %v4622_v17, %v12217_v1  ;;  %v3326_v49 = vrot.slane %v14520_v7, 6 }
 0x312   : > { %v12401_v38 = vadd.f32 %v4807_v8, %v4615_v10  ;;  %v4624_v56 = vpop.f32.mrf.mxu1  ;;  %v3134_v10 = vsel %vm746_vm3, %v3129_v42, %v3133_v52  ;;  %v3329_v8 = vsel %vm3211_vm5, %v3324_v14, %v3328_v15  ;;  %v14524_v42 = vpack.c.bf16 %v12043_v54, %v12038_v2 }
 0x313   : > { %v12409_v61 = vpop.f32.mrf.mxu0  ;;  %v3548_v21 = vpack.c.bf16 %v3138_v27, %v3134_v10  ;;  %v3551_v51 = vpack.c.bf16 %v3333_v34, %v3329_v8  ;;  %v4625_v28 = vadd.f32 %v4624_v56, %v12206_v60  ;;  %v3327_v34 = vsel %vm3211_vm5, %v3322_v40, %v3326_v49  ;;  %v14527_v10 = vld [vmem:[#allocation21_spill] sm:$0xff]  ;;  %v14528_v8 = vld [vmem:[#allocation24_spill] sm:$0xff] }
 0x314   : > { %14523 = vst [vmem:[#allocation16_spill] sm:$0xff] %v12409_v61  ;;  %v12413_v37 = vpop.f32.mrf.mxu1  ;;  %v14530_v40 = vpack.c.bf16 %v12087_v25, %v12080_v63  ;;  %v14532_v63 = vld [vmem:[#allocation20_spill] sm:$0xff]  ;;  %v14533_v25 = vld [vmem:[#allocation23_spill] sm:$0xff]  ;;  %v14544_v61 = vld [vmem:[#allocation34_spill] sm:$0xff] }
 0x315   : > { %v4813_v20 = vpop.f32.mrf.mxu0 }
 0x316   : > { %v12418_v32 = vadd.f32 %v4813_v20, %v4621_v62  ;;  %5278 = vmatmul.mubr.bf16.gmra.mxu0 %v3540_v31  ;;  %v4630_v39 = vpop.f32.mrf.mxu1  ;;  %v14525_v20 = vrot.slane %v11828_v43, 6 }
 0x317   : > { %5095 = vmatmul.mubr.bf16.gmra.mxu1 %v3548_v21  ;;  %5287 = vmatprep.mubr.bf16.mxu0 %v3551_v51  ;;  %v4815_v59 = vpop.f32.mrf.mxu0  ;;  %v3413_v51 = vpack.c.bf16 %v14528_v8, %v14527_v10  ;;  %v14535_v10 = vld [vmem:[#allocation26_spill] sm:$0xff]  ;;  %v14536_v8 = vld [vmem:[#allocation27_spill] sm:$0xff] }
 0x318   : > { %v12422_v23 = vadd.f32 %v4815_v59, %v4623_v5  ;;  %5104 = vmatprep.mubr.bf16.mxu1 %v14524_v42  ;;  %v4632_v14 = vpop.f32.mrf.mxu1  ;;  %v3331_v17 = vsel %vm3211_vm5, %v3326_v49, %v14525_v20  ;;  %v4631_v5 = vadd.f32 %v4630_v39, %v12206_v60  ;;  %v14529_v59 = vpack.c.bf16 %v12075_v4, %v12070_v41 }
 0x319   : > { %v4817_v52 = vpop.f32.mrf.mxu0  ;;  %v3550_v57 = vpack.c.bf16 %v3331_v17, %v3327_v34  ;;  %v4633_v54 = vadd.f32 %v4632_v14, %v12217_v1 }
 0x31a   : > { %v12430_v15 = vadd.f32 %v4817_v52, %v4625_v28  ;;  %v4634_v21 = vpop.f32.mrf.mxu1 }
 0x31b   : > { %v12432_v27 = vpop.f32.mrf.mxu0  ;;  %v4635_v49 = vadd.f32 %v4634_v21, %v12206_v60 }
 0x31c   : > { %v12436_v56 = vpop.f32.mrf.mxu1 }
 0x31d   : > { %14526 = vst [vmem:[#allocation64_spill] sm:$0xff] %v12436_v56  ;;  %v4823_v2 = vpop.f32.mrf.mxu0 }
 0x31e   : > { %v12439_v62 = vadd.f32 %v4823_v2, %v4631_v5  ;;  %5288 = vmatmul.mubr.bf16.gmra.mxu0 %v3550_v57  ;;  %v4640_v31 = vpop.f32.mrf.mxu1  ;;  %v3412_v5 = vpack.c.bf16 %v14533_v25, %v14532_v63  ;;  %v14534_v2 = vpack.c.bf16 %v12097_v58, %v12092_v19  ;;  %v3422_v63 = vpack.c.bf16 %v11296_v44, %v14454_v50 }
 0x31f   : > { %5105 = vmatmul.mubr.bf16.gmra.mxu1 %v14529_v59  ;;  %5297 = vmatprep.mubr.bf16.mxu0 %v14530_v40  ;;  %v4825_v39 = vpop.f32.mrf.mxu0  ;;  %v4641_v4 = vadd.f32 %v4640_v31, %v12206_v60 }
 0x320   : > { %v12450_v28 = vadd.f32 %v4825_v39, %v4633_v54  ;;  %5340 = vmatprep.mubr.bf16.mxu1 %v3413_v51  ;;  %v4642_v42 = vpop.f32.mrf.mxu1  ;;  %v3423_v51 = vpack.c.bf16 %v14536_v8, %v14535_v10 }
 0x321   : > { %v4827_v14 = vpop.f32.mrf.mxu0  ;;  %v4643_v21 = vadd.f32 %v4642_v42, %v12217_v1 }
 0x322   : > { %v12452_v52 = vadd.f32 %v4827_v14, %v4635_v49  ;;  %v4644_v20 = vpop.f32.mrf.mxu1 }
 0x323   : > { %v12454_v17 = vpop.f32.mrf.mxu0  ;;  %v4645_v59 = vadd.f32 %v4644_v20, %v12206_v60 }
 0x324   : > { %14531 = vst [vmem:[#allocation21_spill] sm:$0xff] %v12454_v17  ;;  %v12457_v41 = vpop.f32.mrf.mxu1 }
 0x325   : > { %v4833_v34 = vpop.f32.mrf.mxu0 }
 0x326   : > { %v12462_v57 = vadd.f32 %v4833_v34, %v4641_v4  ;;  %5298 = vmatmul.mubr.bf16.gmra.mxu0 %v14534_v2  ;;  %v4650_v54 = vpop.f32.mrf.mxu1 }
 0x327   : > { %5341 = vmatmul.mubr.bf16.vlgmr.msra.gmra.mxu1 %v3412_v5  ;;  %v4835_v31 = vpop.f32.mrf.mxu0  ;;  %v4651_v19 = vadd.f32 %v4650_v54, %v12206_v60 }
 0x328   : > { %v12470_v40 = vadd.f32 %v4835_v31, %v4643_v21  ;;  %5350 = vmatprep.mubr.bf16.mxu1 %v3423_v51  ;;  %v4652_v39 = vpop.f32.mrf.mxu1  ;;  %v14537_v21 = vld [vmem:[#allocation29_spill] sm:$0xff] }
 0x329   : > { %v4837_v49 = vpop.f32.mrf.mxu0  ;;  %v4653_v25 = vadd.f32 %v4652_v39, %v12217_v1  ;;  %v3433_v2 = vpack.c.bf16 %v14537_v21, %v11323_v30 }
 0x32a   : > { %v12472_v42 = vadd.f32 %v4837_v49, %v4645_v59  ;;  %v4654_v14 = vpop.f32.mrf.mxu1 }
 0x32b   : > { %v12474_v4 = vpop.f32.mrf.mxu0  ;;  %v4655_v8 = vadd.f32 %v4654_v14, %v12206_v60 }
 0x32c   : > { %v4656_v58 = vpop.f32.mrf.mxu1 }
 0x32d   : > { %v4843_v34 = vpop.f32.mrf.mxu0  ;;  %v4657_v59 = vadd.f32 %v4656_v58, %v12217_v1  ;;  %v14540_v58 = vld [vmem:[#allocation35_spill] sm:$0xff] }
 0x32e   : > { %v12480_v20 = vadd.f32 %v4843_v34, %v4651_v19  ;;  %v4660_v5 = vpop.f32.mrf.mxu1 }
 0x32f   : > { %5351 = vmatmul.mubr.bf16.gmra.mxu1 %v3422_v63  ;;  %v4845_v10 = vpop.f32.mrf.mxu0  ;;  %v4661_v49 = vadd.f32 %v4660_v5, %v12206_v60  ;;  %v14538_v63 = vld [vmem:[#allocation28_spill] sm:$0xff] }
 0x330   : > { %v12485_v51 = vadd.f32 %v4845_v10, %v4653_v25  ;;  %5360 = vmatprep.mubr.bf16.mxu1 %v3433_v2  ;;  %v4662_v54 = vpop.f32.mrf.mxu1  ;;  %v3432_v14 = vpack.c.bf16 %v14538_v63, %v11320_v18  ;;  %v14539_v10 = vld [vmem:[#allocation32_spill] sm:$0xff] }
 0x331   : > { %v4847_v31 = vpop.f32.mrf.mxu0  ;;  %v4663_v25 = vadd.f32 %v4662_v54, %v12217_v1 }
 0x332   : > { %v12488_v44 = vadd.f32 %v4847_v31, %v4655_v8  ;;  %v4664_v50 = vpop.f32.mrf.mxu1  ;;  %v3443_v8 = vpack.c.bf16 %v14540_v58, %v14539_v10  ;;  %v14543_v58 = vld [vmem:[#allocation31_spill] sm:$0xff] }
 0x333   : > { %v4849_v39 = vpop.f32.mrf.mxu0  ;;  %v4665_v17 = vadd.f32 %v4664_v50, %v12206_v60  ;;  %v3442_v50 = vpack.c.bf16 %v14544_v61, %v14543_v58 }
 0x334   : > { %v12491_v19 = vadd.f32 %v4849_v39, %v4657_v59  ;;  %v4666_v30 = vpop.f32.mrf.mxu1 }
 0x335   : > { %v4853_v34 = vpop.f32.mrf.mxu0  ;;  %v4667_v56 = vadd.f32 %v4666_v30, %v12217_v1 }
 0x336   : > { %v12496_v21 = vadd.f32 %v4853_v34, %v4661_v49  ;;  %v4670_v2 = vpop.f32.mrf.mxu1 }
 0x337   : > { %5361 = vmatmul.mubr.bf16.gmra.mxu1 %v3432_v14  ;;  %v4855_v31 = vpop.f32.mrf.mxu0  ;;  %v4671_v34 = vadd.f32 %v4670_v2, %v12206_v60 }
 0x338   : > { %v12501_v5 = vadd.f32 %v4855_v31, %v4663_v25  ;;  %5370 = vmatprep.mubr.bf16.mxu1 %v3443_v8  ;;  %v4672_v59 = vpop.f32.mrf.mxu1 }
 0x339   : > { %v4857_v39 = vpop.f32.mrf.mxu0  ;;  %v4673_v25 = vadd.f32 %v4672_v59, %v12217_v1 }
 0x33a   : > { %14541 = vst [vmem:[#allocation24_spill] sm:$0xff] %v12501_v5  ;;  %v12504_v18 = vadd.f32 %v4857_v39, %v4665_v17  ;;  %v4674_v54 = vpop.f32.mrf.mxu1  ;;  %v14545_v5 = vld [vmem:[#allocation38_spill] sm:$0xff] }
 0x33b   : > { %v4859_v49 = vpop.f32.mrf.mxu0  ;;  %v3453_v17 = vpack.c.bf16 %v11455_v3, %v14545_v5  ;;  %v4675_v39 = vadd.f32 %v4674_v54, %v12206_v60  ;;  %v3452_v54 = vpack.c.bf16 %v14459_v36, %v14460_v33 }
 0x33c   : > { %v12507_v63 = vadd.f32 %v4859_v49, %v4667_v56  ;;  %v4676_v10 = vpop.f32.mrf.mxu1 }
 0x33d   : > { %v4863_v14 = vpop.f32.mrf.mxu0 }
 0x33e   : > { %14542 = vst [vmem:[#allocation20_spill] sm:$0xff] %v12507_v63  ;;  %v12512_v8 = vadd.f32 %v4863_v14, %v4671_v34  ;;  %v4680_v31 = vpop.f32.mrf.mxu1  ;;  %v4677_v63 = vadd.f32 %v4676_v10, %v12217_v1  ;;  %v14550_v10 = vld [vmem:[#allocation47_spill] sm:$0xff] }
 0x33f   : > { %5371 = vmatmul.mubr.bf16.gmra.mxu1 %v3442_v50  ;;  %v4865_v30 = vpop.f32.mrf.mxu0  ;;  %v4681_v14 = vadd.f32 %v4680_v31, %v12206_v60 }
 0x340   : > { %v12517_v2 = vadd.f32 %v4865_v30, %v4673_v25  ;;  %5380 = vmatprep.mubr.bf16.mxu1 %v3453_v17  ;;  %v4682_v56 = vpop.f32.mrf.mxu1  ;;  %v14549_v30 = vld [vmem:[#allocation44_spill] sm:$0xff] }
 0x341   : > { %v4867_v49 = vpop.f32.mrf.mxu0  ;;  %v4683_v50 = vadd.f32 %v4682_v56, %v12217_v1 }
 0x342   : > { %v12520_v61 = vadd.f32 %v4867_v49, %v4675_v39  ;;  %v4684_v59 = vpop.f32.mrf.mxu1  ;;  %v3463_v39 = vpack.c.bf16 %v14550_v10, %v14549_v30  ;;  %v14554_v10 = vld [vmem:[#allocation42_spill] sm:$0xff] }
 0x343   : > { %v4869_v34 = vpop.f32.mrf.mxu0 }
 0x344   : > { %14546 = vst [vmem:[#allocation23_spill] sm:$0xff] %v12520_v61  ;;  %v12523_v58 = vadd.f32 %v4869_v34, %v4677_v63  ;;  %v4686_v3 = vpop.f32.mrf.mxu1  ;;  %v4685_v61 = vadd.f32 %v4684_v59, %v12206_v60 }
 0x345   : > { %v4873_v5 = vpop.f32.mrf.mxu0 }
 0x346   : > { %14547 = vst [vmem:[#allocation26_spill] sm:$0xff] %v12523_v58  ;;  %v12528_v25 = vadd.f32 %v4873_v5, %v4681_v14  ;;  %v4690_v17 = vpop.f32.mrf.mxu1  ;;  %v4687_v58 = vadd.f32 %v4686_v3, %v12217_v1 }
 0x347   : > { %5381 = vmatmul.mubr.bf16.gmra.mxu1 %v3452_v54  ;;  %v4875_v49 = vpop.f32.mrf.mxu0  ;;  %v4691_v14 = vadd.f32 %v4690_v17, %v12206_v60 }
 0x348   : > { %14548 = vst [vmem:[#allocation27_spill] sm:$0xff] %v12528_v25  ;;  %v12533_v31 = vadd.f32 %v4875_v49, %v4683_v50  ;;  %5390 = vmatprep.mubr.bf16.mxu1 %v3463_v39  ;;  %v4692_v63 = vpop.f32.mrf.mxu1  ;;  %v14555_v25 = vld [vmem:[#allocation45_spill] sm:$0xff] }
 0x349   : > { %v4877_v34 = vpop.f32.mrf.mxu0  ;;  %v3462_v59 = vpack.c.bf16 %v14555_v25, %v14554_v10  ;;  %v4693_v50 = vadd.f32 %v4692_v63, %v12217_v1 }
 0x34a   : > { %14551 = vst [vmem:[#allocation29_spill] sm:$0xff] %v12533_v31  ;;  %v12536_v36 = vadd.f32 %v4877_v34, %v4685_v61  ;;  %v4694_v33 = vpop.f32.mrf.mxu1  ;;  %v14557_v31 = vld [vmem:[#allocation50_spill] sm:$0xff] }
 0x34b   : > { %v4879_v56 = vpop.f32.mrf.mxu0  ;;  %v3473_v61 = vpack.c.bf16 %v11559_v22, %v14557_v31  ;;  %v4695_v34 = vadd.f32 %v4694_v33, %v12206_v60  ;;  %v14561_v31 = vld [vmem:[#allocation48_spill] sm:$0xff] }
 0x34c   : > { %14552 = vst [vmem:[#allocation28_spill] sm:$0xff] %v12536_v36  ;;  %v12539_v5 = vadd.f32 %v4879_v56, %v4687_v58  ;;  %v4696_v30 = vpop.f32.mrf.mxu1 }
 0x34d   : > { %v4883_v54 = vpop.f32.mrf.mxu0 }
 0x34e   : > { %14553 = vst [vmem:[#allocation32_spill] sm:$0xff] %v12539_v5  ;;  %v12544_v39 = vadd.f32 %v4883_v54, %v4691_v14  ;;  %v4700_v49 = vpop.f32.mrf.mxu1  ;;  %v4697_v5 = vadd.f32 %v4696_v30, %v12217_v1 }
 0x34f   : > { %5391 = vmatmul.mubr.bf16.gmra.mxu1 %v3462_v59  ;;  %v4885_v3 = vpop.f32.mrf.mxu0  ;;  %v4701_v22 = vadd.f32 %v4700_v49, %v12206_v60  ;;  %v14562_v59 = vld [vmem:[#allocation51_spill] sm:$0xff] }
 0x350   : > { %14556 = vst [vmem:[#allocation35_spill] sm:$0xff] %v12544_v39  ;;  %v12549_v17 = vadd.f32 %v4885_v3, %v4693_v50  ;;  %5400 = vmatprep.mubr.bf16.mxu1 %v3473_v61  ;;  %v4702_v58 = vpop.f32.mrf.mxu1  ;;  %v3472_v39 = vpack.c.bf16 %v14562_v59, %v14561_v31  ;;  %v14563_v50 = vld [vmem:[#allocation55_spill] sm:$0xff]  ;;  %v14564_v3 = vld [vmem:[#allocation56_spill] sm:$0xff] }
 0x351   : > { %v4887_v56 = vpop.f32.mrf.mxu0  ;;  %v3483_v61 = vpack.c.bf16 %v14564_v3, %v14563_v50  ;;  %v14570_v3 = vld [vmem:[#allocation57_spill] sm:$0xff] }
 0x352   : > { %14558 = vst [vmem:[#allocation31_spill] sm:$0xff] %v12549_v17  ;;  %v12552_v25 = vadd.f32 %v4887_v56, %v4695_v34  ;;  %v4704_v63 = vpop.f32.mrf.mxu1  ;;  %v4703_v17 = vadd.f32 %v4702_v58, %v12217_v1 }
 0x353   : > { %v4889_v14 = vpop.f32.mrf.mxu0 }
 0x354   : > { %14559 = vst [vmem:[#allocation34_spill] sm:$0xff] %v12552_v25  ;;  %v12554_v54 = vadd.f32 %v4889_v14, %v4697_v5  ;;  %v4706_v10 = vpop.f32.mrf.mxu1  ;;  %v4705_v5 = vadd.f32 %v4704_v63, %v12206_v60  ;;  %v14571_v63 = vld [vmem:[#allocation30_spill] sm:$0xff] }
 0x355   : > { %v4707_v31 = vadd.f32 %v4706_v10, %v12217_v1 }
 0x356   : > { %14560 = vst [vmem:[#allocation38_spill] sm:$0xff] %v12554_v54  ;;  %v4893_v33 = vpop.f32.mrf.mxu0 }
 0x357   : > { %v12562_v36 = vadd.f32 %v4893_v33, %v4701_v22  ;;  %v4710_v30 = vpop.f32.mrf.mxu1  ;;  %5401 = vmatmul.mubr.bf16.gmra.mxu1 %v3472_v39  ;;  %v14569_v39 = vld [vmem:[#allocation53_spill] sm:$0xff] }
 0x358   : > { %v4895_v34 = vpop.f32.mrf.mxu0  ;;  %5410 = vmatprep.mubr.bf16.mxu1 %v3483_v61  ;;  %v4711_v58 = vadd.f32 %v4710_v30, %v12206_v60  ;;  %v3482_v61 = vpack.c.bf16 %v14570_v3, %v14569_v39 }
 0x359   : > { %14565 = vst [vmem:[#allocation44_spill] sm:$0xff] %v12562_v36  ;;  %v12565_v56 = vadd.f32 %v4895_v34, %v4703_v17  ;;  %v4712_v49 = vpop.f32.mrf.mxu1  ;;  %v14572_v17 = vld [vmem:[#allocation33_spill] sm:$0xff] }
 0x35a   : > { %v4897_v14 = vpop.f32.mrf.mxu0  ;;  %v3493_v34 = vpack.c.bf16 %v14572_v17, %v14571_v63  ;;  %v14576_v17 = vld [vmem:[#allocation9_spill] sm:$0xff] }
 0x35b   : > { %14566 = vst [vmem:[#allocation47_spill] sm:$0xff] %v12565_v56  ;;  %v12568_v59 = vadd.f32 %v4897_v14, %v4705_v5  ;;  %v4714_v54 = vpop.f32.mrf.mxu1  ;;  %v4713_v56 = vadd.f32 %v4712_v49, %v12217_v1 }
 0x35c   : > { %v4899_v50 = vpop.f32.mrf.mxu0  ;;  %v4715_v30 = vadd.f32 %v4714_v54, %v12206_v60  ;;  %v14577_v54 = vld [vmem:[#allocation36_spill] sm:$0xff] }
 0x35d   : > { %14567 = vst [vmem:[#allocation42_spill] sm:$0xff] %v12568_v59  ;;  %v12571_v22 = vadd.f32 %v4899_v50, %v4707_v31  ;;  %v4716_v33 = vpop.f32.mrf.mxu1 }
 0x35e   : > { %v4903_v36 = vpop.f32.mrf.mxu0  ;;  %v4717_v39 = vadd.f32 %v4716_v33, %v12217_v1 }
 0x35f   : > { %14568 = vst [vmem:[#allocation45_spill] sm:$0xff] %v12571_v22  ;;  %v12578_v25 = vadd.f32 %v4903_v36, %v4711_v58  ;;  %v4720_v10 = vpop.f32.mrf.mxu1  ;;  %5411 = vmatmul.mubr.bf16.gmra.mxu1 %v3482_v61  ;;  %v14575_v61 = vld [vmem:[#allocation7_spill] sm:$0xff] }
 0x360   : > { %v4905_v5 = vpop.f32.mrf.mxu0  ;;  %5420 = vmatprep.mubr.bf16.mxu1 %v3493_v34  ;;  %v4721_v49 = vadd.f32 %v4720_v10, %v12206_v60  ;;  %v3492_v34 = vpack.c.bf16 %v14576_v17, %v14575_v61  ;;  %v14579_v61 = vld [vmem:[#allocation25_spill] sm:$0xff] }
 0x361   : > { %14573 = vst [vmem:[#allocation50_spill] sm:$0xff] %v12578_v25  ;;  %v12581_v14 = vadd.f32 %v4905_v5, %v4713_v56  ;;  %v4722_v31 = vpop.f32.mrf.mxu1  ;;  %v14578_v56 = vld [vmem:[#allocation10_spill] sm:$0xff] }
 0x362   : > { %v4907_v50 = vpop.f32.mrf.mxu0  ;;  %v3503_v5 = vpack.c.bf16 %v14578_v56, %v14577_v54 }
 0x363   : > { %14574 = vst [vmem:[#allocation48_spill] sm:$0xff] %v12581_v14  ;;  %v12584_v3 = vadd.f32 %v4907_v50, %v4715_v30  ;;  %v4724_v22 = vpop.f32.mrf.mxu1  ;;  %v4723_v14 = vadd.f32 %v4722_v31, %v12217_v1 }
 0x364   : > { %v4909_v63 = vpop.f32.mrf.mxu0  ;;  %v4725_v50 = vadd.f32 %v4724_v22, %v12206_v60  ;;  %v14582_v60 = vld [vmem:[#allocation8_spill] sm:$0xff] }
 0x365   : > { %v12587_v36 = vadd.f32 %v4909_v63, %v4717_v39  ;;  %v4726_v58 = vpop.f32.mrf.mxu1  ;;  %v3502_v22 = vpack.c.bf16 %v11685_v53, %v14582_v60 }
 0x366   : > { %v4913_v25 = vpop.f32.mrf.mxu0  ;;  %v4727_v31 = vadd.f32 %v4726_v58, %v12217_v1 }
 0x367   : > { %v12594_v59 = vadd.f32 %v4913_v25, %v4721_v49  ;;  %v4956_v33 = vpop.f32.mrf.mxu1  ;;  %5421 = vmatmul.mubr.bf16.gmra.mxu1 %v3492_v34  ;;  %v14580_v34 = vld [vmem:[#allocation40_spill] sm:$0xff] }
 0x368   : > { %v12597_v30 = vadd.f32 %v4956_v33, %v12234_v16  ;;  %v4915_v10 = vpop.f32.mrf.mxu0  ;;  %5430 = vmatprep.mubr.bf16.mxu1 %v3503_v5 }
 0x369   : > { %v12600_v39 = vadd.f32 %v4915_v10, %v4723_v14  ;;  %v4958_v63 = vpop.f32.mrf.mxu1 }
 0x36a   : > { %v12603_v17 = vadd.f32 %v4958_v63, %v14579_v61  ;;  %v4917_v54 = vpop.f32.mrf.mxu0  ;;  %v14584_v63 = vld [vmem:[#allocation11_spill] sm:$0xff] }
 0x36b   : > { %v12606_v25 = vadd.f32 %v4917_v54, %v4725_v50  ;;  %v4960_v49 = vpop.f32.mrf.mxu1  ;;  %v3513_v58 = vpack.c.bf16 %v11716_v45, %v14584_v63  ;;  %v14590_v63 = vld [vmem:[#allocation46_spill] sm:$0xff] }
 0x36c   : > { %v12609_v56 = vadd.f32 %v4960_v49, %v14580_v34  ;;  %v4919_v16 = vpop.f32.mrf.mxu0  ;;  %v14585_v49 = vld [vmem:[#allocation37_spill] sm:$0xff] }
 0x36d   : > { %v12611_v33 = vadd.f32 %v4919_v16, %v4727_v31  ;;  %v4962_v5 = vpop.f32.mrf.mxu1 }
 0x36e   : > { %14581 = vst [vmem:[#allocation51_spill] sm:$0xff] %v12609_v56  ;;  %v12616_v14 = vadd.f32 %v4962_v5, %v12262_v35  ;;  %v12618_v10 = vpop.f32.mrf.mxu0  ;;  %v14587_v35 = vld [vmem:[#allocation41_spill] sm:$0xff]  ;;  %v14589_v56 = vld [vmem:[#allocation39_spill] sm:$0xff] }
 0x36f   : > { %v4966_v50 = vpop.f32.mrf.mxu1  ;;  %5431 = vmatmul.mubr.bf16.gmra.mxu1 %v3502_v22  ;;  %v3512_v45 = vpack.c.bf16 %v14490_v12, %v14589_v56 }
 0x370   : > { %14583 = vst [vmem:[#allocation55_spill] sm:$0xff] %v12616_v14  ;;  %v4967_v61 = vadd.f32 %v4966_v50, %v12270_v55  ;;  %v12623_v54 = vpop.f32.mrf.mxu0  ;;  %5440 = vmatprep.mubr.bf16.mxu1 %v3513_v58  ;;  %v3523_v58 = vpack.c.bf16 %v11744_v48, %v14590_v63  ;;  %v14593_v48 = vld [vmem:[#allocation59_spill] sm:$0xff]  ;;  %v14595_v63 = vld [vmem:[#allocation12_spill] sm:$0xff] }
 0x371   : > { %v4968_v31 = vpop.f32.mrf.mxu1 }
 0x372   : > { %v4969_v34 = vadd.f32 %v4968_v31, %v14585_v49  ;;  %v12626_v16 = vpop.f32.mrf.mxu0 }
 0x373   : > { %14586 = vst [vmem:[#allocation56_spill] sm:$0xff] %v12626_v16  ;;  %v4970_v53 = vpop.f32.mrf.mxu1  ;;  %v14591_v16 = vld [vmem:[#allocation43_spill] sm:$0xff] }
 0x374   : > { %v4971_v5 = vadd.f32 %v4970_v53, %v14587_v35  ;;  %v12629_v60 = vpop.f32.mrf.mxu0 }
 0x375   : > { %14588 = vst [vmem:[#allocation53_spill] sm:$0xff] %v12629_v60  ;;  %v4972_v14 = vpop.f32.mrf.mxu1 }
 0x376   : > { %v4973_v22 = vadd.f32 %v4972_v14, %v12302_v47  ;;  %v5159_v55 = vpop.f32.mrf.mxu0 }
 0x377   : > { %v12636_v50 = vadd.f32 %v5159_v55, %v4967_v61  ;;  %v4976_v31 = vpop.f32.mrf.mxu1  ;;  %5441 = vmatmul.mubr.bf16.gmra.mxu1 %v3512_v45 }
 0x378   : > { %v12639_v49 = vadd.f32 %v4976_v31, %v12311_v13  ;;  %v5161_v53 = vpop.f32.mrf.mxu0  ;;  %5450 = vmatprep.mubr.bf16.mxu1 %v3523_v58  ;;  %v3522_v58 = vpack.c.bf16 %v11741_v11, %v14595_v63 }
 0x379   : > { %v12641_v35 = vadd.f32 %v5161_v53, %v4969_v34  ;;  %v4978_v60 = vpop.f32.mrf.mxu1  ;;  %v14598_v53 = vld [vmem:[#allocation60_spill] sm:$0xff] }
 0x37a   : > { %v12644_v12 = vadd.f32 %v4978_v60, %v14591_v16  ;;  %v5163_v47 = vpop.f32.mrf.mxu0  ;;  %v14597_v16 = vld [vmem:[#allocation49_spill] sm:$0xff] }
 0x37b   : > { %v12646_v56 = vadd.f32 %v5163_v47, %v4971_v5  ;;  %v4980_v14 = vpop.f32.mrf.mxu1  ;;  %v3533_v5 = vpack.c.bf16 %v11772_v0, %v14597_v16  ;;  %v14604_v0 = vld [vmem:[#allocation14_spill] sm:$0xff] }
 0x37c   : > { %14592 = vst [vmem:[#allocation57_spill] sm:$0xff] %v12644_v12  ;;  %v12649_v61 = vadd.f32 %v4980_v14, %v14593_v48  ;;  %v5165_v55 = vpop.f32.mrf.mxu0  ;;  %v14600_v48 = vld [vmem:[#allocation61_spill] sm:$0xff] }
 0x37d   : > { %v12651_v45 = vadd.f32 %v5165_v55, %v4973_v22  ;;  %v4982_v13 = vpop.f32.mrf.mxu1  ;;  %v14603_v12 = vld [vmem:[#allocation13_spill] sm:$0xff] }
 0x37e   : > { %14594 = vst [vmem:[#allocation30_spill] sm:$0xff] %v12649_v61  ;;  %v12656_v34 = vadd.f32 %v4982_v13, %v12343_v26  ;;  %v12658_v31 = vpop.f32.mrf.mxu0  ;;  %v14601_v26 = vld [vmem:[#allocation62_spill] sm:$0xff]  ;;  %v3532_v16 = vpack.c.bf16 %v14604_v0, %v14603_v12 }
 0x37f   : > { %v4986_v60 = vpop.f32.mrf.mxu1  ;;  %5451 = vmatmul.mubr.bf16.gmra.mxu1 %v3522_v58 }
 0x380   : > { %14596 = vst [vmem:[#allocation33_spill] sm:$0xff] %v12656_v34  ;;  %v4987_v47 = vadd.f32 %v4986_v60, %v14598_v53  ;;  %v12663_v14 = vpop.f32.mrf.mxu0  ;;  %5460 = vmatprep.mubr.bf16.mxu1 %v3533_v5  ;;  %v14605_v53 = vld [vmem:[#allocation52_spill] sm:$0xff] }
 0x381   : > { %14599 = vst [vmem:[#allocation7_spill] sm:$0xff] %v12663_v14  ;;  %v4988_v22 = vpop.f32.mrf.mxu1  ;;  %v3543_v5 = vpack.c.bf16 %v11800_v9, %v14605_v53 }
 0x382   : > { %v4989_v55 = vadd.f32 %v4988_v22, %v14600_v48  ;;  %v12666_v61 = vpop.f32.mrf.mxu0 }
 0x383   : > { %v4990_v11 = vpop.f32.mrf.mxu1 }
 0x384   : > { %v4991_v13 = vadd.f32 %v4990_v11, %v14601_v26  ;;  %v12669_v63 = vpop.f32.mrf.mxu0 }
 0x385   : > { %14602 = vst [vmem:[#allocation9_spill] sm:$0xff] %v12669_v63  ;;  %v4992_v34 = vpop.f32.mrf.mxu1 }
 0x386   : > { %v4993_v58 = vadd.f32 %v4992_v34, %v12380_v24  ;;  %v5179_v60 = vpop.f32.mrf.mxu0 }
 0x387   : > { %v12676_v14 = vadd.f32 %v5179_v60, %v4987_v47  ;;  %v4996_v22 = vpop.f32.mrf.mxu1  ;;  %5461 = vmatmul.mubr.bf16.gmra.mxu1 %v3532_v16  ;;  %v14607_v60 = vld [vmem:[#allocation15_spill] sm:$0xff] }
 0x388   : > { %v12679_v48 = vadd.f32 %v4996_v22, %v12392_v6  ;;  %v5181_v11 = vpop.f32.mrf.mxu0  ;;  %5470 = vmatprep.mubr.bf16.mxu1 %v3543_v5  ;;  %v14608_v5 = vld [vmem:[#allocation17_spill] sm:$0xff] }
 0x389   : > { %v12681_v26 = vadd.f32 %v5181_v11, %v4989_v55  ;;  %v4998_v63 = vpop.f32.mrf.mxu1  ;;  %v3542_v55 = vpack.c.bf16 %v14607_v60, %v11781_v46 }
 0x38a   : > { %v12684_v12 = vadd.f32 %v4998_v63, %v12396_v29  ;;  %v5183_v24 = vpop.f32.mrf.mxu0  ;;  %v14609_v29 = vld [vmem:[#allocation18_spill] sm:$0xff] }
 0x38b   : > { %v12686_v34 = vadd.f32 %v5183_v24, %v4991_v13  ;;  %v5000_v0 = vpop.f32.mrf.mxu1  ;;  %v3553_v63 = vpack.c.bf16 %v14609_v29, %v14608_v5  ;;  %v3552_v5 = vpack.c.bf16 %v11828_v43, %v14520_v7  ;;  %v14611_v29 = vld [vmem:[#allocation54_spill] sm:$0xff] }
 0x38c   : > { %v12689_v9 = vadd.f32 %v5000_v0, %v12401_v38  ;;  %v5185_v47 = vpop.f32.mrf.mxu0 }
 0x38d   : > { %v12691_v16 = vadd.f32 %v5185_v47, %v4993_v58  ;;  %v12693_v6 = vpop.f32.mrf.mxu1 }
 0x38e   : > { %14606 = vst [vmem:[#allocation36_spill] sm:$0xff] %v12689_v9  ;;  %v12697_v53 = vpop.f32.mrf.mxu0 }
 0x38f   : > { %v5006_v22 = vpop.f32.mrf.mxu1  ;;  %5471 = vmatmul.mubr.bf16.gmra.mxu1 %v3542_v55 }
 0x390   : > { %v5007_v13 = vadd.f32 %v5006_v22, %v12418_v32  ;;  %v12702_v11 = vpop.f32.mrf.mxu0  ;;  %5480 = vmatprep.mubr.bf16.mxu1 %v3553_v63  ;;  %v14612_v32 = vld [vmem:[#allocation19_spill] sm:$0xff]  ;;  %v4627_v63 = vadd.f32 %v12413_v37, %v12217_v1 }
 0x391   : > { %v5008_v38 = vpop.f32.mrf.mxu1  ;;  %v3563_v22 = vpack.c.bf16 %v14612_v32, %v14611_v29 }
 0x392   : > { %v5009_v58 = vadd.f32 %v5008_v38, %v12422_v23  ;;  %v12705_v24 = vpop.f32.mrf.mxu0 }
 0x393   : > { %v5010_v0 = vpop.f32.mrf.mxu1 }
 0x394   : > { %v5011_v46 = vadd.f32 %v5010_v0, %v12430_v15  ;;  %v12708_v47 = vpop.f32.mrf.mxu0  ;;  %v4820_v0 = vadd.f32 %v12432_v27, %v4627_v63  ;;  %v14614_v27 = vld [vmem:[#allocation58_spill] sm:$0xff] }
 0x395   : > { %14610 = vst [vmem:[#allocation10_spill] sm:$0xff] %v12708_v47  ;;  %v5012_v60 = vpop.f32.mrf.mxu1 }
 0x396   : > { %v5199_v55 = vpop.f32.mrf.mxu0  ;;  %v5013_v32 = vadd.f32 %v5012_v60, %v4820_v0 }
 0x397   : > { %v12716_v9 = vadd.f32 %v5199_v55, %v5007_v13  ;;  %v5016_v23 = vpop.f32.mrf.mxu1  ;;  %5481 = vmatmul.mubr.bf16.gmra.mxu1 %v3552_v5 }
 0x398   : > { %v12719_v38 = vadd.f32 %v5016_v23, %v12439_v62  ;;  %v5201_v15 = vpop.f32.mrf.mxu0  ;;  %5490 = vmatprep.mubr.bf16.mxu1 %v3563_v22 }
 0x399   : > { %v12722_v47 = vadd.f32 %v5201_v15, %v5009_v58  ;;  %v5018_v43 = vpop.f32.mrf.mxu1  ;;  %v14615_v58 = vld [vmem:[#allocation22_spill] sm:$0xff] }
 0x39a   : > { %v12725_v7 = vadd.f32 %v5018_v43, %v12450_v28  ;;  %v5203_v29 = vpop.f32.mrf.mxu0  ;;  %v3562_v63 = vpack.c.bf16 %v14615_v58, %v14614_v27 }
 0x39b   : > { %v12727_v37 = vadd.f32 %v5203_v29, %v5011_v46  ;;  %v5020_v13 = vpop.f32.mrf.mxu1 }
 0x39c   : > { %v12730_v5 = vadd.f32 %v5020_v13, %v12452_v52  ;;  %v5205_v62 = vpop.f32.mrf.mxu0  ;;  %v4647_v52 = vadd.f32 %v12457_v41, %v12217_v1 }
 0x39d   : > { %v12732_v55 = vadd.f32 %v5205_v62, %v5013_v32  ;;  %v12734_v22 = vpop.f32.mrf.mxu1 }
 0x39e   : > { %14613 = vst [vmem:[#allocation25_spill] sm:$0xff] %v12730_v5  ;;  %v12738_v23 = vpop.f32.mrf.mxu0  ;;  %v4840_v32 = vadd.f32 %v12474_v4, %v4647_v52 }
 0x39f   : > { %v5026_v28 = vpop.f32.mrf.mxu1  ;;  %5491 = vmatmul.mubr.bf16.gmra.mxu1 %v3562_v63 }
 0x3a0   : > { %v5027_v60 = vadd.f32 %v5026_v28, %v12462_v57  ;;  %v12741_v46 = vpop.f32.mrf.mxu0 }
 0x3a1   : > { %v5028_v15 = vpop.f32.mrf.mxu1 }
 0x3a2   : > { %v5029_v0 = vadd.f32 %v5028_v15, %v12470_v40  ;;  %v12746_v43 = vpop.f32.mrf.mxu0 }
 0x3a3   : > { %14616 = vst [vmem:[#allocation40_spill] sm:$0xff] %v12746_v43  ;;  %v5030_v29 = vpop.f32.mrf.mxu1 }
 0x3a4   : > { %v5031_v13 = vadd.f32 %v5030_v29, %v12472_v42  ;;  %v12750_v62 = vpop.f32.mrf.mxu0 }
 0x3a5   : > { %v5032_v27 = vpop.f32.mrf.mxu1 }
 0x3a6   : > { %v5033_v58 = vadd.f32 %v5032_v27, %v4840_v32  ;;  %v5219_v57 = vpop.f32.mrf.mxu0 }
 0x3a7   : > { %v12752_v63 = vadd.f32 %v5219_v57, %v5027_v60  ;;  %v5036_v28 = vpop.f32.mrf.mxu1 }
 0x3a8   : > { %v12755_v5 = vadd.f32 %v5036_v28, %v12480_v20  ;;  %v5221_v41 = vpop.f32.mrf.mxu0  ;;  %v14617_v28 = vld [vmem:[#allocation24_spill] sm:$0xff] }
 0x3a9   : > { %v12757_v40 = vadd.f32 %v5221_v41, %v5029_v0  ;;  %v5038_v15 = vpop.f32.mrf.mxu1 }
 0x3aa   : > { %v12760_v43 = vadd.f32 %v5038_v15, %v12485_v51  ;;  %v5223_v4 = vpop.f32.mrf.mxu0 }
 0x3ab   : > { %v12762_v42 = vadd.f32 %v5223_v4, %v5031_v13  ;;  %v5040_v52 = vpop.f32.mrf.mxu1  ;;  %v14620_v4 = vld [vmem:[#allocation20_spill] sm:$0xff] }
 0x3ac   : > { %v12765_v29 = vadd.f32 %v5040_v52, %v12488_v44  ;;  %v5225_v60 = vpop.f32.mrf.mxu0 }
 0x3ad   : > { %v12767_v32 = vadd.f32 %v5225_v60, %v5033_v58  ;;  %v5042_v27 = vpop.f32.mrf.mxu1 }
 0x3ae   : > { %v12770_v20 = vadd.f32 %v5042_v27, %v12491_v19 }
 0x3af   : > { %v5046_v0 = vpop.f32.mrf.mxu1 }
 0x3b0   : > { %v12773_v57 = vadd.f32 %v5046_v0, %v12496_v21  ;;  %v14624_v0 = vld [vmem:[#allocation23_spill] sm:$0xff] }
 0x3b1   : > { %v5048_v51 = vpop.f32.mrf.mxu1 }
 0x3b2   : > { %v12776_v41 = vadd.f32 %v5048_v51, %v14617_v28 }
 0x3b3   : > { %v5050_v13 = vpop.f32.mrf.mxu1 }
 0x3b4   : > { %14618 = vst [vmem:[#allocation8_spill] sm:$0xff] %v12776_v41  ;;  %v12779_v15 = vadd.f32 %v5050_v13, %v12504_v18  ;;  %v14626_v41 = vld [vmem:[#allocation26_spill] sm:$0xff] }
 0x3b5   : > { %v5052_v44 = vpop.f32.mrf.mxu1 }
 0x3b6   : > { %14619 = vst [vmem:[#allocation11_spill] sm:$0xff] %v12779_v15  ;;  %v12782_v58 = vadd.f32 %v5052_v44, %v14620_v4  ;;  %v14628_v15 = vld [vmem:[#allocation27_spill] sm:$0xff] }
 0x3b7   : > { %v5056_v52 = vpop.f32.mrf.mxu1 }
 0x3b8   : > { %14621 = vst [vmem:[#allocation37_spill] sm:$0xff] %v12782_v58  ;;  %v12785_v19 = vadd.f32 %v5056_v52, %v12512_v8  ;;  %v14630_v58 = vld [vmem:[#allocation29_spill] sm:$0xff] }
 0x3b9   : > { %v5058_v60 = vpop.f32.mrf.mxu1 }
 0x3ba   : > { %14622 = vst [vmem:[#allocation41_spill] sm:$0xff] %v12785_v19  ;;  %v12788_v21 = vadd.f32 %v5058_v60, %v12517_v2  ;;  %v14632_v19 = vld [vmem:[#allocation28_spill] sm:$0xff] }
 0x3bb   : > { %v5060_v27 = vpop.f32.mrf.mxu1 }
 0x3bc   : > { %14623 = vst [vmem:[#allocation39_spill] sm:$0xff] %v12788_v21  ;;  %v12791_v51 = vadd.f32 %v5060_v27, %v14624_v0  ;;  %v14634_v21 = vld [vmem:[#allocation32_spill] sm:$0xff] }
 0x3bd   : > { %v5062_v28 = vpop.f32.mrf.mxu1 }
 0x3be   : > { %14625 = vst [vmem:[#allocation46_spill] sm:$0xff] %v12791_v51  ;;  %v12794_v18 = vadd.f32 %v5062_v28, %v14626_v41  ;;  %v14636_v51 = vld [vmem:[#allocation35_spill] sm:$0xff] }
 0x3bf   : > { %v5066_v13 = vpop.f32.mrf.mxu1 }
 0x3c0   : > { %14627 = vst [vmem:[#allocation43_spill] sm:$0xff] %v12794_v18  ;;  %v12797_v44 = vadd.f32 %v5066_v13, %v14628_v15  ;;  %v14638_v18 = vld [vmem:[#allocation31_spill] sm:$0xff] }
 0x3c1   : > { %v5068_v4 = vpop.f32.mrf.mxu1 }
 0x3c2   : > { %14629 = vst [vmem:[#allocation59_spill] sm:$0xff] %v12797_v44  ;;  %v12800_v8 = vadd.f32 %v5068_v4, %v14630_v58  ;;  %v14640_v44 = vld [vmem:[#allocation34_spill] sm:$0xff] }
 0x3c3   : > { %v5070_v52 = vpop.f32.mrf.mxu1 }
 0x3c4   : > { %14631 = vst [vmem:[#allocation12_spill] sm:$0xff] %v12800_v8  ;;  %v12803_v2 = vadd.f32 %v5070_v52, %v14632_v19  ;;  %v14642_v8 = vld [vmem:[#allocation38_spill] sm:$0xff] }
 0x3c5   : > { %v5072_v60 = vpop.f32.mrf.mxu1 }
 0x3c6   : > { %14633 = vst [vmem:[#allocation49_spill] sm:$0xff] %v12803_v2  ;;  %v12806_v27 = vadd.f32 %v5072_v60, %v14634_v21  ;;  %v14644_v2 = vld [vmem:[#allocation44_spill] sm:$0xff] }
 0x3c7   : > { %v5076_v0 = vpop.f32.mrf.mxu1 }
 0x3c8   : > { %14635 = vst [vmem:[#allocation60_spill] sm:$0xff] %v12806_v27  ;;  %v12809_v41 = vadd.f32 %v5076_v0, %v14636_v51  ;;  %v14646_v27 = vld [vmem:[#allocation47_spill] sm:$0xff] }
 0x3c9   : > { %v5078_v28 = vpop.f32.mrf.mxu1 }
 0x3ca   : > { %14637 = vst [vmem:[#allocation61_spill] sm:$0xff] %v12809_v41  ;;  %v12812_v15 = vadd.f32 %v5078_v28, %v14638_v18  ;;  %v14648_v41 = vld [vmem:[#allocation42_spill] sm:$0xff] }
 0x3cb   : > { %v5080_v13 = vpop.f32.mrf.mxu1 }
 0x3cc   : > { %14639 = vst [vmem:[#allocation62_spill] sm:$0xff] %v12812_v15  ;;  %v12815_v58 = vadd.f32 %v5080_v13, %v14640_v44  ;;  %v14650_v15 = vld [vmem:[#allocation45_spill] sm:$0xff] }
 0x3cd   : > { %v5082_v4 = vpop.f32.mrf.mxu1 }
 0x3ce   : > { %14641 = vst [vmem:[#allocation13_spill] sm:$0xff] %v12815_v58  ;;  %v12818_v19 = vadd.f32 %v5082_v4, %v14642_v8  ;;  %v14652_v58 = vld [vmem:[#allocation50_spill] sm:$0xff] }
 0x3cf   : > { %v5086_v52 = vpop.f32.mrf.mxu1 }
 0x3d0   : > { %14643 = vst [vmem:[#allocation14_spill] sm:$0xff] %v12818_v19  ;;  %v12821_v21 = vadd.f32 %v5086_v52, %v14644_v2  ;;  %v14654_v19 = vld [vmem:[#allocation48_spill] sm:$0xff] }
 0x3d1   : > { %v5088_v60 = vpop.f32.mrf.mxu1 }
 0x3d2   : > { %14645 = vst [vmem:[#allocation52_spill] sm:$0xff] %v12821_v21  ;;  %v12824_v51 = vadd.f32 %v5088_v60, %v14646_v27 }
 0x3d3   : > { %v5090_v0 = vpop.f32.mrf.mxu1 }
 0x3d4   : > { %14647 = vst [vmem:[#allocation15_spill] sm:$0xff] %v12824_v51  ;;  %v12827_v18 = vadd.f32 %v5090_v0, %v14648_v41 }
 0x3d5   : > { %v5092_v28 = vpop.f32.mrf.mxu1 }
 0x3d6   : > { %14649 = vst [vmem:[#allocation17_spill] sm:$0xff] %v12827_v18  ;;  %v12830_v44 = vadd.f32 %v5092_v28, %v14650_v15 }
 0x3d7   : > { %v5096_v13 = vpop.f32.mrf.mxu1 }
 0x3d8   : > { %14651 = vst [vmem:[#allocation18_spill] sm:$0xff] %v12830_v44  ;;  %v12833_v8 = vadd.f32 %v5096_v13, %v14652_v58 }
 0x3d9   : > { %v5098_v4 = vpop.f32.mrf.mxu1 }
 0x3da   : > { %14653 = vst [vmem:[#allocation54_spill] sm:$0xff] %v12833_v8  ;;  %v12836_v2 = vadd.f32 %v5098_v4, %v14654_v19  ;;  %v12850_v8 = vpop.f32.mrf.mxu0  ;;  %v5150_v4 = vadd.f32 %v12618_v10, %v12597_v30 }
 0x3db   : > { %v5100_v52 = vpop.f32.mrf.mxu1 }
 0x3dc   : > { %14655 = vst [vmem:[#allocation19_spill] sm:$0xff] %v12836_v2  ;;  %v12839_v27 = vadd.f32 %v5100_v52, %v12584_v3 }
 0x3dd   : > { %v5102_v60 = vpop.f32.mrf.mxu1 }
 0x3de   : > { %14656 = vst [vmem:[#allocation58_spill] sm:$0xff] %v12839_v27  ;;  %v12842_v41 = vadd.f32 %v5102_v60, %v12587_v36  ;;  %v12862_v60 = vpop.f32.mrf.mxu0 }
 0x3df   : > { %v5106_v0 = vpop.f32.mrf.mxu1 }
 0x3e0   : > { %14657 = vst [vmem:[#allocation22_spill] sm:$0xff] %v12842_v41  ;;  %v12845_v15 = vadd.f32 %v5106_v0, %v12594_v59  ;;  %v5152_v59 = vadd.f32 %v12623_v54, %v12603_v17  ;;  %v14665_v41 = vld [vmem:[#allocation53_spill] sm:$0xff]  ;;  %v12868_v30 = vpop.f32.mrf.mxu0  ;;  %v8965_v17 = vld [vmem:[%s14015_s5 + $0x78] sm:$0xff]  }
 0x3e1   : > { %v5108_v28 = vpop.f32.mrf.mxu1  ;;  %8119 = vmatprep.subr.bf16.mxu0 %v8965_v17 }
 0x3e2   : > { %14658 = vst [vmem:[#allocation24_spill] sm:$0xff] %v12845_v15  ;;  %v12848_v58 = vadd.f32 %v5108_v28, %v12600_v39  ;;  %v14662_v28 = vld [vmem:[#allocation51_spill] sm:$0xff] }
 0x3e3   : > { %v5110_v13 = vpop.f32.mrf.mxu1 }
 0x3e4   : > { %14659 = vst [vmem:[#allocation20_spill] sm:$0xff] %v12848_v58  ;;  %v12853_v19 = vadd.f32 %v5110_v13, %v12606_v25  ;;  %v14663_v58 = vld [vmem:[#allocation56_spill] sm:$0xff] }
 0x3e5   : > { %v5112_v3 = vpop.f32.mrf.mxu1  ;;  %v5154_v15 = vadd.f32 %v14663_v58, %v14662_v28  ;;  %v12873_v58 = vpop.f32.mrf.mxu0 }
 0x3e6   : > { %14660 = vst [vmem:[#allocation23_spill] sm:$0xff] %v12853_v19  ;;  %v12858_v36 = vadd.f32 %v5112_v3, %v12611_v33  ;;  %v14664_v19 = vld [vmem:[#allocation55_spill] sm:$0xff] }
 0x3e7   : > { %v5342_v52 = vpop.f32.mrf.mxu1  ;;  %v5156_v27 = vadd.f32 %v14665_v41, %v14664_v19 }
 0x3e8   : > { %14661 = vst [vmem:[#allocation26_spill] sm:$0xff] %v12858_v36  ;;  %v5343_v39 = vadd.f32 %v5342_v52, %v5150_v4 }
 0x3e9   : > { %v5344_v0 = vpop.f32.mrf.mxu1 }
 0x3ea   : > { %v5345_v25 = vadd.f32 %v5344_v0, %v5152_v59  ;;  %v5501_v33 = vmax.f32 %v5343_v39, 0.0 }
 0x3eb   : > { %v5346_v13 = vpop.f32.mrf.mxu1 }
 0x3ec   : > { %v5347_v10 = vadd.f32 %v5346_v13, %v5154_v15  ;;  %v5502_v54 = vmax.f32 %v5345_v25, 0.0  ;;  %v5629_v59 = vrot.slane %v5501_v33, 2 }
 0x3ed   : > { %v5348_v3 = vpop.f32.mrf.mxu1 }
 0x3ee   : > { %v5503_v4 = vmax.f32 %v5347_v10, 0.0  ;;  %v5349_v52 = vadd.f32 %v5348_v3, %v5156_v27  ;;  %v5632_v19 = vrot.slane %v5502_v54, 2  ;;  %v12880_v27 = vpop.f32.mrf.mxu0 }
 0x3ef   : > { %v5352_v36 = vpop.f32.mrf.mxu1 }
 0x3f0   : > { %v5630_v0 = vrot.slane %v5503_v4, 2  ;;  %v5504_v28 = vmax.f32 %v5349_v52, 0.0  ;;  %v5353_v41 = vadd.f32 %v5352_v36, %v12636_v50  ;;  %v5170_v50 = vadd.f32 %v12658_v31, %v12639_v49 }
 0x3f1   : > { %v5354_v39 = vpop.f32.mrf.mxu1 }
 0x3f2   : > { %v5633_v15 = vrot.slane %v5504_v28, 2  ;;  %v5505_v13 = vmax.f32 %v5353_v41, 0.0  ;;  %v5355_v2 = vadd.f32 %v5354_v39, %v12641_v35  ;;  %v5631_v25 = vsel %vm552_vm2, %v5629_v59, %v5630_v0  ;;  %v8966_v35 = vld [vmem:[%s14015_s5 + $0x38] sm:$0xff]  }
 0x3f3   : > { %v5356_v44 = vpop.f32.mrf.mxu1  ;;  %v12878_v10 = vmax.f32 %v5501_v33, %v5631_v25  ;;  %v14668_v25 = vld [vmem:[#allocation57_spill] sm:$0xff]  ;;  %8120 = vmatpush3.bf16.msra.mxu0 %v8966_v35 }
 0x3f4   : > { %v5635_v17 = vrot.slane %v5505_v13, 2  ;;  %v5506_v3 = vmax.f32 %v5355_v2, 0.0  ;;  %v5357_v18 = vadd.f32 %v5356_v44, %v12646_v56  ;;  %v5634_v52 = vsel %vm552_vm2, %v5632_v19, %v5633_v15  ;;  %v14669_v56 = vld [vmem:[#allocation7_spill] sm:$0xff] }
 0x3f5   : > { %14666 = vst [vmem:[#allocation27_spill] sm:$0xff] %v12878_v10  ;;  %v5358_v36 = vpop.f32.mrf.mxu1  ;;  %v12886_v41 = vmax.f32 %v5502_v54, %v5634_v52  ;;  %v5172_v44 = vadd.f32 %v14669_v56, %v14668_v25  ;;  %v12899_v54 = vpop.f32.mrf.mxu0  ;;  %v14674_v56 = vld [vmem:[#allocation9_spill] sm:$0xff] }
 0x3f6   : > { %v5637_v33 = vrot.slane %v5506_v3, 2  ;;  %v5507_v59 = vmax.f32 %v5357_v18, 0.0  ;;  %v5359_v39 = vadd.f32 %v5358_v36, %v12651_v45  ;;  %v5636_v2 = vsel %vm552_vm2, %v5630_v0, %v5635_v17  ;;  %v8967_v36 = vld [vmem:[%s14015_s5 + $0x70] sm:$0xff]  }
 0x3f7   : > { %14667 = vst [vmem:[#allocation29_spill] sm:$0xff] %v12886_v41  ;;  %v5362_v19 = vpop.f32.mrf.mxu1  ;;  %v8485_v49 = vpack.i.bf16 %v12886_v41, %v12878_v10  ;;  %v12897_v31 = vmax.f32 %v5503_v4, %v5636_v2  ;;  %v14671_v4 = vld [vmem:[#allocation30_spill] sm:$0xff]  ;;  %8121 = vmatprep.subr.bf16.mxu0 %v8967_v36 }
 0x3f8   : > { %v5639_v52 = vrot.slane %v5507_v59, 2  ;;  %v5508_v51 = vmax.f32 %v5359_v39, 0.0  ;;  %v5363_v21 = vadd.f32 %v5362_v19, %v5170_v50  ;;  %v5638_v18 = vsel %vm552_vm2, %v5633_v15, %v5637_v33  ;;  %v14673_v15 = vld [vmem:[#allocation33_spill] sm:$0xff] }
 0x3f9   : > { %v5364_v45 = vpop.f32.mrf.mxu1  ;;  %8486 = vrot.lane.b32.xlu0 %v8485_v49, %s9127_s12  ;;  %v12903_v0 = vmax.f32 %v5504_v28, %v5638_v18  ;;  %v5174_v35 = vadd.f32 %v12666_v61, %v14671_v4  ;;  %v5176_v19 = vadd.f32 %v14674_v56, %v14673_v15  ;;  %v12915_v28 = vpop.f32.mrf.mxu0 }
 0x3fa   : > { %v5640_v2 = vsel %vm552_vm2, %v5635_v17, %v5639_v52  ;;  %v5641_v59 = vrot.slane %v5508_v51, 2  ;;  %v5365_v39 = vadd.f32 %v5364_v45, %v5172_v44  ;;  %v5509_v18 = vmax.f32 %v5363_v21, 0.0 }
 0x3fb   : > { %14670 = vst [vmem:[#allocation28_spill] sm:$0xff] %v12903_v0  ;;  %v5366_v50 = vpop.f32.mrf.mxu1  ;;  %v12911_v25 = vmax.f32 %v5505_v13, %v5640_v2  ;;  %v12920_v52 = vpop.f32.mrf.mxu0 }
 0x3fc   : > { %v5642_v49 = vsel %vm552_vm2, %v5637_v33, %v5641_v59  ;;  %v5367_v41 = vadd.f32 %v5366_v50, %v5174_v35  ;;  %v5510_v10 = vmax.f32 %v5365_v39, 0.0  ;;  %v5643_v13 = vrot.slane %v5509_v18, 2 }
 0x3fd   : > { %14672 = vst [vmem:[#allocation32_spill] sm:$0xff] %v12911_v25  ;;  %v5368_v0 = vpop.f32.mrf.mxu1  ;;  %v12918_v61 = vmax.f32 %v5506_v3, %v5642_v49 }
 0x3fe   : > { %v5511_v17 = vmax.f32 %v5367_v41, 0.0  ;;  %v5369_v51 = vadd.f32 %v5368_v0, %v5176_v19  ;;  %v5646_v2 = vrot.slane %v5510_v10, 2  ;;  %v12927_v41 = vpop.f32.mrf.mxu0 }
 0x3ff   : > { %v5372_v44 = vpop.f32.mrf.mxu1 }
 0x400   : > { %v5644_v45 = vrot.slane %v5511_v17, 2  ;;  %v5512_v36 = vmax.f32 %v5369_v51, 0.0  ;;  %v5373_v4 = vadd.f32 %v5372_v44, %v12676_v14  ;;  %v14675_v14 = vld [vmem:[#allocation63_spill] sm:$0xff]  ;;  %v5190_v51 = vadd.f32 %v12697_v53, %v12679_v48  ;;  %v12946_v48 = vpop.f32.mrf.mxu0 }
 0x401   : > { %v5374_v15 = vpop.f32.mrf.mxu1  ;;  %v4617_v49 = vadd.f32 %v14675_v14, %v12217_v1 }
 0x402   : > { %v5647_v56 = vrot.slane %v5512_v36, 2  ;;  %v5513_v33 = vmax.f32 %v5373_v4, 0.0  ;;  %v5375_v21 = vadd.f32 %v5374_v15, %v12681_v26  ;;  %v5645_v35 = vsel %vm552_vm2, %v5643_v13, %v5644_v45 }
 0x403   : > { %v5376_v3 = vpop.f32.mrf.mxu1  ;;  %v12925_v59 = vmax.f32 %v5509_v18, %v5645_v35 }
 0x404   : > { %v5649_v0 = vrot.slane %v5513_v33, 2  ;;  %v5514_v39 = vmax.f32 %v5375_v21, 0.0  ;;  %v5377_v50 = vadd.f32 %v5376_v3, %v12686_v34  ;;  %v5648_v19 = vsel %vm552_vm2, %v5646_v2, %v5647_v56  ;;  %v14676_v21 = vld [vmem:[#allocation16_spill] sm:$0xff] }
 0x405   : > { %v5378_v26 = vpop.f32.mrf.mxu1  ;;  %v12935_v44 = vmax.f32 %v5510_v10, %v5648_v19  ;;  %v4810_v35 = vadd.f32 %v14676_v21, %v4617_v49  ;;  %v5192_v34 = vadd.f32 %v12702_v11, %v12684_v12  ;;  %v8968_v12 = vld [vmem:[%s14015_s5 + $0x30] sm:$0xff]   ;;  %v8969_v11 = vld [vmem:[%s14015_s5 + $0xf8] sm:$0xff]   ;;  %v14679_v21 = vld [vmem:[#allocation10_spill] sm:$0xff] }
 0x406   : > { %v5651_v13 = vrot.slane %v5514_v39, 2  ;;  %v5515_v18 = vmax.f32 %v5377_v50, 0.0  ;;  %v5379_v4 = vadd.f32 %v5378_v26, %v12691_v16  ;;  %v5650_v15 = vsel %vm552_vm2, %v5644_v45, %v5649_v0  ;;  %8122 = vmatpush3.bf16.msra.mxu0 %v8968_v12  ;;  %8141 = vmatprep.subr.bf16.mxu1 %v8969_v11 }
 0x407   : > { %v5382_v2 = vpop.f32.mrf.mxu1  ;;  %v8490_v3 = vpack.i.bf16 %v12935_v44, %v12925_v59  ;;  %v12944_v14 = vmax.f32 %v5511_v17, %v5650_v15  ;;  %v5003_v45 = vadd.f32 %v12693_v6, %v4810_v35  ;;  %v8970_v17 = vld [vmem:[%s14015_s5 + $0xb8] sm:$0xff]  }
 0x408   : > { %v5653_v53 = vrot.slane %v5515_v18, 2  ;;  %v5516_v10 = vmax.f32 %v5379_v4, 0.0  ;;  %v5383_v50 = vadd.f32 %v5382_v2, %v5190_v51  ;;  %v5652_v16 = vsel %vm552_vm2, %v5647_v56, %v5651_v13  ;;  %v14677_v56 = vld [vmem:[#allocation36_spill] sm:$0xff]  ;;  %v8971_v18 = vld [vmem:[%s14015_s5 + $0x68] sm:$0xff]   ;;  %v12971_v2 = vpop.f32.mrf.mxu0  ;;  %8142 = vmatpush3.bf16.msra.mxu1 %v8970_v17 }
 0x409   : > { %v5384_v19 = vpop.f32.mrf.mxu1  ;;  %8491 = vrot.lane.b32.xlu0 %v8490_v3, %s9127_s12  ;;  %v12951_v49 = vmax.f32 %v5512_v36, %v5652_v16  ;;  %v5194_v6 = vadd.f32 %v12705_v24, %v14677_v56  ;;  %v5196_v35 = vadd.f32 %v14679_v21, %v5003_v45  ;;  %8123 = vmatprep.subr.bf16.mxu0 %v8971_v18 }
 0x40a   : > { %v5654_v51 = vsel %vm552_vm2, %v5649_v0, %v5653_v53  ;;  %v5655_v26 = vrot.slane %v5516_v10, 2  ;;  %v5385_v36 = vadd.f32 %v5384_v19, %v5192_v34  ;;  %v5517_v24 = vmax.f32 %v5383_v50, 0.0  ;;  %v12976_v56 = vpop.f32.mrf.mxu0 }
 0x40b   : > { %v5386_v4 = vpop.f32.mrf.mxu1  ;;  %v12968_v15 = vmax.f32 %v5513_v33, %v5654_v51 }
 0x40c   : > { %v5656_v3 = vsel %vm552_vm2, %v5651_v13, %v5655_v26  ;;  %v5387_v16 = vadd.f32 %v5386_v4, %v5194_v6  ;;  %v5518_v0 = vmax.f32 %v5385_v36, 0.0  ;;  %v5657_v12 = vrot.slane %v5517_v24, 2  ;;  %v12983_v18 = vpop.f32.mrf.mxu0 }
 0x40d   : > { %14678 = vst [vmem:[#allocation35_spill] sm:$0xff] %v12968_v15  ;;  %v5388_v34 = vpop.f32.mrf.mxu1  ;;  %v12974_v53 = vmax.f32 %v5514_v39, %v5656_v3 }
 0x40e   : > { %v5519_v10 = vmax.f32 %v5387_v16, 0.0  ;;  %v5389_v19 = vadd.f32 %v5388_v34, %v5196_v35  ;;  %v5660_v21 = vrot.slane %v5518_v0, 2 }
 0x40f   : > { %v5392_v33 = vpop.f32.mrf.mxu1 }
 0x410   : > { %v5658_v11 = vrot.slane %v5519_v10, 2  ;;  %v5520_v45 = vmax.f32 %v5389_v19, 0.0  ;;  %v5393_v51 = vadd.f32 %v5392_v33, %v12716_v9  ;;  %v14680_v9 = vld [vmem:[#allocation64_spill] sm:$0xff]  ;;  %v5210_v19 = vadd.f32 %v12738_v23, %v12719_v38  ;;  %v13002_v38 = vpop.f32.mrf.mxu0 }
 0x411   : > { %v5394_v13 = vpop.f32.mrf.mxu1  ;;  %v4637_v34 = vadd.f32 %v14680_v9, %v12217_v1 }
 0x412   : > { %v5661_v50 = vrot.slane %v5520_v45, 2  ;;  %v5521_v6 = vmax.f32 %v5393_v51, 0.0  ;;  %v5395_v17 = vadd.f32 %v5394_v13, %v12722_v47  ;;  %v5659_v26 = vsel %vm552_vm2, %v5657_v12, %v5658_v11 }
 0x413   : > { %v5396_v39 = vpop.f32.mrf.mxu1  ;;  %v12981_v36 = vmax.f32 %v5517_v24, %v5659_v26 }
 0x414   : > { %v5663_v4 = vrot.slane %v5521_v6, 2  ;;  %v5522_v35 = vmax.f32 %v5395_v17, 0.0  ;;  %v5397_v3 = vadd.f32 %v5396_v39, %v12727_v37  ;;  %v5662_v16 = vsel %vm552_vm2, %v5660_v21, %v5661_v50  ;;  %v14681_v17 = vld [vmem:[#allocation21_spill] sm:$0xff] }
 0x415   : > { %v5398_v47 = vpop.f32.mrf.mxu1  ;;  %v12991_v33 = vmax.f32 %v5518_v0, %v5662_v16  ;;  %v4830_v26 = vadd.f32 %v14681_v17, %v4637_v34  ;;  %v5212_v37 = vadd.f32 %v12741_v46, %v12725_v7  ;;  %v8972_v7 = vld [vmem:[%s14015_s5 + $0x28] sm:$0xff]   ;;  %v8973_v46 = vld [vmem:[%s14015_s5 + $0xf0] sm:$0xff]   ;;  %v14683_v34 = vld [vmem:[#allocation40_spill] sm:$0xff] }
 0x416   : > { %v5665_v12 = vrot.slane %v5522_v35, 2  ;;  %v5523_v24 = vmax.f32 %v5397_v3, 0.0  ;;  %v5399_v51 = vadd.f32 %v5398_v47, %v12732_v55  ;;  %v5664_v13 = vsel %vm552_vm2, %v5658_v11, %v5663_v4  ;;  %8124 = vmatpush3.bf16.msra.mxu0 %v8972_v7  ;;  %8143 = vmatprep.subr.bf16.mxu1 %v8973_v46 }
 0x417   : > { %v5402_v21 = vpop.f32.mrf.mxu1  ;;  %v8495_v1 = vpack.i.bf16 %v12991_v33, %v12981_v36  ;;  %v13000_v39 = vmax.f32 %v5519_v10, %v5664_v13  ;;  %v5023_v11 = vadd.f32 %v12734_v22, %v4830_v26  ;;  %v8974_v10 = vld [vmem:[%s14015_s5 + $0xb0] sm:$0xff]   ;;  %v13027_v26 = vpop.f32.mrf.mxu0 }
 0x418   : > { %v5667_v23 = vrot.slane %v5523_v24, 2  ;;  %v5524_v0 = vmax.f32 %v5399_v51, 0.0  ;;  %v5403_v3 = vadd.f32 %v5402_v21, %v5210_v19  ;;  %v5666_v55 = vsel %vm552_vm2, %v5661_v50, %v5665_v12  ;;  %v14682_v50 = vld [vmem:[#allocation25_spill] sm:$0xff]  ;;  %8144 = vmatpush3.bf16.msra.mxu1 %v8974_v10 }
 0x419   : > { %v5404_v16 = vpop.f32.mrf.mxu1  ;;  %8496 = vrot.lane.b32.xlu1 %v8495_v1, %s9127_s12  ;;  %v13007_v9 = vmax.f32 %v5520_v45, %v5666_v55  ;;  %v5214_v22 = vadd.f32 %v14683_v34, %v14682_v50  ;;  %v8975_v24 = vld [vmem:[%s14015_s5 + $0x60] sm:$0xff]   ;;  %v5216_v17 = vadd.f32 %v12750_v62, %v5023_v11  ;;  %v13032_v50 = vpop.f32.mrf.mxu0 }
 0x41a   : > { %v5668_v19 = vsel %vm552_vm2, %v5663_v4, %v5667_v23  ;;  %v5669_v47 = vrot.slane %v5524_v0, 2  ;;  %v5405_v45 = vadd.f32 %v5404_v16, %v5212_v37  ;;  %v5525_v1 = vmax.f32 %v5403_v3, 0.0  ;;  %8125 = vmatprep.subr.bf16.mxu0 %v8975_v24 }
 0x41b   : > { %v5406_v51 = vpop.f32.mrf.mxu1  ;;  %v13024_v13 = vmax.f32 %v5521_v6, %v5668_v19 }
 0x41c   : > { %v5670_v21 = vsel %vm552_vm2, %v5665_v12, %v5669_v47  ;;  %v5407_v55 = vadd.f32 %v5406_v51, %v5214_v22  ;;  %v5526_v4 = vmax.f32 %v5405_v45, 0.0  ;;  %v5671_v7 = vrot.slane %v5525_v1, 2  ;;  %v13039_v45 = vpop.f32.mrf.mxu0 }
 0x41d   : > { %14684 = vst [vmem:[#allocation31_spill] sm:$0xff] %v13024_v13  ;;  %v5408_v37 = vpop.f32.mrf.mxu1  ;;  %v13030_v23 = vmax.f32 %v5522_v35, %v5670_v21 }
 0x41e   : > { %v5527_v0 = vmax.f32 %v5407_v55, 0.0  ;;  %v5409_v16 = vadd.f32 %v5408_v37, %v5216_v17  ;;  %v5674_v34 = vrot.slane %v5526_v4, 2 }
 0x41f   : > { %v5412_v6 = vpop.f32.mrf.mxu1 }
 0x420   : > { %v5672_v46 = vrot.slane %v5527_v0, 2  ;;  %v5528_v62 = vmax.f32 %v5409_v16, 0.0  ;;  %v5413_v11 = vadd.f32 %v5412_v6, %v12752_v63  ;;  %v5230_v63 = vadd.f32 %v12850_v8, %v12755_v5 }
 0x421   : > { %v5414_v12 = vpop.f32.mrf.mxu1 }
 0x422   : > { %v5675_v3 = vrot.slane %v5528_v62, 2  ;;  %v5529_v22 = vmax.f32 %v5413_v11, 0.0  ;;  %v5415_v10 = vadd.f32 %v5414_v12, %v12757_v40  ;;  %v5673_v19 = vsel %vm552_vm2, %v5671_v7, %v5672_v46  ;;  %v13055_v12 = vpop.f32.mrf.mxu0 }
 0x423   : > { %v5416_v35 = vpop.f32.mrf.mxu1  ;;  %v13037_v47 = vmax.f32 %v5525_v1, %v5673_v19  ;;  %v5232_v7 = vadd.f32 %v12862_v60, %v12760_v43  ;;  %v8976_v43 = vld [vmem:[%s14015_s5 + $0x20] sm:$0xff]   ;;  %v8977_v60 = vld [vmem:[%s14015_s5 + $0xe8] sm:$0xff]  }
 0x424   : > { %v5677_v24 = vrot.slane %v5529_v22, 2  ;;  %v5530_v51 = vmax.f32 %v5415_v10, 0.0  ;;  %v5417_v17 = vadd.f32 %v5416_v35, %v12762_v42  ;;  %v5676_v21 = vsel %vm552_vm2, %v5674_v34, %v5675_v3  ;;  %8126 = vmatpush3.bf16.msra.mxu0 %v8976_v43  ;;  %8145 = vmatprep.subr.bf16.mxu1 %v8977_v60  ;;  %v14687_v43 = vld [vmem:[#allocation11_spill] sm:$0xff] }
 0x425   : > { %v5418_v55 = vpop.f32.mrf.mxu1  ;;  %v13045_v37 = vmax.f32 %v5526_v4, %v5676_v21  ;;  %v5244_v60 = vadd.f32 %v12915_v28, %v14687_v43 }
 0x426   : > { %v5679_v40 = vrot.slane %v5530_v51, 2  ;;  %v5531_v16 = vmax.f32 %v5417_v17, 0.0  ;;  %v5419_v6 = vadd.f32 %v5418_v55, %v12767_v32  ;;  %v5678_v1 = vsel %vm552_vm2, %v5672_v46, %v5677_v24  ;;  %v8979_v17 = vld [vmem:[%s14015_s5 + $0x58] sm:$0xff]  }
 0x427   : > { %v5422_v11 = vpop.f32.mrf.mxu1  ;;  %v8500_v42 = vpack.i.bf16 %v13045_v37, %v13037_v47  ;;  %v13053_v34 = vmax.f32 %v5527_v0, %v5678_v1  ;;  %v8978_v0 = vld [vmem:[%s14015_s5 + $0xa8] sm:$0xff]   ;;  %v5234_v46 = vadd.f32 %v12868_v30, %v12765_v29  ;;  %v5236_v55 = vadd.f32 %v12873_v58, %v12770_v20  ;;  %8127 = vmatprep.subr.bf16.mxu0 %v8979_v17 }
 0x428   : > { %v5681_v5 = vrot.slane %v5531_v16, 2  ;;  %v5532_v8 = vmax.f32 %v5419_v6, 0.0  ;;  %v5423_v4 = vadd.f32 %v5422_v11, %v5230_v63  ;;  %v5680_v10 = vsel %vm552_vm2, %v5675_v3, %v5679_v40  ;;  %v13080_v16 = vpop.f32.mrf.mxu0  ;;  %8146 = vmatpush3.bf16.msra.mxu1 %v8978_v0 }
 0x429   : > { %v5424_v19 = vpop.f32.mrf.mxu1  ;;  %8501 = vrot.lane.b32.xlu1 %v8500_v42, %s9127_s12  ;;  %v13059_v32 = vmax.f32 %v5528_v62, %v5680_v10 }
 0x42a   : > { %v5682_v3 = vsel %vm552_vm2, %v5677_v24, %v5681_v5  ;;  %v5683_v35 = vrot.slane %v5532_v8, 2  ;;  %v5425_v62 = vadd.f32 %v5424_v19, %v5232_v7  ;;  %v5533_v30 = vmax.f32 %v5423_v4, 0.0  ;;  %v14686_v5 = vld [vmem:[#allocation8_spill] sm:$0xff]  ;;  %v13089_v8 = vpop.f32.mrf.mxu0 }
 0x42b   : > { %v5426_v21 = vpop.f32.mrf.mxu1  ;;  %v13076_v63 = vmax.f32 %v5529_v22, %v5682_v3  ;;  %v5240_v22 = vadd.f32 %v12880_v27, %v12773_v57  ;;  %v5242_v20 = vadd.f32 %v12899_v54, %v14686_v5 }
 0x42c   : > { %v5684_v29 = vsel %vm552_vm2, %v5679_v40, %v5683_v35  ;;  %v5427_v24 = vadd.f32 %v5426_v21, %v5234_v46  ;;  %v5534_v6 = vmax.f32 %v5425_v62, 0.0  ;;  %v5685_v40 = vrot.slane %v5533_v30, 2  ;;  %v14688_v35 = vld [vmem:[#allocation37_spill] sm:$0xff]  ;;  %v13098_v21 = vpop.f32.mrf.mxu0 }
 0x42d   : > { %14685 = vst [vmem:[#allocation34_spill] sm:$0xff] %v13076_v63  ;;  %v5428_v1 = vpop.f32.mrf.mxu1  ;;  %v13083_v7 = vmax.f32 %v5530_v51, %v5684_v29  ;;  %v5246_v54 = vadd.f32 %v12920_v52, %v14688_v35 }
 0x42e   : > { %v5535_v11 = vmax.f32 %v5427_v24, 0.0  ;;  %v5429_v42 = vadd.f32 %v5428_v1, %v5236_v55  ;;  %v5688_v51 = vrot.slane %v5534_v6, 2  ;;  %v14689_v1 = vld [vmem:[#allocation41_spill] sm:$0xff] }
 0x42f   : > { %v5432_v58 = vpop.f32.mrf.mxu1 }
 0x430   : > { %v5686_v4 = vrot.slane %v5535_v11, 2  ;;  %v5536_v10 = vmax.f32 %v5429_v42, 0.0  ;;  %v5433_v19 = vadd.f32 %v5432_v58, %v5240_v22  ;;  %v5250_v22 = vadd.f32 %v12927_v41, %v14689_v1  ;;  %v8983_v1 = vld [vmem:[%s14015_s5 + $0x50] sm:$0xff]  }
 0x431   : > { %v5434_v0 = vpop.f32.mrf.mxu1 }
 0x432   : > { %v5689_v46 = vrot.slane %v5536_v10, 2  ;;  %v5537_v3 = vmax.f32 %v5433_v19, 0.0  ;;  %v5435_v57 = vadd.f32 %v5434_v0, %v5242_v20  ;;  %v5687_v27 = vsel %vm552_vm2, %v5685_v40, %v5686_v4 }
 0x433   : > { %v5436_v62 = vpop.f32.mrf.mxu1  ;;  %v13096_v17 = vmax.f32 %v5533_v30, %v5687_v27  ;;  %v14690_v30 = vld [vmem:[#allocation39_spill] sm:$0xff] }
 0x434   : > { %v5691_v55 = vrot.slane %v5537_v3, 2  ;;  %v5538_v29 = vmax.f32 %v5435_v57, 0.0  ;;  %v5437_v24 = vadd.f32 %v5436_v62, %v5244_v60  ;;  %v5690_v28 = vsel %vm552_vm2, %v5688_v51, %v5689_v46  ;;  %v13112_v51 = vpop.f32.mrf.mxu0  ;;  %v14691_v62 = vld [vmem:[#allocation46_spill] sm:$0xff] }
 0x435   : > { %v5438_v42 = vpop.f32.mrf.mxu1  ;;  %v13103_v5 = vmax.f32 %v5534_v6, %v5690_v28  ;;  %v5252_v19 = vadd.f32 %v12946_v48, %v14690_v30  ;;  %v8980_v48 = vld [vmem:[%s14015_s5 + $0x18] sm:$0xff]  }
 0x436   : > { %v5693_v20 = vrot.slane %v5538_v29, 2  ;;  %v5539_v58 = vmax.f32 %v5437_v24, 0.0  ;;  %v5439_v40 = vadd.f32 %v5438_v42, %v5246_v54  ;;  %v5692_v52 = vsel %vm552_vm2, %v5686_v4, %v5691_v55  ;;  %v8982_v54 = vld [vmem:[%s14015_s5 + $0xa0] sm:$0xff]   ;;  %8128 = vmatpush3.bf16.msra.mxu0 %v8980_v48 }
 0x437   : > { %v5442_v43 = vpop.f32.mrf.mxu1  ;;  %v8505_v60 = vpack.i.bf16 %v13103_v5, %v13096_v17  ;;  %v13110_v0 = vmax.f32 %v5535_v11, %v5692_v52  ;;  %v8981_v11 = vld [vmem:[%s14015_s5 + $0xe0] sm:$0xff]   ;;  %v13137_v52 = vpop.f32.mrf.mxu0  ;;  %8129 = vmatprep.subr.bf16.mxu0 %v8983_v1 }
 0x438   : > { %v5695_v41 = vrot.slane %v5539_v58, 2  ;;  %v5540_v57 = vmax.f32 %v5439_v40, 0.0  ;;  %v5443_v6 = vadd.f32 %v5442_v43, %v5250_v22  ;;  %v5694_v27 = vsel %vm552_vm2, %v5689_v46, %v5693_v20  ;;  %8147 = vmatprep.subr.bf16.mxu1 %v8981_v11  ;;  %v14693_v58 = vld [vmem:[#allocation43_spill] sm:$0xff] }
 0x439   : > { %v5444_v35 = vpop.f32.mrf.mxu1  ;;  %8506 = vrot.lane.b32.xlu0 %v8505_v60, %s9127_s12  ;;  %v13116_v4 = vmax.f32 %v5536_v10, %v5694_v27  ;;  %v5254_v46 = vadd.f32 %v12971_v2, %v14691_v62  ;;  %v5256_v40 = vadd.f32 %v12976_v56, %v14693_v58  ;;  %8148 = vmatpush3.bf16.msra.mxu1 %v8982_v54  ;;  %v13146_v11 = vpop.f32.mrf.mxu0  ;;  %v14697_v58 = vld [vmem:[#allocation60_spill] sm:$0xff] }
 0x43a   : > { %v5696_v24 = vsel %vm552_vm2, %v5691_v55, %v5695_v41  ;;  %v5697_v28 = vrot.slane %v5540_v57, 2  ;;  %v5445_v10 = vadd.f32 %v5444_v35, %v5252_v19  ;;  %v5541_v30 = vmax.f32 %v5443_v6, 0.0  ;;  %v14694_v41 = vld [vmem:[#allocation59_spill] sm:$0xff]  ;;  %v14695_v35 = vld [vmem:[#allocation12_spill] sm:$0xff] }
 0x43b   : > { %v5446_v22 = vpop.f32.mrf.mxu1  ;;  %v13133_v42 = vmax.f32 %v5537_v3, %v5696_v24  ;;  %v5260_v3 = vadd.f32 %v12983_v18, %v14694_v41  ;;  %v5262_v56 = vadd.f32 %v13002_v38, %v14695_v35  ;;  %v5266_v38 = vadd.f32 %v13032_v50, %v14697_v58 }
 0x43c   : > { %v5698_v2 = vsel %vm552_vm2, %v5693_v20, %v5697_v28  ;;  %v5447_v55 = vadd.f32 %v5446_v22, %v5254_v46  ;;  %v5542_v19 = vmax.f32 %v5445_v10, 0.0  ;;  %v5699_v20 = vrot.slane %v5541_v30, 2  ;;  %v14696_v46 = vld [vmem:[#allocation49_spill] sm:$0xff] }
 0x43d   : > { %14692 = vst [vmem:[#allocation38_spill] sm:$0xff] %v13133_v42  ;;  %v5448_v43 = vpop.f32.mrf.mxu1  ;;  %v13140_v60 = vmax.f32 %v5538_v29, %v5698_v2  ;;  %v5264_v24 = vadd.f32 %v13027_v26, %v14696_v46 }
 0x43e   : > { %v5543_v57 = vmax.f32 %v5447_v55, 0.0  ;;  %v5449_v27 = vadd.f32 %v5448_v43, %v5256_v40  ;;  %v5702_v29 = vrot.slane %v5542_v19, 2  ;;  %v13155_v55 = vpop.f32.mrf.mxu0 }
 0x43f   : > { %v5452_v48 = vpop.f32.mrf.mxu1 }
 0x440   : > { %v5700_v6 = vrot.slane %v5543_v57, 2  ;;  %v5544_v62 = vmax.f32 %v5449_v27, 0.0  ;;  %v5453_v54 = vadd.f32 %v5452_v48, %v5260_v3  ;;  %v14698_v27 = vld [vmem:[#allocation61_spill] sm:$0xff] }
 0x441   : > { %v5454_v28 = vpop.f32.mrf.mxu1  ;;  %v5270_v35 = vadd.f32 %v13039_v45, %v14698_v27 }
 0x442   : > { %v5703_v10 = vrot.slane %v5544_v62, 2  ;;  %v5545_v1 = vmax.f32 %v5453_v54, 0.0  ;;  %v5455_v18 = vadd.f32 %v5454_v28, %v5262_v56  ;;  %v5701_v22 = vsel %vm552_vm2, %v5699_v20, %v5700_v6 }
 0x443   : > { %v5456_v40 = vpop.f32.mrf.mxu1  ;;  %v13153_v2 = vmax.f32 %v5541_v30, %v5701_v22  ;;  %v14700_v30 = vld [vmem:[#allocation62_spill] sm:$0xff] }
 0x444   : > { %v5705_v43 = vrot.slane %v5545_v1, 2  ;;  %v5546_v41 = vmax.f32 %v5455_v18, 0.0  ;;  %v5457_v3 = vadd.f32 %v5456_v40, %v5264_v24  ;;  %v5704_v26 = vsel %vm552_vm2, %v5702_v29, %v5703_v10  ;;  %v13169_v29 = vpop.f32.mrf.mxu0 }
 0x445   : > { %v5458_v48 = vpop.f32.mrf.mxu1  ;;  %v13160_v56 = vmax.f32 %v5542_v19, %v5704_v26  ;;  %v5272_v28 = vadd.f32 %v13055_v12, %v14700_v30  ;;  %v8984_v12 = vld [vmem:[%s14015_s5 + $0x10] sm:$0xff]   ;;  %v14701_v26 = vld [vmem:[#allocation13_spill] sm:$0xff] }
 0x446   : > { %v5707_v20 = vrot.slane %v5546_v41, 2  ;;  %v5547_v54 = vmax.f32 %v5457_v3, 0.0  ;;  %v5459_v46 = vadd.f32 %v5458_v48, %v5266_v38  ;;  %v5706_v50 = vsel %vm552_vm2, %v5700_v6, %v5705_v43  ;;  %v8986_v38 = vld [vmem:[%s14015_s5 + $0x98] sm:$0xff]   ;;  %v8987_v48 = vld [vmem:[%s14015_s5 + $0x48] sm:$0xff]   ;;  %8130 = vmatpush3.bf16.msra.mxu0 %v8984_v12 }
 0x447   : > { %14699 = vst [vmem:[#allocation44_spill] sm:$0xff] %v13160_v56  ;;  %v5462_v22 = vpop.f32.mrf.mxu1  ;;  %v8510_v24 = vpack.i.bf16 %v13160_v56, %v13153_v2  ;;  %v13167_v18 = vmax.f32 %v5543_v57, %v5706_v50  ;;  %v8985_v57 = vld [vmem:[%s14015_s5 + $0xd8] sm:$0xff]   ;;  %v14703_v50 = vld [vmem:[#allocation14_spill] sm:$0xff]  ;;  %8131 = vmatprep.subr.bf16.mxu0 %v8987_v48 }
 0x448   : > { %v5709_v45 = vrot.slane %v5547_v54, 2  ;;  %v5548_v58 = vmax.f32 %v5459_v46, 0.0  ;;  %v5463_v19 = vadd.f32 %v5462_v22, %v5270_v35  ;;  %v5708_v40 = vsel %vm552_vm2, %v5703_v10, %v5707_v20  ;;  %8149 = vmatprep.subr.bf16.mxu1 %v8985_v57  ;;  %v5293_v22 = vpop.f32.mrf.mxu0  ;;  %v14705_v57 = vld [vmem:[#allocation15_spill] sm:$0xff] }
 0x449   : > { %v5464_v3 = vpop.f32.mrf.mxu1  ;;  %8511 = vrot.lane.b32.xlu1 %v8510_v24, %s9127_s12  ;;  %v13173_v6 = vmax.f32 %v5544_v62, %v5708_v40  ;;  %v5274_v10 = vadd.f32 %v13080_v16, %v14701_v26  ;;  %v5276_v30 = vadd.f32 %v13089_v8, %v14703_v50  ;;  %8150 = vmatpush3.bf16.msra.mxu1 %v8986_v38  ;;  %v14706_v38 = vld [vmem:[#allocation17_spill] sm:$0xff] }
 0x44a   : > { %v5710_v27 = vsel %vm552_vm2, %v5705_v43, %v5709_v45  ;;  %v5711_v35 = vrot.slane %v5548_v58, 2  ;;  %v5465_v62 = vadd.f32 %v5464_v3, %v5272_v28  ;;  %v5549_v16 = vmax.f32 %v5463_v19, 0.0  ;;  %v14704_v58 = vld [vmem:[#allocation52_spill] sm:$0xff] }
 0x44b   : > { %v5466_v54 = vpop.f32.mrf.mxu1  ;;  %v13190_v46 = vmax.f32 %v5545_v1, %v5710_v27  ;;  %v5280_v1 = vadd.f32 %v13098_v21, %v14704_v58  ;;  %v5282_v26 = vadd.f32 %v13112_v51, %v14705_v57  ;;  %v5295_v27 = vpop.f32.mrf.mxu0 }
 0x44c   : > { %v5712_v24 = vsel %vm552_vm2, %v5707_v20, %v5711_v35  ;;  %v5467_v40 = vadd.f32 %v5466_v54, %v5274_v10  ;;  %v5550_v43 = vmax.f32 %v5465_v62, 0.0  ;;  %v5713_v50 = vrot.slane %v5549_v16, 2 }
 0x44d   : > { %14702 = vst [vmem:[#allocation47_spill] sm:$0xff] %v13190_v46  ;;  %v5468_v28 = vpop.f32.mrf.mxu1  ;;  %v13195_v45 = vmax.f32 %v5546_v41, %v5712_v24  ;;  %v5284_v35 = vadd.f32 %v13137_v52, %v14706_v38  ;;  %v5299_v58 = vpop.f32.mrf.mxu0  ;;  %v14708_v52 = vld [vmem:[#allocation54_spill] sm:$0xff] }
 0x44e   : > { %v5551_v3 = vmax.f32 %v5467_v40, 0.0  ;;  %v5469_v12 = vadd.f32 %v5468_v28, %v5276_v30  ;;  %v5716_v62 = vrot.slane %v5550_v43, 2  ;;  %v14707_v30 = vld [vmem:[#allocation18_spill] sm:$0xff]  ;;  %v5290_v38 = vadd.f32 %v13155_v55, %v14708_v52 }
 0x44f   : > { %v5472_v8 = vpop.f32.mrf.mxu1  ;;  %v5286_v40 = vadd.f32 %v13146_v11, %v14707_v30  ;;  %v14710_v30 = vld [vmem:[#allocation19_spill] sm:$0xff] }
 0x450   : > { %v5714_v20 = vrot.slane %v5551_v3, 2  ;;  %v5552_v19 = vmax.f32 %v5469_v12, 0.0  ;;  %v5473_v10 = vadd.f32 %v5472_v8, %v5280_v1 }
 0x451   : > { %v5474_v41 = vpop.f32.mrf.mxu1 }
 0x452   : > { %v5717_v48 = vrot.slane %v5552_v19, 2  ;;  %v5553_v54 = vmax.f32 %v5473_v10, 0.0  ;;  %v5475_v24 = vadd.f32 %v5474_v41, %v5282_v26  ;;  %v5715_v21 = vsel %vm552_vm2, %v5713_v50, %v5714_v20 }
 0x453   : > { %v5476_v51 = vpop.f32.mrf.mxu1  ;;  %v13206_v28 = vmax.f32 %v5549_v16, %v5715_v21  ;;  %v5292_v16 = vadd.f32 %v13169_v29, %v14710_v30  ;;  %v8988_v29 = vld [vmem:[%s14015_s5 + $0x8] sm:$0xff]  }
 0x454   : > { %v5719_v57 = vrot.slane %v5553_v54, 2  ;;  %v5554_v12 = vmax.f32 %v5475_v24, 0.0  ;;  %v5477_v1 = vadd.f32 %v5476_v51, %v5284_v35  ;;  %v5718_v8 = vsel %vm552_vm2, %v5716_v62, %v5717_v48  ;;  %v5301_v62 = vpop.f32.mrf.mxu0  ;;  %8132 = vmatpush3.bf16.msra.mxu0 %v8988_v29 }
 0x455   : > { %v5478_v56 = vpop.f32.mrf.mxu1  ;;  %v13211_v10 = vmax.f32 %v5550_v43, %v5718_v8 }
 0x456   : > { %v5721_v26 = vrot.slane %v5554_v12, 2  ;;  %v5555_v50 = vmax.f32 %v5477_v1, 0.0  ;;  %v5479_v41 = vadd.f32 %v5478_v56, %v5286_v40  ;;  %v5720_v11 = vsel %vm552_vm2, %v5714_v20, %v5719_v57  ;;  %v14711_v20 = vld [vmem:[#allocation58_spill] sm:$0xff]  ;;  %v5303_v30 = vpop.f32.mrf.mxu0 }
 0x457   : > { %14709 = vst [vmem:[#allocation42_spill] sm:$0xff] %v13211_v10  ;;  %v5482_v21 = vpop.f32.mrf.mxu1  ;;  %v8515_v35 = vpack.i.bf16 %v13211_v10, %v13206_v28  ;;  %v13218_v24 = vmax.f32 %v5551_v3, %v5720_v11  ;;  %v5294_v40 = vadd.f32 %v5293_v22, %v14711_v20 }
 0x458   : > { %v5723_v51 = vrot.slane %v5555_v50, 2  ;;  %v5556_v55 = vmax.f32 %v5479_v41, 0.0  ;;  %v5483_v52 = vadd.f32 %v5482_v21, %v5290_v38  ;;  %v5722_v43 = vsel %vm552_vm2, %v5717_v48, %v5721_v26  ;;  %v14713_v41 = vld [vmem:[#allocation22_spill] sm:$0xff] }
 0x459   : > { %v5484_v8 = vpop.f32.mrf.mxu1  ;;  %8516 = vrot.lane.b32.xlu0 %v8515_v35, %s9127_s12  ;;  %v13222_v56 = vmax.f32 %v5552_v19, %v5722_v43  ;;  %v8525_v38 = vpack.i.bf16 %v12951_v49, %v12944_v14  ;;  %v5296_v19 = vadd.f32 %v5295_v27, %v14713_v41  ;;  %v14716_v27 = vld [vmem:[#allocation28_spill] sm:$0xff]  ;;  %v5305_v41 = vpop.f32.mrf.mxu0 }
 0x45a   : > { %v5724_v3 = vsel %vm552_vm2, %v5719_v57, %v5723_v51  ;;  %v5725_v1 = vrot.slane %v5556_v55, 2  ;;  %v5485_v11 = vadd.f32 %v5484_v8, %v5292_v16  ;;  %v5557_v35 = vmax.f32 %v5483_v52, 0.0  ;;  %v14714_v16 = vld [vmem:[#allocation24_spill] sm:$0xff] }
 0x45b   : > { %v5486_v50 = vpop.f32.mrf.mxu1  ;;  %v13231_v48 = vmax.f32 %v5553_v54, %v5724_v3  ;;  %v5300_v51 = vadd.f32 %v5299_v58, %v14714_v16  ;;  %v14715_v54 = vld [vmem:[#allocation20_spill] sm:$0xff]  ;;  %v8535_v3 = vpack.i.bf16 %v14716_v27, %v12897_v31 }
 0x45c   : > { %v5726_v21 = vsel %vm552_vm2, %v5721_v26, %v5725_v1  ;;  %v5487_v43 = vadd.f32 %v5486_v50, %v5294_v40  ;;  %v5558_v10 = vmax.f32 %v5485_v11, 0.0  ;;  %v5302_v20 = vadd.f32 %v5301_v62, %v14715_v54  ;;  %v14717_v11 = vld [vmem:[#allocation23_spill] sm:$0xff] }
 0x45d   : > { %14712 = vst [vmem:[#allocation45_spill] sm:$0xff] %v13231_v48  ;;  %v5488_v22 = vpop.f32.mrf.mxu1  ;;  %8526 = vrot.lane.b32.xlu0 %v8525_v38, %s9127_s12  ;;  %v13236_v57 = vmax.f32 %v5554_v12, %v5726_v21  ;;  %v5727_v26 = vrot.slane %v5557_v35, 2  ;;  %v5304_v50 = vadd.f32 %v5303_v30, %v14717_v11  ;;  %v8545_v54 = vpack.i.bf16 %v13116_v4, %v13110_v0 }
 0x45e   : > { %v5559_v55 = vmax.f32 %v5487_v43, 0.0  ;;  %v5489_v8 = vadd.f32 %v5488_v22, %v5296_v19  ;;  %v5730_v38 = vrot.slane %v5558_v10, 2  ;;  %v14718_v43 = vld [vmem:[#allocation26_spill] sm:$0xff] }
 0x45f   : > { %v5492_v29 = vpop.f32.mrf.mxu1  ;;  %v5306_v22 = vadd.f32 %v5305_v41, %v14718_v43  ;;  %v8991_v43 = vld [vmem:[%s14015_s5 + $0x40] sm:$0xff]  }
 0x460   : > { %v5728_v52 = vrot.slane %v5559_v55, 2  ;;  %v5560_v40 = vmax.f32 %v5489_v8, 0.0  ;;  %v5493_v1 = vadd.f32 %v5492_v29, %v5300_v51  ;;  %8133 = vmatprep.subr.bf16.mxu0 %v8991_v43  ;;  %v8997_v43 = vld [vmem:[%s14015_s5 + $0x178] sm:$0xff]  }
 0x461   : > { %v5494_v12 = vpop.f32.mrf.mxu1  ;;  %8536 = vrot.lane.b32.xlu0 %v8535_v3, %s9127_s12 }
 0x462   : > { %v5731_v58 = vrot.slane %v5560_v40, 2  ;;  %v5561_v21 = vmax.f32 %v5493_v1, 0.0  ;;  %v5495_v19 = vadd.f32 %v5494_v12, %v5302_v20  ;;  %v5729_v62 = vsel %vm552_vm2, %v5727_v26, %v5728_v52 }
 0x463   : > { %v5496_v16 = vpop.f32.mrf.mxu1  ;;  %v13248_v27 = vmax.f32 %v5557_v35, %v5729_v62  ;;  %v8555_v35 = vpack.i.bf16 %v13222_v56, %v13218_v24 }
 0x464   : > { %v5733_v51 = vrot.slane %v5561_v21, 2  ;;  %v5562_v8 = vmax.f32 %v5495_v19, 0.0  ;;  %v5497_v30 = vadd.f32 %v5496_v16, %v5304_v50  ;;  %v5732_v29 = vsel %vm552_vm2, %v5730_v38, %v5731_v58 }
 0x465   : > { %v5498_v11 = vpop.f32.mrf.mxu1  ;;  %8546 = vrot.lane.b32.xlu0 %v8545_v54, %s9127_s12  ;;  %v13252_v3 = vmax.f32 %v5558_v10, %v5732_v29  ;;  %v8989_v10 = vld [vmem:[%s14015_s5 + $0xd0] sm:$0xff]   ;;  %v8530_v16 = vpack.i.bf16 %v13007_v9, %v13000_v39  ;;  %v8565_v54 = vpack.i.bf16 %v12974_v53, %v12968_v15 }
 0x466   : > { %v5735_v20 = vrot.slane %v5562_v8, 2  ;;  %v5563_v26 = vmax.f32 %v5497_v30, 0.0  ;;  %v5499_v1 = vadd.f32 %v5498_v11, %v5306_v22  ;;  %v5734_v41 = vsel %vm552_vm2, %v5728_v52, %v5733_v51  ;;  %v8990_v52 = vld [vmem:[%s14015_s5 + $0x90] sm:$0xff]   ;;  %8151 = vmatprep.subr.bf16.mxu1 %v8989_v10  ;;  %v8995_v10 = vld [vmem:[%s14015_s5 + $0xc0] sm:$0xff]  }
 0x467   : > { %v8520_v12 = vpack.i.bf16 %v13252_v3, %v13248_v27  ;;  %v13259_v19 = vmax.f32 %v5559_v55, %v5734_v41  ;;  %8152 = vmatpush3.bf16.msra.mxu1 %v8990_v52  ;;  %v8575_v11 = vpack.i.bf16 %v12918_v61, %v12911_v25  ;;  %v8570_v41 = vpack.i.bf16 %v13030_v23, %v13024_v13  ;;  %v8996_v52 = vld [vmem:[%s14015_s5 + $0x80] sm:$0xff]  }
 0x468   : > { %v5737_v50 = vrot.slane %v5563_v26, 2  ;;  %v5564_v38 = vmax.f32 %v5499_v1, 0.0  ;;  %v5736_v62 = vsel %vm552_vm2, %v5731_v58, %v5735_v20  ;;  %v8595_v1 = vpack.i.bf16 %v13236_v57, %v13231_v48 }
 0x469   : > { %8521 = vrot.lane.b32.xlu1 %v8520_v12, %s9127_s12  ;;  %8556 = vrot.lane.b32.xlu0 %v8555_v35, %s9127_s12  ;;  %v13273_v55 = vmax.f32 %v5560_v40, %v5736_v62  ;;  %v8580_v12 = vpack.i.bf16 %v13083_v7, %v13076_v63  ;;  %v8993_v35 = vld [vmem:[%s14015_s5 + $0xc8] sm:$0xff]  }
 0x46a   : > { %v5738_v58 = vsel %vm552_vm2, %v5733_v51, %v5737_v50  ;;  %v5739_v22 = vrot.slane %v5564_v38, 2  ;;  %v8540_v51 = vpack.i.bf16 %v13059_v32, %v13053_v34  ;;  %v8994_v50 = vld [vmem:[%s14015_s5 + $0x88] sm:$0xff]   ;;  %v8590_v38 = vpack.i.bf16 %v13195_v45, %v13190_v46  ;;  %8153 = vmatprep.subr.bf16.mxu1 %v8993_v35 }
 0x46b   : > { %v13280_v30 = vmax.f32 %v5561_v21, %v5738_v58  ;;  %v8992_v21 = vld [vmem:[%s14015_s5] sm:$0xff]   ;;  %v8560_v26 = vpack.i.bf16 %v13273_v55, %v13259_v19  ;;  %8154 = vmatpush3.bf16.msra.mxu1 %v8994_v50  ;;  %v8999_v58 = vld [vmem:[%s14015_s5 + $0x1f8] sm:$0xff]   ;;  %v14720_v50 = vld [vmem:[#allocation27_spill] sm:$0xff] }
 0x46c   : > { %v5740_v29 = vsel %vm552_vm2, %v5735_v20, %v5739_v22  ;;  %8134 = vmatpush3.bf16.msra.mxu0 %v8992_v21  ;;  %v8550_v20 = vpack.i.bf16 %v13173_v6, %v13167_v18  ;;  %8155 = vmatprep.subr.bf16.mxu1 %v8995_v10  ;;  %v8487_v22 = vpop.permute.xlu0 %8486 }
 0x46d   : > { %14719 = vst [vmem:[#allocation50_spill] sm:$0xff] %v13280_v30  ;;  %8531 = vrot.lane.b32.xlu1 %v8530_v16, %s9127_s12  ;;  %8566 = vrot.lane.b32.xlu0 %v8565_v54, %s9127_s12  ;;  %v13285_v40 = vmax.f32 %v5562_v8, %v5740_v29  ;;  %v8585_v8 = vpack.i.bf16 %v13140_v60, %v13133_v42 }
 0x46e   : > { %8163 = vmatprep.subr.bf16.mxu0 %v8997_v43 }
 0x46f   : > { %v8600_v62 = vpack.i.bf16 %v13285_v40, %v13280_v30  ;;  %8156 = vmatpush3.bf16.msra.mxu1 %v8996_v52 }
 0x470   : > { %8185 = vmatprep.subr.bf16.mxu1 %v8999_v58 }
 0x471   : > { %8541 = vrot.lane.b32.xlu1 %v8540_v51, %s9127_s12  ;;  %8576 = vrot.lane.b32.xlu0 %v8575_v11, %s9127_s12  ;;  %v8489_v51 = vunpack.i.h.bf16 %v8487_v22  ;;  %v8488_v11 = vunpack.i.l.bf16 %v8487_v22 }
 0x475   : > { %8551 = vrot.lane.b32.xlu1 %v8550_v20, %s9127_s12  ;;  %8586 = vrot.lane.b32.xlu0 %v8585_v8, %s9127_s12  ;;  %v5982_v8 = vsel %vm5981_vm6, %v8488_v11, %v8489_v51 }
 0x479   : > { %8561 = vrot.lane.b32.xlu1 %v8560_v26, %s9127_s12  ;;  %8596 = vrot.lane.b32.xlu0 %v8595_v1, %s9127_s12  ;;  %v5983_v26 = vsel %vm5981_vm6, %v8489_v51, %v8488_v11 }
 0x47b   : > { %v8492_v16 = vpop.permute.xlu0 %8491 }
 0x47c   : > { %v8494_v54 = vunpack.i.h.bf16 %v8492_v16  ;;  %v8493_v29 = vunpack.i.l.bf16 %v8492_v16 }
 0x47d   : > { %8571 = vrot.lane.b32.xlu1 %v8570_v41, %s9127_s12 }
 0x47e   : > { %v5988_v21 = vsel %vm5981_vm6, %v8493_v29, %v8494_v54  ;;  %v5989_v1 = vsel %vm5981_vm6, %v8494_v54, %v8493_v29 }
 0x47f   : > { %v6084_v41 = vmax.f32 %v12925_v59, %v5988_v21  ;;  %v6085_v52 = vmax.f32 %v12935_v44, %v5989_v1 }
 0x481   : > { %8581 = vrot.lane.b32.xlu1 %v8580_v12, %s9127_s12  ;;  %v6144_v58 = vrot.slane %v6084_v41, 4  ;;  %v6145_v29 = vrot.slane %v6085_v52, 4  ;;  %v6232_v59 = vpack.c.bf16 %v6084_v41, %v6084_v41  ;;  %v6233_v21 = vpack.c.bf16 %v6085_v52, %v6085_v52 }
 0x485   : > { %8591 = vrot.lane.b32.xlu1 %v8590_v38, %s9127_s12  ;;  %v6078_v38 = vmax.f32 %v14720_v50, %v5982_v8  ;;  %v6234_v8 = vpack.c.bf16 %v6144_v58, %v6144_v58 }
 0x487   : > { %v6142_v11 = vrot.slane %v6078_v38, 4  ;;  %v6222_v44 = vpack.c.bf16 %v6078_v38, %v6078_v38  ;;  %v6561_v52 = vunpack.c.l.b16 %v6234_v8 }
 0x489   : > { %8601 = vrot.lane.b32.xlu1 %v8600_v62, %s9127_s12  ;;  %v14721_v62 = vld [vmem:[#allocation29_spill] sm:$0xff]  ;;  %v6224_v30 = vpack.c.bf16 %v6142_v11, %v6142_v11  ;;  %v6549_v58 = vunpack.c.l.b16 %v6222_v44 }
 0x48a   : > { %v6079_v10 = vmax.f32 %v14721_v62, %v5983_v26 }
 0x48b   : > { %v8497_v20 = vpop.permute.xlu1 %8496 }
 0x48c   : > { %v8499_v12 = vunpack.i.h.bf16 %v8497_v20  ;;  %v8498_v35 = vunpack.i.l.bf16 %v8497_v20  ;;  %v6143_v54 = vrot.slane %v6079_v10, 4  ;;  %v6223_v1 = vpack.c.bf16 %v6079_v10, %v6079_v10 }
 0x48e   : > { %v5994_v22 = vsel %vm5981_vm6, %v8498_v35, %v8499_v12  ;;  %v5995_v16 = vsel %vm5981_vm6, %v8499_v12, %v8498_v35  ;;  %v13351_v42 = vpack.c.bf16 %v6143_v54, %v6143_v54  ;;  %v6235_v12 = vpack.c.bf16 %v6145_v29, %v6145_v29 }
 0x48f   : > { %v6090_v20 = vmax.f32 %v12981_v36, %v5994_v22  ;;  %v6091_v26 = vmax.f32 %v12991_v33, %v5995_v16  ;;  %v6559_v35 = vunpack.c.l.b16 %v6232_v59  ;;  %v6550_v22 = vunpack.c.l.b16 %v6223_v1 }
 0x490   : > { %v6551_v16 = vunpack.c.l.b16 %v6224_v30  ;;  %v6552_v11 = vunpack.c.l.b16 %v13351_v42 }
 0x491   : > { %v6146_v46 = vrot.slane %v6090_v20, 4  ;;  %v6147_v63 = vrot.slane %v6091_v26, 4  ;;  %v6242_v38 = vpack.c.bf16 %v6090_v20, %v6090_v20  ;;  %v6243_v10 = vpack.c.bf16 %v6091_v26, %v6091_v26 }
 0x492   : > { %v6629_v54 = vrot.slane %v6559_v35, 7 }
 0x493   : > { %v6244_v59 = vpack.c.bf16 %v6146_v46, %v6146_v46  ;;  %v6570_v20 = vunpack.c.l.b16 %v6243_v10 }
 0x494   : > { %v6631_v42 = vsel %vm6630_vm7, %v6629_v54, %v6549_v58 }
 0x495   : > { %v6652_v58 = vrot.slane %v6570_v20, 6 }
 0x49b   : > { %v8502_v43 = vpop.permute.xlu1 %8501 }
 0x49c   : > { %v8504_v48 = vunpack.i.h.bf16 %v8502_v43  ;;  %v8503_v51 = vunpack.i.l.bf16 %v8502_v43  ;;  %v6560_v43 = vunpack.c.l.b16 %v6233_v21 }
 0x49e   : > { %v6000_v62 = vsel %vm5981_vm6, %v8503_v51, %v8504_v48  ;;  %v6001_v36 = vsel %vm5981_vm6, %v8504_v48, %v8503_v51  ;;  %v6650_v29 = vrot.slane %v6560_v43, 7  ;;  %v6562_v48 = vunpack.c.l.b16 %v6235_v12 }
 0x49f   : > { %v6096_v33 = vmax.f32 %v13037_v47, %v6000_v62  ;;  %v6097_v21 = vmax.f32 %v13045_v37, %v6001_v36  ;;  %v6664_v51 = vrot.slane %v6561_v52, 7  ;;  %v6245_v47 = vpack.c.bf16 %v6147_v63, %v6147_v63 }
 0x4a0   : > { %v6569_v62 = vunpack.c.l.b16 %v6242_v38  ;;  %v6651_v37 = vsel %vm6630_vm7, %v6650_v29, %v6550_v22  ;;  %v6571_v43 = vunpack.c.l.b16 %v6244_v59  ;;  %v6678_v63 = vrot.slane %v6562_v48, 7 }
 0x4a1   : > { %v6148_v44 = vrot.slane %v6096_v33, 4  ;;  %v6252_v26 = vpack.c.bf16 %v6096_v33, %v6096_v33  ;;  %v6149_v36 = vrot.slane %v6097_v21, 4  ;;  %v6253_v12 = vpack.c.bf16 %v6097_v21, %v6097_v21 }
 0x4a2   : > { %v6572_v15 = vunpack.c.l.b16 %v6245_v47  ;;  %v6666_v29 = vrot.slane %v6571_v43, 6 }
 0x4a3   : > { %v6254_v38 = vpack.c.bf16 %v6148_v44, %v6148_v44  ;;  %v6579_v10 = vunpack.c.l.b16 %v6252_v26  ;;  %v6255_v59 = vpack.c.bf16 %v6149_v36, %v6149_v36 }
 0x4a4   : > { %v6680_v48 = vrot.slane %v6572_v15, 6  ;;  %v6653_v15 = vsel %vm6633_vm8, %v6652_v58, %v6651_v37 }
 0x4a5   : > { %v6581_v47 = vunpack.c.l.b16 %v6254_v38  ;;  %v6635_v20 = vrot.slane %v6579_v10, 5 }
 0x4ab   : > { %v8507_v50 = vpop.permute.xlu0 %8506 }
 0x4ac   : > { %v8509_v25 = vunpack.i.h.bf16 %v8507_v50  ;;  %v8508_v41 = vunpack.i.l.bf16 %v8507_v50 }
 0x4ae   : > { %v6006_v8 = vsel %vm5981_vm6, %v8508_v41, %v8509_v25  ;;  %v6007_v30 = vsel %vm5981_vm6, %v8509_v25, %v8508_v41  ;;  %v6665_v25 = vsel %vm6630_vm7, %v6664_v51, %v6551_v16  ;;  %v6632_v41 = vrot.slane %v6569_v62, 6 }
 0x4af   : > { %v6102_v1 = vmax.f32 %v13096_v17, %v6006_v8  ;;  %v6103_v33 = vmax.f32 %v13103_v5, %v6007_v30  ;;  %v6679_v5 = vsel %vm6630_vm7, %v6678_v63, %v6552_v11  ;;  %v14722_v30 = vld [vmem:[#allocation44_spill] sm:$0xff] }
 0x4b0   : > { %v6634_v16 = vsel %vm6633_vm8, %v6632_v41, %v6631_v42  ;;  %v6681_v11 = vsel %vm6633_vm8, %v6680_v48, %v6679_v5  ;;  %v6668_v42 = vrot.slane %v6581_v47, 5  ;;  %v14723_v48 = vld [vmem:[#allocation42_spill] sm:$0xff] }
 0x4b1   : > { %v6150_v17 = vrot.slane %v6102_v1, 4  ;;  %v6151_v44 = vrot.slane %v6103_v33, 4  ;;  %v6262_v13 = vpack.c.bf16 %v6102_v1, %v6102_v1  ;;  %v6263_v51 = vpack.c.bf16 %v6103_v33, %v6103_v33 }
 0x4b2   : > { %v6582_v1 = vunpack.c.l.b16 %v6255_v59  ;;  %v6637_v10 = vsel %vm6636_vm9, %v6635_v20, %v6634_v16 }
 0x4b3   : > { %v6264_v26 = vpack.c.bf16 %v6150_v17, %v6150_v17  ;;  %v6589_v63 = vunpack.c.l.b16 %v6262_v13 }
 0x4b5   : > { %v6591_v17 = vunpack.c.l.b16 %v6264_v26 }
 0x4b7   : > { %v6670_v16 = vrot.slane %v6591_v17, 4 }
 0x4bb   : > { %v8512_v50 = vpop.permute.xlu1 %8511 }
 0x4bc   : > { %v8514_v35 = vunpack.i.h.bf16 %v8512_v50  ;;  %v8513_v46 = vunpack.i.l.bf16 %v8512_v50  ;;  %v6580_v50 = vunpack.c.l.b16 %v6253_v12 }
 0x4be   : > { %v6012_v54 = vsel %vm5981_vm6, %v8513_v46, %v8514_v35  ;;  %v6013_v21 = vsel %vm5981_vm6, %v8514_v35, %v8513_v46  ;;  %v6667_v35 = vsel %vm6633_vm8, %v6666_v29, %v6665_v25  ;;  %v6654_v46 = vrot.slane %v6580_v50, 5 }
 0x4bf   : > { %v6108_v62 = vmax.f32 %v13153_v2, %v6012_v54  ;;  %v6109_v43 = vmax.f32 %v14722_v30, %v6013_v21  ;;  %v6590_v2 = vunpack.c.l.b16 %v6263_v51  ;;  %v6682_v25 = vrot.slane %v6582_v1, 5 }
 0x4c0   : > { %v6655_v59 = vsel %vm6636_vm9, %v6654_v46, %v6653_v15  ;;  %v6669_v50 = vsel %vm6636_vm9, %v6668_v42, %v6667_v35 }
 0x4c1   : > { %v6272_v38 = vpack.c.bf16 %v6108_v62, %v6108_v62  ;;  %v6152_v37 = vrot.slane %v6108_v62, 4  ;;  %v6153_v58 = vrot.slane %v6109_v43, 4  ;;  %v6273_v21 = vpack.c.bf16 %v6109_v43, %v6109_v43 }
 0x4c2   : > { %v6683_v1 = vsel %vm6636_vm9, %v6682_v25, %v6681_v11 }
 0x4c3   : > { %v6274_v51 = vpack.c.bf16 %v6152_v37, %v6152_v37  ;;  %v6275_v62 = vpack.c.bf16 %v6153_v58, %v6153_v58  ;;  %v6600_v35 = vunpack.c.l.b16 %v6273_v21 }
 0x4c5   : > { %v6602_v37 = vunpack.c.l.b16 %v6275_v62  ;;  %v6658_v25 = vrot.slane %v6600_v35, 3 }
 0x4cb   : > { %v8517_v52 = vpop.permute.xlu0 %8516 }
 0x4cc   : > { %v8519_v8 = vunpack.i.h.bf16 %v8517_v52  ;;  %v8518_v22 = vunpack.i.l.bf16 %v8517_v52  ;;  %v6265_v52 = vpack.c.bf16 %v6151_v44, %v6151_v44  ;;  %v6599_v44 = vunpack.c.l.b16 %v6272_v38 }
 0x4cd   : > { %v6601_v38 = vunpack.c.l.b16 %v6274_v51 }
 0x4ce   : > { %v6018_v36 = vsel %vm5981_vm6, %v8518_v22, %v8519_v8  ;;  %v6019_v33 = vsel %vm5981_vm6, %v8519_v8, %v8518_v22  ;;  %v6592_v13 = vunpack.c.l.b16 %v6265_v52  ;;  %v6638_v22 = vrot.slane %v6589_v63, 4 }
 0x4cf   : > { %v8527_v12 = vpop.permute.xlu0 %8526  ;;  %v6114_v41 = vmax.f32 %v13206_v28, %v6018_v36  ;;  %v6115_v47 = vmax.f32 %v14723_v48, %v6019_v33  ;;  %v6656_v28 = vrot.slane %v6590_v2, 4  ;;  %v6641_v42 = vrot.slane %v6599_v44, 3 }
 0x4d0   : > { %v8529_v54 = vunpack.i.h.bf16 %v8527_v12  ;;  %v8528_v29 = vunpack.i.l.bf16 %v8527_v12  ;;  %v6684_v15 = vrot.slane %v6592_v13, 4  ;;  %v6640_v46 = vsel %vm6639_vm10, %v6638_v22, %v6637_v10 }
 0x4d1   : > { %v6154_v5 = vrot.slane %v6114_v41, 4  ;;  %v6282_v20 = vpack.c.bf16 %v6114_v41, %v6114_v41  ;;  %v6155_v43 = vrot.slane %v6115_v47, 4  ;;  %v6657_v63 = vsel %vm6639_vm10, %v6656_v28, %v6655_v59 }
 0x4d2   : > { %v5990_v26 = vsel %vm5981_vm6, %v8528_v29, %v8529_v54  ;;  %v5991_v30 = vsel %vm5981_vm6, %v8529_v54, %v8528_v29  ;;  %v6671_v2 = vsel %vm6639_vm10, %v6670_v16, %v6669_v50  ;;  %v6283_v58 = vpack.c.bf16 %v6115_v47, %v6115_v47  ;;  %v14724_v16 = vld [vmem:[#allocation28_spill] sm:$0xff] }
 0x4d3   : > { %v8537_v8 = vpop.permute.xlu0 %8536  ;;  %v6284_v52 = vpack.c.bf16 %v6154_v5, %v6154_v5  ;;  %v6086_v33 = vmax.f32 %v12944_v14, %v5990_v26  ;;  %v6087_v41 = vmax.f32 %v12951_v49, %v5991_v30  ;;  %v6609_v54 = vunpack.c.l.b16 %v6282_v20 }
 0x4d4   : > { %v8539_v36 = vunpack.i.h.bf16 %v8537_v8  ;;  %v8538_v12 = vunpack.i.l.bf16 %v8537_v8  ;;  %v6285_v10 = vpack.c.bf16 %v6155_v43, %v6155_v43  ;;  %v6685_v59 = vsel %vm6639_vm10, %v6684_v15, %v6683_v1 }
 0x4d5   : > { %v6643_v50 = vsel %vm6642_vm11, %v6641_v42, %v6640_v46  ;;  %v6611_v13 = vunpack.c.l.b16 %v6284_v52  ;;  %v6672_v48 = vrot.slane %v6601_v38, 3  ;;  %v6192_v8 = vrot.slane %v6086_v33, 4 }
 0x4d6   : > { %v5984_v11 = vsel %vm5981_vm6, %v8538_v12, %v8539_v36  ;;  %v5985_v29 = vsel %vm5981_vm6, %v8539_v36, %v8538_v12  ;;  %v6193_v47 = vrot.slane %v6087_v41, 4  ;;  %v6686_v28 = vrot.slane %v6602_v37, 3 }
 0x4d7   : > { %v8547_v21 = vpop.permute.xlu0 %8546  ;;  %v6080_v22 = vmax.f32 %v12897_v31, %v5984_v11  ;;  %v13397_v44 = vunpack.c.l.b16 %v6283_v58  ;;  %v6644_v5 = vrot.slane %v6609_v54, 2  ;;  %v6081_v51 = vmax.f32 %v14724_v16, %v5985_v29 }
 0x4d8   : > { %v6612_v62 = vunpack.c.l.b16 %v6285_v10  ;;  %v6236_v20 = vpack.c.bf16 %v6086_v33, %v6086_v33  ;;  %v8549_v26 = vunpack.i.h.bf16 %v8547_v21  ;;  %v8548_v30 = vunpack.i.l.bf16 %v8547_v21 }
 0x4d9   : > { %v6674_v36 = vrot.slane %v6611_v13, 2  ;;  %v6237_v12 = vpack.c.bf16 %v6087_v41, %v6087_v41  ;;  %v13402_v35 = vsel %vm6642_vm11, %v6658_v25, %v6657_v63  ;;  %v6673_v43 = vsel %vm6642_vm11, %v6672_v48, %v6671_v2 }
 0x4da   : > { %v6238_v31 = vpack.c.bf16 %v6192_v8, %v6192_v8  ;;  %v6239_v1 = vpack.c.bf16 %v6193_v47, %v6193_v47  ;;  %v6190_v46 = vrot.slane %v6080_v22, 4  ;;  %v13406_v42 = vsel %vm6645_vm12, %v6644_v5, %v6643_v50 }
 0x4db   : > { %v13388_v17 = vpop.permute.xlu1 %8521  ;;  %v6660_v52 = vrot.slane %v13397_v44, 2  ;;  %v6191_v38 = vrot.slane %v6081_v51, 4  ;;  %v13410_v33 = vsel %vm6642_vm11, %v6686_v28, %v6685_v59  ;;  %v13412_v41 = vrot.slane %v6612_v62, 2  ;;  %v8557_v2 = vpop.permute.xlu0 %8556 }
 0x4dc   : > { %v8524_v14 = vunpack.i.h.bf16 %v13388_v17  ;;  %v8523_v49 = vunpack.i.l.bf16 %v13388_v17  ;;  %v6563_v17 = vunpack.c.l.b16 %v6236_v20  ;;  %v6009_v63 = vsel %vm5981_vm6, %v8549_v26, %v8548_v30 }
 0x4dd   : > { %v13417_v58 = vsel %vm6645_vm12, %v6674_v36, %v6673_v43  ;;  %v6564_v54 = vunpack.c.l.b16 %v6237_v12  ;;  %v6226_v11 = vpack.c.bf16 %v6080_v22, %v6080_v22  ;;  %v6008_v25 = vsel %vm5981_vm6, %v8548_v30, %v8549_v26 }
 0x4de   : > { %v6024_v15 = vsel %vm5981_vm6, %v8523_v49, %v8524_v14  ;;  %v6565_v29 = vunpack.c.l.b16 %v6238_v31  ;;  %v6566_v50 = vunpack.c.l.b16 %v6239_v1  ;;  %v6227_v59 = vpack.c.bf16 %v6081_v51, %v6081_v51 }
 0x4df   : > { %v6120_v37 = vmax.f32 %v13248_v27, %v6024_v15  ;;  %v8532_v10 = vpop.permute.xlu1 %8531  ;;  %v6228_v13 = vpack.c.bf16 %v6190_v46, %v6190_v46  ;;  %v6229_v21 = vpack.c.bf16 %v6191_v38, %v6191_v38  ;;  %v6105_v48 = vmax.f32 %v13116_v4, %v6009_v63 }
 0x4e0   : > { %v8559_v8 = vunpack.i.h.bf16 %v8557_v2  ;;  %v8558_v47 = vunpack.i.l.bf16 %v8557_v2  ;;  %v6104_v27 = vmax.f32 %v13110_v0, %v6008_v25  ;;  %v8534_v5 = vunpack.i.h.bf16 %v8532_v10  ;;  %v13440_v25 = vpop.permute.xlu0 %8566 }
 0x4e1   : > { %v6156_v28 = vrot.slane %v6120_v37, 4  ;;  %v8533_v16 = vunpack.i.l.bf16 %v8532_v10  ;;  %v6692_v62 = vrot.slane %v6563_v17, 7  ;;  %v6706_v20 = vrot.slane %v6564_v54, 7 }
 0x4e2   : > { %v6553_v22 = vunpack.c.l.b16 %v6226_v11  ;;  %v6292_v36 = vpack.c.bf16 %v6120_v37, %v6120_v37  ;;  %v6720_v26 = vrot.slane %v6565_v29, 7  ;;  %v6554_v30 = vunpack.c.l.b16 %v6227_v59 }
 0x4e3   : > { %v6555_v12 = vunpack.c.l.b16 %v6228_v13  ;;  %v6025_v51 = vsel %vm5981_vm6, %v8524_v14, %v8523_v49  ;;  %v6734_v15 = vrot.slane %v6566_v50, 7  ;;  %v6556_v43 = vunpack.c.l.b16 %v6229_v21  ;;  %v8542_v10 = vpop.permute.xlu1 %8541 }
 0x4e4   : > { %v6199_v4 = vrot.slane %v6105_v48, 4  ;;  %v6021_v31 = vsel %vm5981_vm6, %v8559_v8, %v8558_v47  ;;  %v6198_v1 = vrot.slane %v6104_v27, 4  ;;  %v6266_v0 = vpack.c.bf16 %v6104_v27, %v6104_v27 }
 0x4e5   : > { %v6294_v46 = vpack.c.bf16 %v6156_v28, %v6156_v28  ;;  %v5996_v38 = vsel %vm5981_vm6, %v8533_v16, %v8534_v5  ;;  %v13426_v17 = vsel %vm6630_vm7, %v6692_v62, %v6553_v22  ;;  %v13429_v63 = vmax.f32 %v13252_v3, %v6025_v51 }
 0x4e6   : > { %v6619_v37 = vunpack.c.l.b16 %v6292_v36  ;;  %v5997_v2 = vsel %vm5981_vm6, %v8534_v5, %v8533_v16  ;;  %v13433_v14 = vsel %vm6630_vm7, %v6706_v20, %v6554_v30  ;;  %v13436_v49 = vsel %vm6630_vm7, %v6720_v26, %v6555_v12 }
 0x4e7   : > { %v6020_v54 = vsel %vm5981_vm6, %v8558_v47, %v8559_v8  ;;  %v6117_v11 = vmax.f32 %v13222_v56, %v6021_v31  ;;  %v13443_v29 = vsel %vm6630_vm7, %v6734_v15, %v6556_v43  ;;  %v6267_v3 = vpack.c.bf16 %v6105_v48, %v6105_v48  ;;  %v13461_v51 = vpop.permute.xlu1 %8551 }
 0x4e8   : > { %v6269_v50 = vpack.c.bf16 %v6199_v4, %v6199_v4  ;;  %v6092_v59 = vmax.f32 %v13000_v39, %v5996_v38  ;;  %v13446_v13 = vpack.c.bf16 %v6198_v1, %v6198_v1  ;;  %v13448_v21 = vunpack.c.l.b16 %v6266_v0 }
 0x4e9   : > { %v6621_v27 = vunpack.c.l.b16 %v6294_v46  ;;  %v6093_v28 = vmax.f32 %v13007_v9, %v5997_v2  ;;  %v6647_v8 = vrot.slane %v6619_v37, 1  ;;  %v6116_v56 = vmax.f32 %v13218_v24, %v6020_v54 }
 0x4ea   : > { %v14189_v47 = vunpack.i.h.bf16 %v13440_v25  ;;  %v14188_v5 = vunpack.i.l.bf16 %v13440_v25  ;;  %v6157_v16 = vrot.slane %v13429_v63, 4  ;;  %v6203_v48 = vrot.slane %v6117_v11, 4 }
 0x4eb   : > { %v8544_v62 = vunpack.i.h.bf16 %v8542_v10  ;;  %v8543_v20 = vunpack.i.l.bf16 %v8542_v10  ;;  %v13455_v39 = vunpack.c.l.b16 %v6267_v3  ;;  %v6596_v22 = vunpack.c.l.b16 %v6269_v50 }
 0x4ec   : > { %v6293_v36 = vpack.c.bf16 %v13429_v63, %v13429_v63  ;;  %v6246_v26 = vpack.c.bf16 %v6092_v59, %v6092_v59  ;;  %v6676_v30 = vrot.slane %v6621_v27, 1  ;;  %v6195_v12 = vrot.slane %v6093_v28, 4 }
 0x4ed   : > { %v13465_v15 = vsel %vm6648_vm13, %v6647_v8, %v13406_v42  ;;  %v6286_v43 = vpack.c.bf16 %v6116_v56, %v6116_v56  ;;  %v6287_v4 = vpack.c.bf16 %v6117_v11, %v6117_v11  ;;  %v5993_v31 = vsel %vm5981_vm6, %v14189_v47, %v14188_v5 }
 0x4ee   : > { %v6289_v1 = vpack.c.bf16 %v6203_v48, %v6203_v48  ;;  %v6194_v0 = vrot.slane %v6092_v59, 4  ;;  %v6247_v46 = vpack.c.bf16 %v6093_v28, %v6093_v28  ;;  %v6002_v38 = vsel %vm5981_vm6, %v8543_v20, %v8544_v62  ;;  %v13484_v59 = vpop.permute.xlu0 %8576 }
 0x4ef   : > { %v6712_v37 = vrot.slane %v13455_v39, 4  ;;  %v13474_v2 = vrot.slane %v6596_v22, 4  ;;  %v6573_v54 = vunpack.c.l.b16 %v6246_v26  ;;  %v6003_v42 = vsel %vm5981_vm6, %v8544_v62, %v8543_v20  ;;  %v13492_v26 = vpop.permute.xlu1 %8561 }
 0x4f0   : > { %v13479_v11 = vsel %vm6648_vm13, %v6676_v30, %v13417_v58  ;;  %v6776_v10 = vpack.c.b16 %v13465_v15, %v13465_v15  ;;  %v6249_v3 = vpack.c.bf16 %v6195_v12, %v6195_v12  ;;  %v6089_v50 = vmax.f32 %v12974_v53, %v5993_v31 }
 0x4f1   : > { %v6202_v27 = vrot.slane %v6116_v56, 4  ;;  %v13486_v28 = vunpack.c.l.b16 %v6286_v43  ;;  %v13488_v8 = vunpack.c.l.b16 %v6287_v4  ;;  %v6098_v48 = vmax.f32 %v13053_v34, %v6002_v38 }
 0x4f2   : > { %v6616_v62 = vunpack.c.l.b16 %v6289_v1  ;;  %v6248_v20 = vpack.c.bf16 %v6194_v0, %v6194_v0  ;;  %v6574_v22 = vunpack.c.l.b16 %v6247_v46  ;;  %v6099_v58 = vmax.f32 %v13059_v32, %v6003_v42  ;;  %v13506_v47 = vpop.permute.xlu0 %8586 }
 0x4f3   : > { %v6778_v30 = vpack.c.b16 %v13479_v11, %v13479_v11  ;;  %v6694_v53 = vrot.slane %v6573_v54, 6  ;;  %v8554_v12 = vunpack.i.h.bf16 %v13461_v51  ;;  %v8553_v56 = vunpack.i.l.bf16 %v13461_v51 }
 0x4f4   : > { %v6576_v43 = vunpack.c.l.b16 %v6249_v3  ;;  %v6241_v4 = vpack.c.bf16 %v6089_v50, %v6089_v50  ;;  %v14191_v31 = vunpack.i.h.bf16 %v13484_v59  ;;  %v14190_v34 = vunpack.i.l.bf16 %v13484_v59 }
 0x4f5   : > { %v13500_v1 = vpack.c.bf16 %v6202_v27, %v6202_v27  ;;  %v6716_v0 = vrot.slane %v13488_v8, 2  ;;  %v6196_v46 = vrot.slane %v6098_v48, 4  ;;  %v13504_v38 = vrot.slane %v6616_v62, 2  ;;  %v9012_v8 = vld [vmem:[%s14015_s5 + $0x1a0] sm:$0xff]  }
 0x4f6   : > { %v6575_v54 = vunpack.c.l.b16 %v6248_v20  ;;  %v6708_v42 = vrot.slane %v6574_v22, 6  ;;  %v6197_v5 = vrot.slane %v6099_v58, 4  ;;  %v6695_v51 = vsel %vm6633_vm8, %v6694_v53, %v13426_v17  ;;  %v13518_v20 = vpop.permute.xlu1 %8571 }
 0x4f7   : > { %v6256_v3 = vpack.c.bf16 %v6098_v48, %v6098_v48  ;;  %v6015_v50 = vsel %vm5981_vm6, %v8554_v12, %v8553_v56  ;;  %v6620_v27 = vunpack.c.l.b16 %v6293_v36  ;;  %v6736_v9 = vrot.slane %v6576_v43, 6 }
 0x4f8   : > { %v13511_v24 = vunpack.c.l.b16 %v6241_v4  ;;  %v6257_v32 = vpack.c.bf16 %v6099_v58, %v6099_v58  ;;  %v5987_v62 = vsel %vm5981_vm6, %v14191_v31, %v14190_v34  ;;  %v13520_v22 = vpack.c.bf16 %v6196_v46, %v6196_v46 }
 0x4f9   : > { %v14193_v17 = vunpack.i.h.bf16 %v13506_v47  ;;  %v6662_v48 = vrot.slane %v6620_v27, 1  ;;  %v8564_v53 = vunpack.i.h.bf16 %v13492_v26  ;;  %v13524_v36 = vpack.c.bf16 %v6197_v5, %v6197_v5 }
 0x4fa   : > { %v6111_v43 = vmax.f32 %v13173_v6, %v6015_v50  ;;  %v6661_v58 = vsel %vm6645_vm12, %v6660_v52, %v13402_v35  ;;  %v8563_v4 = vunpack.i.l.bf16 %v13492_v26  ;;  %v6583_v34 = vunpack.c.l.b16 %v6256_v3  ;;  %v8998_v35 = vld [vmem:[%s14015_s5 + $0x138] sm:$0xff]  }
 0x4fb   : > { %v14192_v46 = vunpack.i.l.bf16 %v13506_v47  ;;  %v6663_v31 = vsel %vm6648_vm13, %v6662_v48, %v6661_v58  ;;  %v6295_v27 = vpack.c.bf16 %v6157_v16, %v6157_v16  ;;  %v13537_v5 = vrot.slane %v6575_v54, 6 }
 0x4fc   : > { %v6083_v6 = vmax.f32 %v12918_v61, %v5987_v62  ;;  %v6777_v50 = vpack.c.b16 %v6663_v31, %v6663_v31  ;;  %v6027_v44 = vsel %vm5981_vm6, %v8564_v53, %v8563_v4  ;;  %v13550_v52 = vsel %vm6633_vm8, %v6708_v42, %v13433_v14  ;;  %v9001_v31 = vld [vmem:[%s14015_s5 + $0x170] sm:$0xff]   ;;  %v13564_v42 = vpop.permute.xlu1 %8581 }
 0x4fd   : > { %v13554_v63 = vsel %vm6633_vm8, %v6736_v9, %v13443_v29  ;;  %v6762_v61 = vrot.slane %v13511_v24, 7  ;;  %v13557_v16 = vunpack.c.l.b16 %v6257_v32  ;;  %v6585_v54 = vunpack.c.l.b16 %v13520_v22 }
 0x4fe   : > { %v6014_v3 = vsel %vm5981_vm6, %v8553_v56, %v8554_v12  ;;  %v6277_v62 = vpack.c.bf16 %v6111_v43, %v6111_v43  ;;  %7308 = vmatprep.mubr.bf16.mxu0 %v6777_v50  ;;  %v6622_v14 = vunpack.c.l.b16 %v6295_v27  ;;  %v6586_v29 = vunpack.c.l.b16 %v13524_v36  ;;  %v13585_v50 = vpop.permute.xlu0 %8596 }
 0x4ff   : > { %v6696_v9 = vrot.slane %v6583_v34, 5  ;;  %v6011_v32 = vsel %vm5981_vm6, %v14193_v17, %v14192_v46  ;;  %v13573_v48 = vmax.f32 %v13273_v55, %v6027_v44  ;;  %7309 = vmatmul.mubr.bf16.vlgmr.msra.gmra.mxu0 %v6776_v10  ;;  %v6231_v12 = vpack.c.bf16 %v6083_v6, %v6083_v6  ;;  %v9002_v34 = vld [vmem:[%s14015_s5 + $0x130] sm:$0xff]   ;;  %v9005_v10 = vld [vmem:[%s14015_s5 + $0x168] sm:$0xff]   ;;  %v9009_v46 = vld [vmem:[%s14015_s5 + $0x160] sm:$0xff]  }
 0x500   : > { %v6201_v56 = vrot.slane %v6111_v43, 4  ;;  %8164 = vmatpush3.bf16.msra.mxu0 %v8998_v35  ;;  %v6690_v58 = vrot.slane %v6622_v14, 1  ;;  %v8574_v36 = vunpack.i.h.bf16 %v13518_v20  ;;  %v13583_v27 = vmax.f32 %v13167_v18, %v6014_v3  ;;  %v9000_v14 = vld [vmem:[%s14015_s5 + $0x1b8] sm:$0xff]  }
 0x501   : > { %v6689_v55 = vsel %vm6645_vm12, %v13412_v41, %v13410_v33  ;;  %8165 = vmatprep.subr.bf16.mxu0 %v9001_v31  ;;  %v14194_v15 = vunpack.i.l.bf16 %v13518_v20  ;;  %v8584_v43 = vunpack.i.h.bf16 %v13564_v42  ;;  %v6604_v6 = vunpack.c.l.b16 %v6277_v62 }
 0x502   : > { %v6107_v44 = vmax.f32 %v13140_v60, %v6011_v32  ;;  %v6691_v18 = vsel %vm6648_vm13, %v6690_v58, %v6689_v55  ;;  %v8583_v35 = vunpack.i.l.bf16 %v13564_v42  ;;  %v13599_v3 = vsel %vm6636_vm9, %v6696_v9, %v6695_v51  ;;  %v9006_v9 = vld [vmem:[%s14015_s5 + $0x128] sm:$0xff]  }
 0x503   : > { %v6710_v33 = vrot.slane %v13557_v16, 5  ;;  %v6297_v41 = vpack.c.bf16 %v13573_v48, %v13573_v48  ;;  %v6779_v31 = vpack.c.b16 %v6691_v18, %v6691_v18  ;;  %v6279_v62 = vpack.c.bf16 %v6201_v56, %v6201_v56  ;;  %v9003_v16 = vld [vmem:[%s14015_s5 + $0x1f0] sm:$0xff]   ;;  %v13620_v56 = vpop.permute.xlu1 %8591 }
 0x504   : > { %v8599_v60 = vunpack.i.h.bf16 %v13585_v50  ;;  %v8598_v32 = vunpack.i.l.bf16 %v13585_v50  ;;  %v5999_v51 = vsel %vm5981_vm6, %v8574_v36, %v14194_v15  ;;  %8166 = vmatpush3.bf16.msra.mxu0 %v9002_v34  ;;  %v6558_v58 = vunpack.c.l.b16 %v6231_v12  ;;  %v14742_v50 = vld [vmem:[#allocation45_spill] sm:$0xff] }
 0x505   : > { %v6276_v55 = vpack.c.bf16 %v13583_v27, %v13583_v27  ;;  %7348 = vmatprep.mubr.bf16.mxu1 %v6779_v31  ;;  %v6095_v18 = vmax.f32 %v13030_v23, %v5999_v51  ;;  %8167 = vmatprep.subr.bf16.mxu0 %v9005_v10  ;;  %v6005_v34 = vsel %vm5981_vm6, %v8584_v43, %v8583_v35  ;;  %v6714_v17 = vrot.slane %v6604_v6, 3  ;;  %v9004_v31 = vld [vmem:[%s14015_s5 + $0x1b0] sm:$0xff]  }
 0x506   : > { %v6271_v15 = vpack.c.bf16 %v6107_v44, %v6107_v44  ;;  %v6026_v12 = vsel %vm5981_vm6, %v8563_v4, %v8564_v53  ;;  %7349 = vmatmul.mubr.bf16.vlgmr.msra.gmra.mxu1 %v6778_v30  ;;  %v6101_v23 = vmax.f32 %v13083_v7, %v6005_v34  ;;  %v8594_v6 = vunpack.i.h.bf16 %v13620_v56  ;;  %v9007_v30 = vld [vmem:[%s14015_s5 + $0x1e8] sm:$0xff]   ;;  %v9010_v53 = vld [vmem:[%s14015_s5 + $0x120] sm:$0xff]  }
 0x507   : > { %8186 = vmatpush3.bf16.msra.mxu1 %v9000_v14  ;;  %v6251_v10 = vpack.c.bf16 %v6095_v18, %v6095_v18  ;;  %v8593_v44 = vunpack.i.l.bf16 %v13620_v56  ;;  %v6624_v51 = vunpack.c.l.b16 %v6297_v41  ;;  %v6606_v26 = vunpack.c.l.b16 %v6279_v62  ;;  %v9008_v34 = vld [vmem:[%s14015_s5 + $0x1a8] sm:$0xff]   ;;  %v9035_v56 = vld [vmem:[%s14015_s5 + $0x260] sm:$0xff]  }
 0x508   : > { %v6023_v11 = vsel %vm5981_vm6, %v8599_v60, %v8598_v32  ;;  %8187 = vmatprep.subr.bf16.mxu1 %v9003_v16  ;;  %v6261_v7 = vpack.c.bf16 %v6101_v23, %v6101_v23  ;;  %8168 = vmatpush3.bf16.msra.mxu0 %v9006_v9  ;;  %v6711_v4 = vsel %vm6636_vm9, %v6710_v33, %v13550_v52  ;;  %v6738_v41 = vrot.slane %v6586_v29, 5  ;;  %v9013_v9 = vld [vmem:[%s14015_s5 + $0x158] sm:$0xff]  }
 0x509   : > { %v6200_v14 = vrot.slane %v13583_v27, 4  ;;  %v6578_v62 = vunpack.c.l.b16 %v6251_v10  ;;  %8169 = vmatprep.subr.bf16.mxu0 %v9009_v46  ;;  %v6017_v16 = vsel %vm5981_vm6, %v8594_v6, %v8593_v44  ;;  %v13670_v18 = vmax.f32 %v13259_v19, %v6026_v12  ;;  %v13676_v27 = vpop.permute.xlu1 %8601 }
 0x50a   : > { %v6205_v52 = vrot.slane %v13573_v48, 4  ;;  %v6588_v29 = vunpack.c.l.b16 %v6261_v7  ;;  %v6713_v46 = vsel %vm6639_vm10, %v6712_v37, %v6711_v4  ;;  %v6119_v33 = vmax.f32 %v13236_v57, %v6023_v11  ;;  %v9011_v57 = vld [vmem:[%s14015_s5 + $0x1e0] sm:$0xff]  }
 0x50b   : > { %8188 = vmatpush3.bf16.msra.mxu1 %v9004_v31  ;;  %v6113_v23 = vmax.f32 %v13195_v45, %v6017_v16  ;;  %v6715_v19 = vsel %vm6642_vm11, %v6714_v17, %v6713_v46  ;;  %v6718_v12 = vrot.slane %v6624_v51, 1  ;;  %v6763_v39 = vsel %vm6630_vm7, %v6762_v61, %v6558_v58  ;;  %v9014_v45 = vld [vmem:[%s14015_s5 + $0x118] sm:$0xff]  }
 0x50c   : > { %v13687_v48 = vunpack.c.l.b16 %v6276_v55  ;;  %v6742_v37 = vrot.slane %v6606_v26, 3  ;;  %v6598_v10 = vunpack.c.l.b16 %v6271_v15  ;;  %8189 = vmatprep.subr.bf16.mxu1 %v9007_v30  ;;  %8170 = vmatpush3.bf16.msra.mxu0 %v9010_v53  ;;  %v6764_v17 = vrot.slane %v6578_v62, 6  ;;  %v9017_v15 = vld [vmem:[%s14015_s5 + $0x150] sm:$0xff]   ;;  %v9015_v16 = vld [vmem:[%s14015_s5 + $0x1d8] sm:$0xff]  }
 0x50d   : > { %v6281_v31 = vpack.c.bf16 %v6113_v23, %v6113_v23  ;;  %8171 = vmatprep.subr.bf16.mxu0 %v9013_v9  ;;  %v6717_v24 = vsel %vm6645_vm12, %v6716_v0, %v6715_v19  ;;  %v8604_v61 = vunpack.i.h.bf16 %v13676_v27  ;;  %v6296_v58 = vpack.c.bf16 %v13670_v18, %v13670_v18 }
 0x50e   : > { %v6766_v55 = vrot.slane %v6588_v29, 5  ;;  %v6719_v51 = vsel %vm6648_vm13, %v6718_v12, %v6717_v24  ;;  %v8603_v26 = vunpack.i.l.bf16 %v13676_v27  ;;  %v6291_v11 = vpack.c.bf16 %v6119_v33, %v6119_v33  ;;  %v9037_v27 = vld [vmem:[%s14015_s5 + $0x258] sm:$0xff]  }
 0x50f   : > { %8190 = vmatpush3.bf16.msra.mxu1 %v9008_v34  ;;  %v6608_v7 = vunpack.c.l.b16 %v6281_v31  ;;  %v6781_v0 = vpack.c.b16 %v6719_v51, %v6719_v51  ;;  %v6299_v30 = vpack.c.bf16 %v6205_v52, %v6205_v52  ;;  %v6278_v53 = vpack.c.bf16 %v6200_v14, %v6200_v14  ;;  %v9018_v14 = vld [vmem:[%s14015_s5 + $0x110] sm:$0xff]   ;;  %v9021_v34 = vld [vmem:[%s14015_s5 + $0x148] sm:$0xff]  }
 0x510   : > { %v6700_v4 = vrot.slane %v13687_v48, 3  ;;  %8191 = vmatprep.subr.bf16.mxu1 %v9011_v57  ;;  %v6029_v62 = vsel %vm5981_vm6, %v8604_v61, %v8603_v26  ;;  %8172 = vmatpush3.bf16.msra.mxu0 %v9014_v45  ;;  %v6739_v9 = vsel %vm6636_vm9, %v6738_v41, %v13554_v63  ;;  %v6204_v52 = vrot.slane %v13670_v18, 4  ;;  %v9022_v31 = vld [vmem:[%s14015_s5 + $0x108] sm:$0xff]  }
 0x511   : > { %v6765_v29 = vsel %vm6633_vm8, %v6764_v17, %v6763_v39  ;;  %7388 = vmatprep.mubr.bf16.mxu0 %v6781_v0  ;;  %v6125_v46 = vmax.f32 %v13285_v40, %v6029_v62  ;;  %v6626_v33 = vunpack.c.l.b16 %v6299_v30  ;;  %8173 = vmatprep.subr.bf16.mxu0 %v9017_v15  ;;  %v6623_v23 = vunpack.c.l.b16 %v6296_v58  ;;  %v9016_v40 = vld [vmem:[%s14015_s5 + $0x198] sm:$0xff]   ;;  %v9020_v0 = vld [vmem:[%s14015_s5 + $0x190] sm:$0xff]  }
 0x512   : > { %v6770_v19 = vrot.slane %v6608_v7, 3  ;;  %v6741_v63 = vsel %vm6639_vm10, %v13474_v2, %v6739_v9  ;;  %v6767_v41 = vsel %vm6636_vm9, %v6766_v55, %v6765_v29  ;;  %v6768_v12 = vrot.slane %v6598_v10, 4  ;;  %v9029_v9 = vld [vmem:[%s14015_s5 + $0x278] sm:$0xff]  }
 0x513   : > { %v6618_v18 = vunpack.c.l.b16 %v6291_v11  ;;  %8192 = vmatpush3.bf16.msra.mxu1 %v9012_v8  ;;  %v6301_v39 = vpack.c.bf16 %v6125_v46, %v6125_v46  ;;  %v6743_v48 = vsel %vm6642_vm11, %v6742_v37, %v6741_v63  ;;  %v6724_v57 = vrot.slane %v6585_v54, 5  ;;  %v9019_v37 = vld [vmem:[%s14015_s5 + $0x1d0] sm:$0xff]  }
 0x514   : > { %v6605_v45 = vunpack.c.l.b16 %v6278_v53  ;;  %v14725_v17 = vrot.slane %v13448_v21, 4  ;;  %8193 = vmatprep.subr.bf16.mxu1 %v9015_v16  ;;  %v6746_v10 = vrot.slane %v6626_v33, 1  ;;  %8174 = vmatpush3.bf16.msra.mxu0 %v9018_v14  ;;  %v6298_v24 = vpack.c.bf16 %v6204_v52, %v6204_v52  ;;  %v9025_v21 = vld [vmem:[%s14015_s5 + $0x140] sm:$0xff]   ;;  %v9023_v53 = vld [vmem:[%s14015_s5 + $0x1c8] sm:$0xff]  }
 0x515   : > { %v6628_v22 = vunpack.c.l.b16 %v6301_v39  ;;  %v6745_v54 = vsel %vm6645_vm12, %v13504_v38, %v6743_v48  ;;  %8175 = vmatprep.subr.bf16.mxu0 %v9021_v34  ;;  %v6704_v58 = vrot.slane %v6623_v23, 1  ;;  %v6723_v11 = vsel %vm6633_vm8, %v13537_v5, %v13436_v49  ;;  %v9026_v49 = vld [vmem:[%s14015_s5 + $0x100] sm:$0xff]  }
 0x516   : > { %v6699_v2 = vsel %vm6639_vm10, %v14725_v17, %v13599_v3  ;;  %v6769_v3 = vsel %vm6639_vm10, %v6768_v12, %v6767_v41  ;;  %v6747_v55 = vsel %vm6648_vm13, %v6746_v10, %v6745_v54  ;;  %v6772_v7 = vrot.slane %v6618_v18, 2  ;;  %v9031_v18 = vld [vmem:[%s14015_s5 + $0x270] sm:$0xff]   ;;  %v9028_v10 = vld [vmem:[%s14015_s5 + $0x180] sm:$0xff]  }
 0x517   : > { %v6701_v15 = vsel %vm6642_vm11, %v6700_v4, %v6699_v2  ;;  %v6771_v51 = vsel %vm6642_vm11, %v6770_v19, %v6769_v3  ;;  %v6774_v38 = vrot.slane %v6628_v22, 1  ;;  %v6783_v8 = vpack.c.b16 %v6747_v55, %v6747_v55  ;;  %8194 = vmatpush3.bf16.msra.mxu1 %v9016_v40  ;;  %v14734_v22 = vld [vmem:[#allocation35_spill] sm:$0xff] }
 0x518   : > { %v6725_v30 = vsel %vm6636_vm9, %v6724_v57, %v6723_v11  ;;  %8195 = vmatprep.subr.bf16.mxu1 %v9019_v37  ;;  %8176 = vmatpush3.bf16.msra.mxu0 %v9022_v31  ;;  %v6728_v5 = vrot.slane %v6605_v45, 3  ;;  %v6625_v4 = vunpack.c.l.b16 %v6298_v24  ;;  %v14726_v62 = vrot.slane %v13486_v28, 2  ;;  %v9024_v28 = vld [vmem:[%s14015_s5 + $0x188] sm:$0xff]  }
 0x519   : > { %7428 = vmatprep.mubr.bf16.mxu1 %v6783_v8  ;;  %8177 = vmatprep.subr.bf16.mxu0 %v9025_v21  ;;  %v6773_v14 = vsel %vm6645_vm12, %v6772_v7, %v6771_v51  ;;  %v14727_v52 = vunpack.c.l.b16 %v13446_v13  ;;  %v6615_v46 = vunpack.c.l.b16 %v13500_v1  ;;  %v9027_v13 = vld [vmem:[%s14015_s5 + $0x1c0] sm:$0xff]   ;;  %v9030_v1 = vld [vmem:[%s14015_s5 + $0x238] sm:$0xff]   ;;  %v14728_v48 = vunpack.i.l.bf16 %v13518_v20  ;;  %v9033_v24 = vld [vmem:[%s14015_s5 + $0x268] sm:$0xff]  }
 0x51a   : > { %v6703_v16 = vsel %vm6645_vm12, %v14726_v62, %v6701_v15  ;;  %v6775_v34 = vsel %vm6648_vm13, %v6774_v38, %v6773_v14  ;;  %v6732_v63 = vrot.slane %v6625_v4, 1  ;;  %v14729_v57 = vunpack.i.h.bf16 %v13440_v25  ;;  %v14735_v21 = vld [vmem:[#allocation34_spill] sm:$0xff]  ;;  %v14736_v15 = vld [vmem:[#allocation32_spill] sm:$0xff]  ;;  %v9036_v62 = vld [vmem:[%s14015_s5 + $0x220] sm:$0xff]  }
 0x51b   : > { %v6726_v29 = vrot.slane %v14727_v52, 4  ;;  %v6705_v33 = vsel %vm6648_vm13, %v6704_v58, %v6703_v16  ;;  %8196 = vmatpush3.bf16.msra.mxu1 %v9020_v0  ;;  %v6785_v12 = vpack.c.b16 %v6775_v34, %v6775_v34  ;;  %v6730_v39 = vrot.slane %v6615_v46, 2  ;;  %v9034_v38 = vld [vmem:[%s14015_s5 + $0x228] sm:$0xff]   ;;  %v14739_v0 = vld [vmem:[#allocation47_spill] sm:$0xff] }
 0x51c   : > { %8197 = vmatprep.subr.bf16.mxu1 %v9023_v53  ;;  %8178 = vmatpush3.bf16.msra.mxu0 %v9026_v49  ;;  %v6780_v41 = vpack.c.b16 %v6705_v33, %v6705_v33  ;;  %v5998_v40 = vsel %vm5981_vm6, %v14728_v48, %v8574_v36  ;;  %v14730_v45 = vunpack.i.l.bf16 %v13440_v25  ;;  %v6004_v2 = vsel %vm5981_vm6, %v8583_v35, %v8584_v43  ;;  %v9032_v25 = vld [vmem:[%s14015_s5 + $0x230] sm:$0xff]   ;;  %v14741_v14 = vld [vmem:[#allocation50_spill] sm:$0xff] }
 0x51d   : > { %v6727_v23 = vsel %vm6639_vm10, %v6726_v29, %v6725_v30  ;;  %8207 = vmatprep.subr.bf16.mxu0 %v9029_v9  ;;  %v14731_v36 = vunpack.i.h.bf16 %v13484_v59  ;;  %v14732_v42 = vunpack.i.l.bf16 %v13484_v59  ;;  %v14733_v35 = vld [vmem:[#allocation31_spill] sm:$0xff]  ;;  %v6100_v3 = vmax.f32 %v14735_v21, %v6004_v2  ;;  %v9042_v2 = vld [vmem:[%s14015_s5 + $0x208] sm:$0xff]  }
 0x51e   : > { %v6729_v19 = vsel %vm6642_vm11, %v6728_v5, %v6727_v23  ;;  %v5992_v17 = vsel %vm5981_vm6, %v14730_v45, %v14729_v57  ;;  %v6094_v37 = vmax.f32 %v14733_v35, %v5998_v40  ;;  %v6016_v59 = vsel %vm5981_vm6, %v8593_v44, %v8594_v6  ;;  %v9039_v34 = vld [vmem:[%s14015_s5 + $0x250] sm:$0xff]  }
 0x51f   : > { %8198 = vmatpush3.bf16.msra.mxu1 %v9024_v28  ;;  %7389 = vmatmul.mubr.bf16.vlgmr.msra.gmra.mxu0 %v6780_v41  ;;  %v6731_v20 = vsel %vm6645_vm12, %v6730_v39, %v6729_v19  ;;  %v5986_v43 = vsel %vm5981_vm6, %v14732_v42, %v14731_v36  ;;  %v6088_v54 = vmax.f32 %v14734_v22, %v5992_v17  ;;  %v14737_v55 = vunpack.i.h.bf16 %v13506_v47  ;;  %v9041_v39 = vld [vmem:[%s14015_s5 + $0x248] sm:$0xff]   ;;  %v9046_v21 = vld [vmem:[%s14017_s7 + $0x30] sm:$0xff]  }
 0x520   : > { %8199 = vmatprep.subr.bf16.mxu1 %v9027_v13  ;;  %8208 = vmatpush3.bf16.msra.mxu0 %v9030_v1  ;;  %v6733_v31 = vsel %vm6648_vm13, %v6732_v63, %v6731_v20  ;;  %v6082_v58 = vmax.f32 %v14736_v15, %v5986_v43  ;;  %v14738_v51 = vunpack.i.l.bf16 %v13506_v47  ;;  %v6250_v8 = vpack.c.bf16 %v6094_v37, %v6094_v37  ;;  %v14740_v47 = vld [vmem:[#allocation38_spill] sm:$0xff]  ;;  %v9043_v20 = vld [vmem:[%s14015_s5 + $0x240] sm:$0xff]   ;;  %v9049_v15 = vld [vmem:[%s14017_s7 + $0x18] sm:$0xff]  }
 0x521   : > { %7468 = vmatprep.mubr.bf16.mxu0 %v6785_v12  ;;  %8209 = vmatprep.subr.bf16.mxu0 %v9031_v18  ;;  %v6782_v7 = vpack.c.b16 %v6733_v31, %v6733_v31  ;;  %v6240_v6 = vpack.c.bf16 %v6088_v54, %v6088_v54  ;;  %v6260_v44 = vpack.c.bf16 %v6100_v3, %v6100_v3  ;;  %v9040_v12 = vld [vmem:[%s14015_s5 + $0x210] sm:$0xff]   ;;  %v9044_v43 = vld [vmem:[%s14015_s5 + $0x200] sm:$0xff]   ;;  %v9128_v22 = vmov 0.0   ;;  %v9047_v3 = vld [vmem:[%s14017_s7 + $0x28] sm:$0xff]  }
 0x522   : > { %v6010_v11 = vsel %vm5981_vm6, %v14738_v51, %v14737_v55  ;;  %v6112_v30 = vmax.f32 %v14739_v0, %v6016_v59  ;;  %v6028_v49 = vsel %vm5981_vm6, %v8603_v26, %v8604_v61  ;;  %v6230_v5 = vpack.c.bf16 %v6082_v58, %v6082_v58  ;;  %v9048_v59 = vld [vmem:[%s14017_s7 + $0x20] sm:$0xff]   ;;  %v9050_v58 = vld [vmem:[%s14017_s7 + $0x10] sm:$0xff]   ;;  %v9051_v55 = vld [vmem:[%s14017_s7 + $0x8] sm:$0xff]  }
 0x523   : > { %8200 = vmatpush3.bf16.msra.mxu1 %v9028_v10  ;;  %v6106_v53 = vmax.f32 %v14740_v47, %v6010_v11  ;;  %v6022_v4 = vsel %vm5981_vm6, %v8598_v32, %v8599_v60  ;;  %v6577_v16 = vunpack.c.l.b16 %v6250_v8  ;;  %v6567_v9 = vunpack.c.l.b16 %v6240_v6  ;;  %v9038_v32 = vld [vmem:[%s14015_s5 + $0x218] sm:$0xff]   ;;  %v9052_v51 = vld [vmem:[%s14017_s7] sm:$0xff]   ;;  %v9053_v11 = vld [vmem:[%s14019_s9 + $0x28] ss:$0 sps:$4 sm:$0x33]  }
 0x524   : > { %8210 = vmatpush3.bf16.msra.mxu0 %v9032_v25  ;;  %v6587_v61 = vunpack.c.l.b16 %v6260_v44  ;;  %v6280_v26 = vpack.c.bf16 %v6112_v30, %v6112_v30  ;;  %v6124_v52 = vmax.f32 %v14741_v14, %v6028_v49  ;;  %v6118_v46 = vmax.f32 %v14742_v50, %v6022_v4  ;;  %8245 = vmatprep.subr.bf16.mxu1 %v9128_v22  ;;  %v9055_v8 = vld [vmem:[%s14019_s9 + $0x18] sm:$0xff]  }
 0x525   : > { %8211 = vmatprep.subr.bf16.mxu0 %v9033_v24  ;;  %v6270_v29 = vpack.c.bf16 %v6106_v53, %v6106_v53  ;;  %v6557_v60 = vunpack.c.l.b16 %v6230_v5  ;;  %v6750_v33 = vrot.slane %v6577_v16, 6  ;;  %v6748_v28 = vrot.slane %v6567_v9, 7  ;;  %v9045_v24 = vld [vmem:[%s14017_s7 + $0x38] ss:$0 sps:$4 sm:$0xff]  }
 0x526   : > { %7429 = vmatmul.mubr.bf16.vlgmr.msra.gmra.mxu1 %v6782_v7  ;;  %v6752_v23 = vrot.slane %v6587_v61, 5  ;;  %v6607_v13 = vunpack.c.l.b16 %v6280_v26  ;;  %v6300_v1 = vpack.c.bf16 %v6124_v52, %v6124_v52  ;;  %v6290_v63 = vpack.c.bf16 %v6118_v46, %v6118_v46 }
 0x527   : > { %v6597_v19 = vunpack.c.l.b16 %v6270_v29  ;;  %v6749_v41 = vsel %vm6630_vm7, %v6748_v28, %v6557_v60  ;;  %v7550_v54 = vsel %vm746_vm3, %v9045_v24, 0  ;;  %8261 = vmatprep.mubr.msk.bf16.mxu1 %vm9129_vm14, %v9128_v22  ;;  %v7650_v7 = vsel %vm3211_vm5, %v9053_v11, 0  ;;  %v8015_v29 = vld [vmem:[%s14016_s6] ss:$0 sm:$0xff] }
 0x528   : > { %8212 = vmatpush3.bf16.msra.mxu0 %v9034_v38  ;;  %v6751_v18 = vsel %vm6633_vm8, %v6750_v33, %v6749_v41  ;;  %v6756_v40 = vrot.slane %v6607_v13, 3  ;;  %v6627_v57 = vunpack.c.l.b16 %v6300_v1  ;;  %v6617_v17 = vunpack.c.l.b16 %v6290_v63  ;;  %8246 = vmatpush3.bf16.msra.mxu1 %v7550_v54  ;;  %v9054_v38 = vld [vmem:[%s14019_s9 + $0x20] sm:$0xff]  }
 0x529   : > { %8213 = vmatprep.subr.bf16.mxu0 %v9035_v56  ;;  %v6753_v48 = vsel %vm6636_vm9, %v6752_v23, %v6751_v18  ;;  %v6754_v45 = vrot.slane %v6597_v19, 4  ;;  %8247 = vmatprep.subr.bf16.mxu1 %v9128_v22  ;;  %v9056_v56 = vld [vmem:[%s14019_s9 + $0x10] sm:$0xff]  }
 0x52a   : > { %v6760_v36 = vrot.slane %v6627_v57, 1  ;;  %v6758_v42 = vrot.slane %v6617_v17, 2 }
 0x52b   : > { %v6755_v10 = vsel %vm6639_vm10, %v6754_v45, %v6753_v48  ;;  %v9058_v48 = vld [vmem:[%s14019_s9] sm:$0xff]  }
 0x52c   : > { %8214 = vmatpush3.bf16.msra.mxu0 %v9036_v62  ;;  %v6757_v25 = vsel %vm6642_vm11, %v6756_v40, %v6755_v10  ;;  %8248 = vmatpush3.bf16.msra.mxu1 %v9046_v21  ;;  %v8096_v40 = vld [vmem:[%s14018_s8] ss:$0 sm:$0xff] }
 0x52d   : > { %8215 = vmatprep.subr.bf16.mxu0 %v9037_v27  ;;  %v6759_v35 = vsel %vm6645_vm12, %v6758_v42, %v6757_v25  ;;  %8249 = vmatprep.subr.bf16.mxu1 %v9128_v22 }
 0x52e   : > { %v6761_v37 = vsel %vm6648_vm13, %v6760_v36, %v6759_v35  ;;  %v8106_v36 = vld [vmem:[%s14020_s10] ss:$0 sm:$0xff] }
 0x52f   : > { %v6784_v31 = vpack.c.b16 %v6761_v37, %v6761_v37 }
 0x530   : > { %8216 = vmatpush3.bf16.msra.mxu0 %v9038_v32  ;;  %8250 = vmatpush3.bf16.msra.mxu1 %v9047_v3 }
 0x531   : > { %8217 = vmatprep.subr.bf16.mxu0 %v9039_v34  ;;  %8251 = vmatprep.subr.bf16.mxu1 %v9128_v22 }
 0x534   : > { %8218 = vmatpush3.bf16.msra.mxu0 %v9040_v12  ;;  %8252 = vmatpush3.bf16.msra.mxu1 %v9048_v59 }
 0x535   : > { %8219 = vmatprep.subr.bf16.mxu0 %v9041_v39  ;;  %8253 = vmatprep.subr.bf16.mxu1 %v9128_v22  ;;  %v9057_v39 = vld [vmem:[%s14019_s9 + $0x8] sm:$0xff]  }
 0x538   : > { %8220 = vmatpush3.bf16.msra.mxu0 %v9042_v2  ;;  %8254 = vmatpush3.bf16.msra.mxu1 %v9049_v15 }
 0x539   : > { %8221 = vmatprep.subr.bf16.mxu0 %v9043_v20  ;;  %8255 = vmatprep.subr.bf16.mxu1 %v9128_v22 }
 0x53c   : > { %8222 = vmatpush3.bf16.msra.mxu0 %v9044_v43  ;;  %8256 = vmatpush3.bf16.msra.mxu1 %v9050_v58 }
 0x53d   : > { %8265 = vmatprep.subr.bf16.mxu0 %v9128_v22  ;;  %8257 = vmatprep.subr.bf16.mxu1 %v9128_v22 }
 0x53f   : > { %7469 = vmatmul.mubr.bf16.vlgmr.msra.gmra.mxu0 %v6784_v31 }
 0x540   : > { %8277 = vmatprep.mubr.msk.bf16.mxu0 %vm9129_vm14, %v9128_v22  ;;  %8258 = vmatpush3.bf16.msra.mxu1 %v9051_v55 }
 0x541   : > { %8259 = vmatprep.subr.bf16.mxu1 %v9128_v22  ;;  %8266 = vmatpush3.bf16.msra.mxu0 %v7650_v7 }
 0x542   : > { %8267 = vmatprep.subr.bf16.mxu0 %v9128_v22 }
 0x544   : > { %8260 = vmatpush3.bf16.msra.mxu1 %v9052_v51 }
 0x545   : > { %8268 = vmatpush3.bf16.msra.mxu0 %v9054_v38 }
 0x546   : > { %8269 = vmatprep.subr.bf16.mxu0 %v9128_v22 }
 0x549   : > { %8270 = vmatpush3.bf16.msra.mxu0 %v9055_v8 }
 0x54a   : > { %8271 = vmatprep.subr.bf16.mxu0 %v9128_v22 }
 0x54d   : > { %8272 = vmatpush3.bf16.msra.mxu0 %v9056_v56 }
 0x54e   : > { %8273 = vmatprep.subr.bf16.mxu0 %v9128_v22 }
 0x551   : > { %8274 = vmatpush3.bf16.msra.mxu0 %v9057_v39 }
 0x552   : > { %8275 = vmatprep.subr.bf16.mxu0 %v9128_v22 }
 0x555   : > { %8276 = vmatpush3.bf16.msra.mxu0 %v9058_v48 }
 0x5bf   : > { %v8135_v6 = vpop.f32.mrf.mxu0 }
 0x5c1   : > { %v8136_v44 = vpop.f32.mrf.mxu0 }
 0x5c2   : > { %v8137_v52 = vadd.f32 %v8136_v44, %v8135_v6 }
 0x5c3   : > { %v8138_v0 = vpop.f32.mrf.mxu0 }
 0x5c4   : > { %v7311_v50 = vadd.f32 %v8137_v52, %v8015_v29 }
 0x5c5   : > { %v8139_v30 = vpop.f32.mrf.mxu0 }
 0x5c6   : > { %v8157_v47 = vpop.f32.mrf.mxu1 }
 0x5c8   : > { %v8158_v53 = vpop.f32.mrf.mxu1 }
 0x5c9   : > { %v8159_v46 = vadd.f32 %v8158_v53, %v8157_v47 }
 0x5ca   : > { %v8160_v49 = vpop.f32.mrf.mxu1 }
 0x5cb   : > { %v7351_v32 = vadd.f32 %v8159_v46, %v7311_v50 }
 0x5cc   : > { %v8161_v5 = vpop.f32.mrf.mxu1 }
 0x5df   : > { %v8179_v4 = vpop.f32.mrf.mxu0 }
 0x5e1   : > { %v8180_v62 = vpop.f32.mrf.mxu0 }
 0x5e2   : > { %v8181_v60 = vadd.f32 %v8180_v62, %v8179_v4 }
 0x5e3   : > { %v8182_v16 = vpop.f32.mrf.mxu0 }
 0x5e4   : > { %v7391_v33 = vadd.f32 %v8181_v60, %v7351_v32 }
 0x5e5   : > { %v8183_v27 = vpop.f32.mrf.mxu0 }
 0x5e6   : > { %v8201_v9 = vpop.f32.mrf.mxu1 }
 0x5e8   : > { %v8202_v61 = vpop.f32.mrf.mxu1 }
 0x5e9   : > { %v8203_v34 = vadd.f32 %v8202_v61, %v8201_v9 }
 0x5ea   : > { %v8204_v26 = vpop.f32.mrf.mxu1 }
 0x5eb   : > { %v7431_v13 = vadd.f32 %v8203_v34, %v7391_v33 }
 0x5ec   : > { %v8205_v14 = vpop.f32.mrf.mxu1 }
 0x5ff   : > { %v8223_v28 = vpop.f32.mrf.mxu0 }
 0x601   : > { %v8224_v23 = vpop.f32.mrf.mxu0 }
 0x602   : > { %v8225_v1 = vadd.f32 %v8224_v23, %v8223_v28 }
 0x603   : > { %v8226_v19 = vpop.f32.mrf.mxu0 }
 0x604   : > { %v7471_v63 = vadd.f32 %v8225_v1, %v7431_v13 }
 0x605   : > { %v8227_v41 = vpop.f32.mrf.mxu0 }
 0x606   : > { %v7476_v12 = vmax.f32 %v7471_v63, 0.0 }
 0x608   : > { %v7477_v18 = vpack.c.bf16 %v7476_v12, %v7476_v12 }
 0x60a   : > { %8262 = vmatmul.mubr.msk.bf16.vlgmr.msra.gmra.mxu1 %vm7545_vm15, %v7477_v18 }
 0x6ca   : > { %v7586_v57 = vpop.f32.mrf.mxu1 }
 0x6cb   : > { %v7587_v45 = vadd.f32 %v8096_v40, %v7586_v57 }
 0x6cc   : > { %v8263_v17 = vpop.f32.mrf.mxu1 }
 0x6cd   : > { %v7592_v2 = vmax.f32 %v7587_v45, 0.0 }
 0x6ce   : > { %v7589_v10 = vpop.f32.mrf.mxu1 }
 0x6cf   : > { %v7593_v20 = vpack.c.bf16 %v7592_v2, %v7592_v2 }
 0x6d0   : > { %v8264_v25 = vpop.f32.mrf.mxu1 }
 0x6d1   : > { %8278 = vmatmul.mubr.msk.bf16.vlgmr.msra.gmra.mxu0 %vm7645_vm0, %v7593_v20 }
 0x791   : > { %v7686_v42 = vpop.f32.mrf.mxu0 }
 0x792   : > { %v7687_v43 = vadd.f32 %v8106_v36, %v7686_v42 }
 0x793   : > { %v8279_v35 = vpop.f32.mrf.mxu0 }
 0x794   : > { %7693 = vst.msk [vmem:[%s382_s25] sm:$0xff] %vm7692_vm1, %v7687_v43 }
 0x795   : > { %v7689_v37 = vpop.f32.mrf.mxu0 }
 0x796   : > { %9076 = shalt.err (!%p9073_p3)
}
 0x797   : > { %s9077_s13 = scalar_lea.hbm %s13969_s24, 128  ;;  %s9081_s25 = scalar_lea.hbm %s14021_s11, 256 }
 0x798   : > { %p9078_p4 = scmp.ne.s32.totalorder %s13969_s24, %s9077_s13  ;;  %p9082_p9 = scmp.lt.s32.totalorder %s13969_s24, %s14021_s11 }
 0x799   : > { %p9083_p10 = scmp.lt.s32.totalorder %s9081_s25, %s9077_s13 }
 0x79a   : > { %p9079_p7 = pnand %p9078_p4, %p9229_p5 }
 0x79b   : > { %p9084_p11 = por %p9083_p10, %p9082_p9 }
 0x79c   : > { %p9080_p8 = pneg %p9079_p7 }
 0x79e   : > { %p9085_p12 = pnand %p9084_p11, %p9080_p8 }
 0x7a0   : > { %9088 = shalt.err (!%p9085_p12)
}
 0x7a1   : > { %8281 = dma.vmem_to_hbm [thread:$0]  (%p9229_p5), %s13971_s29, 128, %s13969_s24, %s7695_s30   ;;  %v8280_v31 = vpop.f32.mrf.mxu0 }
 0x7a2 PF: > { %p8287_p13 = scmp.ge.s32.totalorder %s9123_s20, 2  ;;  %s7720_s21 = sand.u32 1, %s9111_s17  }
 0x7a3   : > { %s7721_s14 = scalar_lea.sflag [#allocation3], %s7720_s21 }
 0x7a4   : > { %p8284_p0 = pnand %p8287_p13, %p9233_p6 }
 0x7a6   : > { %p8285_p1 = pneg %p8284_p0 }
 0x7a8   : > { %9106 = dma.done.wait (%p8285_p1), %s7721_s14, 128  }
 0x7a9   : > { %9108 = vsyncadd (%p8285_p1), %s7721_s14, 4294967168  ;;  %s14743_s16 = sld [smem:[#allocation5_spill]]  ;;  %p21_p2 = scmp.ge.s32.totalorder %s9216_s23, 4  }
 0x7aa   : > { %s14744_s19 = sld [smem:[#allocation6_spill]]  ;;  %s14745_s17 = smov %s9115_s18 }
 0x7ab   : > { %s14747_s20 = smov %s9216_s23  ;;  %23 = sbr.rel (!%p21_p2) target bundleno = 3 (0x3), region = 99 }
 0x7af   : > { %s14746_s18 = smov %s14743_s16 }
 0x7b0   :  { %7726 = vsyncpa [#allocation3], 1 }
 0x7b1   :  { %7728 = vsyncpa [#allocation3 + $0x1], 1 }

</bundles_post_ra>
